<compile_context>
chip_gen: v7x
topology: tpu7x:2x2x1
jax: 0.10.0
libtpu: 0.0.40
codegen_flags: <defaults>
</compile_context>

<pallas_src>
import math
import functools

import jax
import jax.numpy as jnp
from jax.experimental import pallas as pl
from jax.experimental.pallas import tpu as pltpu

SEQ = 8
BATCH = 8
HIDDEN = 128
INPUT = 2 * HIDDEN          # LSTM input size (2048 in the original module)
VOCAB = 512                 # classifier output size (32320 in the original)
VOCAB_TILE = 256            # lane-dense vocab tile (2048-4096 at production)


# ----------------------------------------------------------------------------
# Kernel 1: fused LSTM5 + residual + (eval) dropout + LSTM10 + residual
# ----------------------------------------------------------------------------
def _recurrence_kernel(seq, batch, hidden,
                       x0_ref, r2_ref, x3_ref,
                       w5_ih_hbm, w5_hh_hbm, b5_ref,
                       w10_ihb_hbm, w10_xh_hbm, b10_ref,
                       out11_ref,
                       w5_ih_sc, w5_hh_sc, w10_ihb_sc, w10_xh_sc,
                       gx5_sc, gx10_sc, xh_sc, dma_sems):
    S, B, H = seq, batch, hidden
    M = S * B
    bf16 = jnp.bfloat16

    # ---- Loop-invariant weights: single-buffered manual DMAs (HBM -> VMEM),
    # started up-front so they overlap the hoisted Phase-1 projections.
    cp_w5ih = pltpu.make_async_copy(w5_ih_hbm, w5_ih_sc, dma_sems.at[0])
    cp_w5hh = pltpu.make_async_copy(w5_hh_hbm, w5_hh_sc, dma_sems.at[1])
    cp_w10ib = pltpu.make_async_copy(w10_ihb_hbm, w10_ihb_sc, dma_sems.at[2])
    cp_w10xh = pltpu.make_async_copy(w10_xh_hbm, w10_xh_sc, dma_sems.at[3])
    cp_w5ih.start(); cp_w5hh.start(); cp_w10ib.start(); cp_w10xh.start()

    # ---- Phase 1: hoisted input projections (large, well-filled MXU matmuls)
    # bias folded in here, once, outside the serial loop.  LHS cast to bf16;
    # accumulation in f32.
    x0 = x0_ref[...].reshape(M, 2 * H).astype(bf16)           # (M, I)
    cp_w5ih.wait()
    gx5_sc[...] = (jnp.dot(x0, w5_ih_sc[...],
                           preferred_element_type=jnp.float32)
                   + b5_ref[...])                             # (M, 4H) f32

    x3 = x3_ref[...].reshape(M, H).astype(bf16)               # (M, H)
    cp_w10ib.wait()
    gx10_sc[...] = (jnp.dot(x3, w10_ihb_sc[...],
                            preferred_element_type=jnp.float32)
                    + b10_ref[...])                           # (M, 4H) f32

    cp_w5hh.wait(); cp_w10xh.wait()
    w5_hh = w5_hh_sc[...]                                     # (H, 4H)  bf16
    w10_xh = w10_xh_sc[...]                                   # (2H, 4H) bf16

    def cell(gates, c_prev):
        # PyTorch gate order: i, f, g, o.  All elementwise/EUP work in f32.
        i = jax.nn.sigmoid(gates[:, 0 * H:1 * H])
        f = jax.nn.sigmoid(gates[:, 1 * H:2 * H])
        g = jnp.tanh(gates[:, 2 * H:3 * H])
        o = jax.nn.sigmoid(gates[:, 3 * H:4 * H])
        c = f * c_prev + i * g
        h = o * jnp.tanh(c)
        return h, c

    # Persistent (B, 2H) bf16 scratch holding [out6_t ; h10_prev] so the
    # fused K=2H recurrent matmul never needs a per-step concatenate.
    xh_sc[...] = jnp.zeros_like(xh_sc)                        # h10(prev) = 0

    # ---- Phase 2: serial time recurrence, both LSTMs fused per step --------
    # MXU is irreducibly underfilled here (M = B = 8 rows); the step cost is
    # weight-push bound, which bf16 weights already halve.
    def step(t, carry):
        h5, c5, c10 = carry                                   # h10 lives in xh_sc[:, H:]
        off = pl.multiple_of(t * B, B)

        # LSTM5: only the recurrent matmul remains in the loop.
        g5 = gx5_sc[pl.ds(off, B), :] + jnp.dot(
            h5.astype(bf16), w5_hh, preferred_element_type=jnp.float32)
        h5, c5 = cell(g5, c5)
        out6_t = h5 + r2_ref[t]                               # residual add (f32)
        # layer8 Dropout(p=0.2): eval-mode identity (deterministic kernel).

        # LSTM10: concat([out8, input3]) is split; the input3 half is hoisted
        # into gx10.  out6 half is written into the persistent scratch whose
        # other half already holds h10 from the previous step.
        xh_sc[:, 0:H] = out6_t.astype(bf16)
        g10 = gx10_sc[pl.ds(off, B), :] + jnp.dot(
            xh_sc[...], w10_xh, preferred_element_type=jnp.float32)
        h10, c10 = cell(g10, c10)
        xh_sc[:, H:2 * H] = h10.astype(bf16)                  # recurrent h for t+1

        out11_ref[pl.ds(off, B), :] = (h10 + out6_t).astype(out11_ref.dtype)
        return h5, c5, c10

    zeros = jnp.zeros((B, H), jnp.float32)
    # TODO(synk): re-tune unroll at production H=1024 (vreg pressure).
    jax.lax.fori_loop(0, S, step, (zeros, zeros, zeros), unroll=True)


# ----------------------------------------------------------------------------
# Kernel 2: vocab-tiled classifier (lane-dense output, "parallel" vocab axis)
# ----------------------------------------------------------------------------
def _classifier_kernel(x_ref, w_ref, b_ref, o_ref):
    o_ref[...] = (jnp.dot(x_ref[...], w_ref[...],
                          preferred_element_type=jnp.float32)
                  + b_ref[...]).astype(o_ref.dtype)


# ----------------------------------------------------------------------------
# Wrapper
# ----------------------------------------------------------------------------
def prepare_stage3_weights(params):
    """Pre-transpose / split / fuse and cast weights to bf16 (biases stay f32)."""
    H = HIDDEN
    bf16 = jnp.bfloat16
    # Split W10_ih for the concatenated input [out8, input3]:
    #   out9 @ W10_ih_t = out8 @ W10_ih_t[:H] + input3 @ W10_ih_t[H:]
    w10_ih_ctx = params["l10_wih_t"][H:]                      # multiplies input3 (hoisted)
    # Fuse the out6-projection with the recurrent weight: one K=2H matmul/step.
    w10_xh = jnp.concatenate([params["l10_wih_t"][:H], params["l10_whh_t"]], axis=0)
    return {
        "l5_wih_t": params["l5_wih_t"].astype(bf16),          # (I, 4H)
        "l5_whh_t": params["l5_whh_t"].astype(bf16),          # (H, 4H)
        "l5_b": params["l5_b"],                               # (1, 4H) f32
        "l10_wih_ctx_t": w10_ih_ctx.astype(bf16),             # (H, 4H)
        "l10_xh_t": w10_xh.astype(bf16),                      # (2H, 4H)
        "l10_b": params["l10_b"],                             # (1, 4H) f32
        "cls_w_t": params["cls_w_t"].astype(bf16),            # (H, V)
        "cls_b": params["cls_b"],                             # (1, V) f32
    }


def stage3_forward(w, input3, input2, input0):
    S, B, I = input0.shape
    H = w["l5_whh_t"].shape[0]
    V = w["cls_w_t"].shape[1]
    M = S * B
    TV = VOCAB_TILE
    assert V % TV == 0

    rec_kernel = functools.partial(_recurrence_kernel, S, B, H)

    def full(shape):
        return pl.BlockSpec(shape, lambda i, _n=len(shape): (0,) * _n)

    hbm = pl.BlockSpec(memory_space=pl.ANY)   # raw HBM ref, manual single-buffered DMA

    # ---- Call 1: LSTM recurrence -> out11 (bf16) ----------------------------
    out11 = pl.pallas_call(
        rec_kernel,
        out_shape=jax.ShapeDtypeStruct((M, H), jnp.bfloat16),
        grid_spec=pltpu.PrefetchScalarGridSpec(
            num_scalar_prefetch=0,
            grid=(1,),
            in_specs=[
                full((S, B, I)),          # input0
                full((S, B, H)),          # input2 (residual)
                full((S, B, H)),          # input3 (attention context)
                hbm,                      # W5_ih^T            (bf16, manual copy)
                hbm,                      # W5_hh^T            (bf16, manual copy)
                full((1, 4 * H)),         # b5 = b_ih + b_hh   (f32)
                hbm,                      # W10_ih^T lower half (input3 part)
                hbm,                      # [W10_ih^T upper ; W10_hh^T]
                full((1, 4 * H)),         # b10                (f32)
            ],
            out_specs=full((M, H)),
            scratch_shapes=[
                pltpu.VMEM((I, 4 * H), jnp.bfloat16),       # W5_ih
                pltpu.VMEM((H, 4 * H), jnp.bfloat16),       # W5_hh
                pltpu.VMEM((H, 4 * H), jnp.bfloat16),       # W10_ih ctx half
                pltpu.VMEM((2 * H, 4 * H), jnp.bfloat16),   # fused [W10_ih top; W10_hh]
                pltpu.VMEM((M, 4 * H), jnp.float32),        # hoisted gates_x (LSTM5)
                pltpu.VMEM((M, 4 * H), jnp.float32),        # hoisted ctx gates (LSTM10)
                pltpu.VMEM((B, 2 * H), jnp.bfloat16),       # [out6_t ; h10] recurrent LHS
                pltpu.SemaphoreType.DMA((4,)),
            ],
        ),
        compiler_params=pltpu.CompilerParams(
            dimension_semantics=("arbitrary",),
            vmem_limit_bytes=64 * 1024 * 1024),
    )(input0, input2, input3,
      w["l5_wih_t"], w["l5_whh_t"], w["l5_b"],
      w["l10_wih_ctx_t"], w["l10_xh_t"], w["l10_b"])

    # ---- Call 2: vocab-tiled classifier (pipelined weight DMAs, megacore) ---
    # TODO(synk): emit bf16 logits here if the downstream softmax accepts it.
    logits = pl.pallas_call(
        _classifier_kernel,
        out_shape=jax.ShapeDtypeStruct((M, V), jnp.float32),
        grid_spec=pltpu.PrefetchScalarGridSpec(
            num_scalar_prefetch=0,
            grid=(V // TV,),
            in_specs=[
                pl.BlockSpec((M, H), lambda j: (0, 0)),     # out11 (bf16)
                pl.BlockSpec((H, TV), lambda j: (0, j)),    # classifier W^T tile
                pl.BlockSpec((1, TV), lambda j: (0, j)),    # classifier bias tile
            ],
            out_specs=pl.BlockSpec((M, TV), lambda j: (0, j)),
        ),
        compiler_params=pltpu.CompilerParams(
            dimension_semantics=("parallel",),
            vmem_limit_bytes=64 * 1024 * 1024),
    )(out11, w["cls_w_t"], w["cls_b"])

    return logits.reshape(S, B, V)


# ----------------------------------------------------------------------------
# Pure-JAX reference (for correctness check)
# ----------------------------------------------------------------------------
def _lstm_ref(x, w_ih_t, w_hh_t, bias):
    S, B, I = x.shape
    H = w_hh_t.shape[0]

    def step(carry, xt):
        h, c = carry
        gates = xt @ w_ih_t + h @ w_hh_t + bias
        i = jax.nn.sigmoid(gates[:, 0 * H:1 * H])
        f = jax.nn.sigmoid(gates[:, 1 * H:2 * H])
        g = jnp.tanh(gates[:, 2 * H:3 * H])
        o = jax.nn.sigmoid(gates[:, 3 * H:4 * H])
        c = f * c + i * g
        h = o * jnp.tanh(c)
        return (h, c), h

    h0 = jnp.zeros((B, H), jnp.float32)
    _, hs = jax.lax.scan(step, (h0, h0), x)
    return hs


def stage3_ref(params, input3, input2, input0):
    out6 = _lstm_ref(input0, params["l5_wih_t"], params["l5_whh_t"], params["l5_b"]) + input2
    out9 = jnp.concatenate([out6, input3], axis=2)
    out11 = _lstm_ref(out9, params["l10_wih_t"], params["l10_whh_t"], params["l10_b"]) + out6
    return out11 @ params["cls_w_t"] + params["cls_b"]


def _quantized_ref_params(params):
    """Reference weights rounded the same way the kernel rounds them (bf16)."""
    q = dict(params)
    for k in ("l5_wih_t", "l5_whh_t", "l10_wih_t", "l10_whh_t", "cls_w_t"):
        q[k] = params[k].astype(jnp.bfloat16).astype(jnp.float32)
    return q


# ----------------------------------------------------------------------------
# Parameter init (deterministic, mimics PyTorch default inits)
# ----------------------------------------------------------------------------
def init_params(key):
    ks = jax.random.split(key, 8)
    k_lstm = 1.0 / math.sqrt(HIDDEN)            # PyTorch LSTM: U(-1/sqrt(H), 1/sqrt(H))
    u = lambda k, shape, a: jax.random.uniform(k, shape, jnp.float32, -a, a)
    return {
        # stored pre-transposed: (in, 4H) / (H, 4H); biases b_ih + b_hh combined
        "l5_wih_t": u(ks[0], (INPUT, 4 * HIDDEN), k_lstm),
        "l5_whh_t": u(ks[1], (HIDDEN, 4 * HIDDEN), k_lstm),
        "l5_b":     u(ks[2], (1, 4 * HIDDEN), k_lstm) + u(ks[3], (1, 4 * HIDDEN), k_lstm),
        "l10_wih_t": u(ks[4], (INPUT, 4 * HIDDEN), k_lstm),
        "l10_whh_t": u(ks[5], (HIDDEN, 4 * HIDDEN), k_lstm),
        "l10_b":     u(ks[6], (1, 4 * HIDDEN), k_lstm) + u(ks[7], (1, 4 * HIDDEN), k_lstm),
        # GNMT Classifier: U(-0.1, 0.1) for weight and bias
        "cls_w_t": u(jax.random.fold_in(key, 100), (HIDDEN, VOCAB), 0.1),
        "cls_b":   u(jax.random.fold_in(key, 101), (1, VOCAB), 0.1),
    }


if __name__ == "__main__":
    key = jax.random.PRNGKey(0)
    kp, k3, k2, k0 = jax.random.split(key, 4)
    params = init_params(kp)
    weights = prepare_stage3_weights(params)

    input3 = jax.random.normal(k3, (SEQ, BATCH, HIDDEN), jnp.float32)   # decoder attn ctx
    input2 = jax.random.normal(k2, (SEQ, BATCH, HIDDEN), jnp.float32)   # residual stream
    input0 = jax.random.normal(k0, (SEQ, BATCH, INPUT), jnp.float32)    # LSTM-5 input

    out = jax.jit(stage3_forward)(weights, input3, input2, input0)
    out = jax.block_until_ready(out)
    assert out.shape == (SEQ, BATCH, VOCAB), out.shape

    # Compare against an f32 reference using the same bf16-rounded weights
    # (kernel keeps c, gate math, residuals and accumulation in f32).
    ref = stage3_ref(_quantized_ref_params(params), input3, input2, input0)
    max_err = float(jnp.max(jnp.abs(out - ref)))
    assert jnp.allclose(out, ref, rtol=3e-2, atol=3e-2), max_err

    print("KERNEL_OK")
</pallas_src>

<mosaic_0001>
module attributes {stable_mosaic.version = 11 : i64} {
  func.func @_classifier_kernel(%arg0: i32, %arg1: memref<64x128xbf16, #tpu.memory_space<vmem>>, %arg2: memref<128x256xbf16, #tpu.memory_space<vmem>>, %arg3: memref<1x256xf32, #tpu.memory_space<vmem>>, %arg4: memref<64x256xf32, #tpu.memory_space<vmem>>) attributes {dimension_semantics = [#tpu.dimension_semantics<parallel>], iteration_bounds = array<i64: 2>, scalar_prefetch = 0 : i64, scratch_operands = 0 : i64, tpu.core_type = #tpu.core_type<tc>, window_params = [{pipeline_mode = #tpu.pipeline_mode<synchronous>, transform_indices = @transform_0, window_bounds = array<i64: 64, 128>}, {transform_indices = @transform_1, window_bounds = array<i64: 128, 256>}, {transform_indices = @transform_2, window_bounds = array<i64: 1, 256>}, {transform_indices = @transform_3, window_bounds = array<i64: 64, 256>}]} {
    %c0 = arith.constant 0 : index
    %c0_0 = arith.constant 0 : index
    %0 = vector.load %arg1[%c0, %c0_0] : memref<64x128xbf16, #tpu.memory_space<vmem>>, vector<64x128xbf16>
    %c0_1 = arith.constant 0 : index
    %c0_2 = arith.constant 0 : index
    %1 = vector.load %arg2[%c0_1, %c0_2] : memref<128x256xbf16, #tpu.memory_space<vmem>>, vector<128x256xbf16>
    %cst = arith.constant dense<0.000000e+00> : vector<64x256xf32>
    %2 = tpu.matmul %0, %1, %cst {dimension_numbers = #tpu.dot_dimension_numbers<[1], [0], [0], [1], [0, 0, 1, 1], [], []>} : vector<64x128xbf16>, vector<128x256xbf16>, vector<64x256xf32> -> vector<64x256xf32>
    %c0_3 = arith.constant 0 : index
    %c0_4 = arith.constant 0 : index
    %3 = vector.load %arg3[%c0_3, %c0_4] : memref<1x256xf32, #tpu.memory_space<vmem>>, vector<1x256xf32>
    %4 = vector.broadcast %3 : vector<1x256xf32> to vector<64x256xf32>
    %5 = arith.addf %2, %4 : vector<64x256xf32>
    %c0_5 = arith.constant 0 : index
    %c0_6 = arith.constant 0 : index
    %6 = vector.load %arg4[%c0_5, %c0_6] : memref<64x256xf32, #tpu.memory_space<vmem>>, vector<64x256xf32>
    tpu.vector_store %arg4[%c0_5, %c0_6], %5 {strides = array<i32>} : memref<64x256xf32, #tpu.memory_space<vmem>>, vector<64x256xf32>,
    return
  }
  func.func @transform_0(%arg0: i32) -> (i32, i32) {
    %c0_i32 = arith.constant 0 : i32
    %c0_i32_0 = arith.constant 0 : i32
    %c0_i32_1 = arith.constant 0 : i32
    return %c0_i32, %c0_i32_0 : i32, i32
  }
  func.func @transform_1(%arg0: i32) -> (i32, i32) {
    %c0_i32 = arith.constant 0 : i32
    %c0_i32_0 = arith.constant 0 : i32
    return %c0_i32, %arg0 : i32, i32
  }
  func.func @transform_2(%arg0: i32) -> (i32, i32) {
    %c0_i32 = arith.constant 0 : i32
    %c0_i32_0 = arith.constant 0 : i32
    return %c0_i32, %arg0 : i32, i32
  }
  func.func @transform_3(%arg0: i32) -> (i32, i32) {
    %c0_i32 = arith.constant 0 : i32
    %c0_i32_0 = arith.constant 0 : i32
    return %c0_i32, %arg0 : i32, i32
  }
}

module attributes {stable_mosaic.version = 11 : i64} {
  func.func @_recurrence_kernel(%arg0: i32, %arg1: memref<8x8x256xf32, #tpu.memory_space<vmem>>, %arg2: memref<8x8x128xf32, #tpu.memory_space<vmem>>, %arg3: memref<8x8x128xf32, #tpu.memory_space<vmem>>, %arg4: memref<256x512xbf16, #tpu.memory_space<any>>, %arg5: memref<128x512xbf16, #tpu.memory_space<any>>, %arg6: memref<1x512xf32, #tpu.memory_space<vmem>>, %arg7: memref<128x512xbf16, #tpu.memory_space<any>>, %arg8: memref<256x512xbf16, #tpu.memory_space<any>>, %arg9: memref<1x512xf32, #tpu.memory_space<vmem>>, %arg10: memref<64x128xbf16, #tpu.memory_space<vmem>>, %arg11: memref<256x512xbf16, #tpu.memory_space<vmem>>, %arg12: memref<128x512xbf16, #tpu.memory_space<vmem>>, %arg13: memref<128x512xbf16, #tpu.memory_space<vmem>>, %arg14: memref<256x512xbf16, #tpu.memory_space<vmem>>, %arg15: memref<64x512xf32, #tpu.memory_space<vmem>>, %arg16: memref<64x512xf32, #tpu.memory_space<vmem>>, %arg17: memref<8x256xbf16, #tpu.memory_space<vmem>>, %arg18: memref<4x!tpu.dma_semaphore, #tpu.memory_space<semaphore_mem>>) attributes {dimension_semantics = [#tpu.dimension_semantics<arbitrary>], iteration_bounds = array<i64: 1>, scalar_prefetch = 0 : i64, scratch_operands = 8 : i64, tpu.core_type = #tpu.core_type<tc>, window_params = [{pipeline_mode = #tpu.pipeline_mode<synchronous>, transform_indices = @transform_0, window_bounds = array<i64: 8, 8, 256>}, {pipeline_mode = #tpu.pipeline_mode<synchronous>, transform_indices = @transform_1, window_bounds = array<i64: 8, 8, 128>}, {pipeline_mode = #tpu.pipeline_mode<synchronous>, transform_indices = @transform_2, window_bounds = array<i64: 8, 8, 128>}, {}, {}, {pipeline_mode = #tpu.pipeline_mode<synchronous>, transform_indices = @transform_5, window_bounds = array<i64: 1, 512>}, {}, {}, {pipeline_mode = #tpu.pipeline_mode<synchronous>, transform_indices = @transform_8, window_bounds = array<i64: 1, 512>}, {pipeline_mode = #tpu.pipeline_mode<synchronous>, transform_indices = @transform_9, window_bounds = array<i64: 64, 128>}]} {
    %c0_i32 = arith.constant 0 : i32
    %0 = tpu.memref_slice %arg18[%c0_i32] : memref<4x!tpu.dma_semaphore, #tpu.memory_space<semaphore_mem>> -> memref<1x!tpu.dma_semaphore, #tpu.memory_space<semaphore_mem>>
    %1 = tpu.memref_squeeze %0 : memref<1x!tpu.dma_semaphore, #tpu.memory_space<semaphore_mem>> -> memref<!tpu.dma_semaphore, #tpu.memory_space<semaphore_mem>>
    tpu.enqueue_dma source(%arg4 : memref<256x512xbf16, #tpu.memory_space<any>>) target(%arg11 : memref<256x512xbf16, #tpu.memory_space<vmem>>) target_semaphore(%1 : memref<!tpu.dma_semaphore, #tpu.memory_space<semaphore_mem>>)
    %c1_i32 = arith.constant 1 : i32
    %2 = tpu.memref_slice %arg18[%c1_i32] : memref<4x!tpu.dma_semaphore, #tpu.memory_space<semaphore_mem>> -> memref<1x!tpu.dma_semaphore, #tpu.memory_space<semaphore_mem>>
    %3 = tpu.memref_squeeze %2 : memref<1x!tpu.dma_semaphore, #tpu.memory_space<semaphore_mem>> -> memref<!tpu.dma_semaphore, #tpu.memory_space<semaphore_mem>>
    tpu.enqueue_dma source(%arg5 : memref<128x512xbf16, #tpu.memory_space<any>>) target(%arg12 : memref<128x512xbf16, #tpu.memory_space<vmem>>) target_semaphore(%3 : memref<!tpu.dma_semaphore, #tpu.memory_space<semaphore_mem>>)
    %c2_i32 = arith.constant 2 : i32
    %4 = tpu.memref_slice %arg18[%c2_i32] : memref<4x!tpu.dma_semaphore, #tpu.memory_space<semaphore_mem>> -> memref<1x!tpu.dma_semaphore, #tpu.memory_space<semaphore_mem>>
    %5 = tpu.memref_squeeze %4 : memref<1x!tpu.dma_semaphore, #tpu.memory_space<semaphore_mem>> -> memref<!tpu.dma_semaphore, #tpu.memory_space<semaphore_mem>>
    tpu.enqueue_dma source(%arg7 : memref<128x512xbf16, #tpu.memory_space<any>>) target(%arg13 : memref<128x512xbf16, #tpu.memory_space<vmem>>) target_semaphore(%5 : memref<!tpu.dma_semaphore, #tpu.memory_space<semaphore_mem>>)
    %c3_i32 = arith.constant 3 : i32
    %6 = tpu.memref_slice %arg18[%c3_i32] : memref<4x!tpu.dma_semaphore, #tpu.memory_space<semaphore_mem>> -> memref<1x!tpu.dma_semaphore, #tpu.memory_space<semaphore_mem>>
    %7 = tpu.memref_squeeze %6 : memref<1x!tpu.dma_semaphore, #tpu.memory_space<semaphore_mem>> -> memref<!tpu.dma_semaphore, #tpu.memory_space<semaphore_mem>>
    tpu.enqueue_dma source(%arg8 : memref<256x512xbf16, #tpu.memory_space<any>>) target(%arg14 : memref<256x512xbf16, #tpu.memory_space<vmem>>) target_semaphore(%7 : memref<!tpu.dma_semaphore, #tpu.memory_space<semaphore_mem>>)
    %c0 = arith.constant 0 : index
    %c0_0 = arith.constant 0 : index
    %c0_1 = arith.constant 0 : index
    %8 = vector.load %arg1[%c0, %c0_0, %c0_1] : memref<8x8x256xf32, #tpu.memory_space<vmem>>, vector<8x8x256xf32>
    %9 = vector.shape_cast %8 : vector<8x8x256xf32> to vector<64x256xf32>
    %10 = arith.truncf %9 : vector<64x256xf32> to vector<64x256xbf16>
    %c0_i32_2 = arith.constant 0 : i32
    %11 = tpu.memref_slice %arg18[%c0_i32_2] : memref<4x!tpu.dma_semaphore, #tpu.memory_space<semaphore_mem>> -> memref<1x!tpu.dma_semaphore, #tpu.memory_space<semaphore_mem>>
    %12 = tpu.memref_squeeze %11 : memref<1x!tpu.dma_semaphore, #tpu.memory_space<semaphore_mem>> -> memref<!tpu.dma_semaphore, #tpu.memory_space<semaphore_mem>>
    tpu.wait_dma2 semaphore(%12 : memref<!tpu.dma_semaphore, #tpu.memory_space<semaphore_mem>>) src(%arg4 : memref<256x512xbf16, #tpu.memory_space<any>>) dst(%arg11 : memref<256x512xbf16, #tpu.memory_space<vmem>>)
    %c0_3 = arith.constant 0 : index
    %c0_4 = arith.constant 0 : index
    %13 = vector.load %arg11[%c0_3, %c0_4] : memref<256x512xbf16, #tpu.memory_space<vmem>>, vector<256x512xbf16>
    %cst = arith.constant dense<0.000000e+00> : vector<64x512xf32>
    %14 = tpu.matmul %10, %13, %cst {dimension_numbers = #tpu.dot_dimension_numbers<[1], [0], [0], [1], [0, 0, 1, 1], [], []>} : vector<64x256xbf16>, vector<256x512xbf16>, vector<64x512xf32> -> vector<64x512xf32>
    %c0_5 = arith.constant 0 : index
    %c0_6 = arith.constant 0 : index
    %15 = vector.load %arg6[%c0_5, %c0_6] : memref<1x512xf32, #tpu.memory_space<vmem>>, vector<1x512xf32>
    %16 = vector.broadcast %15 : vector<1x512xf32> to vector<64x512xf32>
    %17 = arith.addf %14, %16 : vector<64x512xf32>
    %c0_7 = arith.constant 0 : index
    %c0_8 = arith.constant 0 : index
    %18 = vector.load %arg15[%c0_7, %c0_8] : memref<64x512xf32, #tpu.memory_space<vmem>>, vector<64x512xf32>
    tpu.vector_store %arg15[%c0_7, %c0_8], %17 {strides = array<i32>} : memref<64x512xf32, #tpu.memory_space<vmem>>, vector<64x512xf32>,
    %c0_9 = arith.constant 0 : index
    %c0_10 = arith.constant 0 : index
    %c0_11 = arith.constant 0 : index
    %19 = vector.load %arg3[%c0_9, %c0_10, %c0_11] : memref<8x8x128xf32, #tpu.memory_space<vmem>>, vector<8x8x128xf32>
    %20 = vector.shape_cast %19 : vector<8x8x128xf32> to vector<64x128xf32>
    %21 = arith.truncf %20 : vector<64x128xf32> to vector<64x128xbf16>
    %c2_i32_12 = arith.constant 2 : i32
    %22 = tpu.memref_slice %arg18[%c2_i32_12] : memref<4x!tpu.dma_semaphore, #tpu.memory_space<semaphore_mem>> -> memref<1x!tpu.dma_semaphore, #tpu.memory_space<semaphore_mem>>
    %23 = tpu.memref_squeeze %22 : memref<1x!tpu.dma_semaphore, #tpu.memory_space<semaphore_mem>> -> memref<!tpu.dma_semaphore, #tpu.memory_space<semaphore_mem>>
    tpu.wait_dma2 semaphore(%23 : memref<!tpu.dma_semaphore, #tpu.memory_space<semaphore_mem>>) src(%arg7 : memref<128x512xbf16, #tpu.memory_space<any>>) dst(%arg13 : memref<128x512xbf16, #tpu.memory_space<vmem>>)
    %c0_13 = arith.constant 0 : index
    %c0_14 = arith.constant 0 : index
    %24 = vector.load %arg13[%c0_13, %c0_14] : memref<128x512xbf16, #tpu.memory_space<vmem>>, vector<128x512xbf16>
    %cst_15 = arith.constant dense<0.000000e+00> : vector<64x512xf32>
    %25 = tpu.matmul %21, %24, %cst_15 {dimension_numbers = #tpu.dot_dimension_numbers<[1], [0], [0], [1], [0, 0, 1, 1], [], []>} : vector<64x128xbf16>, vector<128x512xbf16>, vector<64x512xf32> -> vector<64x512xf32>
    %c0_16 = arith.constant 0 : index
    %c0_17 = arith.constant 0 : index
    %26 = vector.load %arg9[%c0_16, %c0_17] : memref<1x512xf32, #tpu.memory_space<vmem>>, vector<1x512xf32>
    %27 = vector.broadcast %26 : vector<1x512xf32> to vector<64x512xf32>
    %28 = arith.addf %25, %27 : vector<64x512xf32>
    %c0_18 = arith.constant 0 : index
    %c0_19 = arith.constant 0 : index
    %29 = vector.load %arg16[%c0_18, %c0_19] : memref<64x512xf32, #tpu.memory_space<vmem>>, vector<64x512xf32>
    tpu.vector_store %arg16[%c0_18, %c0_19], %28 {strides = array<i32>} : memref<64x512xf32, #tpu.memory_space<vmem>>, vector<64x512xf32>,
    %c1_i32_20 = arith.constant 1 : i32
    %30 = tpu.memref_slice %arg18[%c1_i32_20] : memref<4x!tpu.dma_semaphore, #tpu.memory_space<semaphore_mem>> -> memref<1x!tpu.dma_semaphore, #tpu.memory_space<semaphore_mem>>
    %31 = tpu.memref_squeeze %30 : memref<1x!tpu.dma_semaphore, #tpu.memory_space<semaphore_mem>> -> memref<!tpu.dma_semaphore, #tpu.memory_space<semaphore_mem>>
    tpu.wait_dma2 semaphore(%31 : memref<!tpu.dma_semaphore, #tpu.memory_space<semaphore_mem>>) src(%arg5 : memref<128x512xbf16, #tpu.memory_space<any>>) dst(%arg12 : memref<128x512xbf16, #tpu.memory_space<vmem>>)
    %c3_i32_21 = arith.constant 3 : i32
    %32 = tpu.memref_slice %arg18[%c3_i32_21] : memref<4x!tpu.dma_semaphore, #tpu.memory_space<semaphore_mem>> -> memref<1x!tpu.dma_semaphore, #tpu.memory_space<semaphore_mem>>
    %33 = tpu.memref_squeeze %32 : memref<1x!tpu.dma_semaphore, #tpu.memory_space<semaphore_mem>> -> memref<!tpu.dma_semaphore, #tpu.memory_space<semaphore_mem>>
    tpu.wait_dma2 semaphore(%33 : memref<!tpu.dma_semaphore, #tpu.memory_space<semaphore_mem>>) src(%arg8 : memref<256x512xbf16, #tpu.memory_space<any>>) dst(%arg14 : memref<256x512xbf16, #tpu.memory_space<vmem>>)
    %c0_22 = arith.constant 0 : index
    %c0_23 = arith.constant 0 : index
    %34 = vector.load %arg12[%c0_22, %c0_23] : memref<128x512xbf16, #tpu.memory_space<vmem>>, vector<128x512xbf16>
    %c0_24 = arith.constant 0 : index
    %c0_25 = arith.constant 0 : index
    %35 = vector.load %arg14[%c0_24, %c0_25] : memref<256x512xbf16, #tpu.memory_space<vmem>>, vector<256x512xbf16>
    %cst_26 = arith.constant 0.000000e+00 : bf16
    %36 = vector.broadcast %cst_26 : bf16 to vector<8x256xbf16>
    %c0_27 = arith.constant 0 : index
    %c0_28 = arith.constant 0 : index
    %37 = vector.load %arg17[%c0_27, %c0_28] : memref<8x256xbf16, #tpu.memory_space<vmem>>, vector<8x256xbf16>
    tpu.vector_store %arg17[%c0_27, %c0_28], %36 {strides = array<i32>} : memref<8x256xbf16, #tpu.memory_space<vmem>>, vector<8x256xbf16>,
    %cst_29 = arith.constant 0.000000e+00 : f32
    %38 = vector.broadcast %cst_29 : f32 to vector<8x128xf32>
    %c0_i32_30 = arith.constant 0 : i32
    %c8_i32 = arith.constant 8 : i32
    %39 = arith.muli %c0_i32_30, %c8_i32 : i32
    %40 = tpu.assume_multiple %39, 8 : i32
    %41 = arith.index_cast %40 : i32 to index
    %c0_31 = arith.constant 0 : index
    %42 = vector.load %arg15[%41, %c0_31] : memref<64x512xf32, #tpu.memory_space<vmem>>, vector<8x512xf32>
    %43 = arith.truncf %38 : vector<8x128xf32> to vector<8x128xbf16>
    %cst_32 = arith.constant dense<0.000000e+00> : vector<8x512xf32>
    %44 = tpu.matmul %43, %34, %cst_32 {dimension_numbers = #tpu.dot_dimension_numbers<[1], [0], [0], [1], [0, 0, 1, 1], [], []>} : vector<8x128xbf16>, vector<128x512xbf16>, vector<8x512xf32> -> vector<8x512xf32>
    %45 = arith.addf %42, %44 : vector<8x512xf32>
    %46 = vector.extract_strided_slice %45 {offsets = [0, 0], sizes = [8, 128], strides = [1, 1]} : vector<8x512xf32> to vector<8x128xf32>
    %47 = arith.negf %46 : vector<8x128xf32>
    %48 = math.exp %47 : vector<8x128xf32>
    %cst_33 = arith.constant 1.000000e+00 : f32
    %49 = vector.broadcast %cst_33 : f32 to vector<8x128xf32>
    %50 = arith.addf %49, %48 : vector<8x128xf32>
    %51 = arith.divf %49, %50 : vector<8x128xf32>
    %52 = vector.extract_strided_slice %45 {offsets = [0, 128], sizes = [8, 128], strides = [1, 1]} : vector<8x512xf32> to vector<8x128xf32>
    %53 = arith.negf %52 : vector<8x128xf32>
    %54 = math.exp %53 : vector<8x128xf32>
    %cst_34 = arith.constant 1.000000e+00 : f32
    %55 = vector.broadcast %cst_34 : f32 to vector<8x128xf32>
    %56 = arith.addf %55, %54 : vector<8x128xf32>
    %57 = arith.divf %55, %56 : vector<8x128xf32>
    %58 = vector.extract_strided_slice %45 {offsets = [0, 256], sizes = [8, 128], strides = [1, 1]} : vector<8x512xf32> to vector<8x128xf32>
    %59 = math.tanh %58 : vector<8x128xf32>
    %60 = vector.extract_strided_slice %45 {offsets = [0, 384], sizes = [8, 128], strides = [1, 1]} : vector<8x512xf32> to vector<8x128xf32>
    %61 = arith.negf %60 : vector<8x128xf32>
    %62 = math.exp %61 : vector<8x128xf32>
    %cst_35 = arith.constant 1.000000e+00 : f32
    %63 = vector.broadcast %cst_35 : f32 to vector<8x128xf32>
    %64 = arith.addf %63, %62 : vector<8x128xf32>
    %65 = arith.divf %63, %64 : vector<8x128xf32>
    %66 = arith.mulf %57, %38 : vector<8x128xf32>
    %67 = arith.mulf %51, %59 : vector<8x128xf32>
    %68 = arith.addf %66, %67 : vector<8x128xf32>
    %69 = math.tanh %68 : vector<8x128xf32>
    %70 = arith.mulf %65, %69 : vector<8x128xf32>
    %71 = arith.index_cast %c0_i32_30 : i32 to index
    %c0_36 = arith.constant 0 : index
    %c0_37 = arith.constant 0 : index
    %72 = vector.load %arg2[%71, %c0_36, %c0_37] : memref<8x8x128xf32, #tpu.memory_space<vmem>>, vector<1x8x128xf32>
    %73 = vector.shape_cast %72 : vector<1x8x128xf32> to vector<8x128xf32>
    %74 = arith.addf %70, %73 : vector<8x128xf32>
    %75 = arith.truncf %74 : vector<8x128xf32> to vector<8x128xbf16>
    %c0_38 = arith.constant 0 : index
    %c0_39 = arith.constant 0 : index
    %76 = vector.load %arg17[%c0_38, %c0_39] : memref<8x256xbf16, #tpu.memory_space<vmem>>, vector<8x128xbf16>
    tpu.vector_store %arg17[%c0_38, %c0_39], %75 {strides = array<i32>} : memref<8x256xbf16, #tpu.memory_space<vmem>>, vector<8x128xbf16>,
    %77 = arith.index_cast %40 : i32 to index
    %c0_40 = arith.constant 0 : index
    %78 = vector.load %arg16[%77, %c0_40] : memref<64x512xf32, #tpu.memory_space<vmem>>, vector<8x512xf32>
    %c0_41 = arith.constant 0 : index
    %c0_42 = arith.constant 0 : index
    %79 = vector.load %arg17[%c0_41, %c0_42] : memref<8x256xbf16, #tpu.memory_space<vmem>>, vector<8x256xbf16>
    %cst_43 = arith.constant dense<0.000000e+00> : vector<8x512xf32>
    %80 = tpu.matmul %79, %35, %cst_43 {dimension_numbers = #tpu.dot_dimension_numbers<[1], [0], [0], [1], [0, 0, 1, 1], [], []>} : vector<8x256xbf16>, vector<256x512xbf16>, vector<8x512xf32> -> vector<8x512xf32>
    %81 = arith.addf %78, %80 : vector<8x512xf32>
    %82 = vector.extract_strided_slice %81 {offsets = [0, 0], sizes = [8, 128], strides = [1, 1]} : vector<8x512xf32> to vector<8x128xf32>
    %83 = arith.negf %82 : vector<8x128xf32>
    %84 = math.exp %83 : vector<8x128xf32>
    %cst_44 = arith.constant 1.000000e+00 : f32
    %85 = vector.broadcast %cst_44 : f32 to vector<8x128xf32>
    %86 = arith.addf %85, %84 : vector<8x128xf32>
    %87 = arith.divf %85, %86 : vector<8x128xf32>
    %88 = vector.extract_strided_slice %81 {offsets = [0, 128], sizes = [8, 128], strides = [1, 1]} : vector<8x512xf32> to vector<8x128xf32>
    %89 = arith.negf %88 : vector<8x128xf32>
    %90 = math.exp %89 : vector<8x128xf32>
    %cst_45 = arith.constant 1.000000e+00 : f32
    %91 = vector.broadcast %cst_45 : f32 to vector<8x128xf32>
    %92 = arith.addf %91, %90 : vector<8x128xf32>
    %93 = arith.divf %91, %92 : vector<8x128xf32>
    %94 = vector.extract_strided_slice %81 {offsets = [0, 256], sizes = [8, 128], strides = [1, 1]} : vector<8x512xf32> to vector<8x128xf32>
    %95 = math.tanh %94 : vector<8x128xf32>
    %96 = vector.extract_strided_slice %81 {offsets = [0, 384], sizes = [8, 128], strides = [1, 1]} : vector<8x512xf32> to vector<8x128xf32>
    %97 = arith.negf %96 : vector<8x128xf32>
    %98 = math.exp %97 : vector<8x128xf32>
    %cst_46 = arith.constant 1.000000e+00 : f32
    %99 = vector.broadcast %cst_46 : f32 to vector<8x128xf32>
    %100 = arith.addf %99, %98 : vector<8x128xf32>
    %101 = arith.divf %99, %100 : vector<8x128xf32>
    %102 = arith.mulf %93, %38 : vector<8x128xf32>
    %103 = arith.mulf %87, %95 : vector<8x128xf32>
    %104 = arith.addf %102, %103 : vector<8x128xf32>
    %105 = math.tanh %104 : vector<8x128xf32>
    %106 = arith.mulf %101, %105 : vector<8x128xf32>
    %107 = arith.truncf %106 : vector<8x128xf32> to vector<8x128xbf16>
    %c0_47 = arith.constant 0 : index
    %c128 = arith.constant 128 : index
    %108 = vector.load %arg17[%c0_47, %c128] : memref<8x256xbf16, #tpu.memory_space<vmem>>, vector<8x128xbf16>
    tpu.vector_store %arg17[%c0_47, %c128], %107 {strides = array<i32>} : memref<8x256xbf16, #tpu.memory_space<vmem>>, vector<8x128xbf16>,
    %109 = arith.addf %106, %74 : vector<8x128xf32>
    %110 = arith.truncf %109 : vector<8x128xf32> to vector<8x128xbf16>
    %111 = arith.index_cast %40 : i32 to index
    %c0_48 = arith.constant 0 : index
    %112 = vector.load %arg10[%111, %c0_48] : memref<64x128xbf16, #tpu.memory_space<vmem>>, vector<8x128xbf16>
    tpu.vector_store %arg10[%111, %c0_48], %110 {strides = array<i32>} : memref<64x128xbf16, #tpu.memory_space<vmem>>, vector<8x128xbf16>,
    %c1_i32_49 = arith.constant 1 : i32
    %c8_i32_50 = arith.constant 8 : i32
    %113 = arith.muli %c1_i32_49, %c8_i32_50 : i32
    %114 = tpu.assume_multiple %113, 8 : i32
    %115 = arith.index_cast %114 : i32 to index
    %c0_51 = arith.constant 0 : index
    %116 = vector.load %arg15[%115, %c0_51] : memref<64x512xf32, #tpu.memory_space<vmem>>, vector<8x512xf32>
    %117 = arith.truncf %70 : vector<8x128xf32> to vector<8x128xbf16>
    %cst_52 = arith.constant dense<0.000000e+00> : vector<8x512xf32>
    %118 = tpu.matmul %117, %34, %cst_52 {dimension_numbers = #tpu.dot_dimension_numbers<[1], [0], [0], [1], [0, 0, 1, 1], [], []>} : vector<8x128xbf16>, vector<128x512xbf16>, vector<8x512xf32> -> vector<8x512xf32>
    %119 = arith.addf %116, %118 : vector<8x512xf32>
    %120 = vector.extract_strided_slice %119 {offsets = [0, 0], sizes = [8, 128], strides = [1, 1]} : vector<8x512xf32> to vector<8x128xf32>
    %121 = arith.negf %120 : vector<8x128xf32>
    %122 = math.exp %121 : vector<8x128xf32>
    %cst_53 = arith.constant 1.000000e+00 : f32
    %123 = vector.broadcast %cst_53 : f32 to vector<8x128xf32>
    %124 = arith.addf %123, %122 : vector<8x128xf32>
    %125 = arith.divf %123, %124 : vector<8x128xf32>
    %126 = vector.extract_strided_slice %119 {offsets = [0, 128], sizes = [8, 128], strides = [1, 1]} : vector<8x512xf32> to vector<8x128xf32>
    %127 = arith.negf %126 : vector<8x128xf32>
    %128 = math.exp %127 : vector<8x128xf32>
    %cst_54 = arith.constant 1.000000e+00 : f32
    %129 = vector.broadcast %cst_54 : f32 to vector<8x128xf32>
    %130 = arith.addf %129, %128 : vector<8x128xf32>
    %131 = arith.divf %129, %130 : vector<8x128xf32>
    %132 = vector.extract_strided_slice %119 {offsets = [0, 256], sizes = [8, 128], strides = [1, 1]} : vector<8x512xf32> to vector<8x128xf32>
    %133 = math.tanh %132 : vector<8x128xf32>
    %134 = vector.extract_strided_slice %119 {offsets = [0, 384], sizes = [8, 128], strides = [1, 1]} : vector<8x512xf32> to vector<8x128xf32>
    %135 = arith.negf %134 : vector<8x128xf32>
    %136 = math.exp %135 : vector<8x128xf32>
    %cst_55 = arith.constant 1.000000e+00 : f32
    %137 = vector.broadcast %cst_55 : f32 to vector<8x128xf32>
    %138 = arith.addf %137, %136 : vector<8x128xf32>
    %139 = arith.divf %137, %138 : vector<8x128xf32>
    %140 = arith.mulf %131, %68 : vector<8x128xf32>
    %141 = arith.mulf %125, %133 : vector<8x128xf32>
    %142 = arith.addf %140, %141 : vector<8x128xf32>
    %143 = math.tanh %142 : vector<8x128xf32>
    %144 = arith.mulf %139, %143 : vector<8x128xf32>
    %145 = arith.index_cast %c1_i32_49 : i32 to index
    %c0_56 = arith.constant 0 : index
    %c0_57 = arith.constant 0 : index
    %146 = vector.load %arg2[%145, %c0_56, %c0_57] : memref<8x8x128xf32, #tpu.memory_space<vmem>>, vector<1x8x128xf32>
    %147 = vector.shape_cast %146 : vector<1x8x128xf32> to vector<8x128xf32>
    %148 = arith.addf %144, %147 : vector<8x128xf32>
    %149 = arith.truncf %148 : vector<8x128xf32> to vector<8x128xbf16>
    %c0_58 = arith.constant 0 : index
    %c0_59 = arith.constant 0 : index
    %150 = vector.load %arg17[%c0_58, %c0_59] : memref<8x256xbf16, #tpu.memory_space<vmem>>, vector<8x128xbf16>
    tpu.vector_store %arg17[%c0_58, %c0_59], %149 {strides = array<i32>} : memref<8x256xbf16, #tpu.memory_space<vmem>>, vector<8x128xbf16>,
    %151 = arith.index_cast %114 : i32 to index
    %c0_60 = arith.constant 0 : index
    %152 = vector.load %arg16[%151, %c0_60] : memref<64x512xf32, #tpu.memory_space<vmem>>, vector<8x512xf32>
    %c0_61 = arith.constant 0 : index
    %c0_62 = arith.constant 0 : index
    %153 = vector.load %arg17[%c0_61, %c0_62] : memref<8x256xbf16, #tpu.memory_space<vmem>>, vector<8x256xbf16>
    %cst_63 = arith.constant dense<0.000000e+00> : vector<8x512xf32>
    %154 = tpu.matmul %153, %35, %cst_63 {dimension_numbers = #tpu.dot_dimension_numbers<[1], [0], [0], [1], [0, 0, 1, 1], [], []>} : vector<8x256xbf16>, vector<256x512xbf16>, vector<8x512xf32> -> vector<8x512xf32>
    %155 = arith.addf %152, %154 : vector<8x512xf32>
    %156 = vector.extract_strided_slice %155 {offsets = [0, 0], sizes = [8, 128], strides = [1, 1]} : vector<8x512xf32> to vector<8x128xf32>
    %157 = arith.negf %156 : vector<8x128xf32>
    %158 = math.exp %157 : vector<8x128xf32>
    %cst_64 = arith.constant 1.000000e+00 : f32
    %159 = vector.broadcast %cst_64 : f32 to vector<8x128xf32>
    %160 = arith.addf %159, %158 : vector<8x128xf32>
    %161 = arith.divf %159, %160 : vector<8x128xf32>
    %162 = vector.extract_strided_slice %155 {offsets = [0, 128], sizes = [8, 128], strides = [1, 1]} : vector<8x512xf32> to vector<8x128xf32>
    %163 = arith.negf %162 : vector<8x128xf32>
    %164 = math.exp %163 : vector<8x128xf32>
    %cst_65 = arith.constant 1.000000e+00 : f32
    %165 = vector.broadcast %cst_65 : f32 to vector<8x128xf32>
    %166 = arith.addf %165, %164 : vector<8x128xf32>
    %167 = arith.divf %165, %166 : vector<8x128xf32>
    %168 = vector.extract_strided_slice %155 {offsets = [0, 256], sizes = [8, 128], strides = [1, 1]} : vector<8x512xf32> to vector<8x128xf32>
    %169 = math.tanh %168 : vector<8x128xf32>
    %170 = vector.extract_strided_slice %155 {offsets = [0, 384], sizes = [8, 128], strides = [1, 1]} : vector<8x512xf32> to vector<8x128xf32>
    %171 = arith.negf %170 : vector<8x128xf32>
    %172 = math.exp %171 : vector<8x128xf32>
    %cst_66 = arith.constant 1.000000e+00 : f32
    %173 = vector.broadcast %cst_66 : f32 to vector<8x128xf32>
    %174 = arith.addf %173, %172 : vector<8x128xf32>
    %175 = arith.divf %173, %174 : vector<8x128xf32>
    %176 = arith.mulf %167, %104 : vector<8x128xf32>
    %177 = arith.mulf %161, %169 : vector<8x128xf32>
    %178 = arith.addf %176, %177 : vector<8x128xf32>
    %179 = math.tanh %178 : vector<8x128xf32>
    %180 = arith.mulf %175, %179 : vector<8x128xf32>
    %181 = arith.truncf %180 : vector<8x128xf32> to vector<8x128xbf16>
    %c0_67 = arith.constant 0 : index
    %c128_68 = arith.constant 128 : index
    %182 = vector.load %arg17[%c0_67, %c128_68] : memref<8x256xbf16, #tpu.memory_space<vmem>>, vector<8x128xbf16>
    tpu.vector_store %arg17[%c0_67, %c128_68], %181 {strides = array<i32>} : memref<8x256xbf16, #tpu.memory_space<vmem>>, vector<8x128xbf16>,
    %183 = arith.addf %180, %148 : vector<8x128xf32>
    %184 = arith.truncf %183 : vector<8x128xf32> to vector<8x128xbf16>
    %185 = arith.index_cast %114 : i32 to index
    %c0_69 = arith.constant 0 : index
    %186 = vector.load %arg10[%185, %c0_69] : memref<64x128xbf16, #tpu.memory_space<vmem>>, vector<8x128xbf16>
    tpu.vector_store %arg10[%185, %c0_69], %184 {strides = array<i32>} : memref<64x128xbf16, #tpu.memory_space<vmem>>, vector<8x128xbf16>,
    %c2_i32_70 = arith.constant 2 : i32
    %c8_i32_71 = arith.constant 8 : i32
    %187 = arith.muli %c2_i32_70, %c8_i32_71 : i32
    %188 = tpu.assume_multiple %187, 8 : i32
    %189 = arith.index_cast %188 : i32 to index
    %c0_72 = arith.constant 0 : index
    %190 = vector.load %arg15[%189, %c0_72] : memref<64x512xf32, #tpu.memory_space<vmem>>, vector<8x512xf32>
    %191 = arith.truncf %144 : vector<8x128xf32> to vector<8x128xbf16>
    %cst_73 = arith.constant dense<0.000000e+00> : vector<8x512xf32>
    %192 = tpu.matmul %191, %34, %cst_73 {dimension_numbers = #tpu.dot_dimension_numbers<[1], [0], [0], [1], [0, 0, 1, 1], [], []>} : vector<8x128xbf16>, vector<128x512xbf16>, vector<8x512xf32> -> vector<8x512xf32>
    %193 = arith.addf %190, %192 : vector<8x512xf32>
    %194 = vector.extract_strided_slice %193 {offsets = [0, 0], sizes = [8, 128], strides = [1, 1]} : vector<8x512xf32> to vector<8x128xf32>
    %195 = arith.negf %194 : vector<8x128xf32>
    %196 = math.exp %195 : vector<8x128xf32>
    %cst_74 = arith.constant 1.000000e+00 : f32
    %197 = vector.broadcast %cst_74 : f32 to vector<8x128xf32>
    %198 = arith.addf %197, %196 : vector<8x128xf32>
    %199 = arith.divf %197, %198 : vector<8x128xf32>
    %200 = vector.extract_strided_slice %193 {offsets = [0, 128], sizes = [8, 128], strides = [1, 1]} : vector<8x512xf32> to vector<8x128xf32>
    %201 = arith.negf %200 : vector<8x128xf32>
    %202 = math.exp %201 : vector<8x128xf32>
    %cst_75 = arith.constant 1.000000e+00 : f32
    %203 = vector.broadcast %cst_75 : f32 to vector<8x128xf32>
    %204 = arith.addf %203, %202 : vector<8x128xf32>
    %205 = arith.divf %203, %204 : vector<8x128xf32>
    %206 = vector.extract_strided_slice %193 {offsets = [0, 256], sizes = [8, 128], strides = [1, 1]} : vector<8x512xf32> to vector<8x128xf32>
    %207 = math.tanh %206 : vector<8x128xf32>
    %208 = vector.extract_strided_slice %193 {offsets = [0, 384], sizes = [8, 128], strides = [1, 1]} : vector<8x512xf32> to vector<8x128xf32>
    %209 = arith.negf %208 : vector<8x128xf32>
    %210 = math.exp %209 : vector<8x128xf32>
    %cst_76 = arith.constant 1.000000e+00 : f32
    %211 = vector.broadcast %cst_76 : f32 to vector<8x128xf32>
    %212 = arith.addf %211, %210 : vector<8x128xf32>
    %213 = arith.divf %211, %212 : vector<8x128xf32>
    %214 = arith.mulf %205, %142 : vector<8x128xf32>
    %215 = arith.mulf %199, %207 : vector<8x128xf32>
    %216 = arith.addf %214, %215 : vector<8x128xf32>
    %217 = math.tanh %216 : vector<8x128xf32>
    %218 = arith.mulf %213, %217 : vector<8x128xf32>
    %219 = arith.index_cast %c2_i32_70 : i32 to index
    %c0_77 = arith.constant 0 : index
    %c0_78 = arith.constant 0 : index
    %220 = vector.load %arg2[%219, %c0_77, %c0_78] : memref<8x8x128xf32, #tpu.memory_space<vmem>>, vector<1x8x128xf32>
    %221 = vector.shape_cast %220 : vector<1x8x128xf32> to vector<8x128xf32>
    %222 = arith.addf %218, %221 : vector<8x128xf32>
    %223 = arith.truncf %222 : vector<8x128xf32> to vector<8x128xbf16>
    %c0_79 = arith.constant 0 : index
    %c0_80 = arith.constant 0 : index
    %224 = vector.load %arg17[%c0_79, %c0_80] : memref<8x256xbf16, #tpu.memory_space<vmem>>, vector<8x128xbf16>
    tpu.vector_store %arg17[%c0_79, %c0_80], %223 {strides = array<i32>} : memref<8x256xbf16, #tpu.memory_space<vmem>>, vector<8x128xbf16>,
    %225 = arith.index_cast %188 : i32 to index
    %c0_81 = arith.constant 0 : index
    %226 = vector.load %arg16[%225, %c0_81] : memref<64x512xf32, #tpu.memory_space<vmem>>, vector<8x512xf32>
    %c0_82 = arith.constant 0 : index
    %c0_83 = arith.constant 0 : index
    %227 = vector.load %arg17[%c0_82, %c0_83] : memref<8x256xbf16, #tpu.memory_space<vmem>>, vector<8x256xbf16>
    %cst_84 = arith.constant dense<0.000000e+00> : vector<8x512xf32>
    %228 = tpu.matmul %227, %35, %cst_84 {dimension_numbers = #tpu.dot_dimension_numbers<[1], [0], [0], [1], [0, 0, 1, 1], [], []>} : vector<8x256xbf16>, vector<256x512xbf16>, vector<8x512xf32> -> vector<8x512xf32>
    %229 = arith.addf %226, %228 : vector<8x512xf32>
    %230 = vector.extract_strided_slice %229 {offsets = [0, 0], sizes = [8, 128], strides = [1, 1]} : vector<8x512xf32> to vector<8x128xf32>
    %231 = arith.negf %230 : vector<8x128xf32>
    %232 = math.exp %231 : vector<8x128xf32>
    %cst_85 = arith.constant 1.000000e+00 : f32
    %233 = vector.broadcast %cst_85 : f32 to vector<8x128xf32>
    %234 = arith.addf %233, %232 : vector<8x128xf32>
    %235 = arith.divf %233, %234 : vector<8x128xf32>
    %236 = vector.extract_strided_slice %229 {offsets = [0, 128], sizes = [8, 128], strides = [1, 1]} : vector<8x512xf32> to vector<8x128xf32>
    %237 = arith.negf %236 : vector<8x128xf32>
    %238 = math.exp %237 : vector<8x128xf32>
    %cst_86 = arith.constant 1.000000e+00 : f32
    %239 = vector.broadcast %cst_86 : f32 to vector<8x128xf32>
    %240 = arith.addf %239, %238 : vector<8x128xf32>
    %241 = arith.divf %239, %240 : vector<8x128xf32>
    %242 = vector.extract_strided_slice %229 {offsets = [0, 256], sizes = [8, 128], strides = [1, 1]} : vector<8x512xf32> to vector<8x128xf32>
    %243 = math.tanh %242 : vector<8x128xf32>
    %244 = vector.extract_strided_slice %229 {offsets = [0, 384], sizes = [8, 128], strides = [1, 1]} : vector<8x512xf32> to vector<8x128xf32>
    %245 = arith.negf %244 : vector<8x128xf32>
    %246 = math.exp %245 : vector<8x128xf32>
    %cst_87 = arith.constant 1.000000e+00 : f32
    %247 = vector.broadcast %cst_87 : f32 to vector<8x128xf32>
    %248 = arith.addf %247, %246 : vector<8x128xf32>
    %249 = arith.divf %247, %248 : vector<8x128xf32>
    %250 = arith.mulf %241, %178 : vector<8x128xf32>
    %251 = arith.mulf %235, %243 : vector<8x128xf32>
    %252 = arith.addf %250, %251 : vector<8x128xf32>
    %253 = math.tanh %252 : vector<8x128xf32>
    %254 = arith.mulf %249, %253 : vector<8x128xf32>
    %255 = arith.truncf %254 : vector<8x128xf32> to vector<8x128xbf16>
    %c0_88 = arith.constant 0 : index
    %c128_89 = arith.constant 128 : index
    %256 = vector.load %arg17[%c0_88, %c128_89] : memref<8x256xbf16, #tpu.memory_space<vmem>>, vector<8x128xbf16>
    tpu.vector_store %arg17[%c0_88, %c128_89], %255 {strides = array<i32>} : memref<8x256xbf16, #tpu.memory_space<vmem>>, vector<8x128xbf16>,
    %257 = arith.addf %254, %222 : vector<8x128xf32>
    %258 = arith.truncf %257 : vector<8x128xf32> to vector<8x128xbf16>
    %259 = arith.index_cast %188 : i32 to index
    %c0_90 = arith.constant 0 : index
    %260 = vector.load %arg10[%259, %c0_90] : memref<64x128xbf16, #tpu.memory_space<vmem>>, vector<8x128xbf16>
    tpu.vector_store %arg10[%259, %c0_90], %258 {strides = array<i32>} : memref<64x128xbf16, #tpu.memory_space<vmem>>, vector<8x128xbf16>,
    %c3_i32_91 = arith.constant 3 : i32
    %c8_i32_92 = arith.constant 8 : i32
    %261 = arith.muli %c3_i32_91, %c8_i32_92 : i32
    %262 = tpu.assume_multiple %261, 8 : i32
    %263 = arith.index_cast %262 : i32 to index
    %c0_93 = arith.constant 0 : index
    %264 = vector.load %arg15[%263, %c0_93] : memref<64x512xf32, #tpu.memory_space<vmem>>, vector<8x512xf32>
    %265 = arith.truncf %218 : vector<8x128xf32> to vector<8x128xbf16>
    %cst_94 = arith.constant dense<0.000000e+00> : vector<8x512xf32>
    %266 = tpu.matmul %265, %34, %cst_94 {dimension_numbers = #tpu.dot_dimension_numbers<[1], [0], [0], [1], [0, 0, 1, 1], [], []>} : vector<8x128xbf16>, vector<128x512xbf16>, vector<8x512xf32> -> vector<8x512xf32>
    %267 = arith.addf %264, %266 : vector<8x512xf32>
    %268 = vector.extract_strided_slice %267 {offsets = [0, 0], sizes = [8, 128], strides = [1, 1]} : vector<8x512xf32> to vector<8x128xf32>
    %269 = arith.negf %268 : vector<8x128xf32>
    %270 = math.exp %269 : vector<8x128xf32>
    %cst_95 = arith.constant 1.000000e+00 : f32
    %271 = vector.broadcast %cst_95 : f32 to vector<8x128xf32>
    %272 = arith.addf %271, %270 : vector<8x128xf32>
    %273 = arith.divf %271, %272 : vector<8x128xf32>
    %274 = vector.extract_strided_slice %267 {offsets = [0, 128], sizes = [8, 128], strides = [1, 1]} : vector<8x512xf32> to vector<8x128xf32>
    %275 = arith.negf %274 : vector<8x128xf32>
    %276 = math.exp %275 : vector<8x128xf32>
    %cst_96 = arith.constant 1.000000e+00 : f32
    %277 = vector.broadcast %cst_96 : f32 to vector<8x128xf32>
    %278 = arith.addf %277, %276 : vector<8x128xf32>
    %279 = arith.divf %277, %278 : vector<8x128xf32>
    %280 = vector.extract_strided_slice %267 {offsets = [0, 256], sizes = [8, 128], strides = [1, 1]} : vector<8x512xf32> to vector<8x128xf32>
    %281 = math.tanh %280 : vector<8x128xf32>
    %282 = vector.extract_strided_slice %267 {offsets = [0, 384], sizes = [8, 128], strides = [1, 1]} : vector<8x512xf32> to vector<8x128xf32>
    %283 = arith.negf %282 : vector<8x128xf32>
    %284 = math.exp %283 : vector<8x128xf32>
    %cst_97 = arith.constant 1.000000e+00 : f32
    %285 = vector.broadcast %cst_97 : f32 to vector<8x128xf32>
    %286 = arith.addf %285, %284 : vector<8x128xf32>
    %287 = arith.divf %285, %286 : vector<8x128xf32>
    %288 = arith.mulf %279, %216 : vector<8x128xf32>
    %289 = arith.mulf %273, %281 : vector<8x128xf32>
    %290 = arith.addf %288, %289 : vector<8x128xf32>
    %291 = math.tanh %290 : vector<8x128xf32>
    %292 = arith.mulf %287, %291 : vector<8x128xf32>
    %293 = arith.index_cast %c3_i32_91 : i32 to index
    %c0_98 = arith.constant 0 : index
    %c0_99 = arith.constant 0 : index
    %294 = vector.load %arg2[%293, %c0_98, %c0_99] : memref<8x8x128xf32, #tpu.memory_space<vmem>>, vector<1x8x128xf32>
    %295 = vector.shape_cast %294 : vector<1x8x128xf32> to vector<8x128xf32>
    %296 = arith.addf %292, %295 : vector<8x128xf32>
    %297 = arith.truncf %296 : vector<8x128xf32> to vector<8x128xbf16>
    %c0_100 = arith.constant 0 : index
    %c0_101 = arith.constant 0 : index
    %298 = vector.load %arg17[%c0_100, %c0_101] : memref<8x256xbf16, #tpu.memory_space<vmem>>, vector<8x128xbf16>
    tpu.vector_store %arg17[%c0_100, %c0_101], %297 {strides = array<i32>} : memref<8x256xbf16, #tpu.memory_space<vmem>>, vector<8x128xbf16>,
    %299 = arith.index_cast %262 : i32 to index
    %c0_102 = arith.constant 0 : index
    %300 = vector.load %arg16[%299, %c0_102] : memref<64x512xf32, #tpu.memory_space<vmem>>, vector<8x512xf32>
    %c0_103 = arith.constant 0 : index
    %c0_104 = arith.constant 0 : index
    %301 = vector.load %arg17[%c0_103, %c0_104] : memref<8x256xbf16, #tpu.memory_space<vmem>>, vector<8x256xbf16>
    %cst_105 = arith.constant dense<0.000000e+00> : vector<8x512xf32>
    %302 = tpu.matmul %301, %35, %cst_105 {dimension_numbers = #tpu.dot_dimension_numbers<[1], [0], [0], [1], [0, 0, 1, 1], [], []>} : vector<8x256xbf16>, vector<256x512xbf16>, vector<8x512xf32> -> vector<8x512xf32>
    %303 = arith.addf %300, %302 : vector<8x512xf32>
    %304 = vector.extract_strided_slice %303 {offsets = [0, 0], sizes = [8, 128], strides = [1, 1]} : vector<8x512xf32> to vector<8x128xf32>
    %305 = arith.negf %304 : vector<8x128xf32>
    %306 = math.exp %305 : vector<8x128xf32>
    %cst_106 = arith.constant 1.000000e+00 : f32
    %307 = vector.broadcast %cst_106 : f32 to vector<8x128xf32>
    %308 = arith.addf %307, %306 : vector<8x128xf32>
    %309 = arith.divf %307, %308 : vector<8x128xf32>
    %310 = vector.extract_strided_slice %303 {offsets = [0, 128], sizes = [8, 128], strides = [1, 1]} : vector<8x512xf32> to vector<8x128xf32>
    %311 = arith.negf %310 : vector<8x128xf32>
    %312 = math.exp %311 : vector<8x128xf32>
    %cst_107 = arith.constant 1.000000e+00 : f32
    %313 = vector.broadcast %cst_107 : f32 to vector<8x128xf32>
    %314 = arith.addf %313, %312 : vector<8x128xf32>
    %315 = arith.divf %313, %314 : vector<8x128xf32>
    %316 = vector.extract_strided_slice %303 {offsets = [0, 256], sizes = [8, 128], strides = [1, 1]} : vector<8x512xf32> to vector<8x128xf32>
    %317 = math.tanh %316 : vector<8x128xf32>
    %318 = vector.extract_strided_slice %303 {offsets = [0, 384], sizes = [8, 128], strides = [1, 1]} : vector<8x512xf32> to vector<8x128xf32>
    %319 = arith.negf %318 : vector<8x128xf32>
    %320 = math.exp %319 : vector<8x128xf32>
    %cst_108 = arith.constant 1.000000e+00 : f32
    %321 = vector.broadcast %cst_108 : f32 to vector<8x128xf32>
    %322 = arith.addf %321, %320 : vector<8x128xf32>
    %323 = arith.divf %321, %322 : vector<8x128xf32>
    %324 = arith.mulf %315, %252 : vector<8x128xf32>
    %325 = arith.mulf %309, %317 : vector<8x128xf32>
    %326 = arith.addf %324, %325 : vector<8x128xf32>
    %327 = math.tanh %326 : vector<8x128xf32>
    %328 = arith.mulf %323, %327 : vector<8x128xf32>
    %329 = arith.truncf %328 : vector<8x128xf32> to vector<8x128xbf16>
    %c0_109 = arith.constant 0 : index
    %c128_110 = arith.constant 128 : index
    %330 = vector.load %arg17[%c0_109, %c128_110] : memref<8x256xbf16, #tpu.memory_space<vmem>>, vector<8x128xbf16>
    tpu.vector_store %arg17[%c0_109, %c128_110], %329 {strides = array<i32>} : memref<8x256xbf16, #tpu.memory_space<vmem>>, vector<8x128xbf16>,
    %331 = arith.addf %328, %296 : vector<8x128xf32>
    %332 = arith.truncf %331 : vector<8x128xf32> to vector<8x128xbf16>
    %333 = arith.index_cast %262 : i32 to index
    %c0_111 = arith.constant 0 : index
    %334 = vector.load %arg10[%333, %c0_111] : memref<64x128xbf16, #tpu.memory_space<vmem>>, vector<8x128xbf16>
    tpu.vector_store %arg10[%333, %c0_111], %332 {strides = array<i32>} : memref<64x128xbf16, #tpu.memory_space<vmem>>, vector<8x128xbf16>,
    %c4_i32 = arith.constant 4 : i32
    %c8_i32_112 = arith.constant 8 : i32
    %335 = arith.muli %c4_i32, %c8_i32_112 : i32
    %336 = tpu.assume_multiple %335, 8 : i32
    %337 = arith.index_cast %336 : i32 to index
    %c0_113 = arith.constant 0 : index
    %338 = vector.load %arg15[%337, %c0_113] : memref<64x512xf32, #tpu.memory_space<vmem>>, vector<8x512xf32>
    %339 = arith.truncf %292 : vector<8x128xf32> to vector<8x128xbf16>
    %cst_114 = arith.constant dense<0.000000e+00> : vector<8x512xf32>
    %340 = tpu.matmul %339, %34, %cst_114 {dimension_numbers = #tpu.dot_dimension_numbers<[1], [0], [0], [1], [0, 0, 1, 1], [], []>} : vector<8x128xbf16>, vector<128x512xbf16>, vector<8x512xf32> -> vector<8x512xf32>
    %341 = arith.addf %338, %340 : vector<8x512xf32>
    %342 = vector.extract_strided_slice %341 {offsets = [0, 0], sizes = [8, 128], strides = [1, 1]} : vector<8x512xf32> to vector<8x128xf32>
    %343 = arith.negf %342 : vector<8x128xf32>
    %344 = math.exp %343 : vector<8x128xf32>
    %cst_115 = arith.constant 1.000000e+00 : f32
    %345 = vector.broadcast %cst_115 : f32 to vector<8x128xf32>
    %346 = arith.addf %345, %344 : vector<8x128xf32>
    %347 = arith.divf %345, %346 : vector<8x128xf32>
    %348 = vector.extract_strided_slice %341 {offsets = [0, 128], sizes = [8, 128], strides = [1, 1]} : vector<8x512xf32> to vector<8x128xf32>
    %349 = arith.negf %348 : vector<8x128xf32>
    %350 = math.exp %349 : vector<8x128xf32>
    %cst_116 = arith.constant 1.000000e+00 : f32
    %351 = vector.broadcast %cst_116 : f32 to vector<8x128xf32>
    %352 = arith.addf %351, %350 : vector<8x128xf32>
    %353 = arith.divf %351, %352 : vector<8x128xf32>
    %354 = vector.extract_strided_slice %341 {offsets = [0, 256], sizes = [8, 128], strides = [1, 1]} : vector<8x512xf32> to vector<8x128xf32>
    %355 = math.tanh %354 : vector<8x128xf32>
    %356 = vector.extract_strided_slice %341 {offsets = [0, 384], sizes = [8, 128], strides = [1, 1]} : vector<8x512xf32> to vector<8x128xf32>
    %357 = arith.negf %356 : vector<8x128xf32>
    %358 = math.exp %357 : vector<8x128xf32>
    %cst_117 = arith.constant 1.000000e+00 : f32
    %359 = vector.broadcast %cst_117 : f32 to vector<8x128xf32>
    %360 = arith.addf %359, %358 : vector<8x128xf32>
    %361 = arith.divf %359, %360 : vector<8x128xf32>
    %362 = arith.mulf %353, %290 : vector<8x128xf32>
    %363 = arith.mulf %347, %355 : vector<8x128xf32>
    %364 = arith.addf %362, %363 : vector<8x128xf32>
    %365 = math.tanh %364 : vector<8x128xf32>
    %366 = arith.mulf %361, %365 : vector<8x128xf32>
    %367 = arith.index_cast %c4_i32 : i32 to index
    %c0_118 = arith.constant 0 : index
    %c0_119 = arith.constant 0 : index
    %368 = vector.load %arg2[%367, %c0_118, %c0_119] : memref<8x8x128xf32, #tpu.memory_space<vmem>>, vector<1x8x128xf32>
    %369 = vector.shape_cast %368 : vector<1x8x128xf32> to vector<8x128xf32>
    %370 = arith.addf %366, %369 : vector<8x128xf32>
    %371 = arith.truncf %370 : vector<8x128xf32> to vector<8x128xbf16>
    %c0_120 = arith.constant 0 : index
    %c0_121 = arith.constant 0 : index
    %372 = vector.load %arg17[%c0_120, %c0_121] : memref<8x256xbf16, #tpu.memory_space<vmem>>, vector<8x128xbf16>
    tpu.vector_store %arg17[%c0_120, %c0_121], %371 {strides = array<i32>} : memref<8x256xbf16, #tpu.memory_space<vmem>>, vector<8x128xbf16>,
    %373 = arith.index_cast %336 : i32 to index
    %c0_122 = arith.constant 0 : index
    %374 = vector.load %arg16[%373, %c0_122] : memref<64x512xf32, #tpu.memory_space<vmem>>, vector<8x512xf32>
    %c0_123 = arith.constant 0 : index
    %c0_124 = arith.constant 0 : index
    %375 = vector.load %arg17[%c0_123, %c0_124] : memref<8x256xbf16, #tpu.memory_space<vmem>>, vector<8x256xbf16>
    %cst_125 = arith.constant dense<0.000000e+00> : vector<8x512xf32>
    %376 = tpu.matmul %375, %35, %cst_125 {dimension_numbers = #tpu.dot_dimension_numbers<[1], [0], [0], [1], [0, 0, 1, 1], [], []>} : vector<8x256xbf16>, vector<256x512xbf16>, vector<8x512xf32> -> vector<8x512xf32>
    %377 = arith.addf %374, %376 : vector<8x512xf32>
    %378 = vector.extract_strided_slice %377 {offsets = [0, 0], sizes = [8, 128], strides = [1, 1]} : vector<8x512xf32> to vector<8x128xf32>
    %379 = arith.negf %378 : vector<8x128xf32>
    %380 = math.exp %379 : vector<8x128xf32>
    %cst_126 = arith.constant 1.000000e+00 : f32
    %381 = vector.broadcast %cst_126 : f32 to vector<8x128xf32>
    %382 = arith.addf %381, %380 : vector<8x128xf32>
    %383 = arith.divf %381, %382 : vector<8x128xf32>
    %384 = vector.extract_strided_slice %377 {offsets = [0, 128], sizes = [8, 128], strides = [1, 1]} : vector<8x512xf32> to vector<8x128xf32>
    %385 = arith.negf %384 : vector<8x128xf32>
    %386 = math.exp %385 : vector<8x128xf32>
    %cst_127 = arith.constant 1.000000e+00 : f32
    %387 = vector.broadcast %cst_127 : f32 to vector<8x128xf32>
    %388 = arith.addf %387, %386 : vector<8x128xf32>
    %389 = arith.divf %387, %388 : vector<8x128xf32>
    %390 = vector.extract_strided_slice %377 {offsets = [0, 256], sizes = [8, 128], strides = [1, 1]} : vector<8x512xf32> to vector<8x128xf32>
    %391 = math.tanh %390 : vector<8x128xf32>
    %392 = vector.extract_strided_slice %377 {offsets = [0, 384], sizes = [8, 128], strides = [1, 1]} : vector<8x512xf32> to vector<8x128xf32>
    %393 = arith.negf %392 : vector<8x128xf32>
    %394 = math.exp %393 : vector<8x128xf32>
    %cst_128 = arith.constant 1.000000e+00 : f32
    %395 = vector.broadcast %cst_128 : f32 to vector<8x128xf32>
    %396 = arith.addf %395, %394 : vector<8x128xf32>
    %397 = arith.divf %395, %396 : vector<8x128xf32>
    %398 = arith.mulf %389, %326 : vector<8x128xf32>
    %399 = arith.mulf %383, %391 : vector<8x128xf32>
    %400 = arith.addf %398, %399 : vector<8x128xf32>
    %401 = math.tanh %400 : vector<8x128xf32>
    %402 = arith.mulf %397, %401 : vector<8x128xf32>
    %403 = arith.truncf %402 : vector<8x128xf32> to vector<8x128xbf16>
    %c0_129 = arith.constant 0 : index
    %c128_130 = arith.constant 128 : index
    %404 = vector.load %arg17[%c0_129, %c128_130] : memref<8x256xbf16, #tpu.memory_space<vmem>>, vector<8x128xbf16>
    tpu.vector_store %arg17[%c0_129, %c128_130], %403 {strides = array<i32>} : memref<8x256xbf16, #tpu.memory_space<vmem>>, vector<8x128xbf16>,
    %405 = arith.addf %402, %370 : vector<8x128xf32>
    %406 = arith.truncf %405 : vector<8x128xf32> to vector<8x128xbf16>
    %407 = arith.index_cast %336 : i32 to index
    %c0_131 = arith.constant 0 : index
    %408 = vector.load %arg10[%407, %c0_131] : memref<64x128xbf16, #tpu.memory_space<vmem>>, vector<8x128xbf16>
    tpu.vector_store %arg10[%407, %c0_131], %406 {strides = array<i32>} : memref<64x128xbf16, #tpu.memory_space<vmem>>, vector<8x128xbf16>,
    %c5_i32 = arith.constant 5 : i32
    %c8_i32_132 = arith.constant 8 : i32
    %409 = arith.muli %c5_i32, %c8_i32_132 : i32
    %410 = tpu.assume_multiple %409, 8 : i32
    %411 = arith.index_cast %410 : i32 to index
    %c0_133 = arith.constant 0 : index
    %412 = vector.load %arg15[%411, %c0_133] : memref<64x512xf32, #tpu.memory_space<vmem>>, vector<8x512xf32>
    %413 = arith.truncf %366 : vector<8x128xf32> to vector<8x128xbf16>
    %cst_134 = arith.constant dense<0.000000e+00> : vector<8x512xf32>
    %414 = tpu.matmul %413, %34, %cst_134 {dimension_numbers = #tpu.dot_dimension_numbers<[1], [0], [0], [1], [0, 0, 1, 1], [], []>} : vector<8x128xbf16>, vector<128x512xbf16>, vector<8x512xf32> -> vector<8x512xf32>
    %415 = arith.addf %412, %414 : vector<8x512xf32>
    %416 = vector.extract_strided_slice %415 {offsets = [0, 0], sizes = [8, 128], strides = [1, 1]} : vector<8x512xf32> to vector<8x128xf32>
    %417 = arith.negf %416 : vector<8x128xf32>
    %418 = math.exp %417 : vector<8x128xf32>
    %cst_135 = arith.constant 1.000000e+00 : f32
    %419 = vector.broadcast %cst_135 : f32 to vector<8x128xf32>
    %420 = arith.addf %419, %418 : vector<8x128xf32>
    %421 = arith.divf %419, %420 : vector<8x128xf32>
    %422 = vector.extract_strided_slice %415 {offsets = [0, 128], sizes = [8, 128], strides = [1, 1]} : vector<8x512xf32> to vector<8x128xf32>
    %423 = arith.negf %422 : vector<8x128xf32>
    %424 = math.exp %423 : vector<8x128xf32>
    %cst_136 = arith.constant 1.000000e+00 : f32
    %425 = vector.broadcast %cst_136 : f32 to vector<8x128xf32>
    %426 = arith.addf %425, %424 : vector<8x128xf32>
    %427 = arith.divf %425, %426 : vector<8x128xf32>
    %428 = vector.extract_strided_slice %415 {offsets = [0, 256], sizes = [8, 128], strides = [1, 1]} : vector<8x512xf32> to vector<8x128xf32>
    %429 = math.tanh %428 : vector<8x128xf32>
    %430 = vector.extract_strided_slice %415 {offsets = [0, 384], sizes = [8, 128], strides = [1, 1]} : vector<8x512xf32> to vector<8x128xf32>
    %431 = arith.negf %430 : vector<8x128xf32>
    %432 = math.exp %431 : vector<8x128xf32>
    %cst_137 = arith.constant 1.000000e+00 : f32
    %433 = vector.broadcast %cst_137 : f32 to vector<8x128xf32>
    %434 = arith.addf %433, %432 : vector<8x128xf32>
    %435 = arith.divf %433, %434 : vector<8x128xf32>
    %436 = arith.mulf %427, %364 : vector<8x128xf32>
    %437 = arith.mulf %421, %429 : vector<8x128xf32>
    %438 = arith.addf %436, %437 : vector<8x128xf32>
    %439 = math.tanh %438 : vector<8x128xf32>
    %440 = arith.mulf %435, %439 : vector<8x128xf32>
    %441 = arith.index_cast %c5_i32 : i32 to index
    %c0_138 = arith.constant 0 : index
    %c0_139 = arith.constant 0 : index
    %442 = vector.load %arg2[%441, %c0_138, %c0_139] : memref<8x8x128xf32, #tpu.memory_space<vmem>>, vector<1x8x128xf32>
    %443 = vector.shape_cast %442 : vector<1x8x128xf32> to vector<8x128xf32>
    %444 = arith.addf %440, %443 : vector<8x128xf32>
    %445 = arith.truncf %444 : vector<8x128xf32> to vector<8x128xbf16>
    %c0_140 = arith.constant 0 : index
    %c0_141 = arith.constant 0 : index
    %446 = vector.load %arg17[%c0_140, %c0_141] : memref<8x256xbf16, #tpu.memory_space<vmem>>, vector<8x128xbf16>
    tpu.vector_store %arg17[%c0_140, %c0_141], %445 {strides = array<i32>} : memref<8x256xbf16, #tpu.memory_space<vmem>>, vector<8x128xbf16>,
    %447 = arith.index_cast %410 : i32 to index
    %c0_142 = arith.constant 0 : index
    %448 = vector.load %arg16[%447, %c0_142] : memref<64x512xf32, #tpu.memory_space<vmem>>, vector<8x512xf32>
    %c0_143 = arith.constant 0 : index
    %c0_144 = arith.constant 0 : index
    %449 = vector.load %arg17[%c0_143, %c0_144] : memref<8x256xbf16, #tpu.memory_space<vmem>>, vector<8x256xbf16>
    %cst_145 = arith.constant dense<0.000000e+00> : vector<8x512xf32>
    %450 = tpu.matmul %449, %35, %cst_145 {dimension_numbers = #tpu.dot_dimension_numbers<[1], [0], [0], [1], [0, 0, 1, 1], [], []>} : vector<8x256xbf16>, vector<256x512xbf16>, vector<8x512xf32> -> vector<8x512xf32>
    %451 = arith.addf %448, %450 : vector<8x512xf32>
    %452 = vector.extract_strided_slice %451 {offsets = [0, 0], sizes = [8, 128], strides = [1, 1]} : vector<8x512xf32> to vector<8x128xf32>
    %453 = arith.negf %452 : vector<8x128xf32>
    %454 = math.exp %453 : vector<8x128xf32>
    %cst_146 = arith.constant 1.000000e+00 : f32
    %455 = vector.broadcast %cst_146 : f32 to vector<8x128xf32>
    %456 = arith.addf %455, %454 : vector<8x128xf32>
    %457 = arith.divf %455, %456 : vector<8x128xf32>
    %458 = vector.extract_strided_slice %451 {offsets = [0, 128], sizes = [8, 128], strides = [1, 1]} : vector<8x512xf32> to vector<8x128xf32>
    %459 = arith.negf %458 : vector<8x128xf32>
    %460 = math.exp %459 : vector<8x128xf32>
    %cst_147 = arith.constant 1.000000e+00 : f32
    %461 = vector.broadcast %cst_147 : f32 to vector<8x128xf32>
    %462 = arith.addf %461, %460 : vector<8x128xf32>
    %463 = arith.divf %461, %462 : vector<8x128xf32>
    %464 = vector.extract_strided_slice %451 {offsets = [0, 256], sizes = [8, 128], strides = [1, 1]} : vector<8x512xf32> to vector<8x128xf32>
    %465 = math.tanh %464 : vector<8x128xf32>
    %466 = vector.extract_strided_slice %451 {offsets = [0, 384], sizes = [8, 128], strides = [1, 1]} : vector<8x512xf32> to vector<8x128xf32>
    %467 = arith.negf %466 : vector<8x128xf32>
    %468 = math.exp %467 : vector<8x128xf32>
    %cst_148 = arith.constant 1.000000e+00 : f32
    %469 = vector.broadcast %cst_148 : f32 to vector<8x128xf32>
    %470 = arith.addf %469, %468 : vector<8x128xf32>
    %471 = arith.divf %469, %470 : vector<8x128xf32>
    %472 = arith.mulf %463, %400 : vector<8x128xf32>
    %473 = arith.mulf %457, %465 : vector<8x128xf32>
    %474 = arith.addf %472, %473 : vector<8x128xf32>
    %475 = math.tanh %474 : vector<8x128xf32>
    %476 = arith.mulf %471, %475 : vector<8x128xf32>
    %477 = arith.truncf %476 : vector<8x128xf32> to vector<8x128xbf16>
    %c0_149 = arith.constant 0 : index
    %c128_150 = arith.constant 128 : index
    %478 = vector.load %arg17[%c0_149, %c128_150] : memref<8x256xbf16, #tpu.memory_space<vmem>>, vector<8x128xbf16>
    tpu.vector_store %arg17[%c0_149, %c128_150], %477 {strides = array<i32>} : memref<8x256xbf16, #tpu.memory_space<vmem>>, vector<8x128xbf16>,
    %479 = arith.addf %476, %444 : vector<8x128xf32>
    %480 = arith.truncf %479 : vector<8x128xf32> to vector<8x128xbf16>
    %481 = arith.index_cast %410 : i32 to index
    %c0_151 = arith.constant 0 : index
    %482 = vector.load %arg10[%481, %c0_151] : memref<64x128xbf16, #tpu.memory_space<vmem>>, vector<8x128xbf16>
    tpu.vector_store %arg10[%481, %c0_151], %480 {strides = array<i32>} : memref<64x128xbf16, #tpu.memory_space<vmem>>, vector<8x128xbf16>,
    %c6_i32 = arith.constant 6 : i32
    %c8_i32_152 = arith.constant 8 : i32
    %483 = arith.muli %c6_i32, %c8_i32_152 : i32
    %484 = tpu.assume_multiple %483, 8 : i32
    %485 = arith.index_cast %484 : i32 to index
    %c0_153 = arith.constant 0 : index
    %486 = vector.load %arg15[%485, %c0_153] : memref<64x512xf32, #tpu.memory_space<vmem>>, vector<8x512xf32>
    %487 = arith.truncf %440 : vector<8x128xf32> to vector<8x128xbf16>
    %cst_154 = arith.constant dense<0.000000e+00> : vector<8x512xf32>
    %488 = tpu.matmul %487, %34, %cst_154 {dimension_numbers = #tpu.dot_dimension_numbers<[1], [0], [0], [1], [0, 0, 1, 1], [], []>} : vector<8x128xbf16>, vector<128x512xbf16>, vector<8x512xf32> -> vector<8x512xf32>
    %489 = arith.addf %486, %488 : vector<8x512xf32>
    %490 = vector.extract_strided_slice %489 {offsets = [0, 0], sizes = [8, 128], strides = [1, 1]} : vector<8x512xf32> to vector<8x128xf32>
    %491 = arith.negf %490 : vector<8x128xf32>
    %492 = math.exp %491 : vector<8x128xf32>
    %cst_155 = arith.constant 1.000000e+00 : f32
    %493 = vector.broadcast %cst_155 : f32 to vector<8x128xf32>
    %494 = arith.addf %493, %492 : vector<8x128xf32>
    %495 = arith.divf %493, %494 : vector<8x128xf32>
    %496 = vector.extract_strided_slice %489 {offsets = [0, 128], sizes = [8, 128], strides = [1, 1]} : vector<8x512xf32> to vector<8x128xf32>
    %497 = arith.negf %496 : vector<8x128xf32>
    %498 = math.exp %497 : vector<8x128xf32>
    %cst_156 = arith.constant 1.000000e+00 : f32
    %499 = vector.broadcast %cst_156 : f32 to vector<8x128xf32>
    %500 = arith.addf %499, %498 : vector<8x128xf32>
    %501 = arith.divf %499, %500 : vector<8x128xf32>
    %502 = vector.extract_strided_slice %489 {offsets = [0, 256], sizes = [8, 128], strides = [1, 1]} : vector<8x512xf32> to vector<8x128xf32>
    %503 = math.tanh %502 : vector<8x128xf32>
    %504 = vector.extract_strided_slice %489 {offsets = [0, 384], sizes = [8, 128], strides = [1, 1]} : vector<8x512xf32> to vector<8x128xf32>
    %505 = arith.negf %504 : vector<8x128xf32>
    %506 = math.exp %505 : vector<8x128xf32>
    %cst_157 = arith.constant 1.000000e+00 : f32
    %507 = vector.broadcast %cst_157 : f32 to vector<8x128xf32>
    %508 = arith.addf %507, %506 : vector<8x128xf32>
    %509 = arith.divf %507, %508 : vector<8x128xf32>
    %510 = arith.mulf %501, %438 : vector<8x128xf32>
    %511 = arith.mulf %495, %503 : vector<8x128xf32>
    %512 = arith.addf %510, %511 : vector<8x128xf32>
    %513 = math.tanh %512 : vector<8x128xf32>
    %514 = arith.mulf %509, %513 : vector<8x128xf32>
    %515 = arith.index_cast %c6_i32 : i32 to index
    %c0_158 = arith.constant 0 : index
    %c0_159 = arith.constant 0 : index
    %516 = vector.load %arg2[%515, %c0_158, %c0_159] : memref<8x8x128xf32, #tpu.memory_space<vmem>>, vector<1x8x128xf32>
    %517 = vector.shape_cast %516 : vector<1x8x128xf32> to vector<8x128xf32>
    %518 = arith.addf %514, %517 : vector<8x128xf32>
    %519 = arith.truncf %518 : vector<8x128xf32> to vector<8x128xbf16>
    %c0_160 = arith.constant 0 : index
    %c0_161 = arith.constant 0 : index
    %520 = vector.load %arg17[%c0_160, %c0_161] : memref<8x256xbf16, #tpu.memory_space<vmem>>, vector<8x128xbf16>
    tpu.vector_store %arg17[%c0_160, %c0_161], %519 {strides = array<i32>} : memref<8x256xbf16, #tpu.memory_space<vmem>>, vector<8x128xbf16>,
    %521 = arith.index_cast %484 : i32 to index
    %c0_162 = arith.constant 0 : index
    %522 = vector.load %arg16[%521, %c0_162] : memref<64x512xf32, #tpu.memory_space<vmem>>, vector<8x512xf32>
    %c0_163 = arith.constant 0 : index
    %c0_164 = arith.constant 0 : index
    %523 = vector.load %arg17[%c0_163, %c0_164] : memref<8x256xbf16, #tpu.memory_space<vmem>>, vector<8x256xbf16>
    %cst_165 = arith.constant dense<0.000000e+00> : vector<8x512xf32>
    %524 = tpu.matmul %523, %35, %cst_165 {dimension_numbers = #tpu.dot_dimension_numbers<[1], [0], [0], [1], [0, 0, 1, 1], [], []>} : vector<8x256xbf16>, vector<256x512xbf16>, vector<8x512xf32> -> vector<8x512xf32>
    %525 = arith.addf %522, %524 : vector<8x512xf32>
    %526 = vector.extract_strided_slice %525 {offsets = [0, 0], sizes = [8, 128], strides = [1, 1]} : vector<8x512xf32> to vector<8x128xf32>
    %527 = arith.negf %526 : vector<8x128xf32>
    %528 = math.exp %527 : vector<8x128xf32>
    %cst_166 = arith.constant 1.000000e+00 : f32
    %529 = vector.broadcast %cst_166 : f32 to vector<8x128xf32>
    %530 = arith.addf %529, %528 : vector<8x128xf32>
    %531 = arith.divf %529, %530 : vector<8x128xf32>
    %532 = vector.extract_strided_slice %525 {offsets = [0, 128], sizes = [8, 128], strides = [1, 1]} : vector<8x512xf32> to vector<8x128xf32>
    %533 = arith.negf %532 : vector<8x128xf32>
    %534 = math.exp %533 : vector<8x128xf32>
    %cst_167 = arith.constant 1.000000e+00 : f32
    %535 = vector.broadcast %cst_167 : f32 to vector<8x128xf32>
    %536 = arith.addf %535, %534 : vector<8x128xf32>
    %537 = arith.divf %535, %536 : vector<8x128xf32>
    %538 = vector.extract_strided_slice %525 {offsets = [0, 256], sizes = [8, 128], strides = [1, 1]} : vector<8x512xf32> to vector<8x128xf32>
    %539 = math.tanh %538 : vector<8x128xf32>
    %540 = vector.extract_strided_slice %525 {offsets = [0, 384], sizes = [8, 128], strides = [1, 1]} : vector<8x512xf32> to vector<8x128xf32>
    %541 = arith.negf %540 : vector<8x128xf32>
    %542 = math.exp %541 : vector<8x128xf32>
    %cst_168 = arith.constant 1.000000e+00 : f32
    %543 = vector.broadcast %cst_168 : f32 to vector<8x128xf32>
    %544 = arith.addf %543, %542 : vector<8x128xf32>
    %545 = arith.divf %543, %544 : vector<8x128xf32>
    %546 = arith.mulf %537, %474 : vector<8x128xf32>
    %547 = arith.mulf %531, %539 : vector<8x128xf32>
    %548 = arith.addf %546, %547 : vector<8x128xf32>
    %549 = math.tanh %548 : vector<8x128xf32>
    %550 = arith.mulf %545, %549 : vector<8x128xf32>
    %551 = arith.truncf %550 : vector<8x128xf32> to vector<8x128xbf16>
    %c0_169 = arith.constant 0 : index
    %c128_170 = arith.constant 128 : index
    %552 = vector.load %arg17[%c0_169, %c128_170] : memref<8x256xbf16, #tpu.memory_space<vmem>>, vector<8x128xbf16>
    tpu.vector_store %arg17[%c0_169, %c128_170], %551 {strides = array<i32>} : memref<8x256xbf16, #tpu.memory_space<vmem>>, vector<8x128xbf16>,
    %553 = arith.addf %550, %518 : vector<8x128xf32>
    %554 = arith.truncf %553 : vector<8x128xf32> to vector<8x128xbf16>
    %555 = arith.index_cast %484 : i32 to index
    %c0_171 = arith.constant 0 : index
    %556 = vector.load %arg10[%555, %c0_171] : memref<64x128xbf16, #tpu.memory_space<vmem>>, vector<8x128xbf16>
    tpu.vector_store %arg10[%555, %c0_171], %554 {strides = array<i32>} : memref<64x128xbf16, #tpu.memory_space<vmem>>, vector<8x128xbf16>,
    %c7_i32 = arith.constant 7 : i32
    %c8_i32_172 = arith.constant 8 : i32
    %557 = arith.muli %c7_i32, %c8_i32_172 : i32
    %558 = tpu.assume_multiple %557, 8 : i32
    %559 = arith.index_cast %558 : i32 to index
    %c0_173 = arith.constant 0 : index
    %560 = vector.load %arg15[%559, %c0_173] : memref<64x512xf32, #tpu.memory_space<vmem>>, vector<8x512xf32>
    %561 = arith.truncf %514 : vector<8x128xf32> to vector<8x128xbf16>
    %cst_174 = arith.constant dense<0.000000e+00> : vector<8x512xf32>
    %562 = tpu.matmul %561, %34, %cst_174 {dimension_numbers = #tpu.dot_dimension_numbers<[1], [0], [0], [1], [0, 0, 1, 1], [], []>} : vector<8x128xbf16>, vector<128x512xbf16>, vector<8x512xf32> -> vector<8x512xf32>
    %563 = arith.addf %560, %562 : vector<8x512xf32>
    %564 = vector.extract_strided_slice %563 {offsets = [0, 0], sizes = [8, 128], strides = [1, 1]} : vector<8x512xf32> to vector<8x128xf32>
    %565 = arith.negf %564 : vector<8x128xf32>
    %566 = math.exp %565 : vector<8x128xf32>
    %cst_175 = arith.constant 1.000000e+00 : f32
    %567 = vector.broadcast %cst_175 : f32 to vector<8x128xf32>
    %568 = arith.addf %567, %566 : vector<8x128xf32>
    %569 = arith.divf %567, %568 : vector<8x128xf32>
    %570 = vector.extract_strided_slice %563 {offsets = [0, 128], sizes = [8, 128], strides = [1, 1]} : vector<8x512xf32> to vector<8x128xf32>
    %571 = arith.negf %570 : vector<8x128xf32>
    %572 = math.exp %571 : vector<8x128xf32>
    %cst_176 = arith.constant 1.000000e+00 : f32
    %573 = vector.broadcast %cst_176 : f32 to vector<8x128xf32>
    %574 = arith.addf %573, %572 : vector<8x128xf32>
    %575 = arith.divf %573, %574 : vector<8x128xf32>
    %576 = vector.extract_strided_slice %563 {offsets = [0, 256], sizes = [8, 128], strides = [1, 1]} : vector<8x512xf32> to vector<8x128xf32>
    %577 = math.tanh %576 : vector<8x128xf32>
    %578 = vector.extract_strided_slice %563 {offsets = [0, 384], sizes = [8, 128], strides = [1, 1]} : vector<8x512xf32> to vector<8x128xf32>
    %579 = arith.negf %578 : vector<8x128xf32>
    %580 = math.exp %579 : vector<8x128xf32>
    %cst_177 = arith.constant 1.000000e+00 : f32
    %581 = vector.broadcast %cst_177 : f32 to vector<8x128xf32>
    %582 = arith.addf %581, %580 : vector<8x128xf32>
    %583 = arith.divf %581, %582 : vector<8x128xf32>
    %584 = arith.mulf %575, %512 : vector<8x128xf32>
    %585 = arith.mulf %569, %577 : vector<8x128xf32>
    %586 = arith.addf %584, %585 : vector<8x128xf32>
    %587 = math.tanh %586 : vector<8x128xf32>
    %588 = arith.mulf %583, %587 : vector<8x128xf32>
    %589 = arith.index_cast %c7_i32 : i32 to index
    %c0_178 = arith.constant 0 : index
    %c0_179 = arith.constant 0 : index
    %590 = vector.load %arg2[%589, %c0_178, %c0_179] : memref<8x8x128xf32, #tpu.memory_space<vmem>>, vector<1x8x128xf32>
    %591 = vector.shape_cast %590 : vector<1x8x128xf32> to vector<8x128xf32>
    %592 = arith.addf %588, %591 : vector<8x128xf32>
    %593 = arith.truncf %592 : vector<8x128xf32> to vector<8x128xbf16>
    %c0_180 = arith.constant 0 : index
    %c0_181 = arith.constant 0 : index
    %594 = vector.load %arg17[%c0_180, %c0_181] : memref<8x256xbf16, #tpu.memory_space<vmem>>, vector<8x128xbf16>
    tpu.vector_store %arg17[%c0_180, %c0_181], %593 {strides = array<i32>} : memref<8x256xbf16, #tpu.memory_space<vmem>>, vector<8x128xbf16>,
    %595 = arith.index_cast %558 : i32 to index
    %c0_182 = arith.constant 0 : index
    %596 = vector.load %arg16[%595, %c0_182] : memref<64x512xf32, #tpu.memory_space<vmem>>, vector<8x512xf32>
    %c0_183 = arith.constant 0 : index
    %c0_184 = arith.constant 0 : index
    %597 = vector.load %arg17[%c0_183, %c0_184] : memref<8x256xbf16, #tpu.memory_space<vmem>>, vector<8x256xbf16>
    %cst_185 = arith.constant dense<0.000000e+00> : vector<8x512xf32>
    %598 = tpu.matmul %597, %35, %cst_185 {dimension_numbers = #tpu.dot_dimension_numbers<[1], [0], [0], [1], [0, 0, 1, 1], [], []>} : vector<8x256xbf16>, vector<256x512xbf16>, vector<8x512xf32> -> vector<8x512xf32>
    %599 = arith.addf %596, %598 : vector<8x512xf32>
    %600 = vector.extract_strided_slice %599 {offsets = [0, 0], sizes = [8, 128], strides = [1, 1]} : vector<8x512xf32> to vector<8x128xf32>
    %601 = arith.negf %600 : vector<8x128xf32>
    %602 = math.exp %601 : vector<8x128xf32>
    %cst_186 = arith.constant 1.000000e+00 : f32
    %603 = vector.broadcast %cst_186 : f32 to vector<8x128xf32>
    %604 = arith.addf %603, %602 : vector<8x128xf32>
    %605 = arith.divf %603, %604 : vector<8x128xf32>
    %606 = vector.extract_strided_slice %599 {offsets = [0, 128], sizes = [8, 128], strides = [1, 1]} : vector<8x512xf32> to vector<8x128xf32>
    %607 = arith.negf %606 : vector<8x128xf32>
    %608 = math.exp %607 : vector<8x128xf32>
    %cst_187 = arith.constant 1.000000e+00 : f32
    %609 = vector.broadcast %cst_187 : f32 to vector<8x128xf32>
    %610 = arith.addf %609, %608 : vector<8x128xf32>
    %611 = arith.divf %609, %610 : vector<8x128xf32>
    %612 = vector.extract_strided_slice %599 {offsets = [0, 256], sizes = [8, 128], strides = [1, 1]} : vector<8x512xf32> to vector<8x128xf32>
    %613 = math.tanh %612 : vector<8x128xf32>
    %614 = vector.extract_strided_slice %599 {offsets = [0, 384], sizes = [8, 128], strides = [1, 1]} : vector<8x512xf32> to vector<8x128xf32>
    %615 = arith.negf %614 : vector<8x128xf32>
    %616 = math.exp %615 : vector<8x128xf32>
    %cst_188 = arith.constant 1.000000e+00 : f32
    %617 = vector.broadcast %cst_188 : f32 to vector<8x128xf32>
    %618 = arith.addf %617, %616 : vector<8x128xf32>
    %619 = arith.divf %617, %618 : vector<8x128xf32>
    %620 = arith.mulf %611, %548 : vector<8x128xf32>
    %621 = arith.mulf %605, %613 : vector<8x128xf32>
    %622 = arith.addf %620, %621 : vector<8x128xf32>
    %623 = math.tanh %622 : vector<8x128xf32>
    %624 = arith.mulf %619, %623 : vector<8x128xf32>
    %625 = arith.truncf %624 : vector<8x128xf32> to vector<8x128xbf16>
    %c0_189 = arith.constant 0 : index
    %c128_190 = arith.constant 128 : index
    %626 = vector.load %arg17[%c0_189, %c128_190] : memref<8x256xbf16, #tpu.memory_space<vmem>>, vector<8x128xbf16>
    tpu.vector_store %arg17[%c0_189, %c128_190], %625 {strides = array<i32>} : memref<8x256xbf16, #tpu.memory_space<vmem>>, vector<8x128xbf16>,
    %627 = arith.addf %624, %592 : vector<8x128xf32>
    %628 = arith.truncf %627 : vector<8x128xf32> to vector<8x128xbf16>
    %629 = arith.index_cast %558 : i32 to index
    %c0_191 = arith.constant 0 : index
    %630 = vector.load %arg10[%629, %c0_191] : memref<64x128xbf16, #tpu.memory_space<vmem>>, vector<8x128xbf16>
    tpu.vector_store %arg10[%629, %c0_191], %628 {strides = array<i32>} : memref<64x128xbf16, #tpu.memory_space<vmem>>, vector<8x128xbf16>,
    %c8_i32_192 = arith.constant 8 : i32
    return
  }
  func.func @transform_0(%arg0: i32) -> (i32, i32, i32) {
    %c0_i32 = arith.constant 0 : i32
    %c0_i32_0 = arith.constant 0 : i32
    %c0_i32_1 = arith.constant 0 : i32
    %c0_i32_2 = arith.constant 0 : i32
    return %c0_i32, %c0_i32_0, %c0_i32_1 : i32, i32, i32
  }
  func.func @transform_1(%arg0: i32) -> (i32, i32, i32) {
    %c0_i32 = arith.constant 0 : i32
    %c0_i32_0 = arith.constant 0 : i32
    %c0_i32_1 = arith.constant 0 : i32
    %c0_i32_2 = arith.constant 0 : i32
    return %c0_i32, %c0_i32_0, %c0_i32_1 : i32, i32, i32
  }
  func.func @transform_2(%arg0: i32) -> (i32, i32, i32) {
    %c0_i32 = arith.constant 0 : i32
    %c0_i32_0 = arith.constant 0 : i32
    %c0_i32_1 = arith.constant 0 : i32
    %c0_i32_2 = arith.constant 0 : i32
    return %c0_i32, %c0_i32_0, %c0_i32_1 : i32, i32, i32
  }
  func.func @transform_5(%arg0: i32) -> (i32, i32) {
    %c0_i32 = arith.constant 0 : i32
    %c0_i32_0 = arith.constant 0 : i32
    %c0_i32_1 = arith.constant 0 : i32
    return %c0_i32, %c0_i32_0 : i32, i32
  }
  func.func @transform_8(%arg0: i32) -> (i32, i32) {
    %c0_i32 = arith.constant 0 : i32
    %c0_i32_0 = arith.constant 0 : i32
    %c0_i32_1 = arith.constant 0 : i32
    return %c0_i32, %c0_i32_0 : i32, i32
  }
  func.func @transform_9(%arg0: i32) -> (i32, i32) {
    %c0_i32 = arith.constant 0 : i32
    %c0_i32_0 = arith.constant 0 : i32
    %c0_i32_1 = arith.constant 0 : i32
    return %c0_i32, %c0_i32_0 : i32, i32
  }
}

</mosaic_0001>

<bundles_post_ra>
// kernel: stage3_forward.3
= control target key start
LH: loop header
LB: loop body
LE: loop exit
PB: predicated region body
PF: predicated region fallthrough
CT: control target
= control target key end

     0   :  { %8 = vsyncpa [#allocation3], 0  ;;  %s1226_s0 = inlined_call_operand.hbm [shape: bf16[64,128], index: 0, kind: input, shape index: {}]   ;;  %s1227_s1 = inlined_call_operand.hbm [shape: bf16[128,512], index: 1, kind: input, shape index: {}]   ;;  %s1228_s2 = inlined_call_operand.hbm [shape: f32[1,512], index: 2, kind: input, shape index: {}]   ;;  %s1229_s3 = inlined_call_operand.hbm [shape: f32[64,512], index: 3, kind: output, shape index: {}]  }
   0x1   :  { %9 = vsyncpa [#allocation6], 0 }
   0x2   :  { %11 = vsyncpa [#allocation6 + $0x1], 0 }
   0x3   :  { %12 = vsyncpa [#allocation4], 0 }
   0x4   :  { %14 = vsyncpa [#allocation4 + $0x1], 0  ;;  %s942_s12 = smov 0   ;;  %s944_s13 = smov 0  }
   0x5   :  { %s946_s14 = smov 0   ;;  %s948_s15 = smov 0  }
   0x6 LB: > { %s963_s16 = sadd.s32 1, %s907_s15   ;;  %s48_s17 = sadd.s32 1, %s903_s14  ;;  %s907_s15 = sphi %s948_s15, %s1256_s15   ;;  %s903_s14 = sphi %s946_s14, %s1255_s14   ;;  %s899_s13 = sphi %s944_s13, %s1254_s13   ;;  %s895_s12 = sphi %s942_s12, %s1253_s12  }
   0x7   : > { %s45_s18 = ssub.s32 %s907_s15, %s963_s16  ;;  %p55_p0 = scmp.ne.s32.totalorder %s903_s14, %s899_s13 }
   0x8   : > { %p46_p1 = scmp.eq.s32.totalorder %s45_s18, 0  ;;  %p56_p2 = scmp.eq.s32.totalorder %s907_s15, 0 }
   0x9   : > { %p676_p4 = scmp.lt.s32.totalorder %s907_s15, 2  ;;  %s150_s20 = sand.u32 1, %s907_s15  }
   0xa   : > { %s974_s19 = scalar_select %p46_p1, %s903_s14, %s48_s17  }
   0xb   : > { %p57_p5 = por %p56_p2, %p55_p0  ;;  %s152_s21 = sand.u32 1, %s903_s14  }
   0xc   : > { %s595_s22 = sshll.u32 %s152_s21, 7  ;;  %s631_s23 = sshll.u32 %s907_s15, 7 }
   0xd   : > { %s987_s26 = scalar_lea.hbm %s1227_s1, %s631_s23  ;;  %s154_s27 = scalar_lea.vmem [#allocation5], %s595_s22 }
   0xe   : > { %s161_s28 = sshll.u32 %s154_s27, 4  ;;  %p989_p6 = pnand %p676_p4, %p57_p5  ;;  %s993_s28 = int_to_ptr.vmem [resolvable:$true] %s161_s28 }
   0xf   : > { %s995_s30 = scalar_lea.sflag [#allocation6], %s150_s20  ;;  %s749_s4 = scalar_lea.hbm %s987_s26, 2048 }
  0x10   : > { %s1237_s29 = scalar_select %p989_p6, 1, 0 }
  0x11   : > { %p750_p7 = scmp.ne.s32.totalorder %s987_s26, %s749_s4  ;;  %p1231_p8 = pneg %p989_p6 }
  0x12   : > { %s754_s7 = scalar_lea.hbm %s1227_s1, 4096  ;;  %p755_p11 = scmp.lt.u32.totalorder %s987_s26, %s1227_s1 }
  0x13   : > { %p752_p9 = pnand %p1231_p8, %p750_p7  ;;  %p756_p12 = scmp.lt.u32.totalorder %s754_s7, %s749_s4 }
  0x14   : > { %p758_p1 = scmp.lt.u32.totalorder %s749_s4, %s987_s26 }
  0x15   : > { %p753_p10 = pneg %p752_p9  ;;  %p757_p13 = por %p756_p12, %p755_p11 }
  0x17   : > { %p759_p2 = por %p758_p1, %p757_p13 }
  0x19   : > { %p760_p4 = pnand %p759_p2, %p753_p10 }
  0x1b   : > { %763 = shalt.err (!%p760_p4)
}
  0x1c   : > { %s764_s10 = scalar_lea.vmem %s993_s28, 2048  ;;  %s909_s11 = smov [#allocation5]  }
  0x1d   : > { %p765_p5 = scmp.ne.s32.totalorder %s993_s28, %s764_s10  ;;  %s769_s17 = sshll.u32 %s909_s11, 4  ;;  %s770_s17 = int_to_ptr.vmem [resolvable:$false] %s769_s17 }
  0x1e   : > { %s771_s18 = scalar_lea.vmem %s770_s17, 4096  ;;  %p772_p3 = scmp.lt.s32.totalorder %s993_s28, %s770_s17 }
  0x1f   : > { %p767_p7 = pnand %p765_p5, %p1231_p8  ;;  %p773_p11 = scmp.lt.s32.totalorder %s771_s18, %s764_s10 }
  0x21   : > { %p768_p9 = pneg %p767_p7  ;;  %p774_p12 = por %p773_p11, %p772_p3 }
  0x23   : > { %p775_p13 = pnand %p774_p12, %p768_p9 }
  0x25   : > { %778 = shalt.err (!%p775_p13)
}
  0x26   : > { %s910_s20 = smov 256   ;;  %s911_s22 = smov 128  }
  0x27   : > { %s912_s23 = smov 8   ;;  %s1024_s24 = sadd.s32 4294967295, %s907_s15  }
  0x28   : > { %667 = dma.hbm_to_vmem [thread:$0]  (!%p989_p6), %s987_s26, 2048, %s993_s28, %s995_s30, %s910_s20, %s911_s22, %s912_s23  }
  0x29   : > { %s591_s25 = sadd.s32 4294967294, %s907_s15   ;;  %p61_p3 = scmp.ne.s32.totalorder %s899_s13, %s895_s12 }
  0x2a   : > { %p1230_p10 = scmp.eq.s32.totalorder %s1024_s24, 0  ;;  %p111_p1 = scmp.eq.s32.totalorder %s1024_s24, 1 }
  0x2b   : > { %p117_p2 = scmp.eq.s32.totalorder %s591_s25, 1  ;;  %p592_p4 = scmp.ge.s32.totalorder %s907_s15, 1 }
  0x2c   : > { %p1034_p5 = por %p1230_p10, %p61_p3  ;;  %p1041_p7 = por %p111_p1, %p55_p0 }
  0x2d   : > { %p1045_p9 = por %p117_p2, %p61_p3  ;;  %p124_p11 = scmp.lt.s32.totalorder %s907_s15, 3 }
  0x2e   : > { %s1238_s27 = scalar_select %p1034_p5, 1, 0 }
  0x2f   : > { %s1239_s26 = scalar_select %p1041_p7, 1, 0 }
  0x30   : > { %s1240_s28 = scalar_select %p1045_p9, 1, 0 }
  0x31   : > { %p1050_p12 = pnand %p592_p4, %p124_p11  ;;  %s913_s5 = smov [#allocation2]  }
  0x32   : > { %s136_s6 = sshll.u32 %s913_s5, 4  ;;  %s598_s7 = sshll.u32 %s152_s21, 1  ;;  %s1054_s6 = int_to_ptr.vmem [resolvable:$true] %s136_s6 }
  0x33   : > { %s1241_s4 = scalar_select %p1050_p12, 1, 0 }
  0x34   : > { %p660_p13 = pneg %p1050_p12  ;;  %s632_s8 = sshll.u32 %s907_s15, 5 }
  0x35   : > { %s1070_s17 = scalar_lea.hbm %s1228_s2, %s632_s8  ;;  %s175_s18 = scalar_lea.vmem [#allocation7], %s598_s7 }
  0x36   : > { %p1063_p0 = pnand %p660_p13, %p1230_p10  ;;  %s183_s20 = sshll.u32 %s175_s18, 4  ;;  %s1072_s20 = int_to_ptr.vmem [resolvable:$true] %s183_s20 }
  0x37   : > { %s779_s21 = scalar_lea.hbm %s1226_s0, 512 }
  0x38   : > { %p780_p3 = scmp.ne.s32.totalorder %s1226_s0, %s779_s21  ;;  %p781_p1 = pneg %p1063_p0 }
  0x39   : > { %p786_p11 = scmp.lt.u32.totalorder %s779_s21, %s1226_s0 }
  0x3a   : > { %p782_p2 = pnand %p781_p1, %p780_p3 }
  0x3c   : > { %p783_p4 = pneg %p782_p2 }
  0x3e   : > { %p788_p13 = pnand %p786_p11, %p783_p4 }
  0x40   : > { %791 = shalt.err (!%p788_p13)
}
  0x41   : > { %s792_s7 = scalar_lea.vmem %s1054_s6, 512  ;;  %p800_p7 = scmp.lt.s32.totalorder %s1054_s6, %s1054_s6 }
  0x42   : > { %p793_p10 = scmp.ne.s32.totalorder %s1054_s6, %s792_s7  ;;  %p801_p5 = scmp.lt.s32.totalorder %s792_s7, %s792_s7 }
  0x44   : > { %p795_p8 = pnand %p793_p10, %p781_p1  ;;  %p802_p12 = por %p801_p5, %p800_p7 }
  0x46   : > { %p796_p9 = pneg %p795_p8 }
  0x48   : > { %p803_p6 = pnand %p802_p12, %p796_p9 }
  0x4a   : > { %806 = shalt.err (!%p803_p6)
}
  0x4b   : > { %s914_s8 = smov 64   ;;  %s915_s18 = smov 4  }
  0x4c   : > { %663 = dma.hbm_to_vmem [thread:$0]  (!%p1063_p0), %s1226_s0, 512, %s1054_s6, [#allocation3], %s914_s8, %s914_s8, %s915_s18  }
  0x4d   : > { %s807_s21 = scalar_lea.hbm %s1070_s17, 32  ;;  %p1243_p10 = scmp.ne.s32.totalorder %s1237_s29, 0 }
  0x4e   : > { %p808_p8 = scmp.ne.s32.totalorder %s1070_s17, %s807_s21  ;;  %s812_s10 = scalar_lea.hbm %s1228_s2, 64 }
  0x4f   : > { %p1244_p5 = pneg %p1243_p10  ;;  %p813_p9 = scmp.lt.u32.totalorder %s1070_s17, %s1228_s2 }
  0x50   : > { %p814_p12 = scmp.lt.u32.totalorder %s812_s10, %s807_s21  ;;  %p816_p1 = scmp.lt.u32.totalorder %s807_s21, %s1070_s17 }
  0x51   : > { %p810_p7 = pnand %p808_p8, %p1244_p5 }
  0x52   : > { %p815_p3 = por %p814_p12, %p813_p9 }
  0x53   : > { %p811_p6 = pneg %p810_p7 }
  0x54   : > { %p817_p2 = por %p816_p1, %p815_p3 }
  0x56   : > { %p818_p4 = pnand %p817_p2, %p811_p6 }
  0x58   : > { %821 = shalt.err (!%p818_p4)
}
  0x59   : > { %s822_s6 = scalar_lea.vmem %s1072_s20, 32  ;;  %p1245_p11 = pmov %p1244_p5 }
  0x5a   : > { %p823_p0 = scmp.ne.s32.totalorder %s1072_s20, %s822_s6  ;;  %s916_s9 = smov [#allocation7]  }
  0x5b   : > { %s827_s8 = sshll.u32 %s916_s9, 4  ;;  %s828_s8 = int_to_ptr.vmem [resolvable:$false] %s827_s8 }
  0x5c   : > { %p825_p13 = pnand %p823_p0, %p1245_p11  ;;  %s829_s18 = scalar_lea.vmem %s828_s8, 64 }
  0x5d   : > { %p830_p5 = scmp.lt.s32.totalorder %s1072_s20, %s828_s8  ;;  %p831_p7 = scmp.lt.s32.totalorder %s829_s18, %s822_s6 }
  0x5e   : > { %p826_p8 = pneg %p825_p13 }
  0x5f   : > { %p832_p9 = por %p831_p7, %p830_p5 }
  0x61   : > { %p833_p12 = pnand %p832_p9, %p826_p8 }
  0x63   : > { %836 = shalt.err (!%p833_p12)
}
  0x64   : > { %670 = dma.hbm_to_vmem [thread:$0]  (!%p1243_p10), %s1070_s17, 32, %s1072_s20, %s995_s30  }
  0x65   : > { %p1246_p6 = scmp.ne.s32.totalorder %s1241_s4, 0 }
  0x66   : > { %p1247_p3 = scmp.eq.s32.totalorder (!%p1246_p6), %s1024_s24, 0 }
  0x67   : > { %192 = sbr.rel (%p1246_p6) target bundleno = 391 (0x187), region = 32 }
  0x6e   : > { %882 = dma.done.wait (%p1247_p3), [#allocation3], 512   ;;  %p1248_p1 = pmov %p1247_p3 }
  0x6f   : > { %s198_s22 = sand.u32 1, %s1024_s24   ;;  %s1127_s23 = sand.u32 1, %s899_s13  }
  0x70   : > { %884 = vsyncadd (%p1248_p1), [#allocation3], 4294966784  ;;  %s603_s29 = sshll.u32 %s1127_s23, 7  ;;  %s199_s21 = scalar_lea.sflag [#allocation6], %s198_s22 }
  0x71   : > { %s1132_s30 = scalar_lea.vmem [#allocation5], %s603_s29  ;;  %p1249_p10 = scmp.ne.s32.totalorder %s1238_s27, 0 }
  0x73   : > { %886 = dma.done.wait (%p1249_p10), %s199_s21, 2080  }
  0x74   : > { %888 = vsyncadd (%p1249_p10), %s199_s21, 4294965216  ;;  %v917_v0 = vmov 0   ;;  %v721_v1 = vld [vmem:[%s1132_s30 + $0x4] ss:$8 sps:$4 sm:$0xff]   ;;  %v723_v2 = vld [vmem:[%s1132_s30] ss:$8 sps:$4 sm:$0xff]   ;;  %v269_v21 = vlaneseq }
  0x75   : > { %415 = vmatprep.mubr.bf16.mxu0 %v917_v0  ;;  %435 = vmatprep.mubr.bf16.mxu1 %v917_v0  ;;  %v724_v3 = vld [vmem:[%s1132_s30 + $0x14] ss:$8 sps:$4 sm:$0xff]   ;;  %v726_v4 = vld [vmem:[%s1132_s30 + $0x10] ss:$8 sps:$4 sm:$0xff]   ;;  %v727_v5 = vld [vmem:[%s1132_s30 + $0x24] ss:$8 sps:$4 sm:$0xff]  }
  0x76   : > { %383 = vmatprep.subr.bf16.mxu0 %v721_v1  ;;  %634 = vmatprep.subr.bf16.mxu1 %v721_v1  ;;  %v729_v6 = vld [vmem:[%s1132_s30 + $0x20] ss:$8 sps:$4 sm:$0xff]   ;;  %v730_v7 = vld [vmem:[%s1132_s30 + $0x34] ss:$8 sps:$4 sm:$0xff]   ;;  %v732_v8 = vld [vmem:[%s1132_s30 + $0x30] ss:$8 sps:$4 sm:$0xff]  }
  0x77   : > { %384 = vmatpush1.bf16.msra.mxu0 %v723_v2  ;;  %642 = vmatpush1.bf16.msra.mxu1 %v723_v2  ;;  %v733_v9 = vld [vmem:[%s1132_s30 + $0x44] ss:$8 sps:$4 sm:$0xff]   ;;  %v735_v10 = vld [vmem:[%s1132_s30 + $0x40] ss:$8 sps:$4 sm:$0xff]   ;;  %v736_v11 = vld [vmem:[%s1132_s30 + $0x54] ss:$8 sps:$4 sm:$0xff]  }
  0x78   : > { %385 = vmatprep.subr.bf16.mxu0 %v724_v3  ;;  %635 = vmatprep.subr.bf16.mxu1 %v724_v3  ;;  %v738_v12 = vld [vmem:[%s1132_s30 + $0x50] ss:$8 sps:$4 sm:$0xff]   ;;  %v739_v13 = vld [vmem:[%s1132_s30 + $0x64] ss:$8 sps:$4 sm:$0xff]   ;;  %v741_v14 = vld [vmem:[%s1132_s30 + $0x60] ss:$8 sps:$4 sm:$0xff]  }
  0x79   : > { %v742_v15 = vld [vmem:[%s1132_s30 + $0x74] ss:$8 sps:$4 sm:$0xff]   ;;  %v744_v16 = vld [vmem:[%s1132_s30 + $0x70] ss:$8 sps:$4 sm:$0xff]   ;;  %v745_v17 = vld [vmem:[#allocation2] sm:$0xff]   ;;  %s604_s27 = sshll.u32 %s1127_s23, 1 }
  0x7a   : > { %v746_v18 = vld [vmem:[#allocation2 + $0x10] sm:$0xff]   ;;  %v747_v19 = vld [vmem:[#allocation2 + $0x8] sm:$0xff]   ;;  %v748_v20 = vld [vmem:[#allocation2 + $0x18] sm:$0xff]   ;;  %v270_v22 = vshrl.u32 %v269_v21, 7  ;;  %s211_s4 = scalar_lea.vmem [#allocation7], %s604_s27  ;;  %s1157_s17 = scalar_lea.vmem [#allocation8], %s603_s29 }
  0x7b   : > { %386 = vmatpush1.bf16.msra.mxu0 %v726_v4  ;;  %643 = vmatpush1.bf16.msra.mxu1 %v726_v4  ;;  %v267_v24 = vld [vmem:[%s211_s4] sm:$0x3]  ;;  %s633_s20 = sshll.u32 %s1024_s24, 8  ;;  %s486_s25 = sshll.u32 %s1157_s17, 4  ;;  %s1176_s25 = int_to_ptr.vmem [resolvable:$true] %s486_s25 }
  0x7c   : > { %387 = vmatprep.subr.bf16.mxu0 %v727_v5  ;;  %636 = vmatprep.subr.bf16.mxu1 %v727_v5  ;;  %v271_v23 = vsub.s32 0, %v270_v22  ;;  %v275_v25 = vsub.s32 1, %v270_v22  ;;  %s1172_s24 = scalar_lea.hbm %s1229_s3, %s633_s20  ;;  %s473_s11 = scalar_lea.sflag [#allocation4], %s1127_s23 }
  0x7d   : > { %s837_s7 = scalar_lea.vmem %s1176_s25, 2048  ;;  %p1250_p4 = scmp.ne.s32.totalorder %s1239_s26, 0 }
  0x7e   : > { %v272_v26 = vrot.slane %v267_v24, %v271_v23  ;;  %v276_v27 = vrot.slane %v267_v24, %v275_v25  ;;  %p838_p2 = scmp.ne.s32.totalorder %s1176_s25, %s837_s7  ;;  %s918_s6 = smov [#allocation8]  }
  0x7f   : > { %388 = vmatpush1.bf16.msra.mxu0 %v729_v6  ;;  %644 = vmatpush1.bf16.msra.mxu1 %v729_v6  ;;  %s841_s9 = sshll.u32 %s918_s6, 4  ;;  %s842_s9 = int_to_ptr.vmem [resolvable:$false] %s841_s9 }
  0x80   : > { %389 = vmatprep.subr.bf16.mxu0 %v730_v7  ;;  %637 = vmatprep.subr.bf16.mxu1 %v730_v7  ;;  %p839_p0 = pnand %p838_p2, %p1250_p4  ;;  %s843_s8 = scalar_lea.vmem %s842_s9, 4096 }
  0x81   : > { %p844_p13 = scmp.lt.s32.totalorder %s1176_s25, %s842_s9  ;;  %p845_p8 = scmp.lt.s32.totalorder %s843_s8, %s837_s7 }
  0x82   : > { %p840_p11 = pneg %p839_p0 }
  0x83   : > { %390 = vmatpush1.bf16.msra.mxu0 %v732_v8  ;;  %645 = vmatpush1.bf16.msra.mxu1 %v732_v8  ;;  %p846_p5 = por %p845_p8, %p844_p13 }
  0x84   : > { %391 = vmatprep.subr.bf16.mxu0 %v733_v9  ;;  %638 = vmatprep.subr.bf16.mxu1 %v733_v9 }
  0x85   : > { %p847_p7 = pnand %p846_p5, %p840_p11 }
  0x87   : > { %392 = vmatpush1.bf16.msra.mxu0 %v735_v10  ;;  %646 = vmatpush1.bf16.msra.mxu1 %v735_v10 }
  0x88   : > { %393 = vmatprep.subr.bf16.mxu0 %v736_v11  ;;  %639 = vmatprep.subr.bf16.mxu1 %v736_v11 }
  0x8b   : > { %394 = vmatpush1.bf16.msra.mxu0 %v738_v12  ;;  %647 = vmatpush1.bf16.msra.mxu1 %v738_v12 }
  0x8c   : > { %395 = vmatprep.subr.bf16.mxu0 %v739_v13  ;;  %640 = vmatprep.subr.bf16.mxu1 %v739_v13 }
  0x8f   : > { %396 = vmatpush1.bf16.msra.mxu0 %v741_v14  ;;  %648 = vmatpush1.bf16.msra.mxu1 %v741_v14 }
  0x90   : > { %397 = vmatprep.subr.bf16.mxu0 %v742_v15  ;;  %641 = vmatprep.subr.bf16.mxu1 %v742_v15 }
  0x93   : > { %398 = vmatpush1.bf16.msra.mxu0 %v744_v16  ;;  %649 = vmatpush1.bf16.msra.mxu1 %v744_v16 }
  0x96   : > { %416 = vmatmul.mubr.bf16.vlgmr.msra.gmra.mrb[0].mxu0 %v745_v17  ;;  %436 = vmatmul.mubr.bf16.vlgmr.msra.gmra.mrb[0].mxu1 %v746_v18 }
  0x97   : > { %425 = vmatprep.mubr.bf16.mxu0 %v917_v0  ;;  %445 = vmatprep.mubr.bf16.mxu1 %v917_v0 }
  0x9e   : > { %426 = vmatmul.mubr.bf16.gmra.mrb[4].mxu0 %v747_v19  ;;  %446 = vmatmul.mubr.bf16.gmra.mrb[4].mxu1 %v748_v20 }
 0x169   : > { %v417_v28 = vpop.f32.mrb[0].mxu0  ;;  %v437_v29 = vpop.f32.mrb[0].mxu1 }
 0x16a   : > { %v418_v30 = vadd.f32 %v417_v28, %v272_v26  ;;  %v438_v31 = vadd.f32 %v437_v29, %v272_v26  ;;  %v419_v32 = vpop.f32.mrb[1].mxu0  ;;  %v439_v33 = vpop.f32.mrb[1].mxu1 }
 0x16b   : > { %v420_v34 = vadd.f32 %v419_v32, %v276_v27  ;;  %v440_v35 = vadd.f32 %v439_v33, %v276_v27  ;;  %v421_v36 = vpop.f32.mrb[2].mxu0  ;;  %v441_v37 = vpop.f32.mrb[2].mxu1 }
 0x16c   : > { %456 = vst [vmem:[%s1157_s17] sm:$0xff] %v418_v30  ;;  %464 = vst [vmem:[%s1157_s17 + $0x40] sm:$0xff] %v438_v31  ;;  %v422_v38 = vadd.f32 %v421_v36, %v272_v26  ;;  %v442_v39 = vadd.f32 %v441_v37, %v272_v26  ;;  %v423_v40 = vpop.f32.mrb[3].mxu0  ;;  %v443_v41 = vpop.f32.mrb[3].mxu1 }
 0x16d   : > { %457 = vst [vmem:[%s1157_s17 + $0x8] sm:$0xff] %v420_v34  ;;  %465 = vst [vmem:[%s1157_s17 + $0x48] sm:$0xff] %v440_v35  ;;  %v424_v42 = vadd.f32 %v423_v40, %v276_v27  ;;  %v444_v43 = vadd.f32 %v443_v41, %v276_v27 }
 0x16e   : > { %458 = vst [vmem:[%s1157_s17 + $0x10] sm:$0xff] %v422_v38  ;;  %466 = vst [vmem:[%s1157_s17 + $0x50] sm:$0xff] %v442_v39 }
 0x16f   : > { %459 = vst [vmem:[%s1157_s17 + $0x18] sm:$0xff] %v424_v42  ;;  %467 = vst [vmem:[%s1157_s17 + $0x58] sm:$0xff] %v444_v43 }
 0x171   : > { %v427_v44 = vpop.f32.mrb[4].mxu0  ;;  %v447_v45 = vpop.f32.mrb[4].mxu1 }
 0x172   : > { %v428_v46 = vadd.f32 %v427_v44, %v272_v26  ;;  %v448_v47 = vadd.f32 %v447_v45, %v272_v26  ;;  %v429_v48 = vpop.f32.mrb[5].mxu0  ;;  %v449_v49 = vpop.f32.mrb[5].mxu1 }
 0x173   : > { %v430_v50 = vadd.f32 %v429_v48, %v276_v27  ;;  %v450_v51 = vadd.f32 %v449_v49, %v276_v27  ;;  %v431_v52 = vpop.f32.mrb[6].mxu0  ;;  %v451_v53 = vpop.f32.mrb[6].mxu1 }
 0x174   : > { %460 = vst [vmem:[%s1157_s17 + $0x20] sm:$0xff] %v428_v46  ;;  %468 = vst [vmem:[%s1157_s17 + $0x60] sm:$0xff] %v448_v47  ;;  %v432_v54 = vadd.f32 %v431_v52, %v272_v26  ;;  %v452_v55 = vadd.f32 %v451_v53, %v272_v26  ;;  %v433_v56 = vpop.f32.mrb[7].mxu0  ;;  %v453_v57 = vpop.f32.mrb[7].mxu1 }
 0x175   : > { %461 = vst [vmem:[%s1157_s17 + $0x28] sm:$0xff] %v430_v50  ;;  %469 = vst [vmem:[%s1157_s17 + $0x68] sm:$0xff] %v450_v51  ;;  %v434_v58 = vadd.f32 %v433_v56, %v276_v27  ;;  %v454_v59 = vadd.f32 %v453_v57, %v276_v27 }
 0x176   : > { %462 = vst [vmem:[%s1157_s17 + $0x30] sm:$0xff] %v432_v54  ;;  %470 = vst [vmem:[%s1157_s17 + $0x70] sm:$0xff] %v452_v55 }
 0x177   : > { %463 = vst [vmem:[%s1157_s17 + $0x38] sm:$0xff] %v434_v58  ;;  %471 = vst [vmem:[%s1157_s17 + $0x78] sm:$0xff] %v454_v59 }
 0x178   : > { %850 = shalt.err (!%p847_p7)
}
 0x179   : > { %s851_s18 = scalar_lea.hbm %s1172_s24, 2048  ;;  %s855_s21 = scalar_lea.hbm %s1229_s3, 4096 }
 0x17a   : > { %p852_p9 = scmp.ne.s32.totalorder %s1172_s24, %s851_s18  ;;  %p856_p3 = scmp.lt.u32.totalorder %s1172_s24, %s1229_s3 }
 0x17b   : > { %p857_p1 = scmp.lt.u32.totalorder %s855_s21, %s851_s18  ;;  %p859_p2 = scmp.lt.u32.totalorder %s851_s18, %s1172_s24 }
 0x17c   : > { %p853_p12 = pnand %p852_p9, %p1250_p4 }
 0x17d   : > { %p858_p10 = por %p857_p1, %p856_p3 }
 0x17e   : > { %p854_p6 = pneg %p853_p12 }
 0x17f   : > { %p860_p0 = por %p859_p2, %p858_p10 }
 0x181   : > { %p861_p11 = pnand %p860_p0, %p854_p6 }
 0x183   : > { %864 = shalt.err (!%p861_p11)
}
 0x184   : > { %s919_s4 = smov 256   ;;  %s920_s17 = smov 512  }
 0x185   : > { %s921_s20 = smov 16  }
 0x186   : > { %658 = dma.vmem_to_hbm [thread:$0]  (%p1250_p4), %s1176_s25, 2048, %s1172_s24, %s473_s11, %s919_s4, %s920_s17, %s921_s20  }
 0x187 PF: > { %s501_s5 = sand.u32 1, %s895_s12   ;;  %p1251_p13 = scmp.ne.s32.totalorder %s1240_s28, 0 }
 0x188   : > { %p1252_p8 = scmp.ge.s32.totalorder %s907_s15, 2  ;;  %s502_s10 = scalar_lea.sflag [#allocation4], %s501_s5 }
 0x18a   : > { %p672_p5 = pnand %p1252_p8, %p1251_p13 }
 0x18c   : > { %890 = dma.done.wait (!%p672_p5), %s502_s10, 2048  }
 0x18d   : > { %892 = vsyncadd (!%p672_p5), %s502_s10, 4294965248  ;;  %p17_p7 = scmp.ge.s32.totalorder %s963_s16, 4   ;;  %s1253_s12 = smov %s899_s13 }
 0x18e   : > { %s1254_s13 = smov %s903_s14  ;;  %s1255_s14 = smov %s974_s19 }
 0x18f   : > { %s1256_s15 = smov %s963_s16  ;;  %19 = sbr.rel (!%p17_p7) target bundleno = 6 (0x6), region = 93 }
 0x196   :  { %507 = vsyncpa [#allocation3], 1 }
 0x197   :  { %509 = vsyncpa [#allocation3 + $0x1], 1 }
 0x198   :  { %510 = vsyncpa [#allocation6], 1 }
 0x199   :  { %512 = vsyncpa [#allocation6 + $0x1], 1 }
 0x19a   :  { %513 = vsyncpa [#allocation4], 1 }
 0x19b   :  { %515 = vsyncpa [#allocation4 + $0x1], 1 }

// kernel: stage3_forward.2
= control target key start
LH: loop header
LB: loop body
LE: loop exit
PB: predicated region body
PF: predicated region fallthrough
CT: control target
= control target key end

     0   :  { %14 = vsyncpa [#allocation11], 0  ;;  %s5661_s0 = inlined_call_operand.hbm [shape: f32[8,8,256], index: 0, kind: input, shape index: {}]   ;;  %s5662_s1 = inlined_call_operand.hbm [shape: f32[8,8,128], index: 1, kind: input, shape index: {}]   ;;  %s5663_s2 = inlined_call_operand.hbm [shape: f32[8,8,128], index: 2, kind: input, shape index: {}]   ;;  %s5664_s3 = inlined_call_operand.hbm [shape: bf16[256,512], index: 3, kind: input, shape index: {}]   ;;  %s5665_s4 = inlined_call_operand.hbm [shape: bf16[128,512], index: 4, kind: input, shape index: {}]   ;;  %s5666_s5 = inlined_call_operand.hbm [shape: f32[1,512], index: 5, kind: input, shape index: {}]   ;;  %s5667_s6 = inlined_call_operand.hbm [shape: bf16[128,512], index: 6, kind: input, shape index: {}]   ;;  %s5668_s7 = inlined_call_operand.hbm [shape: bf16[256,512], index: 7, kind: input, shape index: {}]   ;;  %s5669_s8 = inlined_call_operand.hbm [shape: f32[1,512], index: 8, kind: input, shape index: {}]   ;;  %s5670_s9 = inlined_call_operand.hbm [shape: bf16[64,128], index: 9, kind: output, shape index: {}]  }
   0x1   :  { %15 = vsyncpa [#allocation14], 0 }
   0x2   :  { %16 = vsyncpa [#allocation17], 0 }
   0x3   :  { %17 = vsyncpa [#allocation12], 0  ;;  %s3667_s30 = smov [#allocation13]   ;;  %s3519_s13 = scalar_lea.hbm %s5662_s1, 1024 }
   0x4   :  { %s35_s10 = sshll.u32 %s3667_s30, 4  ;;  %p3520_p0 = scmp.ne.s32.totalorder %s5662_s1, %s3519_s13  ;;  %s36_s10 = int_to_ptr.vmem [resolvable:$true] %s35_s10 }
   0x5   :  { %p3523_p1 = scmp.lt.u32.totalorder %s3519_s13, %s5662_s1 }
   0x7   :  { %p3525_p2 = pnand %p3523_p1, %p3520_p0 }
   0x9   :  { %3528 = shalt.err (!%p3525_p2)
}
   0xa   :  { %s3529_s18 = scalar_lea.vmem %s36_s10, 1024  ;;  %p3534_p4 = scmp.lt.s32.totalorder %s36_s10, %s36_s10 }
   0xb   :  { %p3530_p3 = scmp.ne.s32.totalorder %s36_s10, %s3529_s18  ;;  %p3535_p5 = scmp.lt.s32.totalorder %s3529_s18, %s3529_s18 }
   0xd   :  { %p3536_p6 = por %p3535_p5, %p3534_p4 }
   0xf   :  { %p3537_p7 = pnand %p3536_p6, %p3530_p3 }
  0x11   :  { %3540 = shalt.err (!%p3537_p7)
}
  0x12   :  { %s3668_s19 = smov 128   ;;  %s3669_s20 = smov 8  }
  0x13   :  { %41 = dma.hbm_to_vmem [thread:$0]  %s5662_s1, 1024, %s36_s10, [#allocation14], %s3668_s19, %s3668_s19, %s3669_s20  }
  0x14   :  { %s3670_s23 = smov [#allocation16]   ;;  %s3671_s25 = smov [#allocation10]  }
  0x15   :  { %s60_s24 = sshll.u32 %s3670_s23, 4  ;;  %s23_s26 = sshll.u32 %s3671_s25, 4  ;;  %s61_s24 = int_to_ptr.vmem [resolvable:$true] %s60_s24  ;;  %s24_s26 = int_to_ptr.vmem [resolvable:$true] %s23_s26 }
  0x16   :  { %s3541_s29 = scalar_lea.hbm %s5666_s5, 64 }
  0x17   :  { %p3542_p8 = scmp.ne.s32.totalorder %s5666_s5, %s3541_s29  ;;  %p3545_p9 = scmp.lt.u32.totalorder %s3541_s29, %s5666_s5 }
  0x19   :  { %p3547_p10 = pnand %p3545_p9, %p3542_p8 }
  0x1b   :  { %3550 = shalt.err (!%p3547_p10)
}
  0x1c   :  { %s3551_s1 = scalar_lea.vmem %s61_s24, 64  ;;  %p3556_p12 = scmp.lt.s32.totalorder %s61_s24, %s61_s24 }
  0x1d   :  { %p3552_p11 = scmp.ne.s32.totalorder %s61_s24, %s3551_s1  ;;  %p3557_p13 = scmp.lt.s32.totalorder %s3551_s1, %s3551_s1 }
  0x1f   :  { %p3558_p0 = por %p3557_p13, %p3556_p12 }
  0x21   :  { %p3559_p1 = pnand %p3558_p0, %p3552_p11 }
  0x23   :  { %3562 = shalt.err (!%p3559_p1)
}
  0x24   :  { %63 = dma.hbm_to_vmem [thread:$0]  %s5666_s5, 64, %s61_s24, [#allocation17]  }
  0x25   :  { %s3563_s17 = scalar_lea.hbm %s5661_s0, 2048 }
  0x26   :  { %p3564_p2 = scmp.ne.s32.totalorder %s5661_s0, %s3563_s17  ;;  %p3567_p3 = scmp.lt.u32.totalorder %s3563_s17, %s5661_s0 }
  0x28   :  { %p3569_p4 = pnand %p3567_p3, %p3564_p2 }
  0x2a   :  { %3572 = shalt.err (!%p3569_p4)
}
  0x2b   :  { %s3573_s25 = scalar_lea.vmem %s24_s26, 2048  ;;  %p3578_p6 = scmp.lt.s32.totalorder %s24_s26, %s24_s26 }
  0x2c   :  { %p3574_p5 = scmp.ne.s32.totalorder %s24_s26, %s3573_s25  ;;  %p3579_p7 = scmp.lt.s32.totalorder %s3573_s25, %s3573_s25 }
  0x2e   :  { %p3580_p8 = por %p3579_p7, %p3578_p6 }
  0x30   :  { %p3581_p9 = pnand %p3580_p8, %p3574_p5 }
  0x32   :  { %3584 = shalt.err (!%p3581_p9)
}
  0x33   :  { %s3672_s5 = smov 256   ;;  %s3673_s24 = smov 16  }
  0x34   :  { %29 = dma.hbm_to_vmem [thread:$0]  %s5661_s0, 2048, %s24_s26, [#allocation11], %s3672_s5, %s3672_s5, %s3673_s24  }
  0x35   :  { %s3674_s29 = smov [#allocation15]   ;;  %s3675_s11 = smov [#allocation18]  }
  0x36   :  { %s47_s30 = sshll.u32 %s3674_s29, 4  ;;  %s70_s12 = sshll.u32 %s3675_s11, 4  ;;  %s48_s30 = int_to_ptr.vmem [resolvable:$true] %s47_s30  ;;  %s71_s12 = int_to_ptr.vmem [resolvable:$true] %s70_s12 }
  0x37   :  { %s3585_s10 = scalar_lea.hbm %s5663_s2, 1024 }
  0x38   :  { %p3586_p10 = scmp.ne.s32.totalorder %s5663_s2, %s3585_s10  ;;  %p3589_p11 = scmp.lt.u32.totalorder %s3585_s10, %s5663_s2 }
  0x3a   :  { %p3591_p12 = pnand %p3589_p11, %p3586_p10 }
  0x3c   :  { %3594 = shalt.err (!%p3591_p12)
}
  0x3d   :  { %s3595_s0 = scalar_lea.vmem %s48_s30, 1024  ;;  %p3600_p0 = scmp.lt.s32.totalorder %s48_s30, %s48_s30 }
  0x3e   :  { %p3596_p13 = scmp.ne.s32.totalorder %s48_s30, %s3595_s0  ;;  %p3601_p1 = scmp.lt.s32.totalorder %s3595_s0, %s3595_s0 }
  0x40   :  { %p3602_p2 = por %p3601_p1, %p3600_p0 }
  0x42   :  { %p3603_p3 = pnand %p3602_p2, %p3596_p13 }
  0x44   :  { %3606 = shalt.err (!%p3603_p3)
}
  0x45   :  { %53 = dma.hbm_to_vmem [thread:$0]  %s5663_s2, 1024, %s48_s30, [#allocation14], %s3668_s19, %s3668_s19, %s3669_s20  }
  0x46   :  { %s3607_s23 = scalar_lea.hbm %s5669_s8, 64 }
  0x47   :  { %p3608_p4 = scmp.ne.s32.totalorder %s5669_s8, %s3607_s23  ;;  %p3611_p5 = scmp.lt.u32.totalorder %s3607_s23, %s5669_s8 }
  0x49   :  { %p3613_p6 = pnand %p3611_p5, %p3608_p4 }
  0x4b   :  { %3616 = shalt.err (!%p3613_p6)
}
  0x4c   :  { %s3617_s29 = scalar_lea.vmem %s71_s12, 64  ;;  %p3622_p8 = scmp.lt.s32.totalorder %s71_s12, %s71_s12 }
  0x4d   :  { %p3618_p7 = scmp.ne.s32.totalorder %s71_s12, %s3617_s29  ;;  %p3623_p9 = scmp.lt.s32.totalorder %s3617_s29, %s3617_s29 }
  0x4f   :  { %p3624_p10 = por %p3623_p9, %p3622_p8 }
  0x51   :  { %p3625_p11 = pnand %p3624_p10, %p3618_p7 }
  0x53   :  { %3628 = shalt.err (!%p3625_p11)
}
  0x54   :  { %73 = dma.hbm_to_vmem [thread:$0]  %s5669_s8, 64, %s71_s12, [#allocation17]  }
  0x55   :  { %3651 = dma.done.wait [#allocation11], 2048  }
  0x56   :  { %3652 = vsyncadd [#allocation11], 4294965248 }
  0x57   :  { %3653 = dma.done.wait [#allocation14], 2048  }
  0x58   :  { %3654 = vsyncadd [#allocation14], 4294965248 }
  0x59   :  { %3655 = dma.done.wait [#allocation17], 128  }
  0x5a   :  { %3656 = vsyncadd [#allocation17], 4294967168  ;;  %s94_s30 = sld [smem:[#allocation0]]   ;;  %s3676_s11 = smov 512  }
  0x5b   :  { %106 = sst [smem:[#allocation21]] %s3676_s11  ;;  %s3677_s13 = smov 4  }
  0x5c   :  { %108 = sst [smem:[#allocation21 + $0x1]] %s3676_s11  ;;  %s3678_s1 = smov 64  }
  0x5d   :  { %110 = sst [smem:[#allocation21 + $0x2]] %s3677_s13  ;;  %s3679_s10 = smov [#allocation2]  }
  0x5e   :  { %112 = sst [smem:[#allocation21 + $0x3]] %s3678_s1  ;;  %s102_s8 = sshll.u32 %s3679_s10, 4  ;;  %s103_s8 = int_to_ptr.vmem [resolvable:$true] %s102_s8 }
  0x5f   :  { %114 = sst [smem:[#allocation21 + $0x4]] %s3668_s19  ;;  %s3680_s15 = smov 2  }
  0x60   :  { %118 = sst [smem:[#allocation21 + $0x6]] %s3672_s5  ;;  %s2952_s12 = sshll.u32 %s94_s30, 26 }
  0x61   :  { %120 = sst [smem:[#allocation21 + $0x7]] %s3678_s1  ;;  %s3819_s14 = sadd.s32 134217728, %s2952_s12 }
  0x62   :  { %122 = sst [smem:[#allocation21 + $0x8]] %s3677_s13  ;;  %s3681_s16 = smov [#allocation9]  }
  0x63   :  { %116 = sst [smem:[#allocation21 + $0x5]] %s3680_s15  ;;  %s3682_s17 = smov [#allocation20]  }
  0x64   :  { %124 = dma.general %s5664_s3, 8192, %s103_s8, %s3681_s16, %s3682_s17, [#allocation21], %s3819_s14, 0  }
  0x65   :  { %141 = sst [smem:[#allocation23]] %s3676_s11  ;;  %s3683_s18 = smov [#allocation3]  }
  0x66   :  { %143 = sst [smem:[#allocation23 + $0x1]] %s3676_s11  ;;  %s137_s21 = sshll.u32 %s3683_s18, 4  ;;  %s138_s21 = int_to_ptr.vmem [resolvable:$true] %s137_s21 }
  0x67   :  { %145 = sst [smem:[#allocation23 + $0x2]] %s3677_s13  ;;  %s3684_s3 = smov [#allocation9 + $0x1]  }
  0x68   :  { %147 = sst [smem:[#allocation23 + $0x3]] %s3678_s1  ;;  %s3685_s22 = smov [#allocation22]  }
  0x69   :  { %149 = sst [smem:[#allocation23 + $0x4]] %s3668_s19  ;;  %s3686_s24 = smov [#allocation4]  }
  0x6a   :  { %151 = sst [smem:[#allocation23 + $0x5]] %s3680_s15  ;;  %s172_s27 = sshll.u32 %s3686_s24, 4  ;;  %s173_s27 = int_to_ptr.vmem [resolvable:$true] %s172_s27 }
  0x6b   :  { %153 = sst [smem:[#allocation23 + $0x6]] %s3672_s5  ;;  %s3688_s28 = smov [#allocation24]  }
  0x6c   :  { %155 = sst [smem:[#allocation23 + $0x7]] %s3678_s1  ;;  %s3689_s20 = smov [#allocation5]  }
  0x6d   :  { %157 = sst [smem:[#allocation23 + $0x8]] %s3677_s13  ;;  %s207_s30 = sshll.u32 %s3689_s20, 4  ;;  %s208_s30 = int_to_ptr.vmem [resolvable:$true] %s207_s30 }
  0x6e   :  { %159 = dma.general %s5665_s4, 4096, %s138_s21, %s3684_s3, %s3685_s22, [#allocation23], %s3819_s14, 0  }
  0x6f   :  { %176 = sst [smem:[#allocation25]] %s3676_s11  ;;  %s3687_s4 = smov [#allocation9 + $0x2]  }
  0x70   :  { %178 = sst [smem:[#allocation25 + $0x1]] %s3676_s11  ;;  %s3691_s10 = smov [#allocation26]  }
  0x71   :  { %180 = sst [smem:[#allocation25 + $0x2]] %s3677_s13 }
  0x72   :  { %182 = sst [smem:[#allocation25 + $0x3]] %s3678_s1 }
  0x73   :  { %184 = sst [smem:[#allocation25 + $0x4]] %s3668_s19 }
  0x74   :  { %186 = sst [smem:[#allocation25 + $0x5]] %s3680_s15 }
  0x75   :  { %188 = sst [smem:[#allocation25 + $0x6]] %s3672_s5 }
  0x76   :  { %190 = sst [smem:[#allocation25 + $0x7]] %s3678_s1 }
  0x77   :  { %192 = sst [smem:[#allocation25 + $0x8]] %s3677_s13 }
  0x78   :  { %194 = dma.general %s5667_s6, 4096, %s173_s27, %s3687_s4, %s3688_s28, [#allocation25], %s3819_s14, 0  }
  0x79   :  { %211 = sst [smem:[#allocation27]] %s3676_s11  ;;  %s3690_s6 = smov [#allocation9 + $0x3]  }
  0x7a   :  { %213 = sst [smem:[#allocation27 + $0x1]] %s3676_s11 }
  0x7b   :  { %215 = sst [smem:[#allocation27 + $0x2]] %s3677_s13 }
  0x7c   :  { %217 = sst [smem:[#allocation27 + $0x3]] %s3678_s1 }
  0x7d   :  { %219 = sst [smem:[#allocation27 + $0x4]] %s3668_s19 }
  0x7e   :  { %221 = sst [smem:[#allocation27 + $0x5]] %s3680_s15 }
  0x7f   :  { %223 = sst [smem:[#allocation27 + $0x6]] %s3672_s5 }
  0x80   :  { %225 = sst [smem:[#allocation27 + $0x7]] %s3678_s1 }
  0x81   :  { %227 = sst [smem:[#allocation27 + $0x8]] %s3677_s13 }
  0x82   :  { %229 = dma.general %s5668_s7, 8192, %s208_s30, %s3690_s6, %s3691_s10, [#allocation27], %s3819_s14, 0  }
  0x83   :  { %v230_v0 = vld [vmem:[#allocation10] sm:$0xff]  ;;  %v231_v1 = vld [vmem:[#allocation10 + $0x8] sm:$0xff]  ;;  %v232_v2 = vld [vmem:[#allocation10 + $0x10] sm:$0xff] }
  0x84   :  { %v233_v3 = vld [vmem:[#allocation10 + $0x18] sm:$0xff]  ;;  %v234_v4 = vld [vmem:[#allocation10 + $0x20] sm:$0xff]  ;;  %v235_v5 = vld [vmem:[#allocation10 + $0x28] sm:$0xff]  ;;  %v3866_v6 = vpack.c.bf16 %v232_v2, %v230_v0 }
  0x85   :  { %v236_v7 = vld [vmem:[#allocation10 + $0x30] sm:$0xff]  ;;  %v237_v8 = vld [vmem:[#allocation10 + $0x38] sm:$0xff]  ;;  %v238_v9 = vld [vmem:[#allocation10 + $0x40] sm:$0xff]  ;;  %v247_v10 = vpack.c.bf16 %v233_v3, %v231_v1 }
  0x86   :  { %v239_v11 = vld [vmem:[#allocation10 + $0x48] sm:$0xff]  ;;  %v240_v12 = vld [vmem:[#allocation10 + $0x50] sm:$0xff]  ;;  %v241_v13 = vld [vmem:[#allocation10 + $0x58] sm:$0xff]  ;;  %v3868_v14 = vpack.c.bf16 %v236_v7, %v234_v4  ;;  %v3870_v15 = vpack.c.bf16 %v237_v8, %v235_v5 }
  0x87   :  { %v242_v16 = vld [vmem:[#allocation10 + $0x60] sm:$0xff]  ;;  %v243_v17 = vld [vmem:[#allocation10 + $0x68] sm:$0xff]  ;;  %v244_v18 = vld [vmem:[#allocation10 + $0x70] sm:$0xff]  ;;  %v3872_v19 = vpack.c.bf16 %v240_v12, %v238_v9  ;;  %v3874_v20 = vpack.c.bf16 %v241_v13, %v239_v11 }
  0x88   :  { %v245_v21 = vld [vmem:[#allocation10 + $0x78] sm:$0xff]  ;;  %v3876_v22 = vpack.c.bf16 %v244_v18, %v242_v16 }
  0x89   :  { %v3878_v23 = vpack.c.bf16 %v245_v21, %v243_v17 }
  0x8a   :  { %3657 = dma.done.wait [#allocation9], 8192 }
  0x8b   :  { %3658 = vsyncadd [#allocation9], 4294959104  ;;  %376 = vmatprep.mubr.bf16.mxu0 %v247_v10  ;;  %449 = vmatprep.mubr.bf16.mxu1 %v247_v10  ;;  %v522_v24 = vld [vmem:[#allocation15] sm:$0xff]  ;;  %v523_v25 = vld [vmem:[#allocation15 + $0x8] sm:$0xff] }
  0x8c   :  { %v524_v26 = vld [vmem:[#allocation15 + $0x10] sm:$0xff]  ;;  %v525_v27 = vld [vmem:[#allocation15 + $0x18] sm:$0xff]  ;;  %v526_v28 = vld [vmem:[#allocation15 + $0x20] sm:$0xff]  ;;  %v3880_v30 = vpack.c.bf16 %v523_v25, %v522_v24 }
  0x8d   :  { %v527_v29 = vld [vmem:[#allocation15 + $0x28] sm:$0xff]  ;;  %v528_v31 = vld [vmem:[#allocation15 + $0x30] sm:$0xff]  ;;  %v529_v32 = vld [vmem:[#allocation15 + $0x38] sm:$0xff]  ;;  %v3882_v33 = vpack.c.bf16 %v525_v27, %v524_v26 }
  0x8e   :  { %v3884_v34 = vpack.c.bf16 %v527_v29, %v526_v28  ;;  %v259_v35 = vld [vmem:[#allocation2 + $0x8] sm:$0xff]  ;;  %v3886_v36 = vpack.c.bf16 %v529_v32, %v528_v31  ;;  %v261_v37 = vld [vmem:[#allocation2 + $0x18] sm:$0xff]  ;;  %v258_v38 = vld [vmem:[#allocation2] sm:$0xff] }
  0x8f   :  { %344 = vmatprep.subr.bf16.mxu0 %v259_v35  ;;  %v260_v39 = vld [vmem:[#allocation2 + $0x10] sm:$0xff]  ;;  %417 = vmatprep.subr.bf16.mxu1 %v261_v37  ;;  %v263_v40 = vld [vmem:[#allocation2 + $0x28] sm:$0xff]  ;;  %v265_v41 = vld [vmem:[#allocation2 + $0x38] sm:$0xff] }
  0x90   :  { %345 = vmatpush1.bf16.msra.mxu0 %v258_v38  ;;  %418 = vmatpush1.bf16.msra.mxu1 %v260_v39  ;;  %v262_v42 = vld [vmem:[#allocation2 + $0x20] sm:$0xff]  ;;  %v264_v43 = vld [vmem:[#allocation2 + $0x30] sm:$0xff]  ;;  %v267_v44 = vld [vmem:[#allocation2 + $0x48] sm:$0xff] }
  0x91   :  { %346 = vmatprep.subr.bf16.mxu0 %v263_v40  ;;  %419 = vmatprep.subr.bf16.mxu1 %v265_v41  ;;  %v269_v45 = vld [vmem:[#allocation2 + $0x58] sm:$0xff]  ;;  %v266_v46 = vld [vmem:[#allocation2 + $0x40] sm:$0xff]  ;;  %v268_v47 = vld [vmem:[#allocation2 + $0x50] sm:$0xff] }
  0x92   :  { %v271_v48 = vld [vmem:[#allocation2 + $0x68] sm:$0xff]  ;;  %v273_v49 = vld [vmem:[#allocation2 + $0x78] sm:$0xff]  ;;  %v270_v50 = vld [vmem:[#allocation2 + $0x60] sm:$0xff] }
  0x93   :  { %v272_v51 = vld [vmem:[#allocation2 + $0x70] sm:$0xff]  ;;  %v275_v52 = vld [vmem:[#allocation2 + $0x88] sm:$0xff]  ;;  %v277_v53 = vld [vmem:[#allocation2 + $0x98] sm:$0xff] }
  0x94   :  { %347 = vmatpush1.bf16.msra.mxu0 %v262_v42  ;;  %420 = vmatpush1.bf16.msra.mxu1 %v264_v43  ;;  %v274_v54 = vld [vmem:[#allocation2 + $0x80] sm:$0xff]  ;;  %v276_v55 = vld [vmem:[#allocation2 + $0x90] sm:$0xff]  ;;  %v279_v56 = vld [vmem:[#allocation2 + $0xa8] sm:$0xff] }
  0x95   :  { %348 = vmatprep.subr.bf16.mxu0 %v267_v44  ;;  %421 = vmatprep.subr.bf16.mxu1 %v269_v45  ;;  %v281_v57 = vld [vmem:[#allocation2 + $0xb8] sm:$0xff]  ;;  %v278_v58 = vld [vmem:[#allocation2 + $0xa0] sm:$0xff]  ;;  %v280_v59 = vld [vmem:[#allocation2 + $0xb0] sm:$0xff] }
  0x96   :  { %v283_v60 = vld [vmem:[#allocation2 + $0xc8] sm:$0xff]  ;;  %v285_v61 = vld [vmem:[#allocation2 + $0xd8] sm:$0xff]  ;;  %v282_v62 = vld [vmem:[#allocation2 + $0xc0] sm:$0xff] }
  0x97   :  { %v284_v63 = vld [vmem:[#allocation2 + $0xd0] sm:$0xff]  ;;  %v287_v0 = vld [vmem:[#allocation2 + $0xe8] sm:$0xff]  ;;  %v289_v1 = vld [vmem:[#allocation2 + $0xf8] sm:$0xff] }
  0x98   :  { %349 = vmatpush1.bf16.msra.mxu0 %v266_v46  ;;  %422 = vmatpush1.bf16.msra.mxu1 %v268_v47  ;;  %v286_v2 = vld [vmem:[#allocation2 + $0xe0] sm:$0xff]  ;;  %v288_v3 = vld [vmem:[#allocation2 + $0xf0] sm:$0xff]  ;;  %v291_v4 = vld [vmem:[#allocation2 + $0x108] sm:$0xff] }
  0x99   :  { %350 = vmatprep.subr.bf16.mxu0 %v271_v48  ;;  %423 = vmatprep.subr.bf16.mxu1 %v273_v49  ;;  %v293_v5 = vld [vmem:[#allocation2 + $0x118] sm:$0xff]  ;;  %v290_v7 = vld [vmem:[#allocation2 + $0x100] sm:$0xff]  ;;  %v292_v8 = vld [vmem:[#allocation2 + $0x110] sm:$0xff] }
  0x9a   :  { %v295_v9 = vld [vmem:[#allocation2 + $0x128] sm:$0xff]  ;;  %v297_v10 = vld [vmem:[#allocation2 + $0x138] sm:$0xff]  ;;  %v294_v11 = vld [vmem:[#allocation2 + $0x120] sm:$0xff] }
  0x9b   :  { %v296_v12 = vld [vmem:[#allocation2 + $0x130] sm:$0xff]  ;;  %v299_v13 = vld [vmem:[#allocation2 + $0x148] sm:$0xff]  ;;  %v301_v16 = vld [vmem:[#allocation2 + $0x158] sm:$0xff] }
  0x9c   :  { %351 = vmatpush1.bf16.msra.mxu0 %v270_v50  ;;  %424 = vmatpush1.bf16.msra.mxu1 %v272_v51  ;;  %v298_v17 = vld [vmem:[#allocation2 + $0x140] sm:$0xff]  ;;  %v300_v18 = vld [vmem:[#allocation2 + $0x150] sm:$0xff]  ;;  %v303_v21 = vld [vmem:[#allocation2 + $0x168] sm:$0xff] }
  0x9d   :  { %352 = vmatprep.subr.bf16.mxu0 %v275_v52  ;;  %425 = vmatprep.subr.bf16.mxu1 %v277_v53  ;;  %v305_v24 = vld [vmem:[#allocation2 + $0x178] sm:$0xff]  ;;  %v302_v25 = vld [vmem:[#allocation2 + $0x160] sm:$0xff]  ;;  %v304_v26 = vld [vmem:[#allocation2 + $0x170] sm:$0xff] }
  0x9e   :  { %v307_v27 = vld [vmem:[#allocation2 + $0x188] sm:$0xff]  ;;  %v309_v28 = vld [vmem:[#allocation2 + $0x198] sm:$0xff]  ;;  %v306_v29 = vld [vmem:[#allocation2 + $0x180] sm:$0xff] }
  0x9f   :  { %v308_v31 = vld [vmem:[#allocation2 + $0x190] sm:$0xff]  ;;  %v311_v32 = vld [vmem:[#allocation2 + $0x1a8] sm:$0xff]  ;;  %v313_v35 = vld [vmem:[#allocation2 + $0x1b8] sm:$0xff] }
  0xa0   :  { %353 = vmatpush1.bf16.msra.mxu0 %v274_v54  ;;  %426 = vmatpush1.bf16.msra.mxu1 %v276_v55  ;;  %v310_v37 = vld [vmem:[#allocation2 + $0x1a0] sm:$0xff]  ;;  %v312_v38 = vld [vmem:[#allocation2 + $0x1b0] sm:$0xff]  ;;  %v315_v39 = vld [vmem:[#allocation2 + $0x1c8] sm:$0xff] }
  0xa1   :  { %354 = vmatprep.subr.bf16.mxu0 %v279_v56  ;;  %427 = vmatprep.subr.bf16.mxu1 %v281_v57  ;;  %v317_v40 = vld [vmem:[#allocation2 + $0x1d8] sm:$0xff]  ;;  %v314_v41 = vld [vmem:[#allocation2 + $0x1c0] sm:$0xff]  ;;  %v316_v42 = vld [vmem:[#allocation2 + $0x1d0] sm:$0xff] }
  0xa2   :  { %v319_v43 = vld [vmem:[#allocation2 + $0x1e8] sm:$0xff]  ;;  %v321_v44 = vld [vmem:[#allocation2 + $0x1f8] sm:$0xff]  ;;  %v318_v45 = vld [vmem:[#allocation2 + $0x1e0] sm:$0xff] }
  0xa3   :  { %v320_v46 = vld [vmem:[#allocation2 + $0x1f0] sm:$0xff]  ;;  %v322_v47 = vld [vmem:[#allocation16] sm:$0xf] }
  0xa4   :  { %355 = vmatpush1.bf16.msra.mxu0 %v278_v58  ;;  %428 = vmatpush1.bf16.msra.mxu1 %v280_v59 }
  0xa5   :  { %356 = vmatprep.subr.bf16.mxu0 %v283_v60  ;;  %429 = vmatprep.subr.bf16.mxu1 %v285_v61 }
  0xa8   :  { %357 = vmatpush1.bf16.msra.mxu0 %v282_v62  ;;  %430 = vmatpush1.bf16.msra.mxu1 %v284_v63 }
  0xa9   :  { %358 = vmatprep.subr.bf16.mxu0 %v287_v0  ;;  %431 = vmatprep.subr.bf16.mxu1 %v289_v1 }
  0xac   :  { %359 = vmatpush1.bf16.msra.mxu0 %v286_v2  ;;  %432 = vmatpush1.bf16.msra.mxu1 %v288_v3 }
  0xad   :  { %360 = vmatprep.subr.bf16.mxu0 %v291_v4  ;;  %433 = vmatprep.subr.bf16.mxu1 %v293_v5 }
  0xb0   :  { %361 = vmatpush1.bf16.msra.mxu0 %v290_v7  ;;  %434 = vmatpush1.bf16.msra.mxu1 %v292_v8 }
  0xb1   :  { %362 = vmatprep.subr.bf16.mxu0 %v295_v9  ;;  %435 = vmatprep.subr.bf16.mxu1 %v297_v10 }
  0xb4   :  { %363 = vmatpush1.bf16.msra.mxu0 %v294_v11  ;;  %436 = vmatpush1.bf16.msra.mxu1 %v296_v12 }
  0xb5   :  { %364 = vmatprep.subr.bf16.mxu0 %v299_v13  ;;  %437 = vmatprep.subr.bf16.mxu1 %v301_v16 }
  0xb8   :  { %365 = vmatpush1.bf16.msra.mxu0 %v298_v17  ;;  %438 = vmatpush1.bf16.msra.mxu1 %v300_v18 }
  0xb9   :  { %366 = vmatprep.subr.bf16.mxu0 %v303_v21  ;;  %439 = vmatprep.subr.bf16.mxu1 %v305_v24 }
  0xbc   :  { %367 = vmatpush1.bf16.msra.mxu0 %v302_v25  ;;  %440 = vmatpush1.bf16.msra.mxu1 %v304_v26 }
  0xbd   :  { %368 = vmatprep.subr.bf16.mxu0 %v307_v27  ;;  %441 = vmatprep.subr.bf16.mxu1 %v309_v28 }
  0xc0   :  { %369 = vmatpush1.bf16.msra.mxu0 %v306_v29  ;;  %442 = vmatpush1.bf16.msra.mxu1 %v308_v31 }
  0xc1   :  { %370 = vmatprep.subr.bf16.mxu0 %v311_v32  ;;  %443 = vmatprep.subr.bf16.mxu1 %v313_v35 }
  0xc4   :  { %371 = vmatpush1.bf16.msra.mxu0 %v310_v37  ;;  %444 = vmatpush1.bf16.msra.mxu1 %v312_v38 }
  0xc5   :  { %372 = vmatprep.subr.bf16.mxu0 %v315_v39  ;;  %445 = vmatprep.subr.bf16.mxu1 %v317_v40 }
  0xc8   :  { %373 = vmatpush1.bf16.msra.mxu0 %v314_v41  ;;  %446 = vmatpush1.bf16.msra.mxu1 %v316_v42 }
  0xc9   :  { %374 = vmatprep.subr.bf16.mxu0 %v319_v43  ;;  %447 = vmatprep.subr.bf16.mxu1 %v321_v44 }
  0xcc   :  { %375 = vmatpush1.bf16.msra.mxu0 %v318_v45  ;;  %448 = vmatpush1.bf16.msra.mxu1 %v320_v46 }
  0xcf   :  { %377 = vmatmul.mubr.bf16.vlgmr.msra.gmra.mrb[0].mxu0 %v3866_v6  ;;  %450 = vmatmul.mubr.bf16.vlgmr.msra.gmra.mrb[0].mxu1 %v3866_v6  ;;  %v324_v6 = vlaneseq }
  0xd0   :  { %386 = vmatprep.mubr.bf16.mxu0 %v3870_v15  ;;  %459 = vmatprep.mubr.bf16.mxu1 %v3870_v15 }
  0xd1   :  { %v3902_v15 = vshrl.u32 %v324_v6, 7 }
  0xd3   :  { %v330_v48 = vsub.s32 1, %v3902_v15 }
  0xd7   :  { %387 = vmatmul.mubr.bf16.gmra.mrb[4].mxu0 %v3868_v14  ;;  %460 = vmatmul.mubr.bf16.gmra.mrb[4].mxu1 %v3868_v14  ;;  %v326_v14 = vsub.s32 0, %v3902_v15 }
  0xd8   :  { %396 = vmatprep.mubr.bf16.mxu0 %v3874_v20  ;;  %469 = vmatprep.mubr.bf16.mxu1 %v3874_v20  ;;  %v334_v20 = vsub.s32 2, %v3902_v15 }
  0xd9   :  { %v327_v49 = vrot.slane %v322_v47, %v326_v14 }
  0xdf   :  { %397 = vmatmul.mubr.bf16.gmra.mrb[8].mxu0 %v3872_v19  ;;  %470 = vmatmul.mubr.bf16.gmra.mrb[8].mxu1 %v3872_v19  ;;  %v338_v19 = vsub.s32 3, %v3902_v15 }
  0xe0   :  { %406 = vmatprep.mubr.bf16.mxu0 %v3878_v23  ;;  %479 = vmatprep.mubr.bf16.mxu1 %v3878_v23  ;;  %v3912_v23 = vrot.slane %v322_v47, %v334_v20 }
  0xe1   :  { %v3920_v50 = vrot.slane %v322_v47, %v338_v19 }
  0xe7   :  { %407 = vmatmul.mubr.bf16.gmra.mrb[12].mxu0 %v3876_v22  ;;  %480 = vmatmul.mubr.bf16.gmra.mrb[12].mxu1 %v3876_v22  ;;  %v3916_v22 = vrot.slane %v322_v47, %v330_v48 }
 0x1a2   :  { %v378_v51 = vpop.f32.mrb[0].mxu0  ;;  %v451_v53 = vpop.f32.mrb[0].mxu1 }
 0x1a3   :  { %v3922_v52 = vadd.f32 %v378_v51, %v327_v49  ;;  %v380_v54 = vpop.f32.mrb[1].mxu0  ;;  %v3925_v55 = vadd.f32 %v451_v53, %v3912_v23  ;;  %v453_v57 = vpop.f32.mrb[1].mxu1 }
 0x1a4   :  { %v3928_v56 = vadd.f32 %v380_v54, %v3916_v22  ;;  %v382_v58 = vpop.f32.mrb[2].mxu0  ;;  %v3931_v59 = vadd.f32 %v453_v57, %v3920_v50  ;;  %v455_v61 = vpop.f32.mrb[2].mxu1 }
 0x1a5   :  { %v3933_v60 = vadd.f32 %v382_v58, %v327_v49  ;;  %v384_v62 = vpop.f32.mrb[3].mxu0  ;;  %v3936_v63 = vadd.f32 %v455_v61, %v3912_v23  ;;  %v457_v1 = vpop.f32.mrb[3].mxu1 }
 0x1a6   :  { %v3939_v0 = vadd.f32 %v384_v62, %v3916_v22  ;;  %v3942_v2 = vadd.f32 %v457_v1, %v3920_v50 }
 0x1a7   :  { %5952 = vst [vmem:[#allocation36_spill] sm:$0xff] %v3933_v60  ;;  %5953 = vst [vmem:[#allocation37_spill] sm:$0xff] %v3936_v63 }
 0x1a8   :  { %5954 = vst [vmem:[#allocation38_spill] sm:$0xff] %v3939_v0  ;;  %5955 = vst [vmem:[#allocation39_spill] sm:$0xff] %v3942_v2 }
 0x1aa   :  { %v388_v3 = vpop.f32.mrb[4].mxu0  ;;  %v461_v5 = vpop.f32.mrb[4].mxu1 }
 0x1ab   :  { %v3944_v4 = vadd.f32 %v388_v3, %v327_v49  ;;  %v390_v7 = vpop.f32.mrb[5].mxu0  ;;  %v3947_v8 = vadd.f32 %v461_v5, %v3912_v23  ;;  %v463_v10 = vpop.f32.mrb[5].mxu1 }
 0x1ac   :  { %v3950_v9 = vadd.f32 %v390_v7, %v3916_v22  ;;  %v392_v11 = vpop.f32.mrb[6].mxu0  ;;  %v3953_v12 = vadd.f32 %v463_v10, %v3920_v50  ;;  %v465_v16 = vpop.f32.mrb[6].mxu1 }
 0x1ad   :  { %5956 = vst [vmem:[#allocation40_spill] sm:$0xff] %v3944_v4  ;;  %5957 = vst [vmem:[#allocation41_spill] sm:$0xff] %v3947_v8  ;;  %v3955_v13 = vadd.f32 %v392_v11, %v327_v49  ;;  %v394_v17 = vpop.f32.mrb[7].mxu0  ;;  %v3958_v18 = vadd.f32 %v465_v16, %v3912_v23  ;;  %v467_v24 = vpop.f32.mrb[7].mxu1 }
 0x1ae   :  { %5958 = vst [vmem:[#allocation42_spill] sm:$0xff] %v3950_v9  ;;  %5959 = vst [vmem:[#allocation43_spill] sm:$0xff] %v3953_v12  ;;  %v3961_v21 = vadd.f32 %v394_v17, %v3916_v22  ;;  %v3964_v25 = vadd.f32 %v467_v24, %v3920_v50 }
 0x1af   :  { %5960 = vst [vmem:[#allocation44_spill] sm:$0xff] %v3955_v13  ;;  %5961 = vst [vmem:[#allocation45_spill] sm:$0xff] %v3958_v18 }
 0x1b0   :  { %5962 = vst [vmem:[#allocation46_spill] sm:$0xff] %v3961_v21  ;;  %5963 = vst [vmem:[#allocation47_spill] sm:$0xff] %v3964_v25 }
 0x1b2   :  { %v398_v26 = vpop.f32.mrb[8].mxu0  ;;  %v471_v28 = vpop.f32.mrb[8].mxu1 }
 0x1b3   :  { %v3966_v27 = vadd.f32 %v398_v26, %v327_v49  ;;  %v400_v29 = vpop.f32.mrb[9].mxu0  ;;  %v3969_v31 = vadd.f32 %v471_v28, %v3912_v23  ;;  %v473_v35 = vpop.f32.mrb[9].mxu1 }
 0x1b4   :  { %v3972_v32 = vadd.f32 %v400_v29, %v3916_v22  ;;  %v402_v37 = vpop.f32.mrb[10].mxu0  ;;  %v3975_v38 = vadd.f32 %v473_v35, %v3920_v50  ;;  %v475_v40 = vpop.f32.mrb[10].mxu1 }
 0x1b5   :  { %5964 = vst [vmem:[#allocation48_spill] sm:$0xff] %v3966_v27  ;;  %5965 = vst [vmem:[#allocation49_spill] sm:$0xff] %v3969_v31  ;;  %v3977_v39 = vadd.f32 %v402_v37, %v327_v49  ;;  %v404_v41 = vpop.f32.mrb[11].mxu0  ;;  %v3980_v42 = vadd.f32 %v475_v40, %v3912_v23  ;;  %v477_v44 = vpop.f32.mrb[11].mxu1 }
 0x1b6   :  { %5966 = vst [vmem:[#allocation50_spill] sm:$0xff] %v3972_v32  ;;  %5967 = vst [vmem:[#allocation51_spill] sm:$0xff] %v3975_v38  ;;  %v3983_v43 = vadd.f32 %v404_v41, %v3916_v22  ;;  %v3986_v45 = vadd.f32 %v477_v44, %v3920_v50 }
 0x1b7   :  { %5968 = vst [vmem:[#allocation52_spill] sm:$0xff] %v3977_v39  ;;  %5969 = vst [vmem:[#allocation53_spill] sm:$0xff] %v3980_v42 }
 0x1b8   :  { %5970 = vst [vmem:[#allocation54_spill] sm:$0xff] %v3983_v43  ;;  %5971 = vst [vmem:[#allocation55_spill] sm:$0xff] %v3986_v45 }
 0x1ba   :  { %v408_v46 = vpop.f32.mrb[12].mxu0  ;;  %v481_v47 = vpop.f32.mrb[12].mxu1 }
 0x1bb   :  { %v3988_v6 = vadd.f32 %v408_v46, %v327_v49  ;;  %v410_v51 = vpop.f32.mrb[13].mxu0  ;;  %v3991_v53 = vadd.f32 %v481_v47, %v3912_v23  ;;  %v483_v57 = vpop.f32.mrb[13].mxu1 }
 0x1bc   :  { %v3994_v54 = vadd.f32 %v410_v51, %v3916_v22  ;;  %v412_v58 = vpop.f32.mrb[14].mxu0  ;;  %v3997_v61 = vadd.f32 %v483_v57, %v3920_v50  ;;  %v485_v1 = vpop.f32.mrb[14].mxu1 }
 0x1bd   :  { %5972 = vst [vmem:[#allocation56_spill] sm:$0xff] %v3988_v6  ;;  %5973 = vst [vmem:[#allocation57_spill] sm:$0xff] %v3991_v53  ;;  %v3999_v62 = vadd.f32 %v412_v58, %v327_v49  ;;  %v414_v3 = vpop.f32.mrb[15].mxu0  ;;  %v4002_v5 = vadd.f32 %v485_v1, %v3912_v23  ;;  %v487_v10 = vpop.f32.mrb[15].mxu1 }
 0x1be   :  { %5974 = vst [vmem:[#allocation58_spill] sm:$0xff] %v3994_v54  ;;  %5975 = vst [vmem:[#allocation59_spill] sm:$0xff] %v3997_v61  ;;  %v4005_v7 = vadd.f32 %v414_v3, %v3916_v22  ;;  %v4008_v11 = vadd.f32 %v487_v10, %v3920_v50 }
 0x1bf   :  { %5976 = vst [vmem:[#allocation60_spill] sm:$0xff] %v3999_v62  ;;  %5977 = vst [vmem:[#allocation61_spill] sm:$0xff] %v4002_v5 }
 0x1c0   :  { %5978 = vst [vmem:[#allocation62_spill] sm:$0xff] %v4005_v7  ;;  %5979 = vst [vmem:[#allocation63_spill] sm:$0xff] %v4008_v11 }
 0x1c1   :  { %3659 = dma.done.wait [#allocation9 + $0x2], 4096 }
 0x1c2   :  { %3660 = vsyncadd [#allocation9 + $0x2], 4294963200  ;;  %v5671_v16 = vmov 0   ;;  %v539_v49 = vld [vmem:[#allocation4 + $0x8] sm:$0xff]  ;;  %v541_v17 = vld [vmem:[#allocation4 + $0x18] sm:$0xff] }
 0x1c3   :  { %624 = vmatprep.mubr.bf16.mxu0 %v5671_v16  ;;  %697 = vmatprep.mubr.bf16.mxu1 %v5671_v16  ;;  %v538_v24 = vld [vmem:[#allocation4] sm:$0xff]  ;;  %v540_v23 = vld [vmem:[#allocation4 + $0x10] sm:$0xff]  ;;  %v543_v26 = vld [vmem:[#allocation4 + $0x28] sm:$0xff] }
 0x1c4   :  { %592 = vmatprep.subr.bf16.mxu0 %v539_v49  ;;  %665 = vmatprep.subr.bf16.mxu1 %v541_v17  ;;  %v545_v22 = vld [vmem:[#allocation4 + $0x38] sm:$0xff]  ;;  %v542_v50 = vld [vmem:[#allocation4 + $0x20] sm:$0xff]  ;;  %v544_v28 = vld [vmem:[#allocation4 + $0x30] sm:$0xff] }
 0x1c5   :  { %593 = vmatpush1.bf16.msra.mxu0 %v538_v24  ;;  %666 = vmatpush1.bf16.msra.mxu1 %v540_v23  ;;  %v547_v29 = vld [vmem:[#allocation4 + $0x48] sm:$0xff]  ;;  %v549_v35 = vld [vmem:[#allocation4 + $0x58] sm:$0xff]  ;;  %v546_v37 = vld [vmem:[#allocation4 + $0x40] sm:$0xff] }
 0x1c6   :  { %594 = vmatprep.subr.bf16.mxu0 %v543_v26  ;;  %667 = vmatprep.subr.bf16.mxu1 %v545_v22  ;;  %v548_v40 = vld [vmem:[#allocation4 + $0x50] sm:$0xff]  ;;  %v551_v41 = vld [vmem:[#allocation4 + $0x68] sm:$0xff]  ;;  %v553_v44 = vld [vmem:[#allocation4 + $0x78] sm:$0xff] }
 0x1c7   :  { %v550_v46 = vld [vmem:[#allocation4 + $0x60] sm:$0xff]  ;;  %v552_v47 = vld [vmem:[#allocation4 + $0x70] sm:$0xff]  ;;  %v555_v51 = vld [vmem:[#allocation4 + $0x88] sm:$0xff] }
 0x1c8   :  { %v557_v57 = vld [vmem:[#allocation4 + $0x98] sm:$0xff]  ;;  %v554_v58 = vld [vmem:[#allocation4 + $0x80] sm:$0xff]  ;;  %v556_v1 = vld [vmem:[#allocation4 + $0x90] sm:$0xff] }
 0x1c9   :  { %595 = vmatpush1.bf16.msra.mxu0 %v542_v50  ;;  %668 = vmatpush1.bf16.msra.mxu1 %v544_v28  ;;  %v559_v3 = vld [vmem:[#allocation4 + $0xa8] sm:$0xff]  ;;  %v561_v10 = vld [vmem:[#allocation4 + $0xb8] sm:$0xff]  ;;  %v558_v49 = vld [vmem:[#allocation4 + $0xa0] sm:$0xff] }
 0x1ca   :  { %596 = vmatprep.subr.bf16.mxu0 %v547_v29  ;;  %669 = vmatprep.subr.bf16.mxu1 %v549_v35  ;;  %v560_v17 = vld [vmem:[#allocation4 + $0xb0] sm:$0xff]  ;;  %v563_v24 = vld [vmem:[#allocation4 + $0xc8] sm:$0xff]  ;;  %v565_v23 = vld [vmem:[#allocation4 + $0xd8] sm:$0xff] }
 0x1cb   :  { %v562_v26 = vld [vmem:[#allocation4 + $0xc0] sm:$0xff]  ;;  %v564_v22 = vld [vmem:[#allocation4 + $0xd0] sm:$0xff]  ;;  %v567_v50 = vld [vmem:[#allocation4 + $0xe8] sm:$0xff] }
 0x1cc   :  { %v569_v28 = vld [vmem:[#allocation4 + $0xf8] sm:$0xff]  ;;  %v566_v29 = vld [vmem:[#allocation4 + $0xe0] sm:$0xff]  ;;  %v568_v35 = vld [vmem:[#allocation4 + $0xf0] sm:$0xff] }
 0x1cd   :  { %597 = vmatpush1.bf16.msra.mxu0 %v546_v37  ;;  %670 = vmatpush1.bf16.msra.mxu1 %v548_v40 }
 0x1ce   :  { %598 = vmatprep.subr.bf16.mxu0 %v551_v41  ;;  %671 = vmatprep.subr.bf16.mxu1 %v553_v44 }
 0x1d1   :  { %599 = vmatpush1.bf16.msra.mxu0 %v550_v46  ;;  %672 = vmatpush1.bf16.msra.mxu1 %v552_v47 }
 0x1d2   :  { %600 = vmatprep.subr.bf16.mxu0 %v555_v51  ;;  %673 = vmatprep.subr.bf16.mxu1 %v557_v57 }
 0x1d5   :  { %601 = vmatpush1.bf16.msra.mxu0 %v554_v58  ;;  %674 = vmatpush1.bf16.msra.mxu1 %v556_v1 }
 0x1d6   :  { %602 = vmatprep.subr.bf16.mxu0 %v559_v3  ;;  %675 = vmatprep.subr.bf16.mxu1 %v561_v10 }
 0x1d9   :  { %603 = vmatpush1.bf16.msra.mxu0 %v558_v49  ;;  %676 = vmatpush1.bf16.msra.mxu1 %v560_v17 }
 0x1da   :  { %604 = vmatprep.subr.bf16.mxu0 %v563_v24  ;;  %677 = vmatprep.subr.bf16.mxu1 %v565_v23 }
 0x1dd   :  { %605 = vmatpush1.bf16.msra.mxu0 %v562_v26  ;;  %678 = vmatpush1.bf16.msra.mxu1 %v564_v22 }
 0x1de   :  { %606 = vmatprep.subr.bf16.mxu0 %v567_v50  ;;  %679 = vmatprep.subr.bf16.mxu1 %v569_v28 }
 0x1e1   :  { %607 = vmatpush1.bf16.msra.mxu0 %v566_v29  ;;  %680 = vmatpush1.bf16.msra.mxu1 %v568_v35 }
 0x1e4   :  { %625 = vmatmul.mubr.bf16.vlgmr.msra.gmra.mrb[16].mxu0 %v3880_v30  ;;  %698 = vmatmul.mubr.bf16.vlgmr.msra.gmra.mrb[16].mxu1 %v3880_v30  ;;  %v570_v30 = vld [vmem:[#allocation18] sm:$0xf] }
 0x1e5   :  { %634 = vmatprep.mubr.bf16.mxu0 %v5671_v16  ;;  %707 = vmatprep.mubr.bf16.mxu1 %v5671_v16  ;;  %v583_v37 = vrot.slane %v570_v30, %v334_v20  ;;  %v4032_v40 = vrot.slane %v570_v30, %v330_v48 }
 0x1ec   :  { %635 = vmatmul.mubr.bf16.gmra.mrb[20].mxu0 %v3882_v33  ;;  %708 = vmatmul.mubr.bf16.gmra.mrb[20].mxu1 %v3882_v33  ;;  %v575_v33 = vrot.slane %v570_v30, %v326_v14 }
 0x1ed   :  { %644 = vmatprep.mubr.bf16.mxu0 %v5671_v16  ;;  %717 = vmatprep.mubr.bf16.mxu1 %v5671_v16 }
 0x1f4   :  { %645 = vmatmul.mubr.bf16.gmra.mrb[24].mxu0 %v3884_v34  ;;  %718 = vmatmul.mubr.bf16.gmra.mrb[24].mxu1 %v3884_v34  ;;  %v4036_v34 = vrot.slane %v570_v30, %v338_v19 }
 0x1f5   :  { %654 = vmatprep.mubr.bf16.mxu0 %v5671_v16  ;;  %727 = vmatprep.mubr.bf16.mxu1 %v5671_v16 }
 0x1fc   :  { %655 = vmatmul.mubr.bf16.gmra.mrb[28].mxu0 %v3886_v36  ;;  %728 = vmatmul.mubr.bf16.gmra.mrb[28].mxu1 %v3886_v36 }
 0x2b7   :  { %v626_v41 = vpop.f32.mrb[16].mxu0  ;;  %v699_v44 = vpop.f32.mrb[16].mxu1 }
 0x2b8   :  { %v4038_v46 = vadd.f32 %v626_v41, %v575_v33  ;;  %v4040_v36 = vadd.f32 %v699_v44, %v583_v37  ;;  %v628_v47 = vpop.f32.mrb[17].mxu0  ;;  %v701_v51 = vpop.f32.mrb[17].mxu1 }
 0x2b9   :  { %v4043_v14 = vadd.f32 %v628_v47, %v4032_v40  ;;  %v4046_v20 = vadd.f32 %v701_v51, %v4036_v34  ;;  %v630_v48 = vpop.f32.mrb[18].mxu0  ;;  %v703_v57 = vpop.f32.mrb[18].mxu1 }
 0x2ba   :  { %5980 = vst [vmem:[#allocation64_spill] sm:$0xff] %v4038_v46  ;;  %5981 = vst [vmem:[#allocation65_spill] sm:$0xff] %v4040_v36  ;;  %v4048_v58 = vadd.f32 %v630_v48, %v575_v33  ;;  %v4050_v15 = vadd.f32 %v703_v57, %v583_v37  ;;  %v632_v19 = vpop.f32.mrb[19].mxu0  ;;  %v705_v1 = vpop.f32.mrb[19].mxu1 }
 0x2bb   :  { %5982 = vst [vmem:[#allocation66_spill] sm:$0xff] %v4043_v14  ;;  %5983 = vst [vmem:[#allocation67_spill] sm:$0xff] %v4046_v20  ;;  %v4053_v3 = vadd.f32 %v632_v19, %v4032_v40  ;;  %v4056_v10 = vadd.f32 %v705_v1, %v4036_v34 }
 0x2bc   :  { %5984 = vst [vmem:[#allocation68_spill] sm:$0xff] %v4048_v58  ;;  %5985 = vst [vmem:[#allocation69_spill] sm:$0xff] %v4050_v15 }
 0x2bd   :  { %5986 = vst [vmem:[#allocation70_spill] sm:$0xff] %v4053_v3  ;;  %5987 = vst [vmem:[#allocation71_spill] sm:$0xff] %v4056_v10 }
 0x2bf   :  { %v636_v49 = vpop.f32.mrb[20].mxu0  ;;  %v709_v17 = vpop.f32.mrb[20].mxu1 }
 0x2c0   :  { %v4058_v24 = vadd.f32 %v636_v49, %v575_v33  ;;  %v4060_v23 = vadd.f32 %v709_v17, %v583_v37  ;;  %v638_v26 = vpop.f32.mrb[21].mxu0  ;;  %v711_v22 = vpop.f32.mrb[21].mxu1 }
 0x2c1   :  { %v4063_v50 = vadd.f32 %v638_v26, %v4032_v40  ;;  %v4066_v28 = vadd.f32 %v711_v22, %v4036_v34  ;;  %v640_v29 = vpop.f32.mrb[22].mxu0  ;;  %v713_v35 = vpop.f32.mrb[22].mxu1 }
 0x2c2   :  { %5988 = vst [vmem:[#allocation72_spill] sm:$0xff] %v4058_v24  ;;  %5989 = vst [vmem:[#allocation73_spill] sm:$0xff] %v4060_v23  ;;  %v4068_v30 = vadd.f32 %v640_v29, %v575_v33  ;;  %v4070_v41 = vadd.f32 %v713_v35, %v583_v37  ;;  %v642_v44 = vpop.f32.mrb[23].mxu0  ;;  %v715_v47 = vpop.f32.mrb[23].mxu1 }
 0x2c3   :  { %5990 = vst [vmem:[#allocation74_spill] sm:$0xff] %v4063_v50  ;;  %5991 = vst [vmem:[#allocation75_spill] sm:$0xff] %v4066_v28  ;;  %v4073_v51 = vadd.f32 %v642_v44, %v4032_v40  ;;  %v4076_v48 = vadd.f32 %v715_v47, %v4036_v34 }
 0x2c4   :  { %5992 = vst [vmem:[#allocation76_spill] sm:$0xff] %v4068_v30  ;;  %5993 = vst [vmem:[#allocation77_spill] sm:$0xff] %v4070_v41 }
 0x2c5   :  { %5994 = vst [vmem:[#allocation78_spill] sm:$0xff] %v4073_v51  ;;  %5995 = vst [vmem:[#allocation79_spill] sm:$0xff] %v4076_v48 }
 0x2c7   :  { %v646_v57 = vpop.f32.mrb[24].mxu0  ;;  %v719_v19 = vpop.f32.mrb[24].mxu1 }
 0x2c8   :  { %v4078_v1 = vadd.f32 %v646_v57, %v575_v33  ;;  %v4080_v49 = vadd.f32 %v719_v19, %v583_v37  ;;  %v648_v17 = vpop.f32.mrb[25].mxu0  ;;  %v721_v26 = vpop.f32.mrb[25].mxu1 }
 0x2c9   :  { %v4083_v22 = vadd.f32 %v648_v17, %v4032_v40  ;;  %v4086_v29 = vadd.f32 %v721_v26, %v4036_v34  ;;  %v650_v35 = vpop.f32.mrb[26].mxu0  ;;  %v723_v44 = vpop.f32.mrb[26].mxu1 }
 0x2ca   :  { %5996 = vst [vmem:[#allocation80_spill] sm:$0xff] %v4078_v1  ;;  %5997 = vst [vmem:[#allocation81_spill] sm:$0xff] %v4080_v49  ;;  %v4088_v16 = vadd.f32 %v650_v35, %v575_v33  ;;  %v4090_v47 = vadd.f32 %v723_v44, %v583_v37  ;;  %v652_v5 = vpop.f32.mrb[27].mxu0  ;;  %v725_v11 = vpop.f32.mrb[27].mxu1 }
 0x2cb   :  { %5998 = vst [vmem:[#allocation82_spill] sm:$0xff] %v4083_v22  ;;  %5999 = vst [vmem:[#allocation83_spill] sm:$0xff] %v4086_v29  ;;  %v4093_v57 = vadd.f32 %v652_v5, %v4032_v40  ;;  %v4096_v19 = vadd.f32 %v725_v11, %v4036_v34 }
 0x2cc   :  { %6000 = vst [vmem:[#allocation84_spill] sm:$0xff] %v4088_v16  ;;  %6001 = vst [vmem:[#allocation85_spill] sm:$0xff] %v4090_v47 }
 0x2cd   :  { %6002 = vst [vmem:[#allocation86_spill] sm:$0xff] %v4093_v57  ;;  %6003 = vst [vmem:[#allocation87_spill] sm:$0xff] %v4096_v19 }
 0x2cf   :  { %v656_v7 = vpop.f32.mrb[28].mxu0  ;;  %v729_v17 = vpop.f32.mrb[28].mxu1 }
 0x2d0   :  { %v4098_v62 = vadd.f32 %v656_v7, %v575_v33  ;;  %v4100_v26 = vadd.f32 %v729_v17, %v583_v37  ;;  %v658_v53 = vpop.f32.mrb[29].mxu0  ;;  %v731_v61 = vpop.f32.mrb[29].mxu1 }
 0x2d1   :  { %v4103_v35 = vadd.f32 %v658_v53, %v4032_v40  ;;  %v4106_v44 = vadd.f32 %v731_v61, %v4036_v34  ;;  %v660_v54 = vpop.f32.mrb[30].mxu0  ;;  %v733_v5 = vpop.f32.mrb[30].mxu1 }
 0x2d2   :  { %6004 = vst [vmem:[#allocation88_spill] sm:$0xff] %v4098_v62  ;;  %6005 = vst [vmem:[#allocation89_spill] sm:$0xff] %v4100_v26  ;;  %v4108_v6 = vadd.f32 %v660_v54, %v575_v33  ;;  %v4110_v11 = vadd.f32 %v733_v5, %v583_v37  ;;  %v662_v47 = vpop.f32.mrb[31].mxu0  ;;  %v735_v19 = vpop.f32.mrb[31].mxu1 }
 0x2d3   :  { %6006 = vst [vmem:[#allocation90_spill] sm:$0xff] %v4103_v35  ;;  %6007 = vst [vmem:[#allocation91_spill] sm:$0xff] %v4106_v44  ;;  %v4113_v7 = vadd.f32 %v662_v47, %v4032_v40  ;;  %v4116_v17 = vadd.f32 %v735_v19, %v4036_v34 }
 0x2d4   :  { %6008 = vst [vmem:[#allocation92_spill] sm:$0xff] %v4108_v6  ;;  %6009 = vst [vmem:[#allocation93_spill] sm:$0xff] %v4110_v11 }
 0x2d5   :  { %6010 = vst [vmem:[#allocation94_spill] sm:$0xff] %v4113_v7  ;;  %6011 = vst [vmem:[#allocation95_spill] sm:$0xff] %v4116_v17 }
 0x2d6   :  { %3661 = dma.done.wait [#allocation9 + $0x1], 4096 }
 0x2d7   :  { %3662 = vsyncadd [#allocation9 + $0x1], 4294963200 }
 0x2d8   :  { %3663 = dma.done.wait [#allocation9 + $0x3], 8192 }
 0x2d9   :  { %3664 = vsyncadd [#allocation9 + $0x3], 4294959104  ;;  %v6012_v53 = vmov 0   ;;  %v4121_v54 = vld [vmem:[#allocation3 + $0x8] sm:$0xff]  ;;  %v4123_v61 = vld [vmem:[#allocation3] sm:$0xff]  ;;  %s3693_s7 = smov [#allocation19]  }
 0x2da   :  { %910 = vmatprep.mubr.bf16.mxu0 %v6012_v53  ;;  %951 = vmatprep.mubr.bf16.mxu1 %v6012_v53  ;;  %870 = vst [vmem:[#allocation8] sm:$0xff] %v6012_v53  ;;  %6013 = vst [vmem:[#allocation96_spill] sm:$0xff] %v4121_v54  ;;  %v4125_v33 = vld [vmem:[#allocation3 + $0x28] sm:$0xff]  ;;  %v4129_v37 = vld [vmem:[#allocation3 + $0x18] sm:$0xff]  ;;  %s2897_s19 = sshll.u32 %s3693_s7, 4  ;;  %s2898_s19 = int_to_ptr.vmem [resolvable:$true] %s2897_s19 }
 0x2db   :  { %878 = vmatprep.subr.bf16.mxu0 %v4121_v54  ;;  %6014 = vst [vmem:[#allocation97_spill] sm:$0xff] %v4129_v37  ;;  %v4132_v40 = vld [vmem:[#allocation3 + $0x20] sm:$0xff]  ;;  %919 = vmatprep.subr.bf16.mxu1 %v4129_v37  ;;  %v4135_v34 = vld [vmem:[#allocation3 + $0x10] sm:$0xff]  ;;  %v4137_v47 = vld [vmem:[#allocation3 + $0x38] sm:$0xff]  ;;  %s3629_s5 = scalar_lea.vmem %s2898_s19, 512  ;;  %p3634_p13 = scmp.lt.s32.totalorder %s2898_s19, %s2898_s19 }
 0x2dc   :  { %879 = vmatpush1.bf16.msra.mxu0 %v4123_v61  ;;  %v4139_v19 = vld [vmem:[#allocation3 + $0x48] sm:$0xff]  ;;  %920 = vmatpush1.bf16.msra.mxu1 %v4135_v34  ;;  %v4143_v5 = vld [vmem:[#allocation3 + $0x30] sm:$0xff]  ;;  %v4146_v11 = vld [vmem:[#allocation3 + $0x58] sm:$0xff]  ;;  %p3630_p12 = scmp.ne.s32.totalorder %s2898_s19, %s3629_s5  ;;  %p3635_p0 = scmp.lt.s32.totalorder %s3629_s5, %s3629_s5 }
 0x2dd   :  { %880 = vmatprep.subr.bf16.mxu0 %v4125_v33  ;;  %921 = vmatprep.subr.bf16.mxu1 %v4137_v47  ;;  %v4149_v17 = vld [vmem:[#allocation3 + $0x40] sm:$0xff]  ;;  %v4151_v7 = vld [vmem:[#allocation3 + $0x68] sm:$0xff]  ;;  %v4155_v6 = vld [vmem:[#allocation3 + $0x50] sm:$0xff] }
 0x2de   :  { %v4158_v26 = vld [vmem:[#allocation3 + $0x78] sm:$0xff]  ;;  %v4161_v44 = vld [vmem:[#allocation3 + $0x60] sm:$0xff]  ;;  %v4163_v35 = vld [vmem:[#allocation3 + $0x88] sm:$0xff]  ;;  %p3636_p1 = por %p3635_p0, %p3634_p13 }
 0x2df   :  { %v4167_v62 = vld [vmem:[#allocation3 + $0x70] sm:$0xff]  ;;  %v4170_v57 = vld [vmem:[#allocation3 + $0x98] sm:$0xff]  ;;  %v4173_v16 = vld [vmem:[#allocation3 + $0x80] sm:$0xff] }
 0x2e0   :  { %881 = vmatpush1.bf16.msra.mxu0 %v4132_v40  ;;  %922 = vmatpush1.bf16.msra.mxu1 %v4143_v5  ;;  %v4175_v42 = vld [vmem:[#allocation3 + $0xa8] sm:$0xff]  ;;  %v4179_v45 = vld [vmem:[#allocation3 + $0x90] sm:$0xff]  ;;  %v4182_v43 = vld [vmem:[#allocation3 + $0xb8] sm:$0xff]  ;;  %p3637_p2 = pnand %p3636_p1, %p3630_p12 }
 0x2e1   :  { %882 = vmatprep.subr.bf16.mxu0 %v4139_v19  ;;  %923 = vmatprep.subr.bf16.mxu1 %v4146_v11  ;;  %v4185_v39 = vld [vmem:[#allocation3 + $0xa0] sm:$0xff]  ;;  %v4187_v49 = vld [vmem:[#allocation3 + $0xc8] sm:$0xff]  ;;  %v4191_v29 = vld [vmem:[#allocation3 + $0xb0] sm:$0xff] }
 0x2e2   :  { %v4194_v22 = vld [vmem:[#allocation3 + $0xd8] sm:$0xff]  ;;  %v4197_v1 = vld [vmem:[#allocation3 + $0xc0] sm:$0xff]  ;;  %v4199_v31 = vld [vmem:[#allocation3 + $0xe8] sm:$0xff] }
 0x2e3   :  { %v4203_v38 = vld [vmem:[#allocation3 + $0xd0] sm:$0xff]  ;;  %v4206_v32 = vld [vmem:[#allocation3 + $0xf8] sm:$0xff]  ;;  %v4209_v27 = vld [vmem:[#allocation3 + $0xe0] sm:$0xff] }
 0x2e4   :  { %883 = vmatpush1.bf16.msra.mxu0 %v4149_v17  ;;  %924 = vmatpush1.bf16.msra.mxu1 %v4155_v6  ;;  %v4212_v41 = vld [vmem:[#allocation5 + $0x8] sm:$0xff]  ;;  %v4215_v48 = vld [vmem:[#allocation3 + $0xf0] sm:$0xff]  ;;  %v4218_v51 = vld [vmem:[#allocation5 + $0x18] sm:$0xff] }
 0x2e5   :  { %884 = vmatprep.subr.bf16.mxu0 %v4151_v7  ;;  %925 = vmatprep.subr.bf16.mxu1 %v4158_v26  ;;  %v4221_v30 = vld [vmem:[#allocation5] sm:$0xff]  ;;  %v4226_v18 = vld [vmem:[#allocation5 + $0x10] sm:$0xff]  ;;  %v4231_v25 = vld [vmem:[#allocation5 + $0x28] sm:$0xff] }
 0x2e6   :  { %v4233_v21 = vld [vmem:[#allocation5 + $0x38] sm:$0xff]  ;;  %v4237_v13 = vld [vmem:[#allocation5 + $0x20] sm:$0xff]  ;;  %v4239_v23 = vld [vmem:[#allocation5 + $0x30] sm:$0xff] }
 0x2e7   :  { %v4243_v28 = vld [vmem:[#allocation5 + $0x48] sm:$0xff]  ;;  %v4245_v50 = vld [vmem:[#allocation5 + $0x58] sm:$0xff]  ;;  %v4249_v24 = vld [vmem:[#allocation5 + $0x40] sm:$0xff] }
 0x2e8   :  { %885 = vmatpush1.bf16.msra.mxu0 %v4161_v44  ;;  %926 = vmatpush1.bf16.msra.mxu1 %v4167_v62  ;;  %6015 = vst [vmem:[#allocation98_spill] sm:$0xff] %v4245_v50  ;;  %6016 = vst [vmem:[#allocation99_spill] sm:$0xff] %v4249_v24  ;;  %v4251_v8 = vld [vmem:[#allocation5 + $0x50] sm:$0xff]  ;;  %v4255_v12 = vld [vmem:[#allocation5 + $0x68] sm:$0xff] }
 0x2e9   :  { %886 = vmatprep.subr.bf16.mxu0 %v4163_v35  ;;  %927 = vmatprep.subr.bf16.mxu1 %v4170_v57  ;;  %6017 = vst [vmem:[#allocation100_spill] sm:$0xff] %v4251_v8  ;;  %6018 = vst [vmem:[#allocation101_spill] sm:$0xff] %v4255_v12  ;;  %v4257_v9 = vld [vmem:[#allocation5 + $0x78] sm:$0xff]  ;;  %v4261_v4 = vld [vmem:[#allocation5 + $0x60] sm:$0xff] }
 0x2ea   :  { %6019 = vst [vmem:[#allocation102_spill] sm:$0xff] %v4257_v9  ;;  %6020 = vst [vmem:[#allocation103_spill] sm:$0xff] %v4261_v4  ;;  %v4263_v15 = vld [vmem:[#allocation5 + $0x70] sm:$0xff]  ;;  %v4267_v10 = vld [vmem:[#allocation5 + $0x88] sm:$0xff] }
 0x2eb   :  { %6021 = vst [vmem:[#allocation104_spill] sm:$0xff] %v4263_v15  ;;  %6022 = vst [vmem:[#allocation105_spill] sm:$0xff] %v4267_v10  ;;  %v4269_v3 = vld [vmem:[#allocation5 + $0x98] sm:$0xff]  ;;  %v4273_v58 = vld [vmem:[#allocation5 + $0x80] sm:$0xff] }
 0x2ec   :  { %887 = vmatpush1.bf16.msra.mxu0 %v4173_v16  ;;  %928 = vmatpush1.bf16.msra.mxu1 %v4179_v45  ;;  %6023 = vst [vmem:[#allocation106_spill] sm:$0xff] %v4269_v3  ;;  %6024 = vst [vmem:[#allocation107_spill] sm:$0xff] %v4273_v58  ;;  %v4275_v63 = vld [vmem:[#allocation5 + $0x90] sm:$0xff]  ;;  %v4279_v2 = vld [vmem:[#allocation5 + $0xa8] sm:$0xff] }
 0x2ed   :  { %888 = vmatprep.subr.bf16.mxu0 %v4175_v42  ;;  %929 = vmatprep.subr.bf16.mxu1 %v4182_v43  ;;  %6025 = vst [vmem:[#allocation108_spill] sm:$0xff] %v4275_v63  ;;  %6026 = vst [vmem:[#allocation109_spill] sm:$0xff] %v4279_v2  ;;  %v4281_v0 = vld [vmem:[#allocation5 + $0xb8] sm:$0xff]  ;;  %v4285_v60 = vld [vmem:[#allocation5 + $0xa0] sm:$0xff] }
 0x2ee   :  { %6027 = vst [vmem:[#allocation110_spill] sm:$0xff] %v4281_v0  ;;  %6028 = vst [vmem:[#allocation111_spill] sm:$0xff] %v4285_v60  ;;  %v4287_v36 = vld [vmem:[#allocation5 + $0xb0] sm:$0xff]  ;;  %v4291_v20 = vld [vmem:[#allocation5 + $0xc8] sm:$0xff] }
 0x2ef   :  { %6029 = vst [vmem:[#allocation112_spill] sm:$0xff] %v4287_v36  ;;  %6030 = vst [vmem:[#allocation113_spill] sm:$0xff] %v4291_v20  ;;  %v4293_v14 = vld [vmem:[#allocation5 + $0xd8] sm:$0xff]  ;;  %v4297_v46 = vld [vmem:[#allocation5 + $0xc0] sm:$0xff] }
 0x2f0   :  { %889 = vmatpush1.bf16.msra.mxu0 %v4185_v39  ;;  %930 = vmatpush1.bf16.msra.mxu1 %v4191_v29  ;;  %6031 = vst [vmem:[#allocation114_spill] sm:$0xff] %v4293_v14  ;;  %6032 = vst [vmem:[#allocation115_spill] sm:$0xff] %v4297_v46 }
 0x2f1   :  { %890 = vmatprep.subr.bf16.mxu0 %v4187_v49  ;;  %931 = vmatprep.subr.bf16.mxu1 %v4194_v22 }
 0x2f4   :  { %891 = vmatpush1.bf16.msra.mxu0 %v4197_v1  ;;  %932 = vmatpush1.bf16.msra.mxu1 %v4203_v38 }
 0x2f5   :  { %892 = vmatprep.subr.bf16.mxu0 %v4199_v31  ;;  %933 = vmatprep.subr.bf16.mxu1 %v4206_v32 }
 0x2f8   :  { %893 = vmatpush1.bf16.msra.mxu0 %v4209_v27  ;;  %934 = vmatpush1.bf16.msra.mxu1 %v4215_v48 }
 0x2f9   :  { %1006 = vmatprep.subr.bf16.mxu0 %v4212_v41  ;;  %1047 = vmatprep.subr.bf16.mxu1 %v4218_v51 }
 0x2fb   :  { %911 = vmatmul.mubr.bf16.vlgmr.msra.gmra.mrb[32].mxu0 %v6012_v53  ;;  %952 = vmatmul.mubr.bf16.vlgmr.msra.gmra.mrb[32].mxu1 %v6012_v53 }
 0x2fc   :  { %1007 = vmatpush1.bf16.msra.mxu0 %v4221_v30  ;;  %1048 = vmatpush1.bf16.msra.mxu1 %v4226_v18 }
 0x2fd   :  { %1008 = vmatprep.subr.bf16.mxu0 %v4231_v25  ;;  %1049 = vmatprep.subr.bf16.mxu1 %v4233_v21 }
 0x300   :  { %1009 = vmatpush1.bf16.msra.mxu0 %v4237_v13  ;;  %1050 = vmatpush1.bf16.msra.mxu1 %v4239_v23 }
 0x301   :  { %1010 = vmatprep.subr.bf16.mxu0 %v4243_v28  ;;  %1051 = vmatprep.subr.bf16.mxu1 %v4245_v50 }
 0x304   :  { %1011 = vmatpush1.bf16.msra.mxu0 %v4249_v24  ;;  %1052 = vmatpush1.bf16.msra.mxu1 %v4251_v8 }
 0x305   :  { %1012 = vmatprep.subr.bf16.mxu0 %v4255_v12  ;;  %1053 = vmatprep.subr.bf16.mxu1 %v4257_v9 }
 0x308   :  { %1013 = vmatpush1.bf16.msra.mxu0 %v4261_v4  ;;  %1054 = vmatpush1.bf16.msra.mxu1 %v4263_v15 }
 0x309   :  { %1014 = vmatprep.subr.bf16.mxu0 %v4267_v10  ;;  %1055 = vmatprep.subr.bf16.mxu1 %v4269_v3 }
 0x30c   :  { %1015 = vmatpush1.bf16.msra.mxu0 %v4273_v58  ;;  %1056 = vmatpush1.bf16.msra.mxu1 %v4275_v63 }
 0x30d   :  { %1016 = vmatprep.subr.bf16.mxu0 %v4279_v2  ;;  %1057 = vmatprep.subr.bf16.mxu1 %v4281_v0  ;;  %v4299_v2 = vld [vmem:[#allocation5 + $0xd0] sm:$0xff]  ;;  %v4303_v0 = vld [vmem:[#allocation5 + $0xe8] sm:$0xff] }
 0x30e   :  { %6033 = vst [vmem:[#allocation116_spill] sm:$0xff] %v4299_v2  ;;  %6034 = vst [vmem:[#allocation117_spill] sm:$0xff] %v4303_v0 }
 0x310   :  { %1017 = vmatpush1.bf16.msra.mxu0 %v4285_v60  ;;  %1058 = vmatpush1.bf16.msra.mxu1 %v4287_v36  ;;  %v4305_v60 = vld [vmem:[#allocation5 + $0xf8] sm:$0xff]  ;;  %v4309_v36 = vld [vmem:[#allocation5 + $0xe0] sm:$0xff] }
 0x311   :  { %1018 = vmatprep.subr.bf16.mxu0 %v4291_v20  ;;  %1059 = vmatprep.subr.bf16.mxu1 %v4293_v14  ;;  %6035 = vst [vmem:[#allocation118_spill] sm:$0xff] %v4305_v60  ;;  %6036 = vst [vmem:[#allocation119_spill] sm:$0xff] %v4309_v36  ;;  %v4311_v20 = vld [vmem:[#allocation5 + $0xf0] sm:$0xff]  ;;  %v4315_v14 = vld [vmem:[#allocation5 + $0x108] sm:$0xff] }
 0x312   :  { %6037 = vst [vmem:[#allocation120_spill] sm:$0xff] %v4311_v20  ;;  %6038 = vst [vmem:[#allocation121_spill] sm:$0xff] %v4315_v14 }
 0x314   :  { %1019 = vmatpush1.bf16.msra.mxu0 %v4297_v46  ;;  %1060 = vmatpush1.bf16.msra.mxu1 %v4299_v2  ;;  %v4317_v46 = vld [vmem:[#allocation5 + $0x118] sm:$0xff]  ;;  %v4321_v2 = vld [vmem:[#allocation5 + $0x100] sm:$0xff] }
 0x315   :  { %1020 = vmatprep.subr.bf16.mxu0 %v4303_v0  ;;  %1061 = vmatprep.subr.bf16.mxu1 %v4305_v60  ;;  %6039 = vst [vmem:[#allocation122_spill] sm:$0xff] %v4317_v46  ;;  %6040 = vst [vmem:[#allocation123_spill] sm:$0xff] %v4321_v2  ;;  %v4323_v0 = vld [vmem:[#allocation5 + $0x110] sm:$0xff]  ;;  %v4327_v60 = vld [vmem:[#allocation5 + $0x128] sm:$0xff] }
 0x316   :  { %6041 = vst [vmem:[#allocation124_spill] sm:$0xff] %v4323_v0  ;;  %6042 = vst [vmem:[#allocation125_spill] sm:$0xff] %v4327_v60 }
 0x318   :  { %1021 = vmatpush1.bf16.msra.mxu0 %v4309_v36  ;;  %1062 = vmatpush1.bf16.msra.mxu1 %v4311_v20  ;;  %v4329_v36 = vld [vmem:[#allocation5 + $0x138] sm:$0xff]  ;;  %v4333_v20 = vld [vmem:[#allocation5 + $0x120] sm:$0xff] }
 0x319   :  { %1022 = vmatprep.subr.bf16.mxu0 %v4315_v14  ;;  %1063 = vmatprep.subr.bf16.mxu1 %v4317_v46  ;;  %6043 = vst [vmem:[#allocation126_spill] sm:$0xff] %v4329_v36  ;;  %6044 = vst [vmem:[#allocation127_spill] sm:$0xff] %v4333_v20  ;;  %v4335_v14 = vld [vmem:[#allocation5 + $0x130] sm:$0xff]  ;;  %v4339_v46 = vld [vmem:[#allocation5 + $0x148] sm:$0xff] }
 0x31a   :  { %6045 = vst [vmem:[#allocation128_spill] sm:$0xff] %v4335_v14  ;;  %6046 = vst [vmem:[#allocation129_spill] sm:$0xff] %v4339_v46 }
 0x31c   :  { %1023 = vmatpush1.bf16.msra.mxu0 %v4321_v2  ;;  %1064 = vmatpush1.bf16.msra.mxu1 %v4323_v0  ;;  %v4341_v2 = vld [vmem:[#allocation5 + $0x158] sm:$0xff]  ;;  %v4345_v0 = vld [vmem:[#allocation5 + $0x140] sm:$0xff] }
 0x31d   :  { %1024 = vmatprep.subr.bf16.mxu0 %v4327_v60  ;;  %1065 = vmatprep.subr.bf16.mxu1 %v4329_v36  ;;  %6047 = vst [vmem:[#allocation130_spill] sm:$0xff] %v4341_v2  ;;  %6048 = vst [vmem:[#allocation131_spill] sm:$0xff] %v4345_v0  ;;  %v4347_v60 = vld [vmem:[#allocation5 + $0x150] sm:$0xff]  ;;  %v4351_v36 = vld [vmem:[#allocation5 + $0x168] sm:$0xff] }
 0x31e   :  { %6049 = vst [vmem:[#allocation132_spill] sm:$0xff] %v4347_v60  ;;  %6050 = vst [vmem:[#allocation133_spill] sm:$0xff] %v4351_v36 }
 0x320   :  { %1025 = vmatpush1.bf16.msra.mxu0 %v4333_v20  ;;  %1066 = vmatpush1.bf16.msra.mxu1 %v4335_v14  ;;  %v4353_v20 = vld [vmem:[#allocation5 + $0x178] sm:$0xff]  ;;  %v4357_v14 = vld [vmem:[#allocation5 + $0x160] sm:$0xff] }
 0x321   :  { %1026 = vmatprep.subr.bf16.mxu0 %v4339_v46  ;;  %1067 = vmatprep.subr.bf16.mxu1 %v4341_v2  ;;  %6051 = vst [vmem:[#allocation134_spill] sm:$0xff] %v4353_v20  ;;  %6052 = vst [vmem:[#allocation135_spill] sm:$0xff] %v4357_v14  ;;  %v4359_v46 = vld [vmem:[#allocation5 + $0x170] sm:$0xff]  ;;  %v4363_v2 = vld [vmem:[#allocation5 + $0x188] sm:$0xff] }
 0x322   :  { %6053 = vst [vmem:[#allocation136_spill] sm:$0xff] %v4359_v46  ;;  %6054 = vst [vmem:[#allocation137_spill] sm:$0xff] %v4363_v2 }
 0x324   :  { %1027 = vmatpush1.bf16.msra.mxu0 %v4345_v0  ;;  %1068 = vmatpush1.bf16.msra.mxu1 %v4347_v60  ;;  %v4365_v0 = vld [vmem:[#allocation5 + $0x198] sm:$0xff]  ;;  %v4369_v60 = vld [vmem:[#allocation5 + $0x180] sm:$0xff] }
 0x325   :  { %1028 = vmatprep.subr.bf16.mxu0 %v4351_v36  ;;  %1069 = vmatprep.subr.bf16.mxu1 %v4353_v20  ;;  %6055 = vst [vmem:[#allocation138_spill] sm:$0xff] %v4365_v0  ;;  %6056 = vst [vmem:[#allocation139_spill] sm:$0xff] %v4369_v60  ;;  %v4371_v36 = vld [vmem:[#allocation5 + $0x190] sm:$0xff]  ;;  %v4375_v20 = vld [vmem:[#allocation5 + $0x1a8] sm:$0xff] }
 0x326   :  { %6057 = vst [vmem:[#allocation140_spill] sm:$0xff] %v4371_v36  ;;  %6058 = vst [vmem:[#allocation141_spill] sm:$0xff] %v4375_v20 }
 0x328   :  { %1029 = vmatpush1.bf16.msra.mxu0 %v4357_v14  ;;  %1070 = vmatpush1.bf16.msra.mxu1 %v4359_v46  ;;  %v4377_v14 = vld [vmem:[#allocation5 + $0x1b8] sm:$0xff]  ;;  %v4381_v46 = vld [vmem:[#allocation5 + $0x1a0] sm:$0xff] }
 0x329   :  { %1030 = vmatprep.subr.bf16.mxu0 %v4363_v2  ;;  %1071 = vmatprep.subr.bf16.mxu1 %v4365_v0  ;;  %6059 = vst [vmem:[#allocation142_spill] sm:$0xff] %v4377_v14  ;;  %6060 = vst [vmem:[#allocation143_spill] sm:$0xff] %v4381_v46  ;;  %v4383_v2 = vld [vmem:[#allocation5 + $0x1b0] sm:$0xff]  ;;  %v4387_v0 = vld [vmem:[#allocation5 + $0x1c8] sm:$0xff] }
 0x32a   :  { %6061 = vst [vmem:[#allocation144_spill] sm:$0xff] %v4383_v2  ;;  %6062 = vst [vmem:[#allocation145_spill] sm:$0xff] %v4387_v0 }
 0x32c   :  { %1031 = vmatpush1.bf16.msra.mxu0 %v4369_v60  ;;  %1072 = vmatpush1.bf16.msra.mxu1 %v4371_v36  ;;  %v4389_v60 = vld [vmem:[#allocation5 + $0x1d8] sm:$0xff]  ;;  %v4393_v36 = vld [vmem:[#allocation5 + $0x1c0] sm:$0xff] }
 0x32d   :  { %1032 = vmatprep.subr.bf16.mxu0 %v4375_v20  ;;  %1073 = vmatprep.subr.bf16.mxu1 %v4377_v14  ;;  %6063 = vst [vmem:[#allocation146_spill] sm:$0xff] %v4389_v60  ;;  %6064 = vst [vmem:[#allocation147_spill] sm:$0xff] %v4393_v36  ;;  %v4395_v20 = vld [vmem:[#allocation5 + $0x1d0] sm:$0xff]  ;;  %v4399_v14 = vld [vmem:[#allocation5 + $0x1e8] sm:$0xff] }
 0x32e   :  { %6065 = vst [vmem:[#allocation148_spill] sm:$0xff] %v4395_v20  ;;  %6066 = vst [vmem:[#allocation149_spill] sm:$0xff] %v4399_v14 }
 0x330   :  { %1033 = vmatpush1.bf16.msra.mxu0 %v4381_v46  ;;  %1074 = vmatpush1.bf16.msra.mxu1 %v4383_v2  ;;  %v4401_v46 = vld [vmem:[#allocation5 + $0x1f8] sm:$0xff]  ;;  %v4405_v2 = vld [vmem:[#allocation5 + $0x1e0] sm:$0xff] }
 0x331   :  { %1034 = vmatprep.subr.bf16.mxu0 %v4387_v0  ;;  %1075 = vmatprep.subr.bf16.mxu1 %v4389_v60  ;;  %6067 = vst [vmem:[#allocation150_spill] sm:$0xff] %v4401_v46  ;;  %6068 = vst [vmem:[#allocation151_spill] sm:$0xff] %v4405_v2  ;;  %v4407_v0 = vld [vmem:[#allocation5 + $0x1f0] sm:$0xff] }
 0x332   :  { %6069 = vst [vmem:[#allocation152_spill] sm:$0xff] %v4407_v0 }
 0x334   :  { %1035 = vmatpush1.bf16.msra.mxu0 %v4393_v36  ;;  %1076 = vmatpush1.bf16.msra.mxu1 %v4395_v20 }
 0x335   :  { %1036 = vmatprep.subr.bf16.mxu0 %v4399_v14  ;;  %1077 = vmatprep.subr.bf16.mxu1 %v4401_v46 }
 0x338   :  { %1037 = vmatpush1.bf16.msra.mxu0 %v4405_v2  ;;  %1078 = vmatpush1.bf16.msra.mxu1 %v4407_v0 }
 0x339   :  { %1129 = vmatprep.subr.bf16.mxu0 %v4121_v54  ;;  %1170 = vmatprep.subr.bf16.mxu1 %v4129_v37 }
 0x3ce   :  { %v912_v20 = vpop.f32.mrb[32].mxu0  ;;  %v953_v46 = vpop.f32.mrb[32].mxu1 }
 0x3cf   :  { %v960_v36 = vadd.f32 %v912_v20, %v3922_v52  ;;  %v914_v60 = vpop.f32.mrb[33].mxu0  ;;  %v955_v10 = vpop.f32.mrb[33].mxu1  ;;  %v962_v37 = vadd.f32 %v953_v46, %v3925_v55 }
 0x3d0   :  { %v961_v14 = vadd.f32 %v914_v60, %v3928_v56  ;;  %v916_v63 = vpop.f32.mrb[34].mxu0  ;;  %v957_v4 = vpop.f32.mrb[34].mxu1  ;;  %v963_v54 = vadd.f32 %v955_v10, %v3931_v59 }
 0x3d1   :  { %v2960_v58 = vmul.f32 -1.442695, %v960_v36  ;;  %v917_v3 = vpop.f32.mrb[35].mxu0  ;;  %v958_v2 = vpop.f32.mrb[35].mxu1 }
 0x3d2   :  { %v2961_v15 = vmul.f32 -1.442695, %v961_v14  ;;  %v2962_v0 = vmul.f32 -1.442695, %v963_v54 }
 0x3d3   :  { %3071 = vpow2.f32 %v2960_v58 }
 0x3d4   :  { %3073 = vpow2.f32 %v2961_v15 }
 0x3d5   :  { %3075 = vpow2.f32 %v2962_v0  ;;  %v988_v0 = vld [vmem:[#allocation13] sm:$0xff] }
 0x3d6   :  { %3077 = vtanh.f32 %v962_v37 }
 0x3dd   :  { %v3072_v9 = vpop.eup %3071 }
 0x3de   :  { %v3074_v52 = vpop.eup %3073  ;;  %v967_v20 = vadd.f32 1.0, %v3072_v9 }
 0x3df   :  { %v973_v56 = vadd.f32 1.0, %v3074_v52  ;;  %v3076_v60 = vpop.eup %3075 }
 0x3e0   :  { %3079 = vrcp.f32 %v967_v20  ;;  %v3078_v63 = vpop.eup %3077  ;;  %v980_v4 = vadd.f32 1.0, %v3076_v60  ;;  %v6070_v20 = vld [vmem:[#allocation102_spill] sm:$0xff]  ;;  %v6072_v60 = vld [vmem:[#allocation104_spill] sm:$0xff] }
 0x3e1   :  { %3081 = vrcp.f32 %v973_v56  ;;  %v6071_v56 = vld [vmem:[#allocation103_spill] sm:$0xff] }
 0x3e2   :  { %3083 = vrcp.f32 %v980_v4  ;;  %v6075_v4 = vld [vmem:[#allocation107_spill] sm:$0xff] }
 0x3ea   :  { %v3080_v36 = vpop.eup %3079 }
 0x3eb   :  { %v3082_v14 = vpop.eup %3081  ;;  %v984_v2 = vmul.f32 %v3080_v36, %v3078_v63  ;;  %v6073_v63 = vld [vmem:[#allocation105_spill] sm:$0xff]  ;;  %v6074_v36 = vld [vmem:[#allocation106_spill] sm:$0xff] }
 0x3ec   :  { %v983_v58 = vmul.f32 0.0, %v3082_v14  ;;  %v3084_v55 = vpop.eup %3083  ;;  %v6076_v14 = vld [vmem:[#allocation108_spill] sm:$0xff] }
 0x3ee   :  { %v4417_v15 = vadd.f32 %v984_v2, %v983_v58  ;;  %v6077_v2 = vld [vmem:[#allocation109_spill] sm:$0xff]  ;;  %v6078_v58 = vld [vmem:[#allocation110_spill] sm:$0xff] }
 0x3f0   :  { %3085 = vtanh.f32 %v4417_v15 }
 0x3fa   :  { %v3086_v59 = vpop.eup %3085 }
 0x3fb   :  { %v987_v9 = vmul.f32 %v3086_v59, %v3084_v55  ;;  %v6079_v55 = vld [vmem:[#allocation111_spill] sm:$0xff]  ;;  %v6080_v59 = vld [vmem:[#allocation112_spill] sm:$0xff] }
 0x3fd   :  { %v4420_v46 = vadd.f32 %v988_v0, %v987_v9  ;;  %v1128_v52 = vpack.c.bf16 %v987_v9, %v987_v9  ;;  %v6081_v0 = vld [vmem:[#allocation113_spill] sm:$0xff]  ;;  %v6082_v9 = vld [vmem:[#allocation114_spill] sm:$0xff] }
 0x3ff   :  { %v990_v3 = vpack.c.bf16 %v4420_v46, %v4420_v46 }
 0x401   :  { %991 = vst [vmem:[#allocation8] sm:$0xf] %v990_v3  ;;  %v6083_v3 = vld [vmem:[#allocation115_spill] sm:$0xff] }
 0x408   :  { %v998_v10 = vld [vmem:[#allocation8] sm:$0xff] }
 0x409   :  { %v2964_v54 = vcombine.high %v998_v10, %v998_v10  ;;  %v2963_v37 = vcombine.low %v998_v10, %v998_v10  ;;  %v6084_v10 = vld [vmem:[#allocation116_spill] sm:$0xff] }
 0x40b   :  { %1038 = vmatprep.mubr.bf16.mxu0 %v2964_v54  ;;  %1079 = vmatprep.mubr.bf16.mxu1 %v2964_v54  ;;  %v6085_v54 = vld [vmem:[#allocation117_spill] sm:$0xff] }
 0x40c   :  { %1039 = vmatmul.mubr.bf16.vlgmr.msra.gmra.mrb[36].mxu0 %v2963_v37  ;;  %1080 = vmatmul.mubr.bf16.vlgmr.msra.gmra.mrb[36].mxu1 %v2963_v37  ;;  %v6086_v37 = vld [vmem:[#allocation118_spill] sm:$0xff] }
 0x40d   :  { %1130 = vmatpush1.bf16.msra.mxu0 %v4123_v61  ;;  %1171 = vmatpush1.bf16.msra.mxu1 %v4135_v34 }
 0x40e   :  { %1131 = vmatprep.subr.bf16.mxu0 %v4125_v33  ;;  %1172 = vmatprep.subr.bf16.mxu1 %v4137_v47 }
 0x40f   :  { %1161 = vmatprep.mubr.bf16.mxu0 %v6012_v53  ;;  %1202 = vmatprep.mubr.bf16.mxu1 %v6012_v53 }
 0x411   :  { %1132 = vmatpush1.bf16.msra.mxu0 %v4132_v40  ;;  %1173 = vmatpush1.bf16.msra.mxu1 %v4143_v5 }
 0x412   :  { %1133 = vmatprep.subr.bf16.mxu0 %v4139_v19  ;;  %1174 = vmatprep.subr.bf16.mxu1 %v4146_v11 }
 0x415   :  { %1134 = vmatpush1.bf16.msra.mxu0 %v4149_v17  ;;  %1175 = vmatpush1.bf16.msra.mxu1 %v4155_v6 }
 0x416   :  { %1135 = vmatprep.subr.bf16.mxu0 %v4151_v7  ;;  %1176 = vmatprep.subr.bf16.mxu1 %v4158_v26 }
 0x419   :  { %1136 = vmatpush1.bf16.msra.mxu0 %v4161_v44  ;;  %1177 = vmatpush1.bf16.msra.mxu1 %v4167_v62 }
 0x41a   :  { %1137 = vmatprep.subr.bf16.mxu0 %v4163_v35  ;;  %1178 = vmatprep.subr.bf16.mxu1 %v4170_v57 }
 0x41d   :  { %1138 = vmatpush1.bf16.msra.mxu0 %v4173_v16  ;;  %1179 = vmatpush1.bf16.msra.mxu1 %v4179_v45 }
 0x41e   :  { %1139 = vmatprep.subr.bf16.mxu0 %v4175_v42  ;;  %1180 = vmatprep.subr.bf16.mxu1 %v4182_v43 }
 0x421   :  { %1140 = vmatpush1.bf16.msra.mxu0 %v4185_v39  ;;  %1181 = vmatpush1.bf16.msra.mxu1 %v4191_v29 }
 0x422   :  { %1141 = vmatprep.subr.bf16.mxu0 %v4187_v49  ;;  %1182 = vmatprep.subr.bf16.mxu1 %v4194_v22 }
 0x425   :  { %1142 = vmatpush1.bf16.msra.mxu0 %v4197_v1  ;;  %1183 = vmatpush1.bf16.msra.mxu1 %v4203_v38 }
 0x426   :  { %1143 = vmatprep.subr.bf16.mxu0 %v4199_v31  ;;  %1184 = vmatprep.subr.bf16.mxu1 %v4206_v32 }
 0x429   :  { %1144 = vmatpush1.bf16.msra.mxu0 %v4209_v27  ;;  %1185 = vmatpush1.bf16.msra.mxu1 %v4215_v48 }
 0x42a   :  { %1258 = vmatprep.subr.bf16.mxu0 %v4212_v41  ;;  %1299 = vmatprep.subr.bf16.mxu1 %v4218_v51 }
 0x42c   :  { %1162 = vmatmul.mubr.bf16.vlgmr.msra.gmra.mrb[40].mxu0 %v1128_v52  ;;  %1203 = vmatmul.mubr.bf16.vlgmr.msra.gmra.mrb[40].mxu1 %v1128_v52  ;;  %v6087_v52 = vld [vmem:[#allocation119_spill] sm:$0xff] }
 0x42d   :  { %1259 = vmatpush1.bf16.msra.mxu0 %v4221_v30  ;;  %1300 = vmatpush1.bf16.msra.mxu1 %v4226_v18 }
 0x42e   :  { %1260 = vmatprep.subr.bf16.mxu0 %v4231_v25  ;;  %1301 = vmatprep.subr.bf16.mxu1 %v4233_v21 }
 0x431   :  { %1261 = vmatpush1.bf16.msra.mxu0 %v4237_v13  ;;  %1302 = vmatpush1.bf16.msra.mxu1 %v4239_v23 }
 0x432   :  { %1262 = vmatprep.subr.bf16.mxu0 %v4243_v28  ;;  %1303 = vmatprep.subr.bf16.mxu1 %v4245_v50 }
 0x435   :  { %1263 = vmatpush1.bf16.msra.mxu0 %v4249_v24  ;;  %1304 = vmatpush1.bf16.msra.mxu1 %v4251_v8 }
 0x436   :  { %1264 = vmatprep.subr.bf16.mxu0 %v4255_v12  ;;  %1305 = vmatprep.subr.bf16.mxu1 %v6070_v20 }
 0x439   :  { %1265 = vmatpush1.bf16.msra.mxu0 %v6071_v56  ;;  %1306 = vmatpush1.bf16.msra.mxu1 %v6072_v60 }
 0x43a   :  { %1266 = vmatprep.subr.bf16.mxu0 %v6073_v63  ;;  %1307 = vmatprep.subr.bf16.mxu1 %v6074_v36  ;;  %v6124_v36 = vld [vmem:[#allocation66_spill] sm:$0xff] }
 0x43d   :  { %1267 = vmatpush1.bf16.msra.mxu0 %v6075_v4  ;;  %1308 = vmatpush1.bf16.msra.mxu1 %v6076_v14  ;;  %v6123_v14 = vld [vmem:[#allocation64_spill] sm:$0xff] }
 0x43e   :  { %1268 = vmatprep.subr.bf16.mxu0 %v6077_v2  ;;  %1309 = vmatprep.subr.bf16.mxu1 %v6078_v58  ;;  %v6088_v2 = vld [vmem:[#allocation120_spill] sm:$0xff]  ;;  %v6089_v58 = vld [vmem:[#allocation121_spill] sm:$0xff] }
 0x441   :  { %1269 = vmatpush1.bf16.msra.mxu0 %v6079_v55  ;;  %1310 = vmatpush1.bf16.msra.mxu1 %v6080_v59  ;;  %v6090_v55 = vld [vmem:[#allocation122_spill] sm:$0xff]  ;;  %v6091_v59 = vld [vmem:[#allocation123_spill] sm:$0xff] }
 0x442   :  { %1270 = vmatprep.subr.bf16.mxu0 %v6081_v0  ;;  %1311 = vmatprep.subr.bf16.mxu1 %v6082_v9  ;;  %v6092_v0 = vld [vmem:[#allocation124_spill] sm:$0xff]  ;;  %v6093_v9 = vld [vmem:[#allocation125_spill] sm:$0xff] }
 0x445   :  { %1271 = vmatpush1.bf16.msra.mxu0 %v6083_v3  ;;  %1312 = vmatpush1.bf16.msra.mxu1 %v6084_v10  ;;  %v6094_v3 = vld [vmem:[#allocation126_spill] sm:$0xff]  ;;  %v6095_v10 = vld [vmem:[#allocation127_spill] sm:$0xff] }
 0x446   :  { %1272 = vmatprep.subr.bf16.mxu0 %v6085_v54  ;;  %1313 = vmatprep.subr.bf16.mxu1 %v6086_v37  ;;  %v6096_v54 = vld [vmem:[#allocation128_spill] sm:$0xff]  ;;  %v6097_v37 = vld [vmem:[#allocation129_spill] sm:$0xff] }
 0x449   :  { %1273 = vmatpush1.bf16.msra.mxu0 %v6087_v52  ;;  %1314 = vmatpush1.bf16.msra.mxu1 %v6088_v2  ;;  %v6098_v52 = vld [vmem:[#allocation130_spill] sm:$0xff]  ;;  %v6099_v2 = vld [vmem:[#allocation131_spill] sm:$0xff] }
 0x44a   :  { %1274 = vmatprep.subr.bf16.mxu0 %v6089_v58  ;;  %1315 = vmatprep.subr.bf16.mxu1 %v6090_v55  ;;  %v6100_v58 = vld [vmem:[#allocation132_spill] sm:$0xff]  ;;  %v6101_v55 = vld [vmem:[#allocation133_spill] sm:$0xff] }
 0x44d   :  { %1275 = vmatpush1.bf16.msra.mxu0 %v6091_v59  ;;  %1316 = vmatpush1.bf16.msra.mxu1 %v6092_v0  ;;  %v6102_v59 = vld [vmem:[#allocation134_spill] sm:$0xff]  ;;  %v6103_v0 = vld [vmem:[#allocation135_spill] sm:$0xff] }
 0x44e   :  { %1276 = vmatprep.subr.bf16.mxu0 %v6093_v9  ;;  %1317 = vmatprep.subr.bf16.mxu1 %v6094_v3  ;;  %v6104_v9 = vld [vmem:[#allocation136_spill] sm:$0xff]  ;;  %v6105_v3 = vld [vmem:[#allocation137_spill] sm:$0xff] }
 0x451   :  { %1277 = vmatpush1.bf16.msra.mxu0 %v6095_v10  ;;  %1318 = vmatpush1.bf16.msra.mxu1 %v6096_v54  ;;  %v6106_v10 = vld [vmem:[#allocation138_spill] sm:$0xff]  ;;  %v6107_v54 = vld [vmem:[#allocation139_spill] sm:$0xff] }
 0x452   :  { %1278 = vmatprep.subr.bf16.mxu0 %v6097_v37  ;;  %1319 = vmatprep.subr.bf16.mxu1 %v6098_v52  ;;  %v6108_v37 = vld [vmem:[#allocation140_spill] sm:$0xff]  ;;  %v6109_v52 = vld [vmem:[#allocation141_spill] sm:$0xff] }
 0x455   :  { %1279 = vmatpush1.bf16.msra.mxu0 %v6099_v2  ;;  %1320 = vmatpush1.bf16.msra.mxu1 %v6100_v58  ;;  %v6110_v2 = vld [vmem:[#allocation142_spill] sm:$0xff]  ;;  %v6111_v58 = vld [vmem:[#allocation143_spill] sm:$0xff] }
 0x456   :  { %1280 = vmatprep.subr.bf16.mxu0 %v6101_v55  ;;  %1321 = vmatprep.subr.bf16.mxu1 %v6102_v59  ;;  %v6112_v55 = vld [vmem:[#allocation144_spill] sm:$0xff]  ;;  %v6113_v59 = vld [vmem:[#allocation145_spill] sm:$0xff] }
 0x459   :  { %1281 = vmatpush1.bf16.msra.mxu0 %v6103_v0  ;;  %1322 = vmatpush1.bf16.msra.mxu1 %v6104_v9  ;;  %v6114_v0 = vld [vmem:[#allocation146_spill] sm:$0xff]  ;;  %v6115_v9 = vld [vmem:[#allocation147_spill] sm:$0xff] }
 0x45a   :  { %1282 = vmatprep.subr.bf16.mxu0 %v6105_v3  ;;  %1323 = vmatprep.subr.bf16.mxu1 %v6106_v10  ;;  %v6116_v3 = vld [vmem:[#allocation148_spill] sm:$0xff]  ;;  %v6117_v10 = vld [vmem:[#allocation149_spill] sm:$0xff] }
 0x45d   :  { %1283 = vmatpush1.bf16.msra.mxu0 %v6107_v54  ;;  %1324 = vmatpush1.bf16.msra.mxu1 %v6108_v37  ;;  %v6118_v54 = vld [vmem:[#allocation150_spill] sm:$0xff]  ;;  %v6119_v37 = vld [vmem:[#allocation151_spill] sm:$0xff] }
 0x45e   :  { %1284 = vmatprep.subr.bf16.mxu0 %v6109_v52  ;;  %1325 = vmatprep.subr.bf16.mxu1 %v6110_v2  ;;  %v6120_v52 = vld [vmem:[#allocation152_spill] sm:$0xff] }
 0x45f   :  { %v6121_v2 = vld [vmem:[#allocation96_spill] sm:$0xff] }
 0x461   :  { %1285 = vmatpush1.bf16.msra.mxu0 %v6111_v58  ;;  %1326 = vmatpush1.bf16.msra.mxu1 %v6112_v55  ;;  %v6122_v58 = vld [vmem:[#allocation97_spill] sm:$0xff] }
 0x462   :  { %1286 = vmatprep.subr.bf16.mxu0 %v6113_v59  ;;  %1327 = vmatprep.subr.bf16.mxu1 %v6114_v0 }
 0x465   :  { %1287 = vmatpush1.bf16.msra.mxu0 %v6115_v9  ;;  %1328 = vmatpush1.bf16.msra.mxu1 %v6116_v3 }
 0x466   :  { %1288 = vmatprep.subr.bf16.mxu0 %v6117_v10  ;;  %1329 = vmatprep.subr.bf16.mxu1 %v6118_v54 }
 0x469   :  { %1289 = vmatpush1.bf16.msra.mxu0 %v6119_v37  ;;  %1330 = vmatpush1.bf16.msra.mxu1 %v6120_v52  ;;  %v6125_v52 = vld [vmem:[#allocation67_spill] sm:$0xff] }
 0x46a   :  { %1382 = vmatprep.subr.bf16.mxu0 %v6121_v2  ;;  %1423 = vmatprep.subr.bf16.mxu1 %v6122_v58  ;;  %v6126_v58 = vld [vmem:[#allocation65_spill] sm:$0xff] }
 0x4df   :  { %v1040_v55 = vpop.f32.mrb[36].mxu0  ;;  %v1081_v59 = vpop.f32.mrb[36].mxu1 }
 0x4e0   :  { %v1088_v0 = vadd.f32 %v1040_v55, %v6123_v14  ;;  %v1042_v4 = vpop.f32.mrb[37].mxu0  ;;  %v1083_v9 = vpop.f32.mrb[37].mxu1  ;;  %v1090_v12 = vadd.f32 %v1081_v59, %v6126_v58  ;;  %v6128_v59 = vld [vmem:[#allocation36_spill] sm:$0xff] }
 0x4e1   :  { %v1089_v3 = vadd.f32 %v1042_v4, %v6124_v36  ;;  %v1044_v63 = vpop.f32.mrb[38].mxu0  ;;  %v1085_v10 = vpop.f32.mrb[38].mxu1  ;;  %v1091_v2 = vadd.f32 %v1083_v9, %v6125_v52 }
 0x4e2   :  { %v2965_v60 = vmul.f32 -1.442695, %v1088_v0  ;;  %v1045_v54 = vpop.f32.mrb[39].mxu0  ;;  %v1086_v56 = vpop.f32.mrb[39].mxu1 }
 0x4e3   :  { %v2966_v37 = vmul.f32 -1.442695, %v1089_v3  ;;  %v2967_v20 = vmul.f32 -1.442695, %v1091_v2 }
 0x4e4   :  { %3087 = vpow2.f32 %v2965_v60 }
 0x4e5   :  { %3089 = vpow2.f32 %v2966_v37 }
 0x4e6   :  { %3091 = vpow2.f32 %v2967_v20 }
 0x4e7   :  { %3093 = vtanh.f32 %v1090_v12  ;;  %v6129_v12 = vld [vmem:[#allocation38_spill] sm:$0xff] }
 0x4ee   :  { %v3088_v8 = vpop.eup %3087 }
 0x4ef   :  { %v3090_v24 = vpop.eup %3089  ;;  %v1095_v14 = vadd.f32 1.0, %v3088_v8 }
 0x4f0   :  { %v1101_v55 = vadd.f32 1.0, %v3090_v24  ;;  %v3092_v63 = vpop.eup %3091 }
 0x4f1   :  { %3095 = vrcp.f32 %v1095_v14  ;;  %v3094_v36 = vpop.eup %3093  ;;  %v1108_v60 = vadd.f32 1.0, %v3092_v63 }
 0x4f2   :  { %3097 = vrcp.f32 %v1101_v55 }
 0x4f3   :  { %3099 = vrcp.f32 %v1108_v60 }
 0x4fb   :  { %v3096_v4 = vpop.eup %3095 }
 0x4fc   :  { %v3098_v56 = vpop.eup %3097  ;;  %v1112_v0 = vmul.f32 %v3096_v4, %v3094_v36  ;;  %v6130_v36 = vld [vmem:[#allocation39_spill] sm:$0xff] }
 0x4fd   :  { %v1111_v3 = vmul.f32 0.0, %v3098_v56  ;;  %v3100_v56 = vpop.eup %3099 }
 0x4ff   :  { %v4526_v10 = vadd.f32 %v1112_v0, %v1111_v3  ;;  %v1163_v9 = vpop.f32.mrb[40].mxu0  ;;  %v1204_v54 = vpop.f32.mrb[40].mxu1 }
 0x500   :  { %v1211_v37 = vadd.f32 %v1163_v9, %v6128_v59  ;;  %v1165_v8 = vpop.f32.mrb[41].mxu0  ;;  %v1206_v20 = vpop.f32.mrb[41].mxu1  ;;  %v6131_v9 = vld [vmem:[#allocation37_spill] sm:$0xff] }
 0x501   :  { %6127 = vst [vmem:[#allocation96_spill] sm:$0xff] %v4526_v10  ;;  %3101 = vtanh.f32 %v4526_v10  ;;  %v1212_v24 = vadd.f32 %v1165_v8, %v6129_v12  ;;  %v1167_v52 = vpop.f32.mrb[42].mxu0  ;;  %v1208_v2 = vpop.f32.mrb[42].mxu1  ;;  %v1214_v4 = vadd.f32 %v1206_v20, %v6130_v36  ;;  %v1213_v59 = vadd.f32 %v1204_v54, %v6131_v9 }
 0x502   :  { %v2968_v58 = vmul.f32 -1.442695, %v1211_v37  ;;  %v1168_v14 = vpop.f32.mrb[43].mxu0  ;;  %v1209_v55 = vpop.f32.mrb[43].mxu1 }
 0x503   :  { %v2969_v63 = vmul.f32 -1.442695, %v1212_v24  ;;  %v2970_v60 = vmul.f32 -1.442695, %v1214_v4 }
 0x504   :  { %3103 = vpow2.f32 %v2968_v58 }
 0x505   :  { %3105 = vpow2.f32 %v2969_v63 }
 0x506   :  { %3107 = vpow2.f32 %v2970_v60 }
 0x507   :  { %3109 = vtanh.f32 %v1213_v59  ;;  %v6171_v59 = vld [vmem:[#allocation137_spill] sm:$0xff] }
 0x50b   :  { %v3102_v0 = vpop.eup %3101 }
 0x50c   :  { %v1115_v3 = vmul.f32 %v3102_v0, %v3100_v56 }
 0x50e   :  { %v3104_v50 = vpop.eup %3103  ;;  %v1116_v10 = vpack.c.bf16 %v1115_v3, %v1115_v3  ;;  %v1118_v8 = vadd.f32 %v1115_v3, %v4420_v46 }
 0x50f   :  { %v3106_v12 = vpop.eup %3105  ;;  %v1218_v52 = vadd.f32 1.0, %v3104_v50 }
 0x510   :  { %1117 = vst [vmem:[#allocation8 + $0x4] sm:$0xf] %v1116_v10  ;;  %v1119_v37 = vpack.c.bf16 %v1118_v8, %v1118_v8  ;;  %v1224_v24 = vadd.f32 1.0, %v3106_v12  ;;  %v3108_v20 = vpop.eup %3107  ;;  %v1240_v10 = vld [vmem:[#allocation13 + $0x8] sm:$0xff]  ;;  %v6172_v8 = vld [vmem:[#allocation138_spill] sm:$0xff]  ;;  %v6173_v12 = vld [vmem:[#allocation139_spill] sm:$0xff] }
 0x511   :  { %3111 = vrcp.f32 %v1218_v52  ;;  %v3110_v2 = vpop.eup %3109  ;;  %v1231_v54 = vadd.f32 1.0, %v3108_v20  ;;  %v6174_v52 = vld [vmem:[#allocation140_spill] sm:$0xff]  ;;  %v6177_v20 = vld [vmem:[#allocation143_spill] sm:$0xff] }
 0x512   :  { %1120 = vst [vmem:[#allocation19] sm:$0xf] %v1119_v37  ;;  %3113 = vrcp.f32 %v1224_v24  ;;  %v6175_v37 = vld [vmem:[#allocation141_spill] sm:$0xff]  ;;  %v6176_v24 = vld [vmem:[#allocation142_spill] sm:$0xff] }
 0x513   :  { %3115 = vrcp.f32 %v1231_v54  ;;  %v6182_v54 = vld [vmem:[#allocation148_spill] sm:$0xff] }
 0x51b   :  { %v3112_v58 = vpop.eup %3111 }
 0x51c   :  { %v3114_v14 = vpop.eup %3113  ;;  %v1235_v55 = vmul.f32 %v3112_v58, %v3110_v2  ;;  %v6178_v2 = vld [vmem:[#allocation144_spill] sm:$0xff]  ;;  %v6179_v58 = vld [vmem:[#allocation145_spill] sm:$0xff] }
 0x51d   :  { %v1234_v63 = vmul.f32 %v3114_v14, %v4417_v15  ;;  %v3116_v50 = vpop.eup %3115  ;;  %v6170_v15 = vld [vmem:[#allocation136_spill] sm:$0xff]  ;;  %v6180_v14 = vld [vmem:[#allocation146_spill] sm:$0xff] }
 0x51f   :  { %v4535_v36 = vadd.f32 %v1235_v55, %v1234_v63  ;;  %v6181_v55 = vld [vmem:[#allocation147_spill] sm:$0xff]  ;;  %v6183_v63 = vld [vmem:[#allocation149_spill] sm:$0xff] }
 0x521   :  { %3117 = vtanh.f32 %v4535_v36 }
 0x52b   :  { %v3118_v46 = vpop.eup %3117 }
 0x52c   :  { %v1238_v4 = vmul.f32 %v3118_v46, %v3116_v50  ;;  %v6184_v50 = vld [vmem:[#allocation150_spill] sm:$0xff]  ;;  %v6185_v46 = vld [vmem:[#allocation151_spill] sm:$0xff] }
 0x52e   :  { %v4538_v56 = vadd.f32 %v1240_v10, %v1238_v4  ;;  %v6186_v10 = vld [vmem:[#allocation152_spill] sm:$0xff] }
 0x530   :  { %v1242_v0 = vpack.c.bf16 %v4538_v56, %v4538_v56 }
 0x532   :  { %1243 = vst [vmem:[#allocation8] sm:$0xf] %v1242_v0  ;;  %v4641_v0 = vld [vmem:[#allocation3 + $0x18] sm:$0xff] }
 0x533   :  { %6188 = vst [vmem:[#allocation64_spill] sm:$0xff] %v4641_v0 }
 0x539   :  { %v1250_v60 = vld [vmem:[#allocation8] sm:$0xff] }
 0x53a   :  { %v2972_v3 = vcombine.high %v1250_v60, %v1250_v60  ;;  %v2971_v9 = vcombine.low %v1250_v60, %v1250_v60 }
 0x53c   :  { %1290 = vmatprep.mubr.bf16.mxu0 %v2972_v3  ;;  %1331 = vmatprep.mubr.bf16.mxu1 %v2972_v3 }
 0x53d   :  { %1291 = vmatmul.mubr.bf16.vlgmr.msra.gmra.mrb[44].mxu0 %v2971_v9  ;;  %1332 = vmatmul.mubr.bf16.vlgmr.msra.gmra.mrb[44].mxu1 %v2971_v9  ;;  %v6189_v9 = vld [vmem:[#allocation68_spill] sm:$0xff] }
 0x53e   :  { %1383 = vmatpush1.bf16.msra.mxu0 %v4123_v61  ;;  %1424 = vmatpush1.bf16.msra.mxu1 %v4135_v34  ;;  %v6163_v61 = vld [vmem:[#allocation129_spill] sm:$0xff]  ;;  %v6166_v34 = vld [vmem:[#allocation132_spill] sm:$0xff] }
 0x53f   :  { %1384 = vmatprep.subr.bf16.mxu0 %v4125_v33  ;;  %1425 = vmatprep.subr.bf16.mxu1 %v4137_v47  ;;  %v6164_v33 = vld [vmem:[#allocation130_spill] sm:$0xff]  ;;  %v6167_v47 = vld [vmem:[#allocation133_spill] sm:$0xff] }
 0x540   :  { %1414 = vmatprep.mubr.bf16.mxu0 %v6012_v53  ;;  %1455 = vmatprep.mubr.bf16.mxu1 %v6012_v53 }
 0x542   :  { %1385 = vmatpush1.bf16.msra.mxu0 %v4132_v40  ;;  %1426 = vmatpush1.bf16.msra.mxu1 %v4143_v5  ;;  %v6165_v40 = vld [vmem:[#allocation131_spill] sm:$0xff] }
 0x543   :  { %1386 = vmatprep.subr.bf16.mxu0 %v4139_v19  ;;  %1427 = vmatprep.subr.bf16.mxu1 %v4146_v11  ;;  %v6160_v11 = vld [vmem:[#allocation126_spill] sm:$0xff]  ;;  %v6169_v5 = vld [vmem:[#allocation135_spill] sm:$0xff] }
 0x544   :  { %v6168_v19 = vld [vmem:[#allocation134_spill] sm:$0xff] }
 0x546   :  { %1387 = vmatpush1.bf16.msra.mxu0 %v4149_v17  ;;  %1428 = vmatpush1.bf16.msra.mxu1 %v4155_v6  ;;  %v6143_v6 = vld [vmem:[#allocation109_spill] sm:$0xff]  ;;  %v6162_v17 = vld [vmem:[#allocation128_spill] sm:$0xff] }
 0x547   :  { %1388 = vmatprep.subr.bf16.mxu0 %v4151_v7  ;;  %1429 = vmatprep.subr.bf16.mxu1 %v4158_v26  ;;  %v6157_v26 = vld [vmem:[#allocation123_spill] sm:$0xff] }
 0x548   :  { %v6161_v7 = vld [vmem:[#allocation127_spill] sm:$0xff] }
 0x54a   :  { %1389 = vmatpush1.bf16.msra.mxu0 %v4161_v44  ;;  %1430 = vmatpush1.bf16.msra.mxu1 %v4167_v62  ;;  %v6144_v62 = vld [vmem:[#allocation110_spill] sm:$0xff]  ;;  %v6159_v44 = vld [vmem:[#allocation125_spill] sm:$0xff] }
 0x54b   :  { %1390 = vmatprep.subr.bf16.mxu0 %v4163_v35  ;;  %1431 = vmatprep.subr.bf16.mxu1 %v4170_v57  ;;  %v6156_v57 = vld [vmem:[#allocation122_spill] sm:$0xff]  ;;  %v6158_v35 = vld [vmem:[#allocation124_spill] sm:$0xff] }
 0x54e   :  { %1391 = vmatpush1.bf16.msra.mxu0 %v4173_v16  ;;  %1432 = vmatpush1.bf16.msra.mxu1 %v4179_v45  ;;  %v6142_v45 = vld [vmem:[#allocation108_spill] sm:$0xff]  ;;  %v6145_v16 = vld [vmem:[#allocation111_spill] sm:$0xff] }
 0x54f   :  { %1392 = vmatprep.subr.bf16.mxu0 %v4175_v42  ;;  %1433 = vmatprep.subr.bf16.mxu1 %v4182_v43  ;;  %v1381_v42 = vpack.c.bf16 %v1238_v4, %v1238_v4  ;;  %v6141_v43 = vld [vmem:[#allocation107_spill] sm:$0xff] }
 0x550   :  { %v4638_v4 = vld [vmem:[#allocation3 + $0x8] sm:$0xff] }
 0x551   :  { %6187 = vst [vmem:[#allocation97_spill] sm:$0xff] %v4638_v4 }
 0x552   :  { %1393 = vmatpush1.bf16.msra.mxu0 %v4185_v39  ;;  %1434 = vmatpush1.bf16.msra.mxu1 %v4191_v29  ;;  %v6136_v39 = vld [vmem:[#allocation102_spill] sm:$0xff]  ;;  %v6155_v29 = vld [vmem:[#allocation121_spill] sm:$0xff] }
 0x553   :  { %1394 = vmatprep.subr.bf16.mxu0 %v4187_v49  ;;  %1435 = vmatprep.subr.bf16.mxu1 %v4194_v22  ;;  %v6153_v49 = vld [vmem:[#allocation119_spill] sm:$0xff]  ;;  %v6154_v22 = vld [vmem:[#allocation120_spill] sm:$0xff] }
 0x556   :  { %1395 = vmatpush1.bf16.msra.mxu0 %v4197_v1  ;;  %1436 = vmatpush1.bf16.msra.mxu1 %v4203_v38  ;;  %v6135_v38 = vld [vmem:[#allocation101_spill] sm:$0xff]  ;;  %v6152_v1 = vld [vmem:[#allocation118_spill] sm:$0xff] }
 0x557   :  { %1396 = vmatprep.subr.bf16.mxu0 %v4199_v31  ;;  %1437 = vmatprep.subr.bf16.mxu1 %v4206_v32  ;;  %v6133_v31 = vld [vmem:[#allocation99_spill] sm:$0xff]  ;;  %v6134_v32 = vld [vmem:[#allocation100_spill] sm:$0xff] }
 0x55a   :  { %1397 = vmatpush1.bf16.msra.mxu0 %v4209_v27  ;;  %1438 = vmatpush1.bf16.msra.mxu1 %v4215_v48  ;;  %v6132_v27 = vld [vmem:[#allocation98_spill] sm:$0xff]  ;;  %v6151_v48 = vld [vmem:[#allocation117_spill] sm:$0xff] }
 0x55b   :  { %1511 = vmatprep.subr.bf16.mxu0 %v4212_v41  ;;  %1552 = vmatprep.subr.bf16.mxu1 %v4218_v51  ;;  %v6149_v41 = vld [vmem:[#allocation115_spill] sm:$0xff]  ;;  %v6150_v51 = vld [vmem:[#allocation116_spill] sm:$0xff] }
 0x55d   :  { %1415 = vmatmul.mubr.bf16.vlgmr.msra.gmra.mrb[48].mxu0 %v1381_v42  ;;  %1456 = vmatmul.mubr.bf16.vlgmr.msra.gmra.mrb[48].mxu1 %v1381_v42 }
 0x55e   :  { %1512 = vmatpush1.bf16.msra.mxu0 %v4221_v30  ;;  %1553 = vmatpush1.bf16.msra.mxu1 %v4226_v18  ;;  %v6137_v18 = vld [vmem:[#allocation103_spill] sm:$0xff]  ;;  %v6148_v30 = vld [vmem:[#allocation114_spill] sm:$0xff] }
 0x55f   :  { %1513 = vmatprep.subr.bf16.mxu0 %v4231_v25  ;;  %1554 = vmatprep.subr.bf16.mxu1 %v4233_v21  ;;  %v6138_v25 = vld [vmem:[#allocation104_spill] sm:$0xff]  ;;  %v6139_v21 = vld [vmem:[#allocation105_spill] sm:$0xff] }
 0x562   :  { %1514 = vmatpush1.bf16.msra.mxu0 %v4237_v13  ;;  %1555 = vmatpush1.bf16.msra.mxu1 %v4239_v23  ;;  %v6140_v13 = vld [vmem:[#allocation106_spill] sm:$0xff]  ;;  %v6146_v23 = vld [vmem:[#allocation112_spill] sm:$0xff] }
 0x563   :  { %1515 = vmatprep.subr.bf16.mxu0 %v4243_v28  ;;  %1556 = vmatprep.subr.bf16.mxu1 %v6132_v27  ;;  %v6147_v28 = vld [vmem:[#allocation113_spill] sm:$0xff] }
 0x566   :  { %1516 = vmatpush1.bf16.msra.mxu0 %v6133_v31  ;;  %1557 = vmatpush1.bf16.msra.mxu1 %v6134_v32  ;;  %v6190_v32 = vld [vmem:[#allocation70_spill] sm:$0xff] }
 0x567   :  { %1517 = vmatprep.subr.bf16.mxu0 %v6135_v38  ;;  %1558 = vmatprep.subr.bf16.mxu1 %v6136_v39 }
 0x56a   :  { %1518 = vmatpush1.bf16.msra.mxu0 %v6137_v18  ;;  %1559 = vmatpush1.bf16.msra.mxu1 %v6138_v25 }
 0x56b   :  { %1519 = vmatprep.subr.bf16.mxu0 %v6139_v21  ;;  %1560 = vmatprep.subr.bf16.mxu1 %v6140_v13 }
 0x56e   :  { %1520 = vmatpush1.bf16.msra.mxu0 %v6141_v43  ;;  %1561 = vmatpush1.bf16.msra.mxu1 %v6142_v45  ;;  %v6191_v45 = vld [vmem:[#allocation71_spill] sm:$0xff] }
 0x56f   :  { %1521 = vmatprep.subr.bf16.mxu0 %v6143_v6  ;;  %1562 = vmatprep.subr.bf16.mxu1 %v6144_v62 }
 0x572   :  { %1522 = vmatpush1.bf16.msra.mxu0 %v6145_v16  ;;  %1563 = vmatpush1.bf16.msra.mxu1 %v6146_v23  ;;  %v6192_v16 = vld [vmem:[#allocation69_spill] sm:$0xff] }
 0x573   :  { %1523 = vmatprep.subr.bf16.mxu0 %v6147_v28  ;;  %1564 = vmatprep.subr.bf16.mxu1 %v6148_v30 }
 0x576   :  { %1524 = vmatpush1.bf16.msra.mxu0 %v6149_v41  ;;  %1565 = vmatpush1.bf16.msra.mxu1 %v6150_v51 }
 0x577   :  { %1525 = vmatprep.subr.bf16.mxu0 %v6151_v48  ;;  %1566 = vmatprep.subr.bf16.mxu1 %v6152_v1 }
 0x57a   :  { %1526 = vmatpush1.bf16.msra.mxu0 %v6153_v49  ;;  %1567 = vmatpush1.bf16.msra.mxu1 %v6154_v22 }
 0x57b   :  { %1527 = vmatprep.subr.bf16.mxu0 %v6155_v29  ;;  %1568 = vmatprep.subr.bf16.mxu1 %v6156_v57 }
 0x57e   :  { %1528 = vmatpush1.bf16.msra.mxu0 %v6157_v26  ;;  %1569 = vmatpush1.bf16.msra.mxu1 %v6158_v35  ;;  %v6193_v26 = vld [vmem:[#allocation96_spill] sm:$0xff] }
 0x57f   :  { %1529 = vmatprep.subr.bf16.mxu0 %v6159_v44  ;;  %1570 = vmatprep.subr.bf16.mxu1 %v6160_v11 }
 0x582   :  { %1530 = vmatpush1.bf16.msra.mxu0 %v6161_v7  ;;  %1571 = vmatpush1.bf16.msra.mxu1 %v6162_v17  ;;  %v6194_v17 = vld [vmem:[#allocation40_spill] sm:$0xff] }
 0x583   :  { %1531 = vmatprep.subr.bf16.mxu0 %v6163_v61  ;;  %1572 = vmatprep.subr.bf16.mxu1 %v6164_v33 }
 0x586   :  { %1532 = vmatpush1.bf16.msra.mxu0 %v6165_v40  ;;  %1573 = vmatpush1.bf16.msra.mxu1 %v6166_v34  ;;  %v6195_v34 = vld [vmem:[#allocation42_spill] sm:$0xff] }
 0x587   :  { %1533 = vmatprep.subr.bf16.mxu0 %v6167_v47  ;;  %1574 = vmatprep.subr.bf16.mxu1 %v6168_v19 }
 0x58a   :  { %1534 = vmatpush1.bf16.msra.mxu0 %v6169_v5  ;;  %1575 = vmatpush1.bf16.msra.mxu1 %v6170_v15 }
 0x58b   :  { %1535 = vmatprep.subr.bf16.mxu0 %v6171_v59  ;;  %1576 = vmatprep.subr.bf16.mxu1 %v6172_v8 }
 0x58e   :  { %1536 = vmatpush1.bf16.msra.mxu0 %v6173_v12  ;;  %1577 = vmatpush1.bf16.msra.mxu1 %v6174_v52  ;;  %v6196_v52 = vld [vmem:[#allocation43_spill] sm:$0xff] }
 0x58f   :  { %1537 = vmatprep.subr.bf16.mxu0 %v6175_v37  ;;  %1578 = vmatprep.subr.bf16.mxu1 %v6176_v24 }
 0x592   :  { %1538 = vmatpush1.bf16.msra.mxu0 %v6177_v20  ;;  %1579 = vmatpush1.bf16.msra.mxu1 %v6178_v2 }
 0x593   :  { %1539 = vmatprep.subr.bf16.mxu0 %v6179_v58  ;;  %1580 = vmatprep.subr.bf16.mxu1 %v6180_v14  ;;  %v6197_v14 = vld [vmem:[#allocation41_spill] sm:$0xff] }
 0x596   :  { %1540 = vmatpush1.bf16.msra.mxu0 %v6181_v55  ;;  %1581 = vmatpush1.bf16.msra.mxu1 %v6182_v54 }
 0x597   :  { %1541 = vmatprep.subr.bf16.mxu0 %v6183_v63  ;;  %1582 = vmatprep.subr.bf16.mxu1 %v6184_v50 }
 0x59a   :  { %1542 = vmatpush1.bf16.msra.mxu0 %v6185_v46  ;;  %1583 = vmatpush1.bf16.msra.mxu1 %v6186_v10 }
 0x59b   :  { %1635 = vmatprep.subr.bf16.mxu0 %v4638_v4  ;;  %1676 = vmatprep.subr.bf16.mxu1 %v4641_v0 }
 0x610   :  { %v1292_v60 = vpop.f32.mrb[44].mxu0  ;;  %v1333_v3 = vpop.f32.mrb[44].mxu1 }
 0x611   :  { %v1340_v42 = vadd.f32 %v1292_v60, %v6189_v9  ;;  %v1294_v27 = vpop.f32.mrb[45].mxu0  ;;  %v1335_v31 = vpop.f32.mrb[45].mxu1  ;;  %v1342_v23 = vadd.f32 %v1333_v3, %v6192_v16  ;;  %v4668_v16 = vld [vmem:[#allocation3] sm:$0xff] }
 0x612   :  { %v1341_v38 = vadd.f32 %v1294_v27, %v6190_v32  ;;  %v1296_v39 = vpop.f32.mrb[46].mxu0  ;;  %v1337_v18 = vpop.f32.mrb[46].mxu1  ;;  %v1343_v6 = vadd.f32 %v1335_v31, %v6191_v45 }
 0x613   :  { %v2973_v25 = vmul.f32 -1.442695, %v1340_v42  ;;  %v1297_v21 = vpop.f32.mrb[47].mxu0  ;;  %v1338_v13 = vpop.f32.mrb[47].mxu1 }
 0x614   :  { %v2974_v43 = vmul.f32 -1.442695, %v1341_v38  ;;  %v2975_v62 = vmul.f32 -1.442695, %v1343_v6  ;;  %v1493_v21 = vld [vmem:[#allocation13 + $0x10] sm:$0xff] }
 0x615   :  { %3119 = vpow2.f32 %v2973_v25 }
 0x616   :  { %3121 = vpow2.f32 %v2974_v43 }
 0x617   :  { %3123 = vpow2.f32 %v2975_v62 }
 0x618   :  { %3125 = vtanh.f32 %v1342_v23  ;;  %v4671_v23 = vld [vmem:[#allocation3 + $0x10] sm:$0xff] }
 0x61f   :  { %v3120_v28 = vpop.eup %3119 }
 0x620   :  { %v3122_v30 = vpop.eup %3121  ;;  %v1347_v41 = vadd.f32 1.0, %v3120_v28  ;;  %v4674_v28 = vld [vmem:[#allocation3 + $0x28] sm:$0xff] }
 0x621   :  { %v1353_v51 = vadd.f32 1.0, %v3122_v30  ;;  %v3124_v48 = vpop.eup %3123  ;;  %v4677_v30 = vld [vmem:[#allocation3 + $0x38] sm:$0xff] }
 0x622   :  { %3127 = vrcp.f32 %v1347_v41  ;;  %v3126_v1 = vpop.eup %3125  ;;  %v1360_v57 = vadd.f32 1.0, %v3124_v48  ;;  %v4682_v41 = vld [vmem:[#allocation3 + $0x20] sm:$0xff]  ;;  %v4688_v48 = vld [vmem:[#allocation3 + $0x48] sm:$0xff] }
 0x623   :  { %3129 = vrcp.f32 %v1353_v51  ;;  %v4685_v51 = vld [vmem:[#allocation3 + $0x30] sm:$0xff] }
 0x624   :  { %3131 = vrcp.f32 %v1360_v57  ;;  %v4703_v57 = vld [vmem:[#allocation3 + $0x78] sm:$0xff] }
 0x62c   :  { %v3128_v49 = vpop.eup %3127 }
 0x62d   :  { %v3130_v22 = vpop.eup %3129  ;;  %v1364_v29 = vmul.f32 %v3128_v49, %v3126_v1  ;;  %v4691_v1 = vld [vmem:[#allocation3 + $0x58] sm:$0xff]  ;;  %v4694_v49 = vld [vmem:[#allocation3 + $0x40] sm:$0xff] }
 0x62e   :  { %v1363_v35 = vmul.f32 %v3130_v22, %v6193_v26  ;;  %v3132_v24 = vpop.eup %3131  ;;  %v4697_v22 = vld [vmem:[#allocation3 + $0x50] sm:$0xff]  ;;  %v4706_v26 = vld [vmem:[#allocation3 + $0x60] sm:$0xff] }
 0x630   :  { %v4649_v44 = vadd.f32 %v1364_v29, %v1363_v35  ;;  %v1416_v11 = vpop.f32.mrb[48].mxu0  ;;  %v1457_v7 = vpop.f32.mrb[48].mxu1  ;;  %v4700_v29 = vld [vmem:[#allocation3 + $0x68] sm:$0xff]  ;;  %v4709_v35 = vld [vmem:[#allocation3 + $0x70] sm:$0xff] }
 0x631   :  { %v1464_v61 = vadd.f32 %v1416_v11, %v6194_v17  ;;  %v1418_v33 = vpop.f32.mrb[49].mxu0  ;;  %v1459_v40 = vpop.f32.mrb[49].mxu1  ;;  %v1466_v55 = vadd.f32 %v1457_v7, %v6197_v14  ;;  %v4712_v11 = vld [vmem:[#allocation3 + $0x88] sm:$0xff]  ;;  %v4715_v7 = vld [vmem:[#allocation3 + $0x98] sm:$0xff]  ;;  %v4718_v17 = vld [vmem:[#allocation3 + $0x80] sm:$0xff] }
 0x632   :  { %3133 = vtanh.f32 %v4649_v44  ;;  %v1465_v47 = vadd.f32 %v1418_v33, %v6195_v34  ;;  %v1420_v19 = vpop.f32.mrb[50].mxu0  ;;  %v1461_v5 = vpop.f32.mrb[50].mxu1  ;;  %v1467_v37 = vadd.f32 %v1459_v40, %v6196_v52  ;;  %v4724_v33 = vld [vmem:[#allocation3 + $0xa8] sm:$0xff]  ;;  %v4727_v40 = vld [vmem:[#allocation3 + $0xb8] sm:$0xff]  ;;  %v4730_v34 = vld [vmem:[#allocation3 + $0xa0] sm:$0xff] }
 0x633   :  { %v2976_v15 = vmul.f32 -1.442695, %v1464_v61  ;;  %v1421_v59 = vpop.f32.mrb[51].mxu0  ;;  %v1462_v8 = vpop.f32.mrb[51].mxu1  ;;  %v4721_v61 = vld [vmem:[#allocation3 + $0x90] sm:$0xff]  ;;  %v4736_v19 = vld [vmem:[#allocation3 + $0xc8] sm:$0xff] }
 0x634   :  { %v2977_v12 = vmul.f32 -1.442695, %v1465_v47  ;;  %v2978_v2 = vmul.f32 -1.442695, %v1467_v37  ;;  %v4733_v47 = vld [vmem:[#allocation3 + $0xb0] sm:$0xff]  ;;  %v4739_v5 = vld [vmem:[#allocation3 + $0xd8] sm:$0xff] }
 0x635   :  { %3135 = vpow2.f32 %v2976_v15  ;;  %v4742_v15 = vld [vmem:[#allocation3 + $0xc0] sm:$0xff]  ;;  %v4745_v59 = vld [vmem:[#allocation3 + $0xd0] sm:$0xff]  ;;  %v4748_v8 = vld [vmem:[#allocation3 + $0xe8] sm:$0xff] }
 0x636   :  { %3137 = vpow2.f32 %v2977_v12  ;;  %v4751_v12 = vld [vmem:[#allocation3 + $0xf8] sm:$0xff]  ;;  %v4754_v52 = vld [vmem:[#allocation3 + $0xe0] sm:$0xff]  ;;  %v4757_v37 = vld [vmem:[#allocation3 + $0xf0] sm:$0xff] }
 0x637   :  { %3139 = vpow2.f32 %v2978_v2  ;;  %v4765_v2 = vld [vmem:[#allocation5 + $0x18] sm:$0xff]  ;;  %v4771_v14 = vld [vmem:[#allocation5 + $0x10] sm:$0xff] }
 0x638   :  { %3141 = vtanh.f32 %v1466_v55  ;;  %v4774_v55 = vld [vmem:[#allocation5 + $0x28] sm:$0xff] }
 0x63c   :  { %v3134_v20 = vpop.eup %3133 }
 0x63d   :  { %v1367_v58 = vmul.f32 %v3134_v20, %v3132_v24  ;;  %v4762_v20 = vld [vmem:[#allocation5 + $0x8] sm:$0xff] }
 0x63f   :  { %v3136_v54 = vpop.eup %3135  ;;  %v1368_v63 = vpack.c.bf16 %v1367_v58, %v1367_v58  ;;  %v1370_v50 = vadd.f32 %v1367_v58, %v4538_v56  ;;  %v4768_v58 = vld [vmem:[#allocation5] sm:$0xff] }
 0x640   :  { %v3138_v46 = vpop.eup %3137  ;;  %v1471_v10 = vadd.f32 1.0, %v3136_v54  ;;  %v4777_v54 = vld [vmem:[#allocation5 + $0x38] sm:$0xff] }
 0x641   :  { %1369 = vst [vmem:[#allocation8 + $0x4] sm:$0xf] %v1368_v63  ;;  %v1371_v60 = vpack.c.bf16 %v1370_v50, %v1370_v50  ;;  %v1477_v3 = vadd.f32 1.0, %v3138_v46  ;;  %v3140_v9 = vpop.eup %3139  ;;  %v4780_v63 = vld [vmem:[#allocation5 + $0x20] sm:$0xff]  ;;  %v4783_v50 = vld [vmem:[#allocation5 + $0x30] sm:$0xff]  ;;  %v4786_v46 = vld [vmem:[#allocation5 + $0x48] sm:$0xff] }
 0x642   :  { %3143 = vrcp.f32 %v1471_v10  ;;  %v3142_v42 = vpop.eup %3141  ;;  %v1484_v38 = vadd.f32 1.0, %v3140_v9  ;;  %v4789_v10 = vld [vmem:[#allocation5 + $0x58] sm:$0xff]  ;;  %v4798_v9 = vld [vmem:[#allocation5 + $0x68] sm:$0xff] }
 0x643   :  { %1373 = vst [vmem:[#allocation19 + $0x4] sm:$0xf] %v1371_v60  ;;  %3145 = vrcp.f32 %v1477_v3  ;;  %6198 = vst [vmem:[#allocation66_spill] sm:$0xff] %v4789_v10  ;;  %v4792_v60 = vld [vmem:[#allocation5 + $0x40] sm:$0xff]  ;;  %v4795_v3 = vld [vmem:[#allocation5 + $0x50] sm:$0xff] }
 0x644   :  { %3147 = vrcp.f32 %v1484_v38  ;;  %6199 = vst [vmem:[#allocation67_spill] sm:$0xff] %v4792_v60  ;;  %6200 = vst [vmem:[#allocation65_spill] sm:$0xff] %v4795_v3  ;;  %v4813_v38 = vld [vmem:[#allocation5 + $0x98] sm:$0xff] }
 0x645   :  { %6201 = vst [vmem:[#allocation36_spill] sm:$0xff] %v4798_v9  ;;  %6206 = vst [vmem:[#allocation99_spill] sm:$0xff] %v4813_v38 }
 0x64c   :  { %v3144_v27 = vpop.eup %3143 }
 0x64d   :  { %v3146_v31 = vpop.eup %3145  ;;  %v1488_v32 = vmul.f32 %v3144_v27, %v3142_v42  ;;  %v4801_v42 = vld [vmem:[#allocation5 + $0x78] sm:$0xff]  ;;  %v4804_v27 = vld [vmem:[#allocation5 + $0x60] sm:$0xff] }
 0x64e   :  { %v1487_v39 = vmul.f32 %v3146_v31, %v4535_v36  ;;  %v3148_v56 = vpop.eup %3147  ;;  %6202 = vst [vmem:[#allocation38_spill] sm:$0xff] %v4801_v42  ;;  %6203 = vst [vmem:[#allocation39_spill] sm:$0xff] %v4804_v27  ;;  %v4807_v31 = vld [vmem:[#allocation5 + $0x70] sm:$0xff] }
 0x64f   :  { %6204 = vst [vmem:[#allocation37_spill] sm:$0xff] %v4807_v31 }
 0x650   :  { %v4658_v18 = vadd.f32 %v1488_v32, %v1487_v39  ;;  %v4810_v32 = vld [vmem:[#allocation5 + $0x88] sm:$0xff]  ;;  %v4816_v39 = vld [vmem:[#allocation5 + $0x80] sm:$0xff] }
 0x651   :  { %6205 = vst [vmem:[#allocation98_spill] sm:$0xff] %v4810_v32  ;;  %6207 = vst [vmem:[#allocation100_spill] sm:$0xff] %v4816_v39 }
 0x652   :  { %3149 = vtanh.f32 %v4658_v18 }
 0x65c   :  { %v3150_v25 = vpop.eup %3149 }
 0x65d   :  { %v4661_v13 = vmul.f32 %v3150_v25, %v3148_v56  ;;  %v4819_v56 = vld [vmem:[#allocation5 + $0x90] sm:$0xff]  ;;  %v4822_v25 = vld [vmem:[#allocation5 + $0xa8] sm:$0xff] }
 0x65e   :  { %6208 = vst [vmem:[#allocation101_spill] sm:$0xff] %v4819_v56  ;;  %6209 = vst [vmem:[#allocation102_spill] sm:$0xff] %v4822_v25 }
 0x65f   :  { %v4664_v43 = vadd.f32 %v1493_v21, %v4661_v13  ;;  %v1634_v24 = vpack.c.bf16 %v4661_v13, %v4661_v13  ;;  %v4825_v21 = vld [vmem:[#allocation5 + $0xb8] sm:$0xff]  ;;  %v4828_v13 = vld [vmem:[#allocation5 + $0xa0] sm:$0xff] }
 0x660   :  { %6210 = vst [vmem:[#allocation103_spill] sm:$0xff] %v4825_v21  ;;  %6211 = vst [vmem:[#allocation104_spill] sm:$0xff] %v4828_v13 }
 0x661   :  { %v1495_v45 = vpack.c.bf16 %v4664_v43, %v4664_v43 }
 0x663   :  { %1496 = vst [vmem:[#allocation8] sm:$0xf] %v1495_v45  ;;  %v4831_v45 = vld [vmem:[#allocation5 + $0xb0] sm:$0xff] }
 0x664   :  { %6212 = vst [vmem:[#allocation105_spill] sm:$0xff] %v4831_v45 }
 0x66a   :  { %v1503_v6 = vld [vmem:[#allocation8] sm:$0xff] }
 0x66b   :  { %v2980_v62 = vcombine.high %v1503_v6, %v1503_v6  ;;  %v2979_v36 = vcombine.low %v1503_v6, %v1503_v6  ;;  %v4834_v6 = vld [vmem:[#allocation5 + $0xc8] sm:$0xff] }
 0x66c   :  { %6213 = vst [vmem:[#allocation106_spill] sm:$0xff] %v4834_v6 }
 0x66d   :  { %1543 = vmatprep.mubr.bf16.mxu0 %v2980_v62  ;;  %1584 = vmatprep.mubr.bf16.mxu1 %v2980_v62  ;;  %v4837_v62 = vld [vmem:[#allocation5 + $0xd8] sm:$0xff] }
 0x66e   :  { %1544 = vmatmul.mubr.bf16.vlgmr.msra.gmra.mrb[52].mxu0 %v2979_v36  ;;  %1585 = vmatmul.mubr.bf16.vlgmr.msra.gmra.mrb[52].mxu1 %v2979_v36  ;;  %6214 = vst [vmem:[#allocation107_spill] sm:$0xff] %v4837_v62  ;;  %v4840_v36 = vld [vmem:[#allocation5 + $0xc0] sm:$0xff] }
 0x66f   :  { %1636 = vmatpush1.bf16.msra.mxu0 %v4668_v16  ;;  %1677 = vmatpush1.bf16.msra.mxu1 %v4671_v23  ;;  %6215 = vst [vmem:[#allocation108_spill] sm:$0xff] %v4840_v36 }
 0x670   :  { %1637 = vmatprep.subr.bf16.mxu0 %v4674_v28  ;;  %1678 = vmatprep.subr.bf16.mxu1 %v4677_v30 }
 0x671   :  { %1667 = vmatprep.mubr.bf16.mxu0 %v6012_v53  ;;  %1708 = vmatprep.mubr.bf16.mxu1 %v6012_v53 }
 0x673   :  { %1638 = vmatpush1.bf16.msra.mxu0 %v4682_v41  ;;  %1679 = vmatpush1.bf16.msra.mxu1 %v4685_v51 }
 0x674   :  { %1639 = vmatprep.subr.bf16.mxu0 %v4688_v48  ;;  %1680 = vmatprep.subr.bf16.mxu1 %v4691_v1 }
 0x677   :  { %1640 = vmatpush1.bf16.msra.mxu0 %v4694_v49  ;;  %1681 = vmatpush1.bf16.msra.mxu1 %v4697_v22 }
 0x678   :  { %1641 = vmatprep.subr.bf16.mxu0 %v4700_v29  ;;  %1682 = vmatprep.subr.bf16.mxu1 %v4703_v57 }
 0x67b   :  { %1642 = vmatpush1.bf16.msra.mxu0 %v4706_v26  ;;  %1683 = vmatpush1.bf16.msra.mxu1 %v4709_v35 }
 0x67c   :  { %1643 = vmatprep.subr.bf16.mxu0 %v4712_v11  ;;  %1684 = vmatprep.subr.bf16.mxu1 %v4715_v7 }
 0x67f   :  { %1644 = vmatpush1.bf16.msra.mxu0 %v4718_v17  ;;  %1685 = vmatpush1.bf16.msra.mxu1 %v4721_v61 }
 0x680   :  { %1645 = vmatprep.subr.bf16.mxu0 %v4724_v33  ;;  %1686 = vmatprep.subr.bf16.mxu1 %v4727_v40 }
 0x683   :  { %1646 = vmatpush1.bf16.msra.mxu0 %v4730_v34  ;;  %1687 = vmatpush1.bf16.msra.mxu1 %v4733_v47 }
 0x684   :  { %1647 = vmatprep.subr.bf16.mxu0 %v4736_v19  ;;  %1688 = vmatprep.subr.bf16.mxu1 %v4739_v5 }
 0x687   :  { %1648 = vmatpush1.bf16.msra.mxu0 %v4742_v15  ;;  %1689 = vmatpush1.bf16.msra.mxu1 %v4745_v59 }
 0x688   :  { %1649 = vmatprep.subr.bf16.mxu0 %v4748_v8  ;;  %1690 = vmatprep.subr.bf16.mxu1 %v4751_v12 }
 0x68b   :  { %1650 = vmatpush1.bf16.msra.mxu0 %v4754_v52  ;;  %1691 = vmatpush1.bf16.msra.mxu1 %v4757_v37 }
 0x68c   :  { %1764 = vmatprep.subr.bf16.mxu0 %v4762_v20  ;;  %1805 = vmatprep.subr.bf16.mxu1 %v4765_v2 }
 0x68e   :  { %1668 = vmatmul.mubr.bf16.vlgmr.msra.gmra.mrb[56].mxu0 %v1634_v24  ;;  %1709 = vmatmul.mubr.bf16.vlgmr.msra.gmra.mrb[56].mxu1 %v1634_v24  ;;  %v4843_v24 = vld [vmem:[#allocation5 + $0xd0] sm:$0xff] }
 0x68f   :  { %1765 = vmatpush1.bf16.msra.mxu0 %v4768_v58  ;;  %1806 = vmatpush1.bf16.msra.mxu1 %v4771_v14  ;;  %6216 = vst [vmem:[#allocation109_spill] sm:$0xff] %v4843_v24 }
 0x690   :  { %1766 = vmatprep.subr.bf16.mxu0 %v4774_v55  ;;  %1807 = vmatprep.subr.bf16.mxu1 %v4777_v54 }
 0x693   :  { %1767 = vmatpush1.bf16.msra.mxu0 %v4780_v63  ;;  %1808 = vmatpush1.bf16.msra.mxu1 %v4783_v50 }
 0x694   :  { %1768 = vmatprep.subr.bf16.mxu0 %v4786_v46  ;;  %1809 = vmatprep.subr.bf16.mxu1 %v4789_v10 }
 0x697   :  { %1769 = vmatpush1.bf16.msra.mxu0 %v4792_v60  ;;  %1810 = vmatpush1.bf16.msra.mxu1 %v4795_v3 }
 0x698   :  { %1770 = vmatprep.subr.bf16.mxu0 %v4798_v9  ;;  %1811 = vmatprep.subr.bf16.mxu1 %v4801_v42 }
 0x69b   :  { %1771 = vmatpush1.bf16.msra.mxu0 %v4804_v27  ;;  %1812 = vmatpush1.bf16.msra.mxu1 %v4807_v31 }
 0x69c   :  { %1772 = vmatprep.subr.bf16.mxu0 %v4810_v32  ;;  %1813 = vmatprep.subr.bf16.mxu1 %v4813_v38 }
 0x69f   :  { %1773 = vmatpush1.bf16.msra.mxu0 %v4816_v39  ;;  %1814 = vmatpush1.bf16.msra.mxu1 %v4819_v56  ;;  %v6254_v39 = vld [vmem:[#allocation74_spill] sm:$0xff] }
 0x6a0   :  { %1774 = vmatprep.subr.bf16.mxu0 %v4822_v25  ;;  %1815 = vmatprep.subr.bf16.mxu1 %v4825_v21  ;;  %v6253_v21 = vld [vmem:[#allocation72_spill] sm:$0xff] }
 0x6a3   :  { %1775 = vmatpush1.bf16.msra.mxu0 %v4828_v13  ;;  %1816 = vmatpush1.bf16.msra.mxu1 %v4831_v45  ;;  %v4846_v13 = vld [vmem:[#allocation5 + $0xe8] sm:$0xff]  ;;  %v4849_v45 = vld [vmem:[#allocation5 + $0xf8] sm:$0xff] }
 0x6a4   :  { %1776 = vmatprep.subr.bf16.mxu0 %v4834_v6  ;;  %1817 = vmatprep.subr.bf16.mxu1 %v4837_v62  ;;  %6217 = vst [vmem:[#allocation110_spill] sm:$0xff] %v4846_v13  ;;  %6218 = vst [vmem:[#allocation111_spill] sm:$0xff] %v4849_v45  ;;  %v4852_v6 = vld [vmem:[#allocation5 + $0xe0] sm:$0xff]  ;;  %v4855_v62 = vld [vmem:[#allocation5 + $0xf0] sm:$0xff] }
 0x6a5   :  { %6219 = vst [vmem:[#allocation112_spill] sm:$0xff] %v4852_v6  ;;  %6220 = vst [vmem:[#allocation113_spill] sm:$0xff] %v4855_v62 }
 0x6a7   :  { %1777 = vmatpush1.bf16.msra.mxu0 %v4840_v36  ;;  %1818 = vmatpush1.bf16.msra.mxu1 %v4843_v24  ;;  %v4858_v36 = vld [vmem:[#allocation5 + $0x108] sm:$0xff]  ;;  %v4861_v24 = vld [vmem:[#allocation5 + $0x118] sm:$0xff] }
 0x6a8   :  { %1778 = vmatprep.subr.bf16.mxu0 %v4846_v13  ;;  %1819 = vmatprep.subr.bf16.mxu1 %v4849_v45  ;;  %6221 = vst [vmem:[#allocation114_spill] sm:$0xff] %v4858_v36  ;;  %6222 = vst [vmem:[#allocation115_spill] sm:$0xff] %v4861_v24  ;;  %v4864_v13 = vld [vmem:[#allocation5 + $0x100] sm:$0xff]  ;;  %v4867_v45 = vld [vmem:[#allocation5 + $0x110] sm:$0xff] }
 0x6a9   :  { %6223 = vst [vmem:[#allocation116_spill] sm:$0xff] %v4864_v13  ;;  %6224 = vst [vmem:[#allocation117_spill] sm:$0xff] %v4867_v45 }
 0x6ab   :  { %1779 = vmatpush1.bf16.msra.mxu0 %v4852_v6  ;;  %1820 = vmatpush1.bf16.msra.mxu1 %v4855_v62  ;;  %v4870_v6 = vld [vmem:[#allocation5 + $0x128] sm:$0xff]  ;;  %v4873_v62 = vld [vmem:[#allocation5 + $0x138] sm:$0xff] }
 0x6ac   :  { %1780 = vmatprep.subr.bf16.mxu0 %v4858_v36  ;;  %1821 = vmatprep.subr.bf16.mxu1 %v4861_v24  ;;  %6225 = vst [vmem:[#allocation118_spill] sm:$0xff] %v4870_v6  ;;  %6226 = vst [vmem:[#allocation119_spill] sm:$0xff] %v4873_v62  ;;  %v4876_v36 = vld [vmem:[#allocation5 + $0x120] sm:$0xff]  ;;  %v4879_v24 = vld [vmem:[#allocation5 + $0x130] sm:$0xff] }
 0x6ad   :  { %6227 = vst [vmem:[#allocation120_spill] sm:$0xff] %v4876_v36  ;;  %6228 = vst [vmem:[#allocation121_spill] sm:$0xff] %v4879_v24 }
 0x6af   :  { %1781 = vmatpush1.bf16.msra.mxu0 %v4864_v13  ;;  %1822 = vmatpush1.bf16.msra.mxu1 %v4867_v45  ;;  %v4882_v13 = vld [vmem:[#allocation5 + $0x148] sm:$0xff]  ;;  %v4885_v45 = vld [vmem:[#allocation5 + $0x158] sm:$0xff] }
 0x6b0   :  { %1782 = vmatprep.subr.bf16.mxu0 %v4870_v6  ;;  %1823 = vmatprep.subr.bf16.mxu1 %v4873_v62  ;;  %6229 = vst [vmem:[#allocation122_spill] sm:$0xff] %v4882_v13  ;;  %6230 = vst [vmem:[#allocation123_spill] sm:$0xff] %v4885_v45  ;;  %v4888_v6 = vld [vmem:[#allocation5 + $0x140] sm:$0xff]  ;;  %v4891_v62 = vld [vmem:[#allocation5 + $0x150] sm:$0xff] }
 0x6b1   :  { %6231 = vst [vmem:[#allocation124_spill] sm:$0xff] %v4888_v6  ;;  %6232 = vst [vmem:[#allocation125_spill] sm:$0xff] %v4891_v62 }
 0x6b3   :  { %1783 = vmatpush1.bf16.msra.mxu0 %v4876_v36  ;;  %1824 = vmatpush1.bf16.msra.mxu1 %v4879_v24  ;;  %v4894_v36 = vld [vmem:[#allocation5 + $0x168] sm:$0xff]  ;;  %v4897_v24 = vld [vmem:[#allocation5 + $0x178] sm:$0xff] }
 0x6b4   :  { %1784 = vmatprep.subr.bf16.mxu0 %v4882_v13  ;;  %1825 = vmatprep.subr.bf16.mxu1 %v4885_v45  ;;  %6233 = vst [vmem:[#allocation126_spill] sm:$0xff] %v4894_v36  ;;  %6234 = vst [vmem:[#allocation127_spill] sm:$0xff] %v4897_v24  ;;  %v4900_v13 = vld [vmem:[#allocation5 + $0x160] sm:$0xff]  ;;  %v4903_v45 = vld [vmem:[#allocation5 + $0x170] sm:$0xff] }
 0x6b5   :  { %6235 = vst [vmem:[#allocation128_spill] sm:$0xff] %v4900_v13  ;;  %6236 = vst [vmem:[#allocation129_spill] sm:$0xff] %v4903_v45 }
 0x6b7   :  { %1785 = vmatpush1.bf16.msra.mxu0 %v4888_v6  ;;  %1826 = vmatpush1.bf16.msra.mxu1 %v4891_v62  ;;  %v4906_v6 = vld [vmem:[#allocation5 + $0x188] sm:$0xff]  ;;  %v4909_v62 = vld [vmem:[#allocation5 + $0x198] sm:$0xff] }
 0x6b8   :  { %1786 = vmatprep.subr.bf16.mxu0 %v4894_v36  ;;  %1827 = vmatprep.subr.bf16.mxu1 %v4897_v24  ;;  %6237 = vst [vmem:[#allocation130_spill] sm:$0xff] %v4906_v6  ;;  %6238 = vst [vmem:[#allocation131_spill] sm:$0xff] %v4909_v62  ;;  %v4912_v36 = vld [vmem:[#allocation5 + $0x180] sm:$0xff]  ;;  %v4915_v24 = vld [vmem:[#allocation5 + $0x190] sm:$0xff] }
 0x6b9   :  { %6239 = vst [vmem:[#allocation132_spill] sm:$0xff] %v4912_v36  ;;  %6240 = vst [vmem:[#allocation133_spill] sm:$0xff] %v4915_v24 }
 0x6bb   :  { %1787 = vmatpush1.bf16.msra.mxu0 %v4900_v13  ;;  %1828 = vmatpush1.bf16.msra.mxu1 %v4903_v45  ;;  %v4918_v13 = vld [vmem:[#allocation5 + $0x1a8] sm:$0xff]  ;;  %v4921_v45 = vld [vmem:[#allocation5 + $0x1b8] sm:$0xff] }
 0x6bc   :  { %1788 = vmatprep.subr.bf16.mxu0 %v4906_v6  ;;  %1829 = vmatprep.subr.bf16.mxu1 %v4909_v62  ;;  %6241 = vst [vmem:[#allocation134_spill] sm:$0xff] %v4918_v13  ;;  %6242 = vst [vmem:[#allocation135_spill] sm:$0xff] %v4921_v45  ;;  %v4924_v6 = vld [vmem:[#allocation5 + $0x1a0] sm:$0xff]  ;;  %v4927_v62 = vld [vmem:[#allocation5 + $0x1b0] sm:$0xff] }
 0x6bd   :  { %6243 = vst [vmem:[#allocation136_spill] sm:$0xff] %v4924_v6  ;;  %6244 = vst [vmem:[#allocation137_spill] sm:$0xff] %v4927_v62 }
 0x6bf   :  { %1789 = vmatpush1.bf16.msra.mxu0 %v4912_v36  ;;  %1830 = vmatpush1.bf16.msra.mxu1 %v4915_v24  ;;  %v4930_v36 = vld [vmem:[#allocation5 + $0x1c8] sm:$0xff]  ;;  %v4933_v24 = vld [vmem:[#allocation5 + $0x1d8] sm:$0xff] }
 0x6c0   :  { %1790 = vmatprep.subr.bf16.mxu0 %v4918_v13  ;;  %1831 = vmatprep.subr.bf16.mxu1 %v4921_v45  ;;  %6245 = vst [vmem:[#allocation138_spill] sm:$0xff] %v4930_v36  ;;  %6246 = vst [vmem:[#allocation139_spill] sm:$0xff] %v4933_v24  ;;  %v4936_v13 = vld [vmem:[#allocation5 + $0x1c0] sm:$0xff]  ;;  %v4939_v45 = vld [vmem:[#allocation5 + $0x1d0] sm:$0xff] }
 0x6c1   :  { %6247 = vst [vmem:[#allocation140_spill] sm:$0xff] %v4936_v13  ;;  %6248 = vst [vmem:[#allocation141_spill] sm:$0xff] %v4939_v45 }
 0x6c3   :  { %1791 = vmatpush1.bf16.msra.mxu0 %v4924_v6  ;;  %1832 = vmatpush1.bf16.msra.mxu1 %v4927_v62  ;;  %v4942_v6 = vld [vmem:[#allocation5 + $0x1e8] sm:$0xff]  ;;  %v4945_v62 = vld [vmem:[#allocation5 + $0x1f8] sm:$0xff] }
 0x6c4   :  { %1792 = vmatprep.subr.bf16.mxu0 %v4930_v36  ;;  %1833 = vmatprep.subr.bf16.mxu1 %v4933_v24  ;;  %6249 = vst [vmem:[#allocation142_spill] sm:$0xff] %v4942_v6  ;;  %6250 = vst [vmem:[#allocation143_spill] sm:$0xff] %v4945_v62  ;;  %v4948_v36 = vld [vmem:[#allocation5 + $0x1e0] sm:$0xff]  ;;  %v4951_v24 = vld [vmem:[#allocation5 + $0x1f0] sm:$0xff] }
 0x6c5   :  { %6251 = vst [vmem:[#allocation144_spill] sm:$0xff] %v4948_v36  ;;  %6252 = vst [vmem:[#allocation145_spill] sm:$0xff] %v4951_v24 }
 0x6c7   :  { %1793 = vmatpush1.bf16.msra.mxu0 %v4936_v13  ;;  %1834 = vmatpush1.bf16.msra.mxu1 %v4939_v45 }
 0x6c8   :  { %1794 = vmatprep.subr.bf16.mxu0 %v4942_v6  ;;  %1835 = vmatprep.subr.bf16.mxu1 %v4945_v62 }
 0x6cb   :  { %1795 = vmatpush1.bf16.msra.mxu0 %v4948_v36  ;;  %1836 = vmatpush1.bf16.msra.mxu1 %v4951_v24  ;;  %v6255_v24 = vld [vmem:[#allocation75_spill] sm:$0xff] }
 0x6cc   :  { %1888 = vmatprep.subr.bf16.mxu0 %v4638_v4  ;;  %1929 = vmatprep.subr.bf16.mxu1 %v4641_v0  ;;  %v6256_v0 = vld [vmem:[#allocation73_spill] sm:$0xff] }
 0x741   :  { %v1545_v45 = vpop.f32.mrb[52].mxu0  ;;  %v1586_v13 = vpop.f32.mrb[52].mxu1 }
 0x742   :  { %v1593_v6 = vadd.f32 %v1545_v45, %v6253_v21  ;;  %v1547_v25 = vpop.f32.mrb[53].mxu0  ;;  %v1588_v56 = vpop.f32.mrb[53].mxu1  ;;  %v1595_v3 = vadd.f32 %v1586_v13, %v6256_v0  ;;  %v6258_v13 = vld [vmem:[#allocation44_spill] sm:$0xff] }
 0x743   :  { %v1594_v62 = vadd.f32 %v1547_v25, %v6254_v39  ;;  %v1549_v38 = vpop.f32.mrb[54].mxu0  ;;  %v1590_v32 = vpop.f32.mrb[54].mxu1  ;;  %v1596_v4 = vadd.f32 %v1588_v56, %v6255_v24 }
 0x744   :  { %v2981_v31 = vmul.f32 -1.442695, %v1593_v6  ;;  %v1550_v36 = vpop.f32.mrb[55].mxu0  ;;  %v1591_v27 = vpop.f32.mrb[55].mxu1 }
 0x745   :  { %v2982_v42 = vmul.f32 -1.442695, %v1594_v62  ;;  %v2983_v9 = vmul.f32 -1.442695, %v1596_v4 }
 0x746   :  { %3151 = vpow2.f32 %v2981_v31 }
 0x747   :  { %3153 = vpow2.f32 %v2982_v42 }
 0x748   :  { %3155 = vpow2.f32 %v2983_v9 }
 0x749   :  { %3157 = vtanh.f32 %v1595_v3 }
 0x750   :  { %v3152_v60 = vpop.eup %3151 }
 0x751   :  { %v3154_v10 = vpop.eup %3153  ;;  %v1600_v21 = vadd.f32 1.0, %v3152_v60 }
 0x752   :  { %v1606_v45 = vadd.f32 1.0, %v3154_v10  ;;  %v3156_v32 = vpop.eup %3155  ;;  %v6259_v10 = vld [vmem:[#allocation46_spill] sm:$0xff] }
 0x753   :  { %3159 = vrcp.f32 %v1600_v21  ;;  %v3158_v38 = vpop.eup %3157  ;;  %v1613_v31 = vadd.f32 1.0, %v3156_v32 }
 0x754   :  { %3161 = vrcp.f32 %v1606_v45 }
 0x755   :  { %3163 = vrcp.f32 %v1613_v31 }
 0x75d   :  { %v3160_v39 = vpop.eup %3159 }
 0x75e   :  { %v3162_v27 = vpop.eup %3161  ;;  %v1617_v25 = vmul.f32 %v3160_v39, %v3158_v38 }
 0x75f   :  { %v1616_v42 = vmul.f32 %v3162_v27, %v4649_v44  ;;  %v6260_v44 = vld [vmem:[#allocation47_spill] sm:$0xff]  ;;  %v3164_v39 = vpop.eup %3163 }
 0x761   :  { %v4961_v56 = vadd.f32 %v1617_v25, %v1616_v42  ;;  %v1669_v4 = vpop.f32.mrb[56].mxu0  ;;  %v1710_v0 = vpop.f32.mrb[56].mxu1  ;;  %v6261_v42 = vld [vmem:[#allocation45_spill] sm:$0xff] }
 0x762   :  { %v1717_v60 = vadd.f32 %v1669_v4, %v6258_v13  ;;  %v1671_v9 = vpop.f32.mrb[57].mxu0  ;;  %v1712_v3 = vpop.f32.mrb[57].mxu1  ;;  %v1719_v4 = vadd.f32 %v1710_v0, %v6261_v42 }
 0x763   :  { %6257 = vst [vmem:[#allocation146_spill] sm:$0xff] %v4961_v56  ;;  %3165 = vtanh.f32 %v4961_v56  ;;  %v1718_v6 = vadd.f32 %v1671_v9, %v6259_v10  ;;  %v1673_v62 = vpop.f32.mrb[58].mxu0  ;;  %v1714_v36 = vpop.f32.mrb[58].mxu1  ;;  %v1720_v38 = vadd.f32 %v1712_v3, %v6260_v44 }
 0x764   :  { %v2984_v24 = vmul.f32 -1.442695, %v1717_v60  ;;  %v1674_v21 = vpop.f32.mrb[59].mxu0  ;;  %v1715_v45 = vpop.f32.mrb[59].mxu1 }
 0x765   :  { %v2985_v32 = vmul.f32 -1.442695, %v1718_v6  ;;  %v2986_v25 = vmul.f32 -1.442695, %v1720_v38  ;;  %v1746_v38 = vld [vmem:[#allocation13 + $0x18] sm:$0xff] }
 0x766   :  { %3167 = vpow2.f32 %v2984_v24 }
 0x767   :  { %3169 = vpow2.f32 %v2985_v32 }
 0x768   :  { %3171 = vpow2.f32 %v2986_v25 }
 0x769   :  { %3173 = vtanh.f32 %v1719_v4 }
 0x76d   :  { %v3166_v27 = vpop.eup %3165 }
 0x76e   :  { %v1620_v31 = vmul.f32 %v3166_v27, %v3164_v39 }
 0x770   :  { %v3168_v13 = vpop.eup %3167  ;;  %v1621_v56 = vpack.c.bf16 %v1620_v31, %v1620_v31  ;;  %v1623_v9 = vadd.f32 %v1620_v31, %v4664_v43 }
 0x771   :  { %v3170_v10 = vpop.eup %3169  ;;  %v1724_v62 = vadd.f32 1.0, %v3168_v13  ;;  %v6262_v13 = vld [vmem:[#allocation66_spill] sm:$0xff] }
 0x772   :  { %1622 = vst [vmem:[#allocation8 + $0x4] sm:$0xf] %v1621_v56  ;;  %v1624_v60 = vpack.c.bf16 %v1623_v9, %v1623_v9  ;;  %v1730_v6 = vadd.f32 1.0, %v3170_v10  ;;  %v3172_v3 = vpop.eup %3171  ;;  %v6263_v9 = vld [vmem:[#allocation67_spill] sm:$0xff]  ;;  %v6264_v10 = vld [vmem:[#allocation65_spill] sm:$0xff] }
 0x773   :  { %3175 = vrcp.f32 %v1724_v62  ;;  %v3174_v36 = vpop.eup %3173  ;;  %v1737_v0 = vadd.f32 1.0, %v3172_v3  ;;  %v6265_v62 = vld [vmem:[#allocation36_spill] sm:$0xff]  ;;  %v6268_v3 = vld [vmem:[#allocation37_spill] sm:$0xff] }
 0x774   :  { %1626 = vst [vmem:[#allocation19 + $0x8] sm:$0xf] %v1624_v60  ;;  %3177 = vrcp.f32 %v1730_v6  ;;  %v6266_v60 = vld [vmem:[#allocation38_spill] sm:$0xff]  ;;  %v6267_v6 = vld [vmem:[#allocation39_spill] sm:$0xff] }
 0x775   :  { %3179 = vrcp.f32 %v1737_v0  ;;  %v6273_v0 = vld [vmem:[#allocation102_spill] sm:$0xff] }
 0x77d   :  { %v3176_v24 = vpop.eup %3175 }
 0x77e   :  { %v3178_v21 = vpop.eup %3177  ;;  %v1741_v45 = vmul.f32 %v3176_v24, %v3174_v36  ;;  %v6269_v36 = vld [vmem:[#allocation98_spill] sm:$0xff]  ;;  %v6270_v24 = vld [vmem:[#allocation99_spill] sm:$0xff] }
 0x77f   :  { %v1740_v32 = vmul.f32 %v3178_v21, %v4658_v18  ;;  %v3180_v43 = vpop.eup %3179  ;;  %v6271_v21 = vld [vmem:[#allocation100_spill] sm:$0xff] }
 0x781   :  { %v4970_v44 = vadd.f32 %v1741_v45, %v1740_v32  ;;  %v6272_v45 = vld [vmem:[#allocation101_spill] sm:$0xff]  ;;  %v6274_v32 = vld [vmem:[#allocation103_spill] sm:$0xff] }
 0x783   :  { %3181 = vtanh.f32 %v4970_v44 }
 0x78d   :  { %v3182_v56 = vpop.eup %3181 }
 0x78e   :  { %v1744_v39 = vmul.f32 %v3182_v56, %v3180_v43  ;;  %v6275_v43 = vld [vmem:[#allocation104_spill] sm:$0xff]  ;;  %v6276_v56 = vld [vmem:[#allocation105_spill] sm:$0xff] }
 0x790   :  { %v4973_v27 = vadd.f32 %v1746_v38, %v1744_v39  ;;  %v1887_v18 = vpack.c.bf16 %v1744_v39, %v1744_v39  ;;  %v6277_v38 = vld [vmem:[#allocation106_spill] sm:$0xff]  ;;  %v6278_v39 = vld [vmem:[#allocation107_spill] sm:$0xff] }
 0x792   :  { %v1748_v25 = vpack.c.bf16 %v4973_v27, %v4973_v27 }
 0x794   :  { %1749 = vst [vmem:[#allocation8] sm:$0xf] %v1748_v25  ;;  %v6279_v25 = vld [vmem:[#allocation108_spill] sm:$0xff] }
 0x79b   :  { %v1756_v31 = vld [vmem:[#allocation8] sm:$0xff] }
 0x79c   :  { %v2988_v42 = vcombine.high %v1756_v31, %v1756_v31  ;;  %v2987_v4 = vcombine.low %v1756_v31, %v1756_v31  ;;  %v6280_v31 = vld [vmem:[#allocation109_spill] sm:$0xff] }
 0x79e   :  { %1796 = vmatprep.mubr.bf16.mxu0 %v2988_v42  ;;  %1837 = vmatprep.mubr.bf16.mxu1 %v2988_v42  ;;  %v6281_v42 = vld [vmem:[#allocation110_spill] sm:$0xff] }
 0x79f   :  { %1797 = vmatmul.mubr.bf16.vlgmr.msra.gmra.mrb[60].mxu0 %v2987_v4  ;;  %1838 = vmatmul.mubr.bf16.vlgmr.msra.gmra.mrb[60].mxu1 %v2987_v4  ;;  %v6282_v4 = vld [vmem:[#allocation111_spill] sm:$0xff] }
 0x7a0   :  { %1889 = vmatpush1.bf16.msra.mxu0 %v4668_v16  ;;  %1930 = vmatpush1.bf16.msra.mxu1 %v4671_v23 }
 0x7a1   :  { %1890 = vmatprep.subr.bf16.mxu0 %v4674_v28  ;;  %1931 = vmatprep.subr.bf16.mxu1 %v4677_v30 }
 0x7a2   :  { %1920 = vmatprep.mubr.bf16.mxu0 %v6012_v53  ;;  %1961 = vmatprep.mubr.bf16.mxu1 %v6012_v53 }
 0x7a4   :  { %1891 = vmatpush1.bf16.msra.mxu0 %v4682_v41  ;;  %1932 = vmatpush1.bf16.msra.mxu1 %v4685_v51 }
 0x7a5   :  { %1892 = vmatprep.subr.bf16.mxu0 %v4688_v48  ;;  %1933 = vmatprep.subr.bf16.mxu1 %v4691_v1 }
 0x7a8   :  { %1893 = vmatpush1.bf16.msra.mxu0 %v4694_v49  ;;  %1934 = vmatpush1.bf16.msra.mxu1 %v4697_v22 }
 0x7a9   :  { %1894 = vmatprep.subr.bf16.mxu0 %v4700_v29  ;;  %1935 = vmatprep.subr.bf16.mxu1 %v4703_v57 }
 0x7ac   :  { %1895 = vmatpush1.bf16.msra.mxu0 %v4706_v26  ;;  %1936 = vmatpush1.bf16.msra.mxu1 %v4709_v35 }
 0x7ad   :  { %1896 = vmatprep.subr.bf16.mxu0 %v4712_v11  ;;  %1937 = vmatprep.subr.bf16.mxu1 %v4715_v7 }
 0x7b0   :  { %1897 = vmatpush1.bf16.msra.mxu0 %v4718_v17  ;;  %1938 = vmatpush1.bf16.msra.mxu1 %v4721_v61 }
 0x7b1   :  { %1898 = vmatprep.subr.bf16.mxu0 %v4724_v33  ;;  %1939 = vmatprep.subr.bf16.mxu1 %v4727_v40 }
 0x7b4   :  { %1899 = vmatpush1.bf16.msra.mxu0 %v4730_v34  ;;  %1940 = vmatpush1.bf16.msra.mxu1 %v4733_v47 }
 0x7b5   :  { %1900 = vmatprep.subr.bf16.mxu0 %v4736_v19  ;;  %1941 = vmatprep.subr.bf16.mxu1 %v4739_v5 }
 0x7b8   :  { %1901 = vmatpush1.bf16.msra.mxu0 %v4742_v15  ;;  %1942 = vmatpush1.bf16.msra.mxu1 %v4745_v59 }
 0x7b9   :  { %1902 = vmatprep.subr.bf16.mxu0 %v4748_v8  ;;  %1943 = vmatprep.subr.bf16.mxu1 %v4751_v12 }
 0x7bc   :  { %1903 = vmatpush1.bf16.msra.mxu0 %v4754_v52  ;;  %1944 = vmatpush1.bf16.msra.mxu1 %v4757_v37 }
 0x7bd   :  { %2017 = vmatprep.subr.bf16.mxu0 %v4762_v20  ;;  %2058 = vmatprep.subr.bf16.mxu1 %v4765_v2 }
 0x7bf   :  { %1921 = vmatmul.mubr.bf16.vlgmr.msra.gmra.mrb[64].mxu0 %v1887_v18  ;;  %1962 = vmatmul.mubr.bf16.vlgmr.msra.gmra.mrb[64].mxu1 %v1887_v18  ;;  %v6283_v18 = vld [vmem:[#allocation112_spill] sm:$0xff] }
 0x7c0   :  { %2018 = vmatpush1.bf16.msra.mxu0 %v4768_v58  ;;  %2059 = vmatpush1.bf16.msra.mxu1 %v4771_v14 }
 0x7c1   :  { %2019 = vmatprep.subr.bf16.mxu0 %v4774_v55  ;;  %2060 = vmatprep.subr.bf16.mxu1 %v4777_v54 }
 0x7c4   :  { %2020 = vmatpush1.bf16.msra.mxu0 %v4780_v63  ;;  %2061 = vmatpush1.bf16.msra.mxu1 %v4783_v50 }
 0x7c5   :  { %2021 = vmatprep.subr.bf16.mxu0 %v4786_v46  ;;  %2062 = vmatprep.subr.bf16.mxu1 %v6262_v13 }
 0x7c8   :  { %2022 = vmatpush1.bf16.msra.mxu0 %v6263_v9  ;;  %2063 = vmatpush1.bf16.msra.mxu1 %v6264_v10 }
 0x7c9   :  { %2023 = vmatprep.subr.bf16.mxu0 %v6265_v62  ;;  %2064 = vmatprep.subr.bf16.mxu1 %v6266_v60 }
 0x7cc   :  { %2024 = vmatpush1.bf16.msra.mxu0 %v6267_v6  ;;  %2065 = vmatpush1.bf16.msra.mxu1 %v6268_v3 }
 0x7cd   :  { %2025 = vmatprep.subr.bf16.mxu0 %v6269_v36  ;;  %2066 = vmatprep.subr.bf16.mxu1 %v6270_v24  ;;  %v6320_v24 = vld [vmem:[#allocation78_spill] sm:$0xff] }
 0x7d0   :  { %2026 = vmatpush1.bf16.msra.mxu0 %v6271_v21  ;;  %2067 = vmatpush1.bf16.msra.mxu1 %v6272_v45  ;;  %v6319_v45 = vld [vmem:[#allocation76_spill] sm:$0xff] }
 0x7d1   :  { %2027 = vmatprep.subr.bf16.mxu0 %v6273_v0  ;;  %2068 = vmatprep.subr.bf16.mxu1 %v6274_v32  ;;  %v6284_v0 = vld [vmem:[#allocation113_spill] sm:$0xff]  ;;  %v6285_v32 = vld [vmem:[#allocation114_spill] sm:$0xff] }
 0x7d4   :  { %2028 = vmatpush1.bf16.msra.mxu0 %v6275_v43  ;;  %2069 = vmatpush1.bf16.msra.mxu1 %v6276_v56  ;;  %v6286_v43 = vld [vmem:[#allocation115_spill] sm:$0xff]  ;;  %v6287_v56 = vld [vmem:[#allocation116_spill] sm:$0xff] }
 0x7d5   :  { %2029 = vmatprep.subr.bf16.mxu0 %v6277_v38  ;;  %2070 = vmatprep.subr.bf16.mxu1 %v6278_v39  ;;  %v6288_v38 = vld [vmem:[#allocation117_spill] sm:$0xff]  ;;  %v6289_v39 = vld [vmem:[#allocation118_spill] sm:$0xff] }
 0x7d8   :  { %2030 = vmatpush1.bf16.msra.mxu0 %v6279_v25  ;;  %2071 = vmatpush1.bf16.msra.mxu1 %v6280_v31  ;;  %v6290_v25 = vld [vmem:[#allocation119_spill] sm:$0xff]  ;;  %v6291_v31 = vld [vmem:[#allocation120_spill] sm:$0xff] }
 0x7d9   :  { %2031 = vmatprep.subr.bf16.mxu0 %v6281_v42  ;;  %2072 = vmatprep.subr.bf16.mxu1 %v6282_v4  ;;  %v6292_v42 = vld [vmem:[#allocation121_spill] sm:$0xff]  ;;  %v6293_v4 = vld [vmem:[#allocation122_spill] sm:$0xff] }
 0x7dc   :  { %2032 = vmatpush1.bf16.msra.mxu0 %v6283_v18  ;;  %2073 = vmatpush1.bf16.msra.mxu1 %v6284_v0  ;;  %v6294_v18 = vld [vmem:[#allocation123_spill] sm:$0xff]  ;;  %v6295_v0 = vld [vmem:[#allocation124_spill] sm:$0xff] }
 0x7dd   :  { %2033 = vmatprep.subr.bf16.mxu0 %v6285_v32  ;;  %2074 = vmatprep.subr.bf16.mxu1 %v6286_v43  ;;  %v6296_v32 = vld [vmem:[#allocation125_spill] sm:$0xff]  ;;  %v6297_v43 = vld [vmem:[#allocation126_spill] sm:$0xff] }
 0x7e0   :  { %2034 = vmatpush1.bf16.msra.mxu0 %v6287_v56  ;;  %2075 = vmatpush1.bf16.msra.mxu1 %v6288_v38  ;;  %v6298_v56 = vld [vmem:[#allocation127_spill] sm:$0xff]  ;;  %v6299_v38 = vld [vmem:[#allocation128_spill] sm:$0xff] }
 0x7e1   :  { %2035 = vmatprep.subr.bf16.mxu0 %v6289_v39  ;;  %2076 = vmatprep.subr.bf16.mxu1 %v6290_v25  ;;  %v6300_v39 = vld [vmem:[#allocation129_spill] sm:$0xff]  ;;  %v6301_v25 = vld [vmem:[#allocation130_spill] sm:$0xff] }
 0x7e4   :  { %2036 = vmatpush1.bf16.msra.mxu0 %v6291_v31  ;;  %2077 = vmatpush1.bf16.msra.mxu1 %v6292_v42  ;;  %v6302_v31 = vld [vmem:[#allocation131_spill] sm:$0xff]  ;;  %v6303_v42 = vld [vmem:[#allocation132_spill] sm:$0xff] }
 0x7e5   :  { %2037 = vmatprep.subr.bf16.mxu0 %v6293_v4  ;;  %2078 = vmatprep.subr.bf16.mxu1 %v6294_v18  ;;  %v6304_v4 = vld [vmem:[#allocation133_spill] sm:$0xff]  ;;  %v6305_v18 = vld [vmem:[#allocation134_spill] sm:$0xff] }
 0x7e8   :  { %2038 = vmatpush1.bf16.msra.mxu0 %v6295_v0  ;;  %2079 = vmatpush1.bf16.msra.mxu1 %v6296_v32  ;;  %v6306_v0 = vld [vmem:[#allocation135_spill] sm:$0xff]  ;;  %v6307_v32 = vld [vmem:[#allocation136_spill] sm:$0xff] }
 0x7e9   :  { %2039 = vmatprep.subr.bf16.mxu0 %v6297_v43  ;;  %2080 = vmatprep.subr.bf16.mxu1 %v6298_v56  ;;  %v6308_v43 = vld [vmem:[#allocation137_spill] sm:$0xff]  ;;  %v6309_v56 = vld [vmem:[#allocation138_spill] sm:$0xff] }
 0x7ec   :  { %2040 = vmatpush1.bf16.msra.mxu0 %v6299_v38  ;;  %2081 = vmatpush1.bf16.msra.mxu1 %v6300_v39  ;;  %v6310_v38 = vld [vmem:[#allocation139_spill] sm:$0xff]  ;;  %v6311_v39 = vld [vmem:[#allocation140_spill] sm:$0xff] }
 0x7ed   :  { %2041 = vmatprep.subr.bf16.mxu0 %v6301_v25  ;;  %2082 = vmatprep.subr.bf16.mxu1 %v6302_v31  ;;  %v6312_v25 = vld [vmem:[#allocation141_spill] sm:$0xff]  ;;  %v6313_v31 = vld [vmem:[#allocation142_spill] sm:$0xff] }
 0x7f0   :  { %2042 = vmatpush1.bf16.msra.mxu0 %v6303_v42  ;;  %2083 = vmatpush1.bf16.msra.mxu1 %v6304_v4  ;;  %v6314_v42 = vld [vmem:[#allocation143_spill] sm:$0xff]  ;;  %v6315_v4 = vld [vmem:[#allocation144_spill] sm:$0xff] }
 0x7f1   :  { %2043 = vmatprep.subr.bf16.mxu0 %v6305_v18  ;;  %2084 = vmatprep.subr.bf16.mxu1 %v6306_v0  ;;  %v6316_v18 = vld [vmem:[#allocation145_spill] sm:$0xff] }
 0x7f2   :  { %v6317_v0 = vld [vmem:[#allocation97_spill] sm:$0xff] }
 0x7f4   :  { %2044 = vmatpush1.bf16.msra.mxu0 %v6307_v32  ;;  %2085 = vmatpush1.bf16.msra.mxu1 %v6308_v43  ;;  %v6318_v32 = vld [vmem:[#allocation64_spill] sm:$0xff] }
 0x7f5   :  { %2045 = vmatprep.subr.bf16.mxu0 %v6309_v56  ;;  %2086 = vmatprep.subr.bf16.mxu1 %v6310_v38 }
 0x7f8   :  { %2046 = vmatpush1.bf16.msra.mxu0 %v6311_v39  ;;  %2087 = vmatpush1.bf16.msra.mxu1 %v6312_v25 }
 0x7f9   :  { %2047 = vmatprep.subr.bf16.mxu0 %v6313_v31  ;;  %2088 = vmatprep.subr.bf16.mxu1 %v6314_v42 }
 0x7fc   :  { %2048 = vmatpush1.bf16.msra.mxu0 %v6315_v4  ;;  %2089 = vmatpush1.bf16.msra.mxu1 %v6316_v18  ;;  %v6321_v18 = vld [vmem:[#allocation79_spill] sm:$0xff] }
 0x7fd   :  { %2141 = vmatprep.subr.bf16.mxu0 %v6317_v0  ;;  %2182 = vmatprep.subr.bf16.mxu1 %v6318_v32  ;;  %v6322_v32 = vld [vmem:[#allocation77_spill] sm:$0xff] }
 0x872   :  { %v1798_v43 = vpop.f32.mrb[60].mxu0  ;;  %v1839_v56 = vpop.f32.mrb[60].mxu1 }
 0x873   :  { %v1846_v38 = vadd.f32 %v1798_v43, %v6319_v45  ;;  %v1800_v21 = vpop.f32.mrb[61].mxu0  ;;  %v1841_v39 = vpop.f32.mrb[61].mxu1  ;;  %v1848_v62 = vadd.f32 %v1839_v56, %v6322_v32 }
 0x874   :  { %v1847_v25 = vadd.f32 %v1800_v21, %v6320_v24  ;;  %v1802_v36 = vpop.f32.mrb[62].mxu0  ;;  %v1843_v31 = vpop.f32.mrb[62].mxu1  ;;  %v1849_v0 = vadd.f32 %v1841_v39, %v6321_v18 }
 0x875   :  { %v2989_v3 = vmul.f32 -1.442695, %v1846_v38  ;;  %v1803_v42 = vpop.f32.mrb[63].mxu0  ;;  %v1844_v6 = vpop.f32.mrb[63].mxu1 }
 0x876   :  { %v2990_v4 = vmul.f32 -1.442695, %v1847_v25  ;;  %v2991_v60 = vmul.f32 -1.442695, %v1849_v0  ;;  %v6323_v25 = vld [vmem:[#allocation146_spill] sm:$0xff] }
 0x877   :  { %3183 = vpow2.f32 %v2989_v3 }
 0x878   :  { %3185 = vpow2.f32 %v2990_v4  ;;  %v6325_v4 = vld [vmem:[#allocation48_spill] sm:$0xff] }
 0x879   :  { %3187 = vpow2.f32 %v2991_v60 }
 0x87a   :  { %3189 = vtanh.f32 %v1848_v62 }
 0x881   :  { %v3184_v10 = vpop.eup %3183 }
 0x882   :  { %v3186_v9 = vpop.eup %3185  ;;  %v1853_v45 = vadd.f32 1.0, %v3184_v10 }
 0x883   :  { %v1859_v43 = vadd.f32 1.0, %v3186_v9  ;;  %v3188_v36 = vpop.eup %3187  ;;  %v6326_v9 = vld [vmem:[#allocation50_spill] sm:$0xff] }
 0x884   :  { %3191 = vrcp.f32 %v1853_v45  ;;  %v3190_v24 = vpop.eup %3189  ;;  %v1866_v3 = vadd.f32 1.0, %v3188_v36 }
 0x885   :  { %3193 = vrcp.f32 %v1859_v43 }
 0x886   :  { %3195 = vrcp.f32 %v1866_v3 }
 0x88e   :  { %v3192_v21 = vpop.eup %3191 }
 0x88f   :  { %v3194_v6 = vpop.eup %3193  ;;  %v1870_v38 = vmul.f32 %v3192_v21, %v3190_v24  ;;  %v6327_v21 = vld [vmem:[#allocation51_spill] sm:$0xff] }
 0x890   :  { %v1869_v31 = vmul.f32 %v3194_v6, %v6323_v25 }
 0x892   :  { %v5080_v39 = vadd.f32 %v1870_v38, %v1869_v31  ;;  %v1922_v42 = vpop.f32.mrb[64].mxu0  ;;  %v1963_v56 = vpop.f32.mrb[64].mxu1 }
 0x893   :  { %v1970_v10 = vadd.f32 %v1922_v42, %v6325_v4  ;;  %v1924_v60 = vpop.f32.mrb[65].mxu0  ;;  %v1965_v62 = vpop.f32.mrb[65].mxu1  ;;  %v6328_v42 = vld [vmem:[#allocation49_spill] sm:$0xff] }
 0x894   :  { %6324 = vst [vmem:[#allocation147_spill] sm:$0xff] %v5080_v39  ;;  %3197 = vtanh.f32 %v5080_v39  ;;  %v1971_v18 = vadd.f32 %v1924_v60, %v6326_v9  ;;  %v1926_v0 = vpop.f32.mrb[66].mxu0  ;;  %v1967_v32 = vpop.f32.mrb[66].mxu1  ;;  %v1973_v6 = vadd.f32 %v1965_v62, %v6327_v21  ;;  %v1972_v4 = vadd.f32 %v1963_v56, %v6328_v42 }
 0x895   :  { %v2992_v45 = vmul.f32 -1.442695, %v1970_v10  ;;  %v1927_v43 = vpop.f32.mrb[67].mxu0  ;;  %v1968_v36 = vpop.f32.mrb[67].mxu1 }
 0x896   :  { %v2993_v24 = vmul.f32 -1.442695, %v1971_v18  ;;  %v3196_v38 = vpop.eup %3195  ;;  %v2994_v25 = vmul.f32 -1.442695, %v1973_v6 }
 0x897   :  { %3199 = vpow2.f32 %v2992_v45 }
 0x898   :  { %3201 = vpow2.f32 %v2993_v24 }
 0x899   :  { %3203 = vpow2.f32 %v2994_v25 }
 0x89a   :  { %3205 = vtanh.f32 %v1972_v4  ;;  %v6368_v4 = vld [vmem:[#allocation130_spill] sm:$0xff] }
 0x89e   :  { %v3198_v3 = vpop.eup %3197 }
 0x89f   :  { %v1873_v31 = vmul.f32 %v3198_v3, %v3196_v38 }
 0x8a1   :  { %v3200_v13 = vpop.eup %3199  ;;  %v1874_v39 = vpack.c.bf16 %v1873_v31, %v1873_v31  ;;  %v1876_v60 = vadd.f32 %v1873_v31, %v4973_v27 }
 0x8a2   :  { %v3202_v9 = vpop.eup %3201  ;;  %v1977_v0 = vadd.f32 1.0, %v3200_v13 }
 0x8a3   :  { %1875 = vst [vmem:[#allocation8 + $0x4] sm:$0xf] %v1874_v39  ;;  %v1877_v10 = vpack.c.bf16 %v1876_v60, %v1876_v60  ;;  %v1983_v18 = vadd.f32 1.0, %v3202_v9  ;;  %v3204_v62 = vpop.eup %3203  ;;  %v1999_v39 = vld [vmem:[#allocation13 + $0x20] sm:$0xff]  ;;  %v6370_v9 = vld [vmem:[#allocation132_spill] sm:$0xff] }
 0x8a4   :  { %3207 = vrcp.f32 %v1977_v0  ;;  %v3206_v32 = vpop.eup %3205  ;;  %v1990_v56 = vadd.f32 1.0, %v3204_v62  ;;  %v6369_v60 = vld [vmem:[#allocation131_spill] sm:$0xff]  ;;  %v6371_v0 = vld [vmem:[#allocation133_spill] sm:$0xff]  ;;  %v6374_v62 = vld [vmem:[#allocation136_spill] sm:$0xff] }
 0x8a5   :  { %1879 = vst [vmem:[#allocation19 + $0xc] sm:$0xf] %v1877_v10  ;;  %3209 = vrcp.f32 %v1983_v18  ;;  %v6372_v10 = vld [vmem:[#allocation134_spill] sm:$0xff]  ;;  %v6373_v18 = vld [vmem:[#allocation135_spill] sm:$0xff] }
 0x8a6   :  { %3211 = vrcp.f32 %v1990_v56  ;;  %v6379_v56 = vld [vmem:[#allocation141_spill] sm:$0xff] }
 0x8ae   :  { %v3208_v45 = vpop.eup %3207 }
 0x8af   :  { %v3210_v43 = vpop.eup %3209  ;;  %v1994_v36 = vmul.f32 %v3208_v45, %v3206_v32  ;;  %v6375_v32 = vld [vmem:[#allocation137_spill] sm:$0xff]  ;;  %v6376_v45 = vld [vmem:[#allocation138_spill] sm:$0xff] }
 0x8b0   :  { %v1993_v24 = vmul.f32 %v3210_v43, %v4970_v44  ;;  %v3212_v27 = vpop.eup %3211  ;;  %v6367_v44 = vld [vmem:[#allocation129_spill] sm:$0xff]  ;;  %v6377_v43 = vld [vmem:[#allocation139_spill] sm:$0xff] }
 0x8b2   :  { %v5089_v21 = vadd.f32 %v1994_v36, %v1993_v24  ;;  %v6378_v36 = vld [vmem:[#allocation140_spill] sm:$0xff]  ;;  %v6380_v24 = vld [vmem:[#allocation142_spill] sm:$0xff] }
 0x8b4   :  { %3213 = vtanh.f32 %v5089_v21 }
 0x8be   :  { %v3214_v13 = vpop.eup %3213 }
 0x8bf   :  { %v1997_v6 = vmul.f32 %v3214_v13, %v3212_v27  ;;  %v6381_v27 = vld [vmem:[#allocation143_spill] sm:$0xff]  ;;  %v6382_v13 = vld [vmem:[#allocation144_spill] sm:$0xff] }
 0x8c1   :  { %v5092_v38 = vadd.f32 %v1999_v39, %v1997_v6  ;;  %v6383_v39 = vld [vmem:[#allocation145_spill] sm:$0xff] }
 0x8c3   :  { %v2001_v3 = vpack.c.bf16 %v5092_v38, %v5092_v38 }
 0x8c5   :  { %2002 = vst [vmem:[#allocation8] sm:$0xf] %v2001_v3  ;;  %v5195_v3 = vld [vmem:[#allocation3 + $0x18] sm:$0xff] }
 0x8cc   :  { %v2009_v25 = vld [vmem:[#allocation8] sm:$0xff] }
 0x8cd   :  { %v2996_v31 = vcombine.high %v2009_v25, %v2009_v25  ;;  %v2995_v42 = vcombine.low %v2009_v25, %v2009_v25 }
 0x8cf   :  { %2049 = vmatprep.mubr.bf16.mxu0 %v2996_v31  ;;  %2090 = vmatprep.mubr.bf16.mxu1 %v2996_v31 }
 0x8d0   :  { %2050 = vmatmul.mubr.bf16.vlgmr.msra.gmra.mrb[68].mxu0 %v2995_v42  ;;  %2091 = vmatmul.mubr.bf16.vlgmr.msra.gmra.mrb[68].mxu1 %v2995_v42  ;;  %v6384_v42 = vld [vmem:[#allocation80_spill] sm:$0xff] }
 0x8d1   :  { %2142 = vmatpush1.bf16.msra.mxu0 %v4668_v16  ;;  %2183 = vmatpush1.bf16.msra.mxu1 %v4671_v23  ;;  %v2140_v16 = vpack.c.bf16 %v1997_v6, %v1997_v6  ;;  %v6329_v23 = vld [vmem:[#allocation66_spill] sm:$0xff]  ;;  %v5192_v6 = vld [vmem:[#allocation3 + $0x8] sm:$0xff] }
 0x8d2   :  { %2143 = vmatprep.subr.bf16.mxu0 %v4674_v28  ;;  %2184 = vmatprep.subr.bf16.mxu1 %v4677_v30  ;;  %v6330_v28 = vld [vmem:[#allocation67_spill] sm:$0xff]  ;;  %v6331_v30 = vld [vmem:[#allocation65_spill] sm:$0xff] }
 0x8d3   :  { %2173 = vmatprep.mubr.bf16.mxu0 %v6012_v53  ;;  %2214 = vmatprep.mubr.bf16.mxu1 %v6012_v53 }
 0x8d5   :  { %2144 = vmatpush1.bf16.msra.mxu0 %v4682_v41  ;;  %2185 = vmatpush1.bf16.msra.mxu1 %v4685_v51  ;;  %v6332_v41 = vld [vmem:[#allocation36_spill] sm:$0xff]  ;;  %v6333_v51 = vld [vmem:[#allocation38_spill] sm:$0xff] }
 0x8d6   :  { %2145 = vmatprep.subr.bf16.mxu0 %v4688_v48  ;;  %2186 = vmatprep.subr.bf16.mxu1 %v4691_v1  ;;  %v6334_v48 = vld [vmem:[#allocation39_spill] sm:$0xff]  ;;  %v6335_v1 = vld [vmem:[#allocation37_spill] sm:$0xff] }
 0x8d9   :  { %2146 = vmatpush1.bf16.msra.mxu0 %v4694_v49  ;;  %2187 = vmatpush1.bf16.msra.mxu1 %v4697_v22  ;;  %v6336_v49 = vld [vmem:[#allocation98_spill] sm:$0xff]  ;;  %v6337_v22 = vld [vmem:[#allocation99_spill] sm:$0xff] }
 0x8da   :  { %2147 = vmatprep.subr.bf16.mxu0 %v4700_v29  ;;  %2188 = vmatprep.subr.bf16.mxu1 %v4703_v57  ;;  %v6338_v29 = vld [vmem:[#allocation100_spill] sm:$0xff]  ;;  %v6339_v57 = vld [vmem:[#allocation101_spill] sm:$0xff] }
 0x8dd   :  { %2148 = vmatpush1.bf16.msra.mxu0 %v4706_v26  ;;  %2189 = vmatpush1.bf16.msra.mxu1 %v4709_v35  ;;  %v6340_v26 = vld [vmem:[#allocation102_spill] sm:$0xff]  ;;  %v6341_v35 = vld [vmem:[#allocation103_spill] sm:$0xff] }
 0x8de   :  { %2149 = vmatprep.subr.bf16.mxu0 %v4712_v11  ;;  %2190 = vmatprep.subr.bf16.mxu1 %v4715_v7  ;;  %v6342_v11 = vld [vmem:[#allocation104_spill] sm:$0xff]  ;;  %v6343_v7 = vld [vmem:[#allocation105_spill] sm:$0xff] }
 0x8e1   :  { %2150 = vmatpush1.bf16.msra.mxu0 %v4718_v17  ;;  %2191 = vmatpush1.bf16.msra.mxu1 %v4721_v61  ;;  %v6344_v17 = vld [vmem:[#allocation106_spill] sm:$0xff]  ;;  %v6345_v61 = vld [vmem:[#allocation107_spill] sm:$0xff] }
 0x8e2   :  { %2151 = vmatprep.subr.bf16.mxu0 %v4724_v33  ;;  %2192 = vmatprep.subr.bf16.mxu1 %v4727_v40  ;;  %v6346_v33 = vld [vmem:[#allocation108_spill] sm:$0xff]  ;;  %v6347_v40 = vld [vmem:[#allocation109_spill] sm:$0xff] }
 0x8e5   :  { %2152 = vmatpush1.bf16.msra.mxu0 %v4730_v34  ;;  %2193 = vmatpush1.bf16.msra.mxu1 %v4733_v47  ;;  %v6348_v34 = vld [vmem:[#allocation110_spill] sm:$0xff]  ;;  %v6349_v47 = vld [vmem:[#allocation111_spill] sm:$0xff] }
 0x8e6   :  { %2153 = vmatprep.subr.bf16.mxu0 %v4736_v19  ;;  %2194 = vmatprep.subr.bf16.mxu1 %v4739_v5  ;;  %v6350_v19 = vld [vmem:[#allocation112_spill] sm:$0xff]  ;;  %v6351_v5 = vld [vmem:[#allocation113_spill] sm:$0xff] }
 0x8e9   :  { %2154 = vmatpush1.bf16.msra.mxu0 %v4742_v15  ;;  %2195 = vmatpush1.bf16.msra.mxu1 %v4745_v59  ;;  %v6352_v15 = vld [vmem:[#allocation114_spill] sm:$0xff]  ;;  %v6353_v59 = vld [vmem:[#allocation115_spill] sm:$0xff] }
 0x8ea   :  { %2155 = vmatprep.subr.bf16.mxu0 %v4748_v8  ;;  %2196 = vmatprep.subr.bf16.mxu1 %v4751_v12  ;;  %v6354_v8 = vld [vmem:[#allocation116_spill] sm:$0xff]  ;;  %v6355_v12 = vld [vmem:[#allocation117_spill] sm:$0xff] }
 0x8ed   :  { %2156 = vmatpush1.bf16.msra.mxu0 %v4754_v52  ;;  %2197 = vmatpush1.bf16.msra.mxu1 %v4757_v37  ;;  %v6356_v52 = vld [vmem:[#allocation118_spill] sm:$0xff]  ;;  %v6357_v37 = vld [vmem:[#allocation119_spill] sm:$0xff] }
 0x8ee   :  { %2270 = vmatprep.subr.bf16.mxu0 %v4762_v20  ;;  %2311 = vmatprep.subr.bf16.mxu1 %v4765_v2  ;;  %v6358_v20 = vld [vmem:[#allocation120_spill] sm:$0xff]  ;;  %v6359_v2 = vld [vmem:[#allocation121_spill] sm:$0xff] }
 0x8f0   :  { %2174 = vmatmul.mubr.bf16.vlgmr.msra.gmra.mrb[72].mxu0 %v2140_v16  ;;  %2215 = vmatmul.mubr.bf16.vlgmr.msra.gmra.mrb[72].mxu1 %v2140_v16 }
 0x8f1   :  { %2271 = vmatpush1.bf16.msra.mxu0 %v4768_v58  ;;  %2312 = vmatpush1.bf16.msra.mxu1 %v4771_v14  ;;  %v6360_v58 = vld [vmem:[#allocation122_spill] sm:$0xff]  ;;  %v6361_v14 = vld [vmem:[#allocation123_spill] sm:$0xff] }
 0x8f2   :  { %2272 = vmatprep.subr.bf16.mxu0 %v4774_v55  ;;  %2313 = vmatprep.subr.bf16.mxu1 %v4777_v54  ;;  %v6362_v55 = vld [vmem:[#allocation124_spill] sm:$0xff]  ;;  %v6363_v54 = vld [vmem:[#allocation125_spill] sm:$0xff] }
 0x8f5   :  { %2273 = vmatpush1.bf16.msra.mxu0 %v4780_v63  ;;  %2314 = vmatpush1.bf16.msra.mxu1 %v4783_v50  ;;  %v6364_v63 = vld [vmem:[#allocation126_spill] sm:$0xff]  ;;  %v6365_v50 = vld [vmem:[#allocation127_spill] sm:$0xff] }
 0x8f6   :  { %2274 = vmatprep.subr.bf16.mxu0 %v4786_v46  ;;  %2315 = vmatprep.subr.bf16.mxu1 %v6329_v23  ;;  %v6366_v46 = vld [vmem:[#allocation128_spill] sm:$0xff] }
 0x8f9   :  { %2275 = vmatpush1.bf16.msra.mxu0 %v6330_v28  ;;  %2316 = vmatpush1.bf16.msra.mxu1 %v6331_v30  ;;  %v6385_v30 = vld [vmem:[#allocation82_spill] sm:$0xff] }
 0x8fa   :  { %2276 = vmatprep.subr.bf16.mxu0 %v6332_v41  ;;  %2317 = vmatprep.subr.bf16.mxu1 %v6333_v51 }
 0x8fd   :  { %2277 = vmatpush1.bf16.msra.mxu0 %v6334_v48  ;;  %2318 = vmatpush1.bf16.msra.mxu1 %v6335_v1 }
 0x8fe   :  { %2278 = vmatprep.subr.bf16.mxu0 %v6336_v49  ;;  %2319 = vmatprep.subr.bf16.mxu1 %v6337_v22 }
 0x901   :  { %2279 = vmatpush1.bf16.msra.mxu0 %v6338_v29  ;;  %2320 = vmatpush1.bf16.msra.mxu1 %v6339_v57  ;;  %v6386_v57 = vld [vmem:[#allocation83_spill] sm:$0xff] }
 0x902   :  { %2280 = vmatprep.subr.bf16.mxu0 %v6340_v26  ;;  %2321 = vmatprep.subr.bf16.mxu1 %v6341_v35 }
 0x905   :  { %2281 = vmatpush1.bf16.msra.mxu0 %v6342_v11  ;;  %2322 = vmatpush1.bf16.msra.mxu1 %v6343_v7  ;;  %v6387_v11 = vld [vmem:[#allocation81_spill] sm:$0xff] }
 0x906   :  { %2282 = vmatprep.subr.bf16.mxu0 %v6344_v17  ;;  %2323 = vmatprep.subr.bf16.mxu1 %v6345_v61 }
 0x909   :  { %2283 = vmatpush1.bf16.msra.mxu0 %v6346_v33  ;;  %2324 = vmatpush1.bf16.msra.mxu1 %v6347_v40 }
 0x90a   :  { %2284 = vmatprep.subr.bf16.mxu0 %v6348_v34  ;;  %2325 = vmatprep.subr.bf16.mxu1 %v6349_v47 }
 0x90d   :  { %2285 = vmatpush1.bf16.msra.mxu0 %v6350_v19  ;;  %2326 = vmatpush1.bf16.msra.mxu1 %v6351_v5 }
 0x90e   :  { %2286 = vmatprep.subr.bf16.mxu0 %v6352_v15  ;;  %2327 = vmatprep.subr.bf16.mxu1 %v6353_v59 }
 0x911   :  { %2287 = vmatpush1.bf16.msra.mxu0 %v6354_v8  ;;  %2328 = vmatpush1.bf16.msra.mxu1 %v6355_v12  ;;  %v6388_v8 = vld [vmem:[#allocation147_spill] sm:$0xff] }
 0x912   :  { %2288 = vmatprep.subr.bf16.mxu0 %v6356_v52  ;;  %2329 = vmatprep.subr.bf16.mxu1 %v6357_v37 }
 0x915   :  { %2289 = vmatpush1.bf16.msra.mxu0 %v6358_v20  ;;  %2330 = vmatpush1.bf16.msra.mxu1 %v6359_v2  ;;  %v6389_v2 = vld [vmem:[#allocation52_spill] sm:$0xff] }
 0x916   :  { %2290 = vmatprep.subr.bf16.mxu0 %v6360_v58  ;;  %2331 = vmatprep.subr.bf16.mxu1 %v6361_v14 }
 0x919   :  { %2291 = vmatpush1.bf16.msra.mxu0 %v6362_v55  ;;  %2332 = vmatpush1.bf16.msra.mxu1 %v6363_v54  ;;  %v6390_v54 = vld [vmem:[#allocation54_spill] sm:$0xff] }
 0x91a   :  { %2292 = vmatprep.subr.bf16.mxu0 %v6364_v63  ;;  %2333 = vmatprep.subr.bf16.mxu1 %v6365_v50 }
 0x91d   :  { %2293 = vmatpush1.bf16.msra.mxu0 %v6366_v46  ;;  %2334 = vmatpush1.bf16.msra.mxu1 %v6367_v44 }
 0x91e   :  { %2294 = vmatprep.subr.bf16.mxu0 %v6368_v4  ;;  %2335 = vmatprep.subr.bf16.mxu1 %v6369_v60 }
 0x921   :  { %2295 = vmatpush1.bf16.msra.mxu0 %v6370_v9  ;;  %2336 = vmatpush1.bf16.msra.mxu1 %v6371_v0  ;;  %v6391_v0 = vld [vmem:[#allocation55_spill] sm:$0xff] }
 0x922   :  { %2296 = vmatprep.subr.bf16.mxu0 %v6372_v10  ;;  %2337 = vmatprep.subr.bf16.mxu1 %v6373_v18 }
 0x925   :  { %2297 = vmatpush1.bf16.msra.mxu0 %v6374_v62  ;;  %2338 = vmatpush1.bf16.msra.mxu1 %v6375_v32 }
 0x926   :  { %2298 = vmatprep.subr.bf16.mxu0 %v6376_v45  ;;  %2339 = vmatprep.subr.bf16.mxu1 %v6377_v43  ;;  %v6392_v43 = vld [vmem:[#allocation53_spill] sm:$0xff] }
 0x929   :  { %2299 = vmatpush1.bf16.msra.mxu0 %v6378_v36  ;;  %2340 = vmatpush1.bf16.msra.mxu1 %v6379_v56 }
 0x92a   :  { %2300 = vmatprep.subr.bf16.mxu0 %v6380_v24  ;;  %2341 = vmatprep.subr.bf16.mxu1 %v6381_v27 }
 0x92d   :  { %2301 = vmatpush1.bf16.msra.mxu0 %v6382_v13  ;;  %2342 = vmatpush1.bf16.msra.mxu1 %v6383_v39 }
 0x92e   :  { %2394 = vmatprep.subr.bf16.mxu0 %v5192_v6  ;;  %2435 = vmatprep.subr.bf16.mxu1 %v5195_v3 }
 0x9a3   :  { %v2051_v25 = vpop.f32.mrb[68].mxu0  ;;  %v2092_v31 = vpop.f32.mrb[68].mxu1 }
 0x9a4   :  { %v2099_v16 = vadd.f32 %v2051_v25, %v6384_v42  ;;  %v2053_v23 = vpop.f32.mrb[69].mxu0  ;;  %v2094_v28 = vpop.f32.mrb[69].mxu1  ;;  %v2101_v7 = vadd.f32 %v2092_v31, %v6387_v11  ;;  %v5222_v11 = vld [vmem:[#allocation3] sm:$0xff] }
 0x9a5   :  { %v2100_v41 = vadd.f32 %v2053_v23, %v6385_v30  ;;  %v2055_v51 = vpop.f32.mrb[70].mxu0  ;;  %v2096_v48 = vpop.f32.mrb[70].mxu1  ;;  %v2102_v26 = vadd.f32 %v2094_v28, %v6386_v57 }
 0x9a6   :  { %v2997_v1 = vmul.f32 -1.442695, %v2099_v16  ;;  %v2056_v49 = vpop.f32.mrb[71].mxu0  ;;  %v2097_v22 = vpop.f32.mrb[71].mxu1 }
 0x9a7   :  { %v2998_v29 = vmul.f32 -1.442695, %v2100_v41  ;;  %v2999_v35 = vmul.f32 -1.442695, %v2102_v26  ;;  %v2252_v49 = vld [vmem:[#allocation13 + $0x28] sm:$0xff] }
 0x9a8   :  { %3215 = vpow2.f32 %v2997_v1 }
 0x9a9   :  { %3217 = vpow2.f32 %v2998_v29 }
 0x9aa   :  { %3219 = vpow2.f32 %v2999_v35 }
 0x9ab   :  { %3221 = vtanh.f32 %v2101_v7  ;;  %v5225_v7 = vld [vmem:[#allocation3 + $0x10] sm:$0xff] }
 0x9b2   :  { %v3216_v17 = vpop.eup %3215 }
 0x9b3   :  { %v3218_v61 = vpop.eup %3217  ;;  %v2106_v33 = vadd.f32 1.0, %v3216_v17  ;;  %v5228_v17 = vld [vmem:[#allocation3 + $0x28] sm:$0xff] }
 0x9b4   :  { %v2112_v40 = vadd.f32 1.0, %v3218_v61  ;;  %v3220_v34 = vpop.eup %3219  ;;  %v5231_v61 = vld [vmem:[#allocation3 + $0x38] sm:$0xff] }
 0x9b5   :  { %3223 = vrcp.f32 %v2106_v33  ;;  %v3222_v47 = vpop.eup %3221  ;;  %v2119_v59 = vadd.f32 1.0, %v3220_v34  ;;  %v5236_v33 = vld [vmem:[#allocation3 + $0x20] sm:$0xff]  ;;  %v5242_v34 = vld [vmem:[#allocation3 + $0x48] sm:$0xff] }
 0x9b6   :  { %3225 = vrcp.f32 %v2112_v40  ;;  %v5239_v40 = vld [vmem:[#allocation3 + $0x30] sm:$0xff] }
 0x9b7   :  { %3227 = vrcp.f32 %v2119_v59  ;;  %v5257_v59 = vld [vmem:[#allocation3 + $0x78] sm:$0xff] }
 0x9bf   :  { %v3224_v19 = vpop.eup %3223 }
 0x9c0   :  { %v3226_v5 = vpop.eup %3225  ;;  %v2123_v15 = vmul.f32 %v3224_v19, %v3222_v47  ;;  %v5245_v47 = vld [vmem:[#allocation3 + $0x58] sm:$0xff]  ;;  %v5248_v19 = vld [vmem:[#allocation3 + $0x40] sm:$0xff] }
 0x9c1   :  { %v2122_v12 = vmul.f32 %v3226_v5, %v6388_v8  ;;  %v3228_v18 = vpop.eup %3227  ;;  %v5251_v5 = vld [vmem:[#allocation3 + $0x50] sm:$0xff]  ;;  %v5260_v8 = vld [vmem:[#allocation3 + $0x60] sm:$0xff] }
 0x9c3   :  { %v5203_v52 = vadd.f32 %v2123_v15, %v2122_v12  ;;  %v2175_v37 = vpop.f32.mrb[72].mxu0  ;;  %v2216_v20 = vpop.f32.mrb[72].mxu1  ;;  %v5254_v15 = vld [vmem:[#allocation3 + $0x68] sm:$0xff]  ;;  %v5263_v12 = vld [vmem:[#allocation3 + $0x70] sm:$0xff] }
 0x9c4   :  { %v2223_v58 = vadd.f32 %v2175_v37, %v6389_v2  ;;  %v2177_v14 = vpop.f32.mrb[73].mxu0  ;;  %v2218_v55 = vpop.f32.mrb[73].mxu1  ;;  %v2225_v36 = vadd.f32 %v2216_v20, %v6392_v43  ;;  %v5266_v37 = vld [vmem:[#allocation3 + $0x88] sm:$0xff]  ;;  %v5269_v20 = vld [vmem:[#allocation3 + $0x98] sm:$0xff]  ;;  %v5272_v2 = vld [vmem:[#allocation3 + $0x80] sm:$0xff] }
 0x9c5   :  { %3229 = vtanh.f32 %v5203_v52  ;;  %v2224_v63 = vadd.f32 %v2177_v14, %v6390_v54  ;;  %v2179_v50 = vpop.f32.mrb[74].mxu0  ;;  %v2220_v46 = vpop.f32.mrb[74].mxu1  ;;  %v2226_v10 = vadd.f32 %v2218_v55, %v6391_v0  ;;  %v5278_v14 = vld [vmem:[#allocation3 + $0xa8] sm:$0xff]  ;;  %v5281_v55 = vld [vmem:[#allocation3 + $0xb8] sm:$0xff]  ;;  %v5284_v54 = vld [vmem:[#allocation3 + $0xa0] sm:$0xff] }
 0x9c6   :  { %v3000_v44 = vmul.f32 -1.442695, %v2223_v58  ;;  %v2180_v4 = vpop.f32.mrb[75].mxu0  ;;  %v2221_v60 = vpop.f32.mrb[75].mxu1  ;;  %v5275_v58 = vld [vmem:[#allocation3 + $0x90] sm:$0xff]  ;;  %v5290_v50 = vld [vmem:[#allocation3 + $0xc8] sm:$0xff] }
 0x9c7   :  { %v3001_v9 = vmul.f32 -1.442695, %v2224_v63  ;;  %v3002_v32 = vmul.f32 -1.442695, %v2226_v10  ;;  %v5287_v63 = vld [vmem:[#allocation3 + $0xb0] sm:$0xff]  ;;  %v5293_v46 = vld [vmem:[#allocation3 + $0xd8] sm:$0xff] }
 0x9c8   :  { %3231 = vpow2.f32 %v3000_v44  ;;  %v5296_v44 = vld [vmem:[#allocation3 + $0xc0] sm:$0xff]  ;;  %v5299_v4 = vld [vmem:[#allocation3 + $0xd0] sm:$0xff]  ;;  %v5302_v60 = vld [vmem:[#allocation3 + $0xe8] sm:$0xff] }
 0x9c9   :  { %3233 = vpow2.f32 %v3001_v9  ;;  %v5305_v9 = vld [vmem:[#allocation3 + $0xf8] sm:$0xff]  ;;  %v5308_v0 = vld [vmem:[#allocation3 + $0xe0] sm:$0xff]  ;;  %v5311_v10 = vld [vmem:[#allocation3 + $0xf0] sm:$0xff] }
 0x9ca   :  { %3235 = vpow2.f32 %v3002_v32  ;;  %v5319_v32 = vld [vmem:[#allocation5 + $0x18] sm:$0xff]  ;;  %v5325_v43 = vld [vmem:[#allocation5 + $0x10] sm:$0xff] }
 0x9cb   :  { %3237 = vtanh.f32 %v2225_v36  ;;  %v5328_v36 = vld [vmem:[#allocation5 + $0x28] sm:$0xff] }
 0x9cf   :  { %v3230_v62 = vpop.eup %3229 }
 0x9d0   :  { %v2126_v45 = vmul.f32 %v3230_v62, %v3228_v18  ;;  %v5316_v62 = vld [vmem:[#allocation5 + $0x8] sm:$0xff] }
 0x9d2   :  { %v3232_v56 = vpop.eup %3231  ;;  %v2127_v24 = vpack.c.bf16 %v2126_v45, %v2126_v45  ;;  %v2129_v27 = vadd.f32 %v2126_v45, %v5092_v38  ;;  %v5322_v45 = vld [vmem:[#allocation5] sm:$0xff] }
 0x9d3   :  { %v3234_v13 = vpop.eup %3233  ;;  %v2230_v39 = vadd.f32 1.0, %v3232_v56  ;;  %v5331_v56 = vld [vmem:[#allocation5 + $0x38] sm:$0xff] }
 0x9d4   :  { %v2130_v25 = vpack.c.bf16 %v2129_v27, %v2129_v27  ;;  %2128 = vst [vmem:[#allocation8 + $0x4] sm:$0xf] %v2127_v24  ;;  %v2236_v31 = vadd.f32 1.0, %v3234_v13  ;;  %v3236_v42 = vpop.eup %3235  ;;  %v5334_v24 = vld [vmem:[#allocation5 + $0x20] sm:$0xff]  ;;  %v5337_v27 = vld [vmem:[#allocation5 + $0x30] sm:$0xff]  ;;  %v5340_v13 = vld [vmem:[#allocation5 + $0x48] sm:$0xff] }
 0x9d5   :  { %3239 = vrcp.f32 %v2230_v39  ;;  %v3238_v16 = vpop.eup %3237  ;;  %v2243_v41 = vadd.f32 1.0, %v3236_v42  ;;  %v5343_v39 = vld [vmem:[#allocation5 + $0x58] sm:$0xff]  ;;  %v5352_v42 = vld [vmem:[#allocation5 + $0x68] sm:$0xff] }
 0x9d6   :  { %2132 = vst [vmem:[#allocation19 + $0x10] sm:$0xf] %v2130_v25  ;;  %3241 = vrcp.f32 %v2236_v31  ;;  %6393 = vst [vmem:[#allocation148_spill] sm:$0xff] %v5343_v39  ;;  %v5346_v25 = vld [vmem:[#allocation5 + $0x40] sm:$0xff]  ;;  %v5349_v31 = vld [vmem:[#allocation5 + $0x50] sm:$0xff] }
 0x9d7   :  { %3243 = vrcp.f32 %v2243_v41  ;;  %6394 = vst [vmem:[#allocation149_spill] sm:$0xff] %v5346_v25  ;;  %6395 = vst [vmem:[#allocation150_spill] sm:$0xff] %v5349_v31  ;;  %v5367_v41 = vld [vmem:[#allocation5 + $0x98] sm:$0xff] }
 0x9d8   :  { %6396 = vst [vmem:[#allocation151_spill] sm:$0xff] %v5352_v42  ;;  %6401 = vst [vmem:[#allocation69_spill] sm:$0xff] %v5367_v41 }
 0x9df   :  { %v3240_v23 = vpop.eup %3239 }
 0x9e0   :  { %v3242_v28 = vpop.eup %3241  ;;  %v2247_v30 = vmul.f32 %v3240_v23, %v3238_v16  ;;  %v5355_v16 = vld [vmem:[#allocation5 + $0x78] sm:$0xff]  ;;  %v5358_v23 = vld [vmem:[#allocation5 + $0x60] sm:$0xff] }
 0x9e1   :  { %v2246_v51 = vmul.f32 %v3242_v28, %v5089_v21  ;;  %v3244_v38 = vpop.eup %3243  ;;  %6397 = vst [vmem:[#allocation152_spill] sm:$0xff] %v5355_v16  ;;  %6398 = vst [vmem:[#allocation68_spill] sm:$0xff] %v5358_v23  ;;  %v5361_v28 = vld [vmem:[#allocation5 + $0x70] sm:$0xff] }
 0x9e2   :  { %6399 = vst [vmem:[#allocation70_spill] sm:$0xff] %v5361_v28 }
 0x9e3   :  { %v5212_v48 = vadd.f32 %v2247_v30, %v2246_v51  ;;  %v5364_v30 = vld [vmem:[#allocation5 + $0x88] sm:$0xff]  ;;  %v5370_v51 = vld [vmem:[#allocation5 + $0x80] sm:$0xff] }
 0x9e4   :  { %6400 = vst [vmem:[#allocation71_spill] sm:$0xff] %v5364_v30  ;;  %6402 = vst [vmem:[#allocation96_spill] sm:$0xff] %v5370_v51 }
 0x9e5   :  { %3245 = vtanh.f32 %v5212_v48 }
 0x9ef   :  { %v3246_v1 = vpop.eup %3245 }
 0x9f0   :  { %v5215_v22 = vmul.f32 %v3246_v1, %v3244_v38  ;;  %v5373_v38 = vld [vmem:[#allocation5 + $0x90] sm:$0xff]  ;;  %v5376_v1 = vld [vmem:[#allocation5 + $0xa8] sm:$0xff] }
 0x9f1   :  { %6403 = vst [vmem:[#allocation40_spill] sm:$0xff] %v5373_v38  ;;  %6404 = vst [vmem:[#allocation42_spill] sm:$0xff] %v5376_v1 }
 0x9f2   :  { %v5218_v29 = vadd.f32 %v2252_v49, %v5215_v22  ;;  %v2393_v18 = vpack.c.bf16 %v5215_v22, %v5215_v22  ;;  %v5379_v49 = vld [vmem:[#allocation5 + $0xb8] sm:$0xff]  ;;  %v5382_v22 = vld [vmem:[#allocation5 + $0xa0] sm:$0xff] }
 0x9f3   :  { %6405 = vst [vmem:[#allocation43_spill] sm:$0xff] %v5379_v49  ;;  %6406 = vst [vmem:[#allocation41_spill] sm:$0xff] %v5382_v22 }
 0x9f4   :  { %v2254_v57 = vpack.c.bf16 %v5218_v29, %v5218_v29 }
 0x9f6   :  { %2255 = vst [vmem:[#allocation8] sm:$0xf] %v2254_v57  ;;  %v5385_v57 = vld [vmem:[#allocation5 + $0xb0] sm:$0xff] }
 0x9f7   :  { %6407 = vst [vmem:[#allocation72_spill] sm:$0xff] %v5385_v57 }
 0x9fd   :  { %v2262_v26 = vld [vmem:[#allocation8] sm:$0xff] }
 0x9fe   :  { %v3004_v35 = vcombine.high %v2262_v26, %v2262_v26  ;;  %v3003_v21 = vcombine.low %v2262_v26, %v2262_v26  ;;  %v5388_v26 = vld [vmem:[#allocation5 + $0xc8] sm:$0xff] }
 0x9ff   :  { %6408 = vst [vmem:[#allocation74_spill] sm:$0xff] %v5388_v26 }
 0xa00   :  { %2302 = vmatprep.mubr.bf16.mxu0 %v3004_v35  ;;  %2343 = vmatprep.mubr.bf16.mxu1 %v3004_v35  ;;  %v5391_v35 = vld [vmem:[#allocation5 + $0xd8] sm:$0xff] }
 0xa01   :  { %2303 = vmatmul.mubr.bf16.vlgmr.msra.gmra.mrb[76].mxu0 %v3003_v21  ;;  %2344 = vmatmul.mubr.bf16.vlgmr.msra.gmra.mrb[76].mxu1 %v3003_v21  ;;  %6409 = vst [vmem:[#allocation75_spill] sm:$0xff] %v5391_v35  ;;  %v5394_v21 = vld [vmem:[#allocation5 + $0xc0] sm:$0xff] }
 0xa02   :  { %2395 = vmatpush1.bf16.msra.mxu0 %v5222_v11  ;;  %2436 = vmatpush1.bf16.msra.mxu1 %v5225_v7  ;;  %6410 = vst [vmem:[#allocation73_spill] sm:$0xff] %v5394_v21 }
 0xa03   :  { %2396 = vmatprep.subr.bf16.mxu0 %v5228_v17  ;;  %2437 = vmatprep.subr.bf16.mxu1 %v5231_v61 }
 0xa04   :  { %2426 = vmatprep.mubr.bf16.mxu0 %v6012_v53  ;;  %2467 = vmatprep.mubr.bf16.mxu1 %v6012_v53 }
 0xa06   :  { %2397 = vmatpush1.bf16.msra.mxu0 %v5236_v33  ;;  %2438 = vmatpush1.bf16.msra.mxu1 %v5239_v40 }
 0xa07   :  { %2398 = vmatprep.subr.bf16.mxu0 %v5242_v34  ;;  %2439 = vmatprep.subr.bf16.mxu1 %v5245_v47 }
 0xa0a   :  { %2399 = vmatpush1.bf16.msra.mxu0 %v5248_v19  ;;  %2440 = vmatpush1.bf16.msra.mxu1 %v5251_v5 }
 0xa0b   :  { %2400 = vmatprep.subr.bf16.mxu0 %v5254_v15  ;;  %2441 = vmatprep.subr.bf16.mxu1 %v5257_v59 }
 0xa0e   :  { %2401 = vmatpush1.bf16.msra.mxu0 %v5260_v8  ;;  %2442 = vmatpush1.bf16.msra.mxu1 %v5263_v12 }
 0xa0f   :  { %2402 = vmatprep.subr.bf16.mxu0 %v5266_v37  ;;  %2443 = vmatprep.subr.bf16.mxu1 %v5269_v20 }
 0xa12   :  { %2403 = vmatpush1.bf16.msra.mxu0 %v5272_v2  ;;  %2444 = vmatpush1.bf16.msra.mxu1 %v5275_v58 }
 0xa13   :  { %2404 = vmatprep.subr.bf16.mxu0 %v5278_v14  ;;  %2445 = vmatprep.subr.bf16.mxu1 %v5281_v55 }
 0xa16   :  { %2405 = vmatpush1.bf16.msra.mxu0 %v5284_v54  ;;  %2446 = vmatpush1.bf16.msra.mxu1 %v5287_v63 }
 0xa17   :  { %2406 = vmatprep.subr.bf16.mxu0 %v5290_v50  ;;  %2447 = vmatprep.subr.bf16.mxu1 %v5293_v46 }
 0xa1a   :  { %2407 = vmatpush1.bf16.msra.mxu0 %v5296_v44  ;;  %2448 = vmatpush1.bf16.msra.mxu1 %v5299_v4 }
 0xa1b   :  { %2408 = vmatprep.subr.bf16.mxu0 %v5302_v60  ;;  %2449 = vmatprep.subr.bf16.mxu1 %v5305_v9 }
 0xa1e   :  { %2409 = vmatpush1.bf16.msra.mxu0 %v5308_v0  ;;  %2450 = vmatpush1.bf16.msra.mxu1 %v5311_v10 }
 0xa1f   :  { %2523 = vmatprep.subr.bf16.mxu0 %v5316_v62  ;;  %2564 = vmatprep.subr.bf16.mxu1 %v5319_v32 }
 0xa21   :  { %2427 = vmatmul.mubr.bf16.vlgmr.msra.gmra.mrb[80].mxu0 %v2393_v18  ;;  %2468 = vmatmul.mubr.bf16.vlgmr.msra.gmra.mrb[80].mxu1 %v2393_v18  ;;  %v5397_v18 = vld [vmem:[#allocation5 + $0xd0] sm:$0xff] }
 0xa22   :  { %2524 = vmatpush1.bf16.msra.mxu0 %v5322_v45  ;;  %2565 = vmatpush1.bf16.msra.mxu1 %v5325_v43  ;;  %6411 = vst [vmem:[#allocation44_spill] sm:$0xff] %v5397_v18 }
 0xa23   :  { %2525 = vmatprep.subr.bf16.mxu0 %v5328_v36  ;;  %2566 = vmatprep.subr.bf16.mxu1 %v5331_v56 }
 0xa26   :  { %2526 = vmatpush1.bf16.msra.mxu0 %v5334_v24  ;;  %2567 = vmatpush1.bf16.msra.mxu1 %v5337_v27 }
 0xa27   :  { %2527 = vmatprep.subr.bf16.mxu0 %v5340_v13  ;;  %2568 = vmatprep.subr.bf16.mxu1 %v5343_v39 }
 0xa2a   :  { %2528 = vmatpush1.bf16.msra.mxu0 %v5346_v25  ;;  %2569 = vmatpush1.bf16.msra.mxu1 %v5349_v31 }
 0xa2b   :  { %2529 = vmatprep.subr.bf16.mxu0 %v5352_v42  ;;  %2570 = vmatprep.subr.bf16.mxu1 %v5355_v16 }
 0xa2e   :  { %2530 = vmatpush1.bf16.msra.mxu0 %v5358_v23  ;;  %2571 = vmatpush1.bf16.msra.mxu1 %v5361_v28 }
 0xa2f   :  { %2531 = vmatprep.subr.bf16.mxu0 %v5364_v30  ;;  %2572 = vmatprep.subr.bf16.mxu1 %v5367_v41 }
 0xa32   :  { %2532 = vmatpush1.bf16.msra.mxu0 %v5370_v51  ;;  %2573 = vmatpush1.bf16.msra.mxu1 %v5373_v38  ;;  %v6449_v51 = vld [vmem:[#allocation86_spill] sm:$0xff] }
 0xa33   :  { %2533 = vmatprep.subr.bf16.mxu0 %v5376_v1  ;;  %2574 = vmatprep.subr.bf16.mxu1 %v5379_v49  ;;  %v6448_v49 = vld [vmem:[#allocation84_spill] sm:$0xff] }
 0xa36   :  { %2534 = vmatpush1.bf16.msra.mxu0 %v5382_v22  ;;  %2575 = vmatpush1.bf16.msra.mxu1 %v5385_v57  ;;  %v5400_v22 = vld [vmem:[#allocation5 + $0xe8] sm:$0xff]  ;;  %v5403_v57 = vld [vmem:[#allocation5 + $0xf8] sm:$0xff] }
 0xa37   :  { %2535 = vmatprep.subr.bf16.mxu0 %v5388_v26  ;;  %2576 = vmatprep.subr.bf16.mxu1 %v5391_v35  ;;  %6412 = vst [vmem:[#allocation46_spill] sm:$0xff] %v5400_v22  ;;  %6413 = vst [vmem:[#allocation47_spill] sm:$0xff] %v5403_v57  ;;  %v5406_v26 = vld [vmem:[#allocation5 + $0xe0] sm:$0xff]  ;;  %v5409_v35 = vld [vmem:[#allocation5 + $0xf0] sm:$0xff] }
 0xa38   :  { %6414 = vst [vmem:[#allocation45_spill] sm:$0xff] %v5406_v26  ;;  %6415 = vst [vmem:[#allocation97_spill] sm:$0xff] %v5409_v35 }
 0xa3a   :  { %2536 = vmatpush1.bf16.msra.mxu0 %v5394_v21  ;;  %2577 = vmatpush1.bf16.msra.mxu1 %v5397_v18  ;;  %v5412_v21 = vld [vmem:[#allocation5 + $0x108] sm:$0xff]  ;;  %v5415_v18 = vld [vmem:[#allocation5 + $0x118] sm:$0xff] }
 0xa3b   :  { %2537 = vmatprep.subr.bf16.mxu0 %v5400_v22  ;;  %2578 = vmatprep.subr.bf16.mxu1 %v5403_v57  ;;  %6416 = vst [vmem:[#allocation64_spill] sm:$0xff] %v5412_v21  ;;  %6417 = vst [vmem:[#allocation76_spill] sm:$0xff] %v5415_v18  ;;  %v5418_v22 = vld [vmem:[#allocation5 + $0x100] sm:$0xff]  ;;  %v5421_v57 = vld [vmem:[#allocation5 + $0x110] sm:$0xff] }
 0xa3c   :  { %6418 = vst [vmem:[#allocation78_spill] sm:$0xff] %v5418_v22  ;;  %6419 = vst [vmem:[#allocation79_spill] sm:$0xff] %v5421_v57 }
 0xa3e   :  { %2538 = vmatpush1.bf16.msra.mxu0 %v5406_v26  ;;  %2579 = vmatpush1.bf16.msra.mxu1 %v5409_v35  ;;  %v5424_v26 = vld [vmem:[#allocation5 + $0x128] sm:$0xff]  ;;  %v5427_v35 = vld [vmem:[#allocation5 + $0x138] sm:$0xff] }
 0xa3f   :  { %2539 = vmatprep.subr.bf16.mxu0 %v5412_v21  ;;  %2580 = vmatprep.subr.bf16.mxu1 %v5415_v18  ;;  %6420 = vst [vmem:[#allocation77_spill] sm:$0xff] %v5424_v26  ;;  %6421 = vst [vmem:[#allocation146_spill] sm:$0xff] %v5427_v35  ;;  %v5430_v21 = vld [vmem:[#allocation5 + $0x120] sm:$0xff]  ;;  %v5433_v18 = vld [vmem:[#allocation5 + $0x130] sm:$0xff] }
 0xa40   :  { %6422 = vst [vmem:[#allocation48_spill] sm:$0xff] %v5430_v21  ;;  %6423 = vst [vmem:[#allocation50_spill] sm:$0xff] %v5433_v18 }
 0xa42   :  { %2540 = vmatpush1.bf16.msra.mxu0 %v5418_v22  ;;  %2581 = vmatpush1.bf16.msra.mxu1 %v5421_v57  ;;  %v5436_v22 = vld [vmem:[#allocation5 + $0x148] sm:$0xff]  ;;  %v5439_v57 = vld [vmem:[#allocation5 + $0x158] sm:$0xff] }
 0xa43   :  { %2541 = vmatprep.subr.bf16.mxu0 %v5424_v26  ;;  %2582 = vmatprep.subr.bf16.mxu1 %v5427_v35  ;;  %6424 = vst [vmem:[#allocation51_spill] sm:$0xff] %v5436_v22  ;;  %6425 = vst [vmem:[#allocation49_spill] sm:$0xff] %v5439_v57  ;;  %v5442_v26 = vld [vmem:[#allocation5 + $0x140] sm:$0xff]  ;;  %v5445_v35 = vld [vmem:[#allocation5 + $0x150] sm:$0xff] }
 0xa44   :  { %6426 = vst [vmem:[#allocation66_spill] sm:$0xff] %v5442_v26  ;;  %6427 = vst [vmem:[#allocation67_spill] sm:$0xff] %v5445_v35 }
 0xa46   :  { %2542 = vmatpush1.bf16.msra.mxu0 %v5430_v21  ;;  %2583 = vmatpush1.bf16.msra.mxu1 %v5433_v18  ;;  %v5448_v21 = vld [vmem:[#allocation5 + $0x168] sm:$0xff]  ;;  %v5451_v18 = vld [vmem:[#allocation5 + $0x178] sm:$0xff] }
 0xa47   :  { %2543 = vmatprep.subr.bf16.mxu0 %v5436_v22  ;;  %2584 = vmatprep.subr.bf16.mxu1 %v5439_v57  ;;  %6428 = vst [vmem:[#allocation65_spill] sm:$0xff] %v5448_v21  ;;  %6429 = vst [vmem:[#allocation36_spill] sm:$0xff] %v5451_v18  ;;  %v5454_v22 = vld [vmem:[#allocation5 + $0x160] sm:$0xff]  ;;  %v5457_v57 = vld [vmem:[#allocation5 + $0x170] sm:$0xff] }
 0xa48   :  { %6430 = vst [vmem:[#allocation38_spill] sm:$0xff] %v5454_v22  ;;  %6431 = vst [vmem:[#allocation39_spill] sm:$0xff] %v5457_v57 }
 0xa4a   :  { %2544 = vmatpush1.bf16.msra.mxu0 %v5442_v26  ;;  %2585 = vmatpush1.bf16.msra.mxu1 %v5445_v35  ;;  %v5460_v26 = vld [vmem:[#allocation5 + $0x188] sm:$0xff]  ;;  %v5463_v35 = vld [vmem:[#allocation5 + $0x198] sm:$0xff] }
 0xa4b   :  { %2545 = vmatprep.subr.bf16.mxu0 %v5448_v21  ;;  %2586 = vmatprep.subr.bf16.mxu1 %v5451_v18  ;;  %6432 = vst [vmem:[#allocation37_spill] sm:$0xff] %v5460_v26  ;;  %6433 = vst [vmem:[#allocation98_spill] sm:$0xff] %v5463_v35  ;;  %v5466_v21 = vld [vmem:[#allocation5 + $0x180] sm:$0xff]  ;;  %v5469_v18 = vld [vmem:[#allocation5 + $0x190] sm:$0xff] }
 0xa4c   :  { %6434 = vst [vmem:[#allocation99_spill] sm:$0xff] %v5466_v21  ;;  %6435 = vst [vmem:[#allocation100_spill] sm:$0xff] %v5469_v18 }
 0xa4e   :  { %2546 = vmatpush1.bf16.msra.mxu0 %v5454_v22  ;;  %2587 = vmatpush1.bf16.msra.mxu1 %v5457_v57  ;;  %v5472_v22 = vld [vmem:[#allocation5 + $0x1a8] sm:$0xff]  ;;  %v5475_v57 = vld [vmem:[#allocation5 + $0x1b8] sm:$0xff] }
 0xa4f   :  { %2547 = vmatprep.subr.bf16.mxu0 %v5460_v26  ;;  %2588 = vmatprep.subr.bf16.mxu1 %v5463_v35  ;;  %6436 = vst [vmem:[#allocation101_spill] sm:$0xff] %v5472_v22  ;;  %6437 = vst [vmem:[#allocation102_spill] sm:$0xff] %v5475_v57  ;;  %v5478_v26 = vld [vmem:[#allocation5 + $0x1a0] sm:$0xff]  ;;  %v5481_v35 = vld [vmem:[#allocation5 + $0x1b0] sm:$0xff] }
 0xa50   :  { %6438 = vst [vmem:[#allocation103_spill] sm:$0xff] %v5478_v26  ;;  %6439 = vst [vmem:[#allocation104_spill] sm:$0xff] %v5481_v35 }
 0xa52   :  { %2548 = vmatpush1.bf16.msra.mxu0 %v5466_v21  ;;  %2589 = vmatpush1.bf16.msra.mxu1 %v5469_v18  ;;  %v5484_v21 = vld [vmem:[#allocation5 + $0x1c8] sm:$0xff]  ;;  %v5487_v18 = vld [vmem:[#allocation5 + $0x1d8] sm:$0xff] }
 0xa53   :  { %2549 = vmatprep.subr.bf16.mxu0 %v5472_v22  ;;  %2590 = vmatprep.subr.bf16.mxu1 %v5475_v57  ;;  %6440 = vst [vmem:[#allocation105_spill] sm:$0xff] %v5484_v21  ;;  %6441 = vst [vmem:[#allocation106_spill] sm:$0xff] %v5487_v18  ;;  %v5490_v22 = vld [vmem:[#allocation5 + $0x1c0] sm:$0xff]  ;;  %v5493_v57 = vld [vmem:[#allocation5 + $0x1d0] sm:$0xff] }
 0xa54   :  { %6442 = vst [vmem:[#allocation107_spill] sm:$0xff] %v5490_v22  ;;  %6443 = vst [vmem:[#allocation108_spill] sm:$0xff] %v5493_v57 }
 0xa56   :  { %2550 = vmatpush1.bf16.msra.mxu0 %v5478_v26  ;;  %2591 = vmatpush1.bf16.msra.mxu1 %v5481_v35  ;;  %v5496_v26 = vld [vmem:[#allocation5 + $0x1e8] sm:$0xff]  ;;  %v5499_v35 = vld [vmem:[#allocation5 + $0x1f8] sm:$0xff] }
 0xa57   :  { %2551 = vmatprep.subr.bf16.mxu0 %v5484_v21  ;;  %2592 = vmatprep.subr.bf16.mxu1 %v5487_v18  ;;  %6444 = vst [vmem:[#allocation109_spill] sm:$0xff] %v5496_v26  ;;  %6445 = vst [vmem:[#allocation110_spill] sm:$0xff] %v5499_v35  ;;  %v5502_v21 = vld [vmem:[#allocation5 + $0x1e0] sm:$0xff]  ;;  %v5505_v18 = vld [vmem:[#allocation5 + $0x1f0] sm:$0xff] }
 0xa58   :  { %6446 = vst [vmem:[#allocation111_spill] sm:$0xff] %v5502_v21  ;;  %6447 = vst [vmem:[#allocation112_spill] sm:$0xff] %v5505_v18 }
 0xa5a   :  { %2552 = vmatpush1.bf16.msra.mxu0 %v5490_v22  ;;  %2593 = vmatpush1.bf16.msra.mxu1 %v5493_v57 }
 0xa5b   :  { %2553 = vmatprep.subr.bf16.mxu0 %v5496_v26  ;;  %2594 = vmatprep.subr.bf16.mxu1 %v5499_v35 }
 0xa5e   :  { %2554 = vmatpush1.bf16.msra.mxu0 %v5502_v21  ;;  %2595 = vmatpush1.bf16.msra.mxu1 %v5505_v18  ;;  %v6450_v18 = vld [vmem:[#allocation87_spill] sm:$0xff] }
 0xa5f   :  { %2647 = vmatprep.subr.bf16.mxu0 %v5192_v6  ;;  %2688 = vmatprep.subr.bf16.mxu1 %v5195_v3  ;;  %v6451_v3 = vld [vmem:[#allocation85_spill] sm:$0xff] }
 0xad4   :  { %v2304_v57 = vpop.f32.mrb[76].mxu0  ;;  %v2345_v22 = vpop.f32.mrb[76].mxu1 }
 0xad5   :  { %v2352_v26 = vadd.f32 %v2304_v57, %v6448_v49  ;;  %v2306_v1 = vpop.f32.mrb[77].mxu0  ;;  %v2347_v38 = vpop.f32.mrb[77].mxu1  ;;  %v2354_v31 = vadd.f32 %v2345_v22, %v6451_v3 }
 0xad6   :  { %v2353_v35 = vadd.f32 %v2306_v1, %v6449_v51  ;;  %v2308_v41 = vpop.f32.mrb[78].mxu0  ;;  %v2349_v30 = vpop.f32.mrb[78].mxu1  ;;  %v2355_v6 = vadd.f32 %v2347_v38, %v6450_v18 }
 0xad7   :  { %v3005_v28 = vmul.f32 -1.442695, %v2352_v26  ;;  %v2309_v21 = vpop.f32.mrb[79].mxu0  ;;  %v2350_v23 = vpop.f32.mrb[79].mxu1 }
 0xad8   :  { %v3006_v16 = vmul.f32 -1.442695, %v2353_v35  ;;  %v3007_v42 = vmul.f32 -1.442695, %v2355_v6  ;;  %v6453_v35 = vld [vmem:[#allocation56_spill] sm:$0xff] }
 0xad9   :  { %3247 = vpow2.f32 %v3005_v28 }
 0xada   :  { %3249 = vpow2.f32 %v3006_v16 }
 0xadb   :  { %3251 = vpow2.f32 %v3007_v42 }
 0xadc   :  { %3253 = vtanh.f32 %v2354_v31 }
 0xae3   :  { %v3248_v25 = vpop.eup %3247 }
 0xae4   :  { %v3250_v39 = vpop.eup %3249  ;;  %v2359_v49 = vadd.f32 1.0, %v3248_v25 }
 0xae5   :  { %v2365_v57 = vadd.f32 1.0, %v3250_v39  ;;  %v3252_v30 = vpop.eup %3251  ;;  %v6454_v39 = vld [vmem:[#allocation58_spill] sm:$0xff] }
 0xae6   :  { %3255 = vrcp.f32 %v2359_v49  ;;  %v3254_v41 = vpop.eup %3253  ;;  %v2372_v28 = vadd.f32 1.0, %v3252_v30 }
 0xae7   :  { %3257 = vrcp.f32 %v2365_v57 }
 0xae8   :  { %3259 = vrcp.f32 %v2372_v28 }
 0xaf0   :  { %v3256_v51 = vpop.eup %3255 }
 0xaf1   :  { %v3258_v23 = vpop.eup %3257  ;;  %v2376_v1 = vmul.f32 %v3256_v51, %v3254_v41 }
 0xaf2   :  { %v2375_v16 = vmul.f32 %v3258_v23, %v5203_v52  ;;  %v6455_v52 = vld [vmem:[#allocation59_spill] sm:$0xff]  ;;  %v3260_v51 = vpop.eup %3259 }
 0xaf4   :  { %v5515_v38 = vadd.f32 %v2376_v1, %v2375_v16  ;;  %v2428_v26 = vpop.f32.mrb[80].mxu0  ;;  %v2469_v22 = vpop.f32.mrb[80].mxu1  ;;  %v6456_v16 = vld [vmem:[#allocation57_spill] sm:$0xff] }
 0xaf5   :  { %v2476_v25 = vadd.f32 %v2428_v26, %v6453_v35  ;;  %v2430_v42 = vpop.f32.mrb[81].mxu0  ;;  %v2471_v31 = vpop.f32.mrb[81].mxu1  ;;  %v2478_v26 = vadd.f32 %v2469_v22, %v6456_v16 }
 0xaf6   :  { %6452 = vst [vmem:[#allocation113_spill] sm:$0xff] %v5515_v38  ;;  %3261 = vtanh.f32 %v5515_v38  ;;  %v2477_v21 = vadd.f32 %v2430_v42, %v6454_v39  ;;  %v2432_v18 = vpop.f32.mrb[82].mxu0  ;;  %v2473_v6 = vpop.f32.mrb[82].mxu1  ;;  %v2479_v41 = vadd.f32 %v2471_v31, %v6455_v52 }
 0xaf7   :  { %v3008_v3 = vmul.f32 -1.442695, %v2476_v25  ;;  %v2433_v49 = vpop.f32.mrb[83].mxu0  ;;  %v2474_v57 = vpop.f32.mrb[83].mxu1 }
 0xaf8   :  { %v3009_v30 = vmul.f32 -1.442695, %v2477_v21  ;;  %v3010_v1 = vmul.f32 -1.442695, %v2479_v41  ;;  %v2505_v41 = vld [vmem:[#allocation13 + $0x30] sm:$0xff] }
 0xaf9   :  { %3263 = vpow2.f32 %v3008_v3 }
 0xafa   :  { %3265 = vpow2.f32 %v3009_v30 }
 0xafb   :  { %3267 = vpow2.f32 %v3010_v1 }
 0xafc   :  { %3269 = vtanh.f32 %v2478_v26 }
 0xb00   :  { %v3262_v23 = vpop.eup %3261 }
 0xb01   :  { %v2379_v28 = vmul.f32 %v3262_v23, %v3260_v51 }
 0xb03   :  { %v3264_v35 = vpop.eup %3263  ;;  %v2380_v38 = vpack.c.bf16 %v2379_v28, %v2379_v28  ;;  %v2382_v42 = vadd.f32 %v2379_v28, %v5218_v29 }
 0xb04   :  { %v3266_v39 = vpop.eup %3265  ;;  %v2483_v18 = vadd.f32 1.0, %v3264_v35  ;;  %v6497_v35 = vld [vmem:[#allocation98_spill] sm:$0xff] }
 0xb05   :  { %v2383_v25 = vpack.c.bf16 %v2382_v42, %v2382_v42  ;;  %2381 = vst [vmem:[#allocation8 + $0x4] sm:$0xf] %v2380_v38  ;;  %v2489_v21 = vadd.f32 1.0, %v3266_v39  ;;  %v3268_v31 = vpop.eup %3267  ;;  %v6498_v42 = vld [vmem:[#allocation99_spill] sm:$0xff]  ;;  %v6499_v39 = vld [vmem:[#allocation100_spill] sm:$0xff] }
 0xb06   :  { %3271 = vrcp.f32 %v2483_v18  ;;  %v3270_v6 = vpop.eup %3269  ;;  %v2496_v22 = vadd.f32 1.0, %v3268_v31  ;;  %v6500_v18 = vld [vmem:[#allocation101_spill] sm:$0xff]  ;;  %v6503_v31 = vld [vmem:[#allocation104_spill] sm:$0xff] }
 0xb07   :  { %2385 = vst [vmem:[#allocation19 + $0x14] sm:$0xf] %v2383_v25  ;;  %3273 = vrcp.f32 %v2489_v21  ;;  %v6501_v25 = vld [vmem:[#allocation102_spill] sm:$0xff]  ;;  %v6502_v21 = vld [vmem:[#allocation103_spill] sm:$0xff] }
 0xb08   :  { %3275 = vrcp.f32 %v2496_v22  ;;  %v6508_v22 = vld [vmem:[#allocation109_spill] sm:$0xff] }
 0xb10   :  { %v3272_v3 = vpop.eup %3271 }
 0xb11   :  { %v3274_v49 = vpop.eup %3273  ;;  %v2500_v57 = vmul.f32 %v3272_v3, %v3270_v6  ;;  %v6504_v6 = vld [vmem:[#allocation105_spill] sm:$0xff]  ;;  %v6505_v3 = vld [vmem:[#allocation106_spill] sm:$0xff] }
 0xb12   :  { %v2499_v30 = vmul.f32 %v3274_v49, %v5212_v48  ;;  %v3276_v29 = vpop.eup %3275  ;;  %v6457_v48 = vld [vmem:[#allocation148_spill] sm:$0xff]  ;;  %v6506_v49 = vld [vmem:[#allocation107_spill] sm:$0xff] }
 0xb14   :  { %v5524_v52 = vadd.f32 %v2500_v57, %v2499_v30  ;;  %v6507_v57 = vld [vmem:[#allocation108_spill] sm:$0xff]  ;;  %v6509_v30 = vld [vmem:[#allocation110_spill] sm:$0xff] }
 0xb16   :  { %3277 = vtanh.f32 %v5524_v52 }
 0xb20   :  { %v3278_v38 = vpop.eup %3277 }
 0xb21   :  { %v2503_v51 = vmul.f32 %v3278_v38, %v3276_v29  ;;  %v6510_v29 = vld [vmem:[#allocation111_spill] sm:$0xff]  ;;  %v6511_v38 = vld [vmem:[#allocation112_spill] sm:$0xff] }
 0xb23   :  { %v5527_v23 = vadd.f32 %v2505_v41, %v2503_v51 }
 0xb25   :  { %v2507_v1 = vpack.c.bf16 %v5527_v23, %v5527_v23 }
 0xb27   :  { %2508 = vst [vmem:[#allocation8] sm:$0xf] %v2507_v1  ;;  %v6512_v1 = vld [vmem:[#allocation88_spill] sm:$0xff] }
 0xb2e   :  { %v2515_v28 = vld [vmem:[#allocation8] sm:$0xff] }
 0xb2f   :  { %v3012_v16 = vcombine.high %v2515_v28, %v2515_v28  ;;  %v3011_v26 = vcombine.low %v2515_v28, %v2515_v28 }
 0xb31   :  { %2555 = vmatprep.mubr.bf16.mxu0 %v3012_v16  ;;  %2596 = vmatprep.mubr.bf16.mxu1 %v3012_v16 }
 0xb32   :  { %2556 = vmatmul.mubr.bf16.vlgmr.msra.gmra.mrb[84].mxu0 %v3011_v26  ;;  %2597 = vmatmul.mubr.bf16.vlgmr.msra.gmra.mrb[84].mxu1 %v3011_v26 }
 0xb33   :  { %2648 = vmatpush1.bf16.msra.mxu0 %v5222_v11  ;;  %2689 = vmatpush1.bf16.msra.mxu1 %v5225_v7  ;;  %v6458_v11 = vld [vmem:[#allocation149_spill] sm:$0xff]  ;;  %v6459_v7 = vld [vmem:[#allocation150_spill] sm:$0xff] }
 0xb34   :  { %2649 = vmatprep.subr.bf16.mxu0 %v5228_v17  ;;  %2690 = vmatprep.subr.bf16.mxu1 %v5231_v61  ;;  %v6460_v17 = vld [vmem:[#allocation151_spill] sm:$0xff]  ;;  %v6461_v61 = vld [vmem:[#allocation152_spill] sm:$0xff] }
 0xb35   :  { %2679 = vmatprep.mubr.bf16.mxu0 %v6012_v53  ;;  %2720 = vmatprep.mubr.bf16.mxu1 %v6012_v53  ;;  %v2646_v53 = vpack.c.bf16 %v2503_v51, %v2503_v51 }
 0xb37   :  { %2650 = vmatpush1.bf16.msra.mxu0 %v5236_v33  ;;  %2691 = vmatpush1.bf16.msra.mxu1 %v5239_v40  ;;  %v6462_v33 = vld [vmem:[#allocation68_spill] sm:$0xff]  ;;  %v6463_v40 = vld [vmem:[#allocation70_spill] sm:$0xff] }
 0xb38   :  { %2651 = vmatprep.subr.bf16.mxu0 %v5242_v34  ;;  %2692 = vmatprep.subr.bf16.mxu1 %v5245_v47  ;;  %v6464_v34 = vld [vmem:[#allocation71_spill] sm:$0xff]  ;;  %v6465_v47 = vld [vmem:[#allocation69_spill] sm:$0xff] }
 0xb3b   :  { %2652 = vmatpush1.bf16.msra.mxu0 %v5248_v19  ;;  %2693 = vmatpush1.bf16.msra.mxu1 %v5251_v5  ;;  %v6466_v19 = vld [vmem:[#allocation96_spill] sm:$0xff] }
 0xb3c   :  { %2653 = vmatprep.subr.bf16.mxu0 %v5254_v15  ;;  %2694 = vmatprep.subr.bf16.mxu1 %v5257_v59  ;;  %v6467_v5 = vld [vmem:[#allocation40_spill] sm:$0xff]  ;;  %v6468_v15 = vld [vmem:[#allocation42_spill] sm:$0xff]  ;;  %v6469_v59 = vld [vmem:[#allocation43_spill] sm:$0xff] }
 0xb3f   :  { %2654 = vmatpush1.bf16.msra.mxu0 %v5260_v8  ;;  %2695 = vmatpush1.bf16.msra.mxu1 %v5263_v12  ;;  %v6470_v8 = vld [vmem:[#allocation41_spill] sm:$0xff]  ;;  %v6471_v12 = vld [vmem:[#allocation72_spill] sm:$0xff] }
 0xb40   :  { %2655 = vmatprep.subr.bf16.mxu0 %v5266_v37  ;;  %2696 = vmatprep.subr.bf16.mxu1 %v5269_v20  ;;  %v6472_v37 = vld [vmem:[#allocation74_spill] sm:$0xff]  ;;  %v6473_v20 = vld [vmem:[#allocation75_spill] sm:$0xff] }
 0xb43   :  { %2656 = vmatpush1.bf16.msra.mxu0 %v5272_v2  ;;  %2697 = vmatpush1.bf16.msra.mxu1 %v5275_v58  ;;  %v6474_v2 = vld [vmem:[#allocation73_spill] sm:$0xff]  ;;  %v6475_v58 = vld [vmem:[#allocation44_spill] sm:$0xff] }
 0xb44   :  { %2657 = vmatprep.subr.bf16.mxu0 %v5278_v14  ;;  %2698 = vmatprep.subr.bf16.mxu1 %v5281_v55  ;;  %v6476_v14 = vld [vmem:[#allocation46_spill] sm:$0xff]  ;;  %v6477_v55 = vld [vmem:[#allocation47_spill] sm:$0xff] }
 0xb47   :  { %2658 = vmatpush1.bf16.msra.mxu0 %v5284_v54  ;;  %2699 = vmatpush1.bf16.msra.mxu1 %v5287_v63  ;;  %v6478_v54 = vld [vmem:[#allocation45_spill] sm:$0xff] }
 0xb48   :  { %2659 = vmatprep.subr.bf16.mxu0 %v5290_v50  ;;  %2700 = vmatprep.subr.bf16.mxu1 %v5293_v46  ;;  %v6479_v63 = vld [vmem:[#allocation97_spill] sm:$0xff]  ;;  %v6480_v50 = vld [vmem:[#allocation64_spill] sm:$0xff] }
 0xb49   :  { %v6481_v46 = vld [vmem:[#allocation76_spill] sm:$0xff] }
 0xb4b   :  { %2660 = vmatpush1.bf16.msra.mxu0 %v5296_v44  ;;  %2701 = vmatpush1.bf16.msra.mxu1 %v5299_v4  ;;  %v6482_v44 = vld [vmem:[#allocation78_spill] sm:$0xff]  ;;  %v6483_v4 = vld [vmem:[#allocation79_spill] sm:$0xff] }
 0xb4c   :  { %2661 = vmatprep.subr.bf16.mxu0 %v5302_v60  ;;  %2702 = vmatprep.subr.bf16.mxu1 %v5305_v9  ;;  %v6484_v60 = vld [vmem:[#allocation77_spill] sm:$0xff]  ;;  %v6485_v9 = vld [vmem:[#allocation146_spill] sm:$0xff] }
 0xb4f   :  { %2662 = vmatpush1.bf16.msra.mxu0 %v5308_v0  ;;  %2703 = vmatpush1.bf16.msra.mxu1 %v5311_v10  ;;  %v6486_v0 = vld [vmem:[#allocation48_spill] sm:$0xff]  ;;  %v6487_v10 = vld [vmem:[#allocation50_spill] sm:$0xff] }
 0xb50   :  { %2776 = vmatprep.subr.bf16.mxu0 %v5316_v62  ;;  %2817 = vmatprep.subr.bf16.mxu1 %v5319_v32  ;;  %v6488_v62 = vld [vmem:[#allocation51_spill] sm:$0xff]  ;;  %v6489_v32 = vld [vmem:[#allocation49_spill] sm:$0xff] }
 0xb52   :  { %2680 = vmatmul.mubr.bf16.vlgmr.msra.gmra.mrb[88].mxu0 %v2646_v53  ;;  %2721 = vmatmul.mubr.bf16.vlgmr.msra.gmra.mrb[88].mxu1 %v2646_v53  ;;  %v6513_v53 = vld [vmem:[#allocation90_spill] sm:$0xff] }
 0xb53   :  { %2777 = vmatpush1.bf16.msra.mxu0 %v5322_v45  ;;  %2818 = vmatpush1.bf16.msra.mxu1 %v5325_v43  ;;  %v6490_v45 = vld [vmem:[#allocation66_spill] sm:$0xff]  ;;  %v6491_v43 = vld [vmem:[#allocation67_spill] sm:$0xff] }
 0xb54   :  { %2778 = vmatprep.subr.bf16.mxu0 %v5328_v36  ;;  %2819 = vmatprep.subr.bf16.mxu1 %v5331_v56  ;;  %v6492_v36 = vld [vmem:[#allocation65_spill] sm:$0xff]  ;;  %v6493_v56 = vld [vmem:[#allocation36_spill] sm:$0xff] }
 0xb57   :  { %2779 = vmatpush1.bf16.msra.mxu0 %v5334_v24  ;;  %2820 = vmatpush1.bf16.msra.mxu1 %v5337_v27  ;;  %v6494_v24 = vld [vmem:[#allocation38_spill] sm:$0xff]  ;;  %v6495_v27 = vld [vmem:[#allocation39_spill] sm:$0xff] }
 0xb58   :  { %2780 = vmatprep.subr.bf16.mxu0 %v5340_v13  ;;  %2821 = vmatprep.subr.bf16.mxu1 %v6457_v48  ;;  %v6496_v13 = vld [vmem:[#allocation37_spill] sm:$0xff] }
 0xb5b   :  { %2781 = vmatpush1.bf16.msra.mxu0 %v6458_v11  ;;  %2822 = vmatpush1.bf16.msra.mxu1 %v6459_v7 }
 0xb5c   :  { %2782 = vmatprep.subr.bf16.mxu0 %v6460_v17  ;;  %2823 = vmatprep.subr.bf16.mxu1 %v6461_v61 }
 0xb5f   :  { %2783 = vmatpush1.bf16.msra.mxu0 %v6462_v33  ;;  %2824 = vmatpush1.bf16.msra.mxu1 %v6463_v40 }
 0xb60   :  { %2784 = vmatprep.subr.bf16.mxu0 %v6464_v34  ;;  %2825 = vmatprep.subr.bf16.mxu1 %v6465_v47  ;;  %v6514_v34 = vld [vmem:[#allocation91_spill] sm:$0xff] }
 0xb63   :  { %2785 = vmatpush1.bf16.msra.mxu0 %v6466_v19  ;;  %2826 = vmatpush1.bf16.msra.mxu1 %v6467_v5  ;;  %v6515_v5 = vld [vmem:[#allocation89_spill] sm:$0xff] }
 0xb64   :  { %2786 = vmatprep.subr.bf16.mxu0 %v6468_v15  ;;  %2827 = vmatprep.subr.bf16.mxu1 %v6469_v59 }
 0xb67   :  { %2787 = vmatpush1.bf16.msra.mxu0 %v6470_v8  ;;  %2828 = vmatpush1.bf16.msra.mxu1 %v6471_v12 }
 0xb68   :  { %2788 = vmatprep.subr.bf16.mxu0 %v6472_v37  ;;  %2829 = vmatprep.subr.bf16.mxu1 %v6473_v20 }
 0xb6b   :  { %2789 = vmatpush1.bf16.msra.mxu0 %v6474_v2  ;;  %2830 = vmatpush1.bf16.msra.mxu1 %v6475_v58 }
 0xb6c   :  { %2790 = vmatprep.subr.bf16.mxu0 %v6476_v14  ;;  %2831 = vmatprep.subr.bf16.mxu1 %v6477_v55 }
 0xb6f   :  { %2791 = vmatpush1.bf16.msra.mxu0 %v6478_v54  ;;  %2832 = vmatpush1.bf16.msra.mxu1 %v6479_v63  ;;  %v6516_v63 = vld [vmem:[#allocation113_spill] sm:$0xff] }
 0xb70   :  { %2792 = vmatprep.subr.bf16.mxu0 %v6480_v50  ;;  %2833 = vmatprep.subr.bf16.mxu1 %v6481_v46 }
 0xb73   :  { %2793 = vmatpush1.bf16.msra.mxu0 %v6482_v44  ;;  %2834 = vmatpush1.bf16.msra.mxu1 %v6483_v4 }
 0xb74   :  { %2794 = vmatprep.subr.bf16.mxu0 %v6484_v60  ;;  %2835 = vmatprep.subr.bf16.mxu1 %v6485_v9  ;;  %v6517_v60 = vld [vmem:[#allocation60_spill] sm:$0xff] }
 0xb77   :  { %2795 = vmatpush1.bf16.msra.mxu0 %v6486_v0  ;;  %2836 = vmatpush1.bf16.msra.mxu1 %v6487_v10 }
 0xb78   :  { %2796 = vmatprep.subr.bf16.mxu0 %v6488_v62  ;;  %2837 = vmatprep.subr.bf16.mxu1 %v6489_v32  ;;  %v6518_v62 = vld [vmem:[#allocation62_spill] sm:$0xff] }
 0xb7b   :  { %2797 = vmatpush1.bf16.msra.mxu0 %v6490_v45  ;;  %2838 = vmatpush1.bf16.msra.mxu1 %v6491_v43 }
 0xb7c   :  { %2798 = vmatprep.subr.bf16.mxu0 %v6492_v36  ;;  %2839 = vmatprep.subr.bf16.mxu1 %v6493_v56 }
 0xb7f   :  { %2799 = vmatpush1.bf16.msra.mxu0 %v6494_v24  ;;  %2840 = vmatpush1.bf16.msra.mxu1 %v6495_v27 }
 0xb80   :  { %2800 = vmatprep.subr.bf16.mxu0 %v6496_v13  ;;  %2841 = vmatprep.subr.bf16.mxu1 %v6497_v35  ;;  %v6519_v13 = vld [vmem:[#allocation63_spill] sm:$0xff] }
 0xb83   :  { %2801 = vmatpush1.bf16.msra.mxu0 %v6498_v42  ;;  %2842 = vmatpush1.bf16.msra.mxu1 %v6499_v39 }
 0xb84   :  { %2802 = vmatprep.subr.bf16.mxu0 %v6500_v18  ;;  %2843 = vmatprep.subr.bf16.mxu1 %v6501_v25 }
 0xb87   :  { %2803 = vmatpush1.bf16.msra.mxu0 %v6502_v21  ;;  %2844 = vmatpush1.bf16.msra.mxu1 %v6503_v31  ;;  %v6520_v21 = vld [vmem:[#allocation61_spill] sm:$0xff] }
 0xb88   :  { %2804 = vmatprep.subr.bf16.mxu0 %v6504_v6  ;;  %2845 = vmatprep.subr.bf16.mxu1 %v6505_v3 }
 0xb8b   :  { %2805 = vmatpush1.bf16.msra.mxu0 %v6506_v49  ;;  %2846 = vmatpush1.bf16.msra.mxu1 %v6507_v57 }
 0xb8c   :  { %2806 = vmatprep.subr.bf16.mxu0 %v6508_v22  ;;  %2847 = vmatprep.subr.bf16.mxu1 %v6509_v30 }
 0xb8f   :  { %2807 = vmatpush1.bf16.msra.mxu0 %v6510_v29  ;;  %2848 = vmatpush1.bf16.msra.mxu1 %v6511_v38 }
 0xc05   :  { %v2557_v41 = vpop.f32.mrb[84].mxu0  ;;  %v2598_v51 = vpop.f32.mrb[84].mxu1 }
 0xc06   :  { %v2605_v28 = vadd.f32 %v2557_v41, %v6512_v1  ;;  %v2559_v16 = vpop.f32.mrb[85].mxu0  ;;  %v2600_v26 = vpop.f32.mrb[85].mxu1  ;;  %v2607_v15 = vadd.f32 %v2598_v51, %v6515_v5 }
 0xc07   :  { %v2606_v48 = vadd.f32 %v2559_v16, %v6513_v53  ;;  %v2561_v11 = vpop.f32.mrb[86].mxu0  ;;  %v2602_v7 = vpop.f32.mrb[86].mxu1  ;;  %v2608_v47 = vadd.f32 %v2600_v26, %v6514_v34 }
 0xc08   :  { %v3013_v17 = vmul.f32 -1.442695, %v2605_v28  ;;  %v2562_v61 = vpop.f32.mrb[87].mxu0  ;;  %v2603_v33 = vpop.f32.mrb[87].mxu1  ;;  %v2758_v11 = vld [vmem:[#allocation13 + $0x38] sm:$0xff] }
 0xc09   :  { %v3014_v40 = vmul.f32 -1.442695, %v2606_v48  ;;  %v3015_v19 = vmul.f32 -1.442695, %v2608_v47 }
 0xc0a   :  { %3279 = vpow2.f32 %v3013_v17 }
 0xc0b   :  { %3281 = vpow2.f32 %v3014_v40 }
 0xc0c   :  { %3283 = vpow2.f32 %v3015_v19 }
 0xc0d   :  { %3285 = vtanh.f32 %v2607_v15 }
 0xc14   :  { %v3280_v59 = vpop.eup %3279 }
 0xc15   :  { %v3282_v8 = vpop.eup %3281  ;;  %v2612_v12 = vadd.f32 1.0, %v3280_v59 }
 0xc16   :  { %v2618_v37 = vadd.f32 1.0, %v3282_v8  ;;  %v3284_v20 = vpop.eup %3283  ;;  %v6522_v8 = vld [vmem:[#allocation94_spill] sm:$0xff] }
 0xc17   :  { %3287 = vrcp.f32 %v2612_v12  ;;  %v3286_v2 = vpop.eup %3285  ;;  %v2625_v54 = vadd.f32 1.0, %v3284_v20 }
 0xc18   :  { %3289 = vrcp.f32 %v2618_v37 }
 0xc19   :  { %3291 = vrcp.f32 %v2625_v54  ;;  %v6523_v54 = vld [vmem:[#allocation95_spill] sm:$0xff] }
 0xc21   :  { %v3288_v58 = vpop.eup %3287 }
 0xc22   :  { %v3290_v14 = vpop.eup %3289  ;;  %v2629_v55 = vmul.f32 %v3288_v58, %v3286_v2 }
 0xc23   :  { %v2628_v50 = vmul.f32 %v3290_v14, %v6516_v63  ;;  %v3292_v42 = vpop.eup %3291 }
 0xc25   :  { %v5632_v46 = vadd.f32 %v2629_v55, %v2628_v50  ;;  %v2681_v44 = vpop.f32.mrb[88].mxu0  ;;  %v2722_v4 = vpop.f32.mrb[88].mxu1 }
 0xc26   :  { %v2729_v9 = vadd.f32 %v2681_v44, %v6517_v60  ;;  %v2683_v0 = vpop.f32.mrb[89].mxu0  ;;  %v2724_v10 = vpop.f32.mrb[89].mxu1  ;;  %v2731_v31 = vadd.f32 %v2722_v4, %v6520_v21  ;;  %v6524_v44 = vld [vmem:[#allocation93_spill] sm:$0xff] }
 0xc27   :  { %3293 = vtanh.f32 %v5632_v46  ;;  %v2730_v32 = vadd.f32 %v2683_v0, %v6518_v62  ;;  %v2685_v45 = vpop.f32.mrb[90].mxu0  ;;  %v2726_v43 = vpop.f32.mrb[90].mxu1  ;;  %v2732_v35 = vadd.f32 %v2724_v10, %v6519_v13 }
 0xc28   :  { %v3016_v36 = vmul.f32 -1.442695, %v2729_v9  ;;  %v2686_v56 = vpop.f32.mrb[91].mxu0  ;;  %v2727_v24 = vpop.f32.mrb[91].mxu1 }
 0xc29   :  { %v3017_v27 = vmul.f32 -1.442695, %v2730_v32  ;;  %v3018_v18 = vmul.f32 -1.442695, %v2732_v35 }
 0xc2a   :  { %3295 = vpow2.f32 %v3016_v36 }
 0xc2b   :  { %3297 = vpow2.f32 %v3017_v27 }
 0xc2c   :  { %3299 = vpow2.f32 %v3018_v18 }
 0xc2d   :  { %3301 = vtanh.f32 %v2731_v31 }
 0xc31   :  { %v3294_v39 = vpop.eup %3293 }
 0xc32   :  { %v2632_v25 = vmul.f32 %v3294_v39, %v3292_v42 }
 0xc34   :  { %v3296_v6 = vpop.eup %3295  ;;  %v2633_v3 = vpack.c.bf16 %v2632_v25, %v2632_v25  ;;  %v2635_v49 = vadd.f32 %v2632_v25, %v5527_v23 }
 0xc35   :  { %v3298_v57 = vpop.eup %3297  ;;  %v2736_v22 = vadd.f32 1.0, %v3296_v6 }
 0xc36   :  { %v2636_v30 = vpack.c.bf16 %v2635_v49, %v2635_v49  ;;  %2634 = vst [vmem:[#allocation8 + $0x4] sm:$0xf] %v2633_v3  ;;  %v2742_v29 = vadd.f32 1.0, %v3298_v57  ;;  %v3300_v38 = vpop.eup %3299 }
 0xc37   :  { %3303 = vrcp.f32 %v2736_v22  ;;  %v3302_v41 = vpop.eup %3301  ;;  %v2749_v16 = vadd.f32 1.0, %v3300_v38 }
 0xc38   :  { %2638 = vst [vmem:[#allocation19 + $0x18] sm:$0xf] %v2636_v30  ;;  %3305 = vrcp.f32 %v2742_v29 }
 0xc39   :  { %3307 = vrcp.f32 %v2749_v16 }
 0xc41   :  { %v3304_v51 = vpop.eup %3303 }
 0xc42   :  { %v3306_v1 = vpop.eup %3305  ;;  %v2753_v28 = vmul.f32 %v3304_v51, %v3302_v41 }
 0xc43   :  { %v2752_v26 = vmul.f32 %v3306_v1, %v5524_v52  ;;  %v3308_v23 = vpop.eup %3307  ;;  %v6521_v52 = vld [vmem:[#allocation92_spill] sm:$0xff] }
 0xc45   :  { %v2754_v53 = vadd.f32 %v2753_v28, %v2752_v26 }
 0xc47   :  { %3309 = vtanh.f32 %v2754_v53 }
 0xc51   :  { %v3310_v48 = vpop.eup %3309 }
 0xc52   :  { %v2756_v7 = vmul.f32 %v3310_v48, %v3308_v23 }
 0xc54   :  { %v2759_v17 = vadd.f32 %v2758_v11, %v2756_v7 }
 0xc56   :  { %v2760_v61 = vpack.c.bf16 %v2759_v17, %v2759_v17 }
 0xc58   :  { %2761 = vst [vmem:[#allocation8] sm:$0xf] %v2760_v61 }
 0xc5f   :  { %v2768_v33 = vld [vmem:[#allocation8] sm:$0xff] }
 0xc60   :  { %v3020_v40 = vcombine.high %v2768_v33, %v2768_v33  ;;  %v3019_v34 = vcombine.low %v2768_v33, %v2768_v33 }
 0xc62   :  { %2808 = vmatprep.mubr.bf16.mxu0 %v3020_v40  ;;  %2849 = vmatprep.mubr.bf16.mxu1 %v3020_v40 }
 0xc63   :  { %2809 = vmatmul.mubr.bf16.vlgmr.msra.gmra.mrb[92].mxu0 %v3019_v34  ;;  %2850 = vmatmul.mubr.bf16.vlgmr.msra.gmra.mrb[92].mxu1 %v3019_v34 }
 0xd36   :  { %v2810_v47 = vpop.f32.mrb[92].mxu0  ;;  %v2851_v19 = vpop.f32.mrb[92].mxu1 }
 0xd37   :  { %v2858_v5 = vadd.f32 %v2810_v47, %v6521_v52  ;;  %v2812_v15 = vpop.f32.mrb[93].mxu0  ;;  %v2853_v59 = vpop.f32.mrb[93].mxu1  ;;  %v2860_v4 = vadd.f32 %v2851_v19, %v6524_v44 }
 0xd38   :  { %v2859_v12 = vadd.f32 %v2812_v15, %v6522_v8  ;;  %v2814_v37 = vpop.f32.mrb[94].mxu0  ;;  %v2855_v20 = vpop.f32.mrb[94].mxu1  ;;  %v2861_v63 = vadd.f32 %v2853_v59, %v6523_v54 }
 0xd39   :  { %v3021_v2 = vmul.f32 -1.442695, %v2858_v5  ;;  %v2815_v58 = vpop.f32.mrb[95].mxu0  ;;  %v2856_v14 = vpop.f32.mrb[95].mxu1 }
 0xd3a   :  { %v3022_v55 = vmul.f32 -1.442695, %v2859_v12  ;;  %v3023_v50 = vmul.f32 -1.442695, %v2861_v63 }
 0xd3b   :  { %3311 = vpow2.f32 %v3021_v2 }
 0xd3c   :  { %3313 = vpow2.f32 %v3022_v55 }
 0xd3d   :  { %3315 = vpow2.f32 %v3023_v50 }
 0xd3e   :  { %3317 = vtanh.f32 %v2860_v4 }
 0xd45   :  { %v3312_v60 = vpop.eup %3311 }
 0xd46   :  { %v3314_v9 = vpop.eup %3313  ;;  %v2865_v0 = vadd.f32 1.0, %v3312_v60 }
 0xd47   :  { %v2871_v10 = vadd.f32 1.0, %v3314_v9  ;;  %v3316_v62 = vpop.eup %3315 }
 0xd48   :  { %3319 = vrcp.f32 %v2865_v0  ;;  %v3318_v32 = vpop.eup %3317  ;;  %v2878_v56 = vadd.f32 1.0, %v3316_v62 }
 0xd49   :  { %3321 = vrcp.f32 %v2871_v10 }
 0xd4a   :  { %3323 = vrcp.f32 %v2878_v56 }
 0xd52   :  { %v3320_v45 = vpop.eup %3319 }
 0xd53   :  { %v3322_v43 = vpop.eup %3321  ;;  %v2882_v36 = vmul.f32 %v3320_v45, %v3318_v32 }
 0xd54   :  { %v2881_v24 = vmul.f32 %v3322_v43, %v5632_v46  ;;  %v3324_v13 = vpop.eup %3323 }
 0xd56   :  { %v2883_v27 = vadd.f32 %v2882_v36, %v2881_v24 }
 0xd58   :  { %3325 = vtanh.f32 %v2883_v27 }
 0xd62   :  { %v3326_v35 = vpop.eup %3325 }
 0xd63   :  { %v2885_v42 = vmul.f32 %v3326_v35, %v3324_v13 }
 0xd65   :  { %v2886_v39 = vpack.c.bf16 %v2885_v42, %v2885_v42  ;;  %v2888_v18 = vadd.f32 %v2885_v42, %v2759_v17 }
 0xd67   :  { %2887 = vst [vmem:[#allocation8 + $0x4] sm:$0xf] %v2886_v39  ;;  %v2889_v25 = vpack.c.bf16 %v2888_v18, %v2888_v18 }
 0xd69   :  { %2891 = vst [vmem:[#allocation19 + $0x1c] sm:$0xf] %v2889_v25 }
 0xd6a   :  { %3640 = shalt.err (!%p3637_p2)
}
 0xd6b   :  { %s3641_s15 = scalar_lea.hbm %s5670_s9, 512 }
 0xd6c   :  { %p3642_p3 = scmp.ne.s32.totalorder %s5670_s9, %s3641_s15  ;;  %p3645_p4 = scmp.lt.u32.totalorder %s3641_s15, %s5670_s9 }
 0xd6e   :  { %p3647_p5 = pnand %p3645_p4, %p3642_p3 }
 0xd70   :  { %3650 = shalt.err (!%p3647_p5)
}
 0xd71   :  { %2903 = dma.vmem_to_hbm [thread:$0]  %s2898_s19, 512, %s5670_s9, [#allocation12], %s3678_s1, %s3678_s1, %s3677_s13  }
 0xd72   :  { %3665 = dma.done.wait [#allocation12], 512  }
 0xd73   :  { %3666 = vsyncadd [#allocation12], 4294966784 }
 0xd74   :  { %2907 = vsyncpa [#allocation11], 1 }
 0xd75   :  { %2908 = vsyncpa [#allocation14], 1 }
 0xd76   :  { %2909 = vsyncpa [#allocation17], 1 }
 0xd77   :  { %2910 = vsyncpa [#allocation12], 1 }
 0xd78   :  { %2911 = vsyncmov [#allocation9] }
 0xd7b   :  { %s2912_s3 = vpop.sfrf %2911 }
 0xd7c   :  { %p3024_p6 = scmp.ne.s32.totalorder %s2912_s3, 0 }
 0xd7e   :  { %2916 = shalt.err (%p3024_p6)  }
 0xd7f   :  { %2918 = vsyncmov [#allocation9 + $0x1] }
 0xd82   :  { %s2919_s22 = vpop.sfrf %2918 }
 0xd83   :  { %p3025_p7 = scmp.ne.s32.totalorder %s2919_s22, 0 }
 0xd85   :  { %2923 = shalt.err (%p3025_p7)  }
 0xd86   :  { %2925 = vsyncmov [#allocation9 + $0x2] }
 0xd89   :  { %s2926_s23 = vpop.sfrf %2925 }
 0xd8a   :  { %p3026_p8 = scmp.ne.s32.totalorder %s2926_s23, 0 }
 0xd8c   :  { %2930 = shalt.err (%p3026_p8)  }
 0xd8d   :  { %2932 = vsyncmov [#allocation9 + $0x3] }
 0xd90   :  { %s2933_s9 = vpop.sfrf %2932 }
 0xd91   :  { %p3027_p9 = scmp.ne.s32.totalorder %s2933_s9, 0 }
 0xd93   :  { %2937 = shalt.err (%p3027_p9)  }

</bundles_post_ra>
